<compile_context>
chip_gen: v7x
topology: tpu7x:2x2x1
jax: 0.10.0
libtpu: 0.0.40
codegen_flags: <defaults>
</compile_context>

<pallas_src>
import math

import jax
import jax.numpy as jnp
from jax import lax
from jax.experimental import pallas as pl
from jax.experimental.pallas import tpu as pltpu

_MASK_NEG = -1e9  # finite "minus infinity" for masked scores (masked_fill value)

_WEIGHT_KEYS = ['g1', 'b1', 'wq', 'bq', 'wk', 'bk', 'wv', 'bv', 'wo', 'bo',
                'g2', 'b2', 'w1', 'bf1', 'w2', 'bf2']


def make_encoder_layer_kernel(num_heads, head_size, eps=1e-12):
    scale = 1.0 / math.sqrt(head_size)
    bf16 = jnp.bfloat16
    f32 = jnp.float32
    H, hd = num_heads, head_size

    def kernel(xf_ref, xt_ref, mask_ref,
               g1_ref, b1_ref,
               wq_ref, bq_ref, wk_ref, bk_ref, wv_ref, bv_ref, wo_ref, bo_ref,
               g2_ref, b2_ref,
               w1_ref, bf1_ref, w2_ref, bf2_ref,
               o_ref,
               k_scr, v_scr):
        t = pl.program_id(1)
        S = xf_ref.shape[1]
        TQ, D = xt_ref.shape[1], xt_ref.shape[2]

        def layer_norm(h, g, b):
            u = jnp.mean(h, axis=-1, keepdims=True)
            c = h - u
            var = jnp.mean(c * c, axis=-1, keepdims=True)
            return (c * lax.rsqrt(var + eps)) * g + b

        # ---- K / V for the whole sequence, built once per batch element ----
        @pl.when(t == 0)
        def _build_kv():
            hf = layer_norm(xf_ref[0], g1_ref[0], b1_ref[0]).astype(bf16)    # (S, D)
            kf = (jnp.dot(hf, wk_ref[...], preferred_element_type=f32)
                  + bk_ref[0]).astype(bf16)                                   # (S, D)
            vf = (jnp.dot(hf, wv_ref[...], preferred_element_type=f32)
                  + bv_ref[0]).astype(bf16)
            # Bulk head split (no per-head masked slice stores):
            #   K stored pre-transposed (H, hd, S) -> lane-dense in S and no
            #   per-query-tile RHS transpose in QK^T; V stored (H, S, hd).
            k_scr[...] = kf.T.reshape(H, hd, S)
            v_scr[...] = vf.T.reshape(H, hd, S).transpose(0, 2, 1)

        # ---- per query tile: LN1 + attention ----
        x_t = xt_ref[0]                                                       # (TQ, D) f32
        h_t = layer_norm(x_t, g1_ref[0], b1_ref[0]).astype(bf16)
        q = jnp.dot(h_t, wq_ref[...], preferred_element_type=f32) + bq_ref[0]
        qh = ((q * scale).astype(bf16).T                                      # (D, TQ)
              .reshape(H, hd, TQ).transpose(0, 2, 1))                         # (H, TQ, hd)

        scores = jnp.einsum('hqd,hdk->hqk', qh, k_scr[...],
                            preferred_element_type=f32)                       # (H, TQ, S)
        keep = mask_ref[0] != 0                                               # (TQ, S) bool
        scores = jnp.where(keep[None], scores, _MASK_NEG)                     # masked_fill

        m = jnp.max(scores, axis=-1, keepdims=True)
        p = jnp.exp(scores - m)          # f32 exp (v5e-safe; bf16 exp would ~2x EUP
                                         # throughput on v6e/v7x at ~3e-3 extra error)
        denom = jnp.sum(p, axis=-1, keepdims=True)
        probs = (p * pl.reciprocal(denom, approx=True)).astype(bf16)          # (H, TQ, S)

        ctx = jnp.einsum('hqk,hkd->hqd', probs, v_scr[...],
                         preferred_element_type=f32)                          # (H, TQ, hd)
        ctx_flat = ctx.astype(bf16).transpose(0, 2, 1).reshape(D, TQ).T       # (TQ, D)

        attn_out = jnp.dot(ctx_flat, wo_ref[...],
                           preferred_element_type=f32) + bo_ref[0]
        x1 = x_t + attn_out                      # residual 1 (dropout p=0 -> identity)

        # ---- LN2 + feed-forward (Linear -> exact GELU -> Linear) ----
        h2 = layer_norm(x1, g2_ref[0], b2_ref[0]).astype(bf16)
        ff = jnp.dot(h2, w1_ref[...], preferred_element_type=f32) + bf1_ref[0]
        ff = 0.5 * ff * (1.0 + lax.erf(ff * (1.0 / math.sqrt(2.0))))          # exact GELU
        ff2 = jnp.dot(ff.astype(bf16), w2_ref[...],
                      preferred_element_type=f32) + bf2_ref[0]

        o_ref[0] = x1 + ff2                      # residual 2

    return kernel


def _vmem_capacity_bytes():
    try:
        return int(pltpu.get_tpu_info().vmem_capacity_bytes)
    except Exception:
        return 64 * 1024 * 1024   # conservative (v7x-sized) fallback


def _pick_q_tile(S, D, mlp, H, hd, budget_bytes):
    """Largest query tile whose approximate live VMEM footprint fits the budget."""
    cands = [t for t in (1024, 512, 256, 128, 64, 32, 16, 8) if t <= S and S % t == 0]
    if not cands:
        return S
    fixed = (2 * (4 * D * D + 2 * D * mlp)     # bf16 weights, single-buffered
             + 4 * S * D                       # full-seq x block (f32, single-buffered)
             + 2 * 2 * H * S * hd              # K + V scratch (bf16)
             + 2 * 4 * (6 * D + 2 * mlp))      # LN / bias vectors (double-buffered)
    for t in cands:
        per_tile = (2 * 4 * t * D * 2          # x tile + out tile (f32, double-buffered)
                    + 2 * t * S                # int8 mask tile (double-buffered)
                    + 3 * 4 * H * t * S        # scores / exp / probs intermediates
                    + 6 * t * mlp              # FFN hidden activations (f32 + bf16)
                    + 6 * 4 * t * D)           # LN / residual / context temporaries
        if fixed + per_tile <= budget_bytes:
            return t
    return cands[-1]


def encoder_layer_pallas(x, mask, params, num_heads, q_tile=None):
    """x: (B,S,D) float32; mask: (B,S,S) keep-mask (nonzero/True = attend)."""
    B, S, D = x.shape
    assert D % num_heads == 0
    hd = D // num_heads
    mlp = params['w1'].shape[1]

    vmem_cap = _vmem_capacity_bytes()
    vmem_limit = int(max(32 * 2 ** 20, vmem_cap - 8 * 2 ** 20))
    TQ = q_tile if q_tile is not None else _pick_q_tile(
        S, D, mlp, num_heads, hd, int(0.75 * vmem_limit))
    assert S % TQ == 0
    n_q = S // TQ

    # int8 keep-mask (1 byte/elem); the -1e9 fill happens inside the kernel.
    mask_i8 = mask.astype(jnp.bool_).astype(jnp.int8)

    kernel = make_encoder_layer_kernel(num_heads, hd)
    weights = [params[k] for k in _WEIGHT_KEYS]

    flops = int(2 * B * S * (4 * D * D + 2 * S * D + 2 * D * mlp))
    transcendentals = int(B * S * (num_heads * S + mlp + 4))
    bytes_accessed = int(3 * B * S * D * 4 + B * S * S
                         + 2 * (4 * D * D + 2 * D * mlp) + 4 * (6 * D + 2 * mlp))

    def build_call(single_buffer_residents):
        # Weights (constant block index) and the full-seq x block (index changes
        # only with b) gain nothing from double-buffering -> Buffered(1) halves
        # their VMEM residency.
        pm = ({'pipeline_mode': pl.Buffered(1)} if single_buffer_residents else {})

        def wspec(a):
            return pl.BlockSpec(a.shape, lambda b, t, _n=a.ndim: (0,) * _n, **pm)

        in_specs = ([pl.BlockSpec((1, S, D), lambda b, t: (b, 0, 0), **pm),   # K/V source
                     pl.BlockSpec((1, TQ, D), lambda b, t: (b, t, 0)),        # query tile
                     pl.BlockSpec((1, TQ, S), lambda b, t: (b, t, 0))]        # int8 mask
                    + [wspec(w) for w in weights])

        grid_spec = pltpu.PrefetchScalarGridSpec(
            num_scalar_prefetch=0,
            grid=(B, n_q),
            in_specs=in_specs,
            out_specs=pl.BlockSpec((1, TQ, D), lambda b, t: (b, t, 0)),
            scratch_shapes=[
                pltpu.VMEM((num_heads, hd, S), jnp.bfloat16),   # K (pre-transposed)
                pltpu.VMEM((num_heads, S, hd), jnp.bfloat16),   # V
            ],
        )
        return pl.pallas_call(
            kernel,
            out_shape=jax.ShapeDtypeStruct((B, S, D), jnp.float32),
            grid_spec=grid_spec,
            compiler_params=pltpu.CompilerParams(
                dimension_semantics=("parallel", "arbitrary"),
                vmem_limit_bytes=vmem_limit,
            ),
            cost_estimate=pl.CostEstimate(flops=flops,
                                          transcendentals=transcendentals,
                                          bytes_accessed=bytes_accessed),
        )

    try:
        return build_call(True)(x, x, mask_i8, *weights)
    except Exception:
        # Fallback if this Pallas build rejects pipeline_mode=pl.Buffered(1):
        # identical math, default double-buffering (correct, more VMEM).
        return build_call(False)(x, x, mask_i8, *weights)


def encoder_layer_ref(x, mask, p, num_heads, matmul_dtype=jnp.float32, eps=1e-12):
    """Pure-JAX reference. matmul_dtype=bf16 mirrors the kernel's precision;
    matmul_dtype=f32 is the PyTorch-style float32 math with the same
    bf16-stored weights."""
    f32 = jnp.float32
    md = matmul_dtype

    def ln(h, g, b):
        u = h.mean(-1, keepdims=True)
        c = h - u
        s = (c * c).mean(-1, keepdims=True)
        return c / jnp.sqrt(s + eps) * g + b

    B, S, D = x.shape
    hd = D // num_heads
    scale = 1.0 / math.sqrt(hd)
    keep = mask.astype(jnp.bool_)[:, None]                                   # (B,1,S,S)

    h = ln(x, p['g1'], p['b1'])
    q = jnp.dot(h.astype(md), p['wq'].astype(md), preferred_element_type=f32) + p['bq']
    k = jnp.dot(h.astype(md), p['wk'].astype(md), preferred_element_type=f32) + p['bk']
    v = jnp.dot(h.astype(md), p['wv'].astype(md), preferred_element_type=f32) + p['bv']
    q = (q * scale).reshape(B, S, num_heads, hd).transpose(0, 2, 1, 3).astype(md)
    k = k.reshape(B, S, num_heads, hd).transpose(0, 2, 1, 3).astype(md)
    v = v.reshape(B, S, num_heads, hd).transpose(0, 2, 1, 3).astype(md)
    scores = jnp.einsum('bhqd,bhkd->bhqk', q, k, preferred_element_type=f32)
    scores = jnp.where(keep, scores, _MASK_NEG)                              # masked_fill
    attn = jax.nn.softmax(scores, axis=-1)
    ctx = jnp.einsum('bhqk,bhkd->bhqd', attn.astype(md), v, preferred_element_type=f32)
    ctx = ctx.transpose(0, 2, 1, 3).reshape(B, S, D)
    x1 = x + jnp.dot(ctx.astype(md), p['wo'].astype(md), preferred_element_type=f32) + p['bo']
    h2 = ln(x1, p['g2'], p['b2'])
    ff = jnp.dot(h2.astype(md), p['w1'].astype(md), preferred_element_type=f32) + p['bf1']
    ff = 0.5 * ff * (1.0 + lax.erf(ff * (1.0 / math.sqrt(2.0))))
    return x1 + jnp.dot(ff.astype(md), p['w2'].astype(md), preferred_element_type=f32) + p['bf2']


def init_params(key, dim, mlp_dim):
    ks = jax.random.split(key, 6)
    scale = 0.02

    def lin(k, fan_in, fan_out):
        # Matmul weights stored in bf16 (MXU-native, halves weight DMA bytes).
        return (scale * jax.random.normal(k, (fan_in, fan_out), jnp.float32)).astype(jnp.bfloat16)

    return {
        'g1': jnp.ones((1, dim), jnp.float32),
        'b1': jnp.zeros((1, dim), jnp.float32),
        'wq': lin(ks[0], dim, dim), 'bq': jnp.zeros((1, dim), jnp.float32),
        'wk': lin(ks[1], dim, dim), 'bk': jnp.zeros((1, dim), jnp.float32),
        'wv': lin(ks[2], dim, dim), 'bv': jnp.zeros((1, dim), jnp.float32),
        'wo': lin(ks[3], dim, dim), 'bo': jnp.zeros((1, dim), jnp.float32),
        'g2': jnp.ones((1, dim), jnp.float32),
        'b2': jnp.zeros((1, dim), jnp.float32),
        'w1': lin(ks[4], dim, mlp_dim), 'bf1': 0.01 * jnp.ones((1, mlp_dim), jnp.float32),
        'w2': lin(ks[5], mlp_dim, dim), 'bf2': 0.01 * jnp.ones((1, dim), jnp.float32),
    }


if __name__ == "__main__":
    # Small but tile-aligned demo shapes: head_size = 128 keeps every head
    # split/merge on native (8,128) boundaries; q_tile=32 forces a multi-tile
    # query grid so the persistent K/V scratch reuse path is exercised
    # (q_tile=None would auto-select from the VMEM budget).
    B, S, D, HEADS, MLP = 2, 64, 256, 2, 512

    key = jax.random.PRNGKey(0)
    kx, kp = jax.random.split(key)
    x = jax.random.normal(kx, (B, S, D), jnp.float32)
    # causal keep-mask (1.0 = attend, 0.0 = masked), broadcast over heads
    mask = jnp.broadcast_to(jnp.tril(jnp.ones((S, S), jnp.float32)), (B, S, S))
    params = init_params(kp, D, MLP)

    out = jax.block_until_ready(encoder_layer_pallas(x, mask, params, HEADS, q_tile=32))

    ref_match = encoder_layer_ref(x, mask, params, HEADS, matmul_dtype=jnp.bfloat16)
    ref_f32 = encoder_layer_ref(x, mask, params, HEADS, matmul_dtype=jnp.float32)

    assert out.shape == (B, S, D)
    assert bool(jnp.all(jnp.isfinite(out)))
    assert jnp.allclose(out, ref_match, atol=2e-3, rtol=2e-3), \
        "mismatch vs matched-precision (bf16-matmul) reference"
    assert jnp.allclose(out, ref_f32, atol=5e-3, rtol=5e-3), \
        "mismatch vs float32 reference"

    print("KERNEL_OK")
</pallas_src>

<mosaic_0001>
module attributes {stable_mosaic.version = 11 : i64} {
  func.func @kernel(%arg0: i32, %arg1: i32, %arg2: memref<1x64x256xf32, #tpu.memory_space<vmem>>, %arg3: memref<1x32x256xf32, #tpu.memory_space<vmem>>, %arg4: memref<1x32x64xi8, #tpu.memory_space<vmem>>, %arg5: memref<1x256xf32, #tpu.memory_space<vmem>>, %arg6: memref<1x256xf32, #tpu.memory_space<vmem>>, %arg7: memref<256x256xbf16, #tpu.memory_space<vmem>>, %arg8: memref<1x256xf32, #tpu.memory_space<vmem>>, %arg9: memref<256x256xbf16, #tpu.memory_space<vmem>>, %arg10: memref<1x256xf32, #tpu.memory_space<vmem>>, %arg11: memref<256x256xbf16, #tpu.memory_space<vmem>>, %arg12: memref<1x256xf32, #tpu.memory_space<vmem>>, %arg13: memref<256x256xbf16, #tpu.memory_space<vmem>>, %arg14: memref<1x256xf32, #tpu.memory_space<vmem>>, %arg15: memref<1x256xf32, #tpu.memory_space<vmem>>, %arg16: memref<1x256xf32, #tpu.memory_space<vmem>>, %arg17: memref<256x512xbf16, #tpu.memory_space<vmem>>, %arg18: memref<1x512xf32, #tpu.memory_space<vmem>>, %arg19: memref<512x256xbf16, #tpu.memory_space<vmem>>, %arg20: memref<1x256xf32, #tpu.memory_space<vmem>>, %arg21: memref<1x32x256xf32, #tpu.memory_space<vmem>>, %arg22: memref<2x128x64xbf16, #tpu.memory_space<vmem>>, %arg23: memref<2x64x128xbf16, #tpu.memory_space<vmem>>) attributes {dimension_semantics = [#tpu.dimension_semantics<parallel>, #tpu.dimension_semantics<arbitrary>], iteration_bounds = array<i64: 2, 2>, scalar_prefetch = 0 : i64, scratch_operands = 2 : i64, tpu.core_type = #tpu.core_type<tc>, window_params = [{pipeline_mode = #tpu.pipeline_mode<synchronous>, transform_indices = @transform_0, window_bounds = array<i64: 1, 64, 256>}, {transform_indices = @transform_1, window_bounds = array<i64: 1, 32, 256>}, {transform_indices = @transform_2, window_bounds = array<i64: 1, 32, 64>}, {pipeline_mode = #tpu.pipeline_mode<synchronous>, transform_indices = @transform_3, window_bounds = array<i64: 1, 256>}, {pipeline_mode = #tpu.pipeline_mode<synchronous>, transform_indices = @transform_4, window_bounds = array<i64: 1, 256>}, {pipeline_mode = #tpu.pipeline_mode<synchronous>, transform_indices = @transform_5, window_bounds = array<i64: 256, 256>}, {pipeline_mode = #tpu.pipeline_mode<synchronous>, transform_indices = @transform_6, window_bounds = array<i64: 1, 256>}, {pipeline_mode = #tpu.pipeline_mode<synchronous>, transform_indices = @transform_7, window_bounds = array<i64: 256, 256>}, {pipeline_mode = #tpu.pipeline_mode<synchronous>, transform_indices = @transform_8, window_bounds = array<i64: 1, 256>}, {pipeline_mode = #tpu.pipeline_mode<synchronous>, transform_indices = @transform_9, window_bounds = array<i64: 256, 256>}, {pipeline_mode = #tpu.pipeline_mode<synchronous>, transform_indices = @transform_10, window_bounds = array<i64: 1, 256>}, {pipeline_mode = #tpu.pipeline_mode<synchronous>, transform_indices = @transform_11, window_bounds = array<i64: 256, 256>}, {pipeline_mode = #tpu.pipeline_mode<synchronous>, transform_indices = @transform_12, window_bounds = array<i64: 1, 256>}, {pipeline_mode = #tpu.pipeline_mode<synchronous>, transform_indices = @transform_13, window_bounds = array<i64: 1, 256>}, {pipeline_mode = #tpu.pipeline_mode<synchronous>, transform_indices = @transform_14, window_bounds = array<i64: 1, 256>}, {pipeline_mode = #tpu.pipeline_mode<synchronous>, transform_indices = @transform_15, window_bounds = array<i64: 256, 512>}, {pipeline_mode = #tpu.pipeline_mode<synchronous>, transform_indices = @transform_16, window_bounds = array<i64: 1, 512>}, {pipeline_mode = #tpu.pipeline_mode<synchronous>, transform_indices = @transform_17, window_bounds = array<i64: 512, 256>}, {pipeline_mode = #tpu.pipeline_mode<synchronous>, transform_indices = @transform_18, window_bounds = array<i64: 1, 256>}, {transform_indices = @transform_19, window_bounds = array<i64: 1, 32, 256>}]} {
    %c0_i32 = arith.constant 0 : i32
    %0 = arith.cmpi eq, %arg1, %c0_i32 : i32
    %1 = arith.extui %0 : i1 to i32
    %c0_i32_0 = arith.constant 0 : i32
    %2 = arith.cmpi ne, %1, %c0_i32_0 : i32
    scf.if %2 {
      %c0_61 = arith.constant 0 : index
      %c0_62 = arith.constant 0 : index
      %c0_63 = arith.constant 0 : index
      %135 = vector.load %arg2[%c0_61, %c0_62, %c0_63] : memref<1x64x256xf32, #tpu.memory_space<vmem>>, vector<1x64x256xf32>
      %136 = vector.shape_cast %135 : vector<1x64x256xf32> to vector<64x256xf32>
      %c0_64 = arith.constant 0 : index
      %c0_65 = arith.constant 0 : index
      %137 = vector.load %arg5[%c0_64, %c0_65] : memref<1x256xf32, #tpu.memory_space<vmem>>, vector<1x256xf32>
      %138 = vector.shape_cast %137 : vector<1x256xf32> to vector<256xf32>
      %c0_66 = arith.constant 0 : index
      %c0_67 = arith.constant 0 : index
      %139 = vector.load %arg6[%c0_66, %c0_67] : memref<1x256xf32, #tpu.memory_space<vmem>>, vector<1x256xf32>
      %140 = vector.shape_cast %139 : vector<1x256xf32> to vector<256xf32>
      %cst_68 = arith.constant dense<0.000000e+00> : vector<64xf32>
      %141 = vector.multi_reduction <add>, %136, %cst_68 [1] : vector<64x256xf32> to vector<64xf32>
      %142 = vector.shape_cast %141 : vector<64xf32> to vector<64x1xf32>
      %cst_69 = arith.constant 2.560000e+02 : f32
      %143 = vector.broadcast %cst_69 : f32 to vector<64x1xf32>
      %144 = arith.divf %142, %143 : vector<64x1xf32>
      %145 = vector.broadcast %144 : vector<64x1xf32> to vector<64x256xf32>
      %146 = arith.subf %136, %145 : vector<64x256xf32>
      %147 = arith.mulf %146, %146 : vector<64x256xf32>
      %cst_70 = arith.constant dense<0.000000e+00> : vector<64xf32>
      %148 = vector.multi_reduction <add>, %147, %cst_70 [1] : vector<64x256xf32> to vector<64xf32>
      %149 = vector.shape_cast %148 : vector<64xf32> to vector<64x1xf32>
      %cst_71 = arith.constant 2.560000e+02 : f32
      %150 = vector.broadcast %cst_71 : f32 to vector<64x1xf32>
      %151 = arith.divf %149, %150 : vector<64x1xf32>
      %cst_72 = arith.constant 9.99999996E-13 : f32
      %152 = vector.broadcast %cst_72 : f32 to vector<64x1xf32>
      %153 = arith.addf %151, %152 : vector<64x1xf32>
      %154 = math.rsqrt %153 : vector<64x1xf32>
      %155 = vector.broadcast %154 : vector<64x1xf32> to vector<64x256xf32>
      %156 = arith.mulf %146, %155 : vector<64x256xf32>
      %157 = vector.shape_cast %138 : vector<256xf32> to vector<1x256xf32>
      %158 = vector.broadcast %157 : vector<1x256xf32> to vector<64x256xf32>
      %159 = arith.mulf %156, %158 : vector<64x256xf32>
      %160 = vector.shape_cast %140 : vector<256xf32> to vector<1x256xf32>
      %161 = vector.broadcast %160 : vector<1x256xf32> to vector<64x256xf32>
      %162 = arith.addf %159, %161 : vector<64x256xf32>
      %163 = arith.truncf %162 : vector<64x256xf32> to vector<64x256xbf16>
      %c0_73 = arith.constant 0 : index
      %c0_74 = arith.constant 0 : index
      %164 = vector.load %arg9[%c0_73, %c0_74] : memref<256x256xbf16, #tpu.memory_space<vmem>>, vector<256x256xbf16>
      %cst_75 = arith.constant dense<0.000000e+00> : vector<64x256xf32>
      %165 = tpu.matmul %163, %164, %cst_75 {dimension_numbers = #tpu.dot_dimension_numbers<[1], [0], [0], [1], [0, 0, 1, 1], [], []>} : vector<64x256xbf16>, vector<256x256xbf16>, vector<64x256xf32> -> vector<64x256xf32>
      %c0_76 = arith.constant 0 : index
      %c0_77 = arith.constant 0 : index
      %166 = vector.load %arg10[%c0_76, %c0_77] : memref<1x256xf32, #tpu.memory_space<vmem>>, vector<1x256xf32>
      %167 = vector.shape_cast %166 : vector<1x256xf32> to vector<256xf32>
      %168 = vector.shape_cast %167 : vector<256xf32> to vector<1x256xf32>
      %169 = vector.broadcast %168 : vector<1x256xf32> to vector<64x256xf32>
      %170 = arith.addf %165, %169 : vector<64x256xf32>
      %171 = arith.truncf %170 : vector<64x256xf32> to vector<64x256xbf16>
      %c0_78 = arith.constant 0 : index
      %c0_79 = arith.constant 0 : index
      %172 = vector.load %arg11[%c0_78, %c0_79] : memref<256x256xbf16, #tpu.memory_space<vmem>>, vector<256x256xbf16>
      %cst_80 = arith.constant dense<0.000000e+00> : vector<64x256xf32>
      %173 = tpu.matmul %163, %172, %cst_80 {dimension_numbers = #tpu.dot_dimension_numbers<[1], [0], [0], [1], [0, 0, 1, 1], [], []>} : vector<64x256xbf16>, vector<256x256xbf16>, vector<64x256xf32> -> vector<64x256xf32>
      %c0_81 = arith.constant 0 : index
      %c0_82 = arith.constant 0 : index
      %174 = vector.load %arg12[%c0_81, %c0_82] : memref<1x256xf32, #tpu.memory_space<vmem>>, vector<1x256xf32>
      %175 = vector.shape_cast %174 : vector<1x256xf32> to vector<256xf32>
      %176 = vector.shape_cast %175 : vector<256xf32> to vector<1x256xf32>
      %177 = vector.broadcast %176 : vector<1x256xf32> to vector<64x256xf32>
      %178 = arith.addf %173, %177 : vector<64x256xf32>
      %179 = arith.truncf %178 : vector<64x256xf32> to vector<64x256xbf16>
      %180 = tpu.transpose %171, [1, 0] : vector<64x256xbf16> -> vector<256x64xbf16>
      %181 = vector.shape_cast %180 : vector<256x64xbf16> to vector<2x128x64xbf16>
      %c0_83 = arith.constant 0 : index
      %c0_84 = arith.constant 0 : index
      %c0_85 = arith.constant 0 : index
      %182 = vector.load %arg22[%c0_83, %c0_84, %c0_85] : memref<2x128x64xbf16, #tpu.memory_space<vmem>>, vector<2x128x64xbf16>
      tpu.vector_store %arg22[%c0_83, %c0_84, %c0_85], %181 {strides = array<i32>} : memref<2x128x64xbf16, #tpu.memory_space<vmem>>, vector<2x128x64xbf16>,
      %183 = tpu.transpose %179, [1, 0] : vector<64x256xbf16> -> vector<256x64xbf16>
      %184 = vector.shape_cast %183 : vector<256x64xbf16> to vector<2x128x64xbf16>
      %185 = tpu.transpose %184, [0, 2, 1] : vector<2x128x64xbf16> -> vector<2x64x128xbf16>
      %c0_86 = arith.constant 0 : index
      %c0_87 = arith.constant 0 : index
      %c0_88 = arith.constant 0 : index
      %186 = vector.load %arg23[%c0_86, %c0_87, %c0_88] : memref<2x64x128xbf16, #tpu.memory_space<vmem>>, vector<2x64x128xbf16>
      tpu.vector_store %arg23[%c0_86, %c0_87, %c0_88], %185 {strides = array<i32>} : memref<2x64x128xbf16, #tpu.memory_space<vmem>>, vector<2x64x128xbf16>,
    } else {
    }
    %c0 = arith.constant 0 : index
    %c0_1 = arith.constant 0 : index
    %c0_2 = arith.constant 0 : index
    %3 = vector.load %arg3[%c0, %c0_1, %c0_2] : memref<1x32x256xf32, #tpu.memory_space<vmem>>, vector<1x32x256xf32>
    %4 = vector.shape_cast %3 : vector<1x32x256xf32> to vector<32x256xf32>
    %c0_3 = arith.constant 0 : index
    %c0_4 = arith.constant 0 : index
    %5 = vector.load %arg5[%c0_3, %c0_4] : memref<1x256xf32, #tpu.memory_space<vmem>>, vector<1x256xf32>
    %6 = vector.shape_cast %5 : vector<1x256xf32> to vector<256xf32>
    %c0_5 = arith.constant 0 : index
    %c0_6 = arith.constant 0 : index
    %7 = vector.load %arg6[%c0_5, %c0_6] : memref<1x256xf32, #tpu.memory_space<vmem>>, vector<1x256xf32>
    %8 = vector.shape_cast %7 : vector<1x256xf32> to vector<256xf32>
    %cst = arith.constant dense<0.000000e+00> : vector<32xf32>
    %9 = vector.multi_reduction <add>, %4, %cst [1] : vector<32x256xf32> to vector<32xf32>
    %10 = vector.shape_cast %9 : vector<32xf32> to vector<32x1xf32>
    %cst_7 = arith.constant 2.560000e+02 : f32
    %11 = vector.broadcast %cst_7 : f32 to vector<32x1xf32>
    %12 = arith.divf %10, %11 : vector<32x1xf32>
    %13 = vector.broadcast %12 : vector<32x1xf32> to vector<32x256xf32>
    %14 = arith.subf %4, %13 : vector<32x256xf32>
    %15 = arith.mulf %14, %14 : vector<32x256xf32>
    %cst_8 = arith.constant dense<0.000000e+00> : vector<32xf32>
    %16 = vector.multi_reduction <add>, %15, %cst_8 [1] : vector<32x256xf32> to vector<32xf32>
    %17 = vector.shape_cast %16 : vector<32xf32> to vector<32x1xf32>
    %cst_9 = arith.constant 2.560000e+02 : f32
    %18 = vector.broadcast %cst_9 : f32 to vector<32x1xf32>
    %19 = arith.divf %17, %18 : vector<32x1xf32>
    %cst_10 = arith.constant 9.99999996E-13 : f32
    %20 = vector.broadcast %cst_10 : f32 to vector<32x1xf32>
    %21 = arith.addf %19, %20 : vector<32x1xf32>
    %22 = math.rsqrt %21 : vector<32x1xf32>
    %23 = vector.broadcast %22 : vector<32x1xf32> to vector<32x256xf32>
    %24 = arith.mulf %14, %23 : vector<32x256xf32>
    %25 = vector.shape_cast %6 : vector<256xf32> to vector<1x256xf32>
    %26 = vector.broadcast %25 : vector<1x256xf32> to vector<32x256xf32>
    %27 = arith.mulf %24, %26 : vector<32x256xf32>
    %28 = vector.shape_cast %8 : vector<256xf32> to vector<1x256xf32>
    %29 = vector.broadcast %28 : vector<1x256xf32> to vector<32x256xf32>
    %30 = arith.addf %27, %29 : vector<32x256xf32>
    %31 = arith.truncf %30 : vector<32x256xf32> to vector<32x256xbf16>
    %c0_11 = arith.constant 0 : index
    %c0_12 = arith.constant 0 : index
    %32 = vector.load %arg7[%c0_11, %c0_12] : memref<256x256xbf16, #tpu.memory_space<vmem>>, vector<256x256xbf16>
    %cst_13 = arith.constant dense<0.000000e+00> : vector<32x256xf32>
    %33 = tpu.matmul %31, %32, %cst_13 {dimension_numbers = #tpu.dot_dimension_numbers<[1], [0], [0], [1], [0, 0, 1, 1], [], []>} : vector<32x256xbf16>, vector<256x256xbf16>, vector<32x256xf32> -> vector<32x256xf32>
    %c0_14 = arith.constant 0 : index
    %c0_15 = arith.constant 0 : index
    %34 = vector.load %arg8[%c0_14, %c0_15] : memref<1x256xf32, #tpu.memory_space<vmem>>, vector<1x256xf32>
    %35 = vector.shape_cast %34 : vector<1x256xf32> to vector<256xf32>
    %36 = vector.shape_cast %35 : vector<256xf32> to vector<1x256xf32>
    %37 = vector.broadcast %36 : vector<1x256xf32> to vector<32x256xf32>
    %38 = arith.addf %33, %37 : vector<32x256xf32>
    %cst_16 = arith.constant 0.0883883461 : f32
    %39 = vector.broadcast %cst_16 : f32 to vector<32x256xf32>
    %40 = arith.mulf %38, %39 : vector<32x256xf32>
    %41 = arith.truncf %40 : vector<32x256xf32> to vector<32x256xbf16>
    %42 = tpu.transpose %41, [1, 0] : vector<32x256xbf16> -> vector<256x32xbf16>
    %43 = vector.shape_cast %42 : vector<256x32xbf16> to vector<2x128x32xbf16>
    %44 = tpu.transpose %43, [0, 2, 1] : vector<2x128x32xbf16> -> vector<2x32x128xbf16>
    %c0_17 = arith.constant 0 : index
    %c0_18 = arith.constant 0 : index
    %c0_19 = arith.constant 0 : index
    %45 = vector.load %arg22[%c0_17, %c0_18, %c0_19] : memref<2x128x64xbf16, #tpu.memory_space<vmem>>, vector<2x128x64xbf16>
    "tpu.trace_start"() <{level = 10 : i32, message = "hqd,hdk->hqk"}> : () -> ()
    %cst_20 = arith.constant dense<0.000000e+00> : vector<2x32x64xf32>
    %46 = tpu.matmul %44, %45, %cst_20 {dimension_numbers = #tpu.dot_dimension_numbers<[2], [1], [1], [2], [0, 0, 0, 1, 1, 2], [0], [0]>} : vector<2x32x128xbf16>, vector<2x128x64xbf16>, vector<2x32x64xf32> -> vector<2x32x64xf32>
    "tpu.trace_stop"() : () -> ()
    %c0_21 = arith.constant 0 : index
    %c0_22 = arith.constant 0 : index
    %c0_23 = arith.constant 0 : index
    %47 = vector.load %arg4[%c0_21, %c0_22, %c0_23] : memref<1x32x64xi8, #tpu.memory_space<vmem>>, vector<1x32x64xi8>
    %48 = vector.shape_cast %47 : vector<1x32x64xi8> to vector<32x64xi8>
    %c0_i8 = arith.constant 0 : i8
    %49 = vector.broadcast %c0_i8 : i8 to vector<32x64xi8>
    %50 = arith.cmpi ne, %48, %49 : vector<32x64xi8>
    %51 = vector.shape_cast %50 : vector<32x64xi1> to vector<1x32x64xi1>
    %cst_24 = arith.constant -1.000000e+09 : f32
    %52 = vector.shape_cast %51 : vector<1x32x64xi1> to vector<1x32x64xi1>
    %53 = vector.broadcast %52 : vector<1x32x64xi1> to vector<2x32x64xi1>
    %54 = vector.broadcast %cst_24 : f32 to vector<2x32x64xf32>
    %55 = arith.select %53, %46, %54 : vector<2x32x64xi1>, vector<2x32x64xf32>
    %cst_25 = arith.constant dense<0xFF800000> : vector<2x32xf32>
    %56 = vector.multi_reduction <maximumf>, %55, %cst_25 [2] : vector<2x32x64xf32> to vector<2x32xf32>
    %57 = vector.shape_cast %56 : vector<2x32xf32> to vector<2x32x1xf32>
    %58 = vector.broadcast %57 : vector<2x32x1xf32> to vector<2x32x64xf32>
    %59 = arith.subf %55, %58 : vector<2x32x64xf32>
    %60 = math.exp %59 : vector<2x32x64xf32>
    %cst_26 = arith.constant dense<0.000000e+00> : vector<2x32xf32>
    %61 = vector.multi_reduction <add>, %60, %cst_26 [2] : vector<2x32x64xf32> to vector<2x32xf32>
    %62 = vector.shape_cast %61 : vector<2x32xf32> to vector<2x32x1xf32>
    %63 = tpu.reciprocal %62 {approx = true} : vector<2x32x1xf32> -> vector<2x32x1xf32>
    %64 = vector.broadcast %63 : vector<2x32x1xf32> to vector<2x32x64xf32>
    %65 = arith.mulf %60, %64 : vector<2x32x64xf32>
    %66 = arith.truncf %65 : vector<2x32x64xf32> to vector<2x32x64xbf16>
    %c0_27 = arith.constant 0 : index
    %c0_28 = arith.constant 0 : index
    %c0_29 = arith.constant 0 : index
    %67 = vector.load %arg23[%c0_27, %c0_28, %c0_29] : memref<2x64x128xbf16, #tpu.memory_space<vmem>>, vector<2x64x128xbf16>
    "tpu.trace_start"() <{level = 10 : i32, message = "hqk,hkd->hqd"}> : () -> ()
    %cst_30 = arith.constant dense<0.000000e+00> : vector<2x32x128xf32>
    %68 = tpu.matmul %66, %67, %cst_30 {dimension_numbers = #tpu.dot_dimension_numbers<[2], [1], [1], [2], [0, 0, 0, 1, 1, 2], [0], [0]>} : vector<2x32x64xbf16>, vector<2x64x128xbf16>, vector<2x32x128xf32> -> vector<2x32x128xf32>
    "tpu.trace_stop"() : () -> ()
    %69 = arith.truncf %68 : vector<2x32x128xf32> to vector<2x32x128xbf16>
    %70 = tpu.transpose %69, [0, 2, 1] : vector<2x32x128xbf16> -> vector<2x128x32xbf16>
    %71 = vector.shape_cast %70 : vector<2x128x32xbf16> to vector<256x32xbf16>
    %72 = tpu.transpose %71, [1, 0] : vector<256x32xbf16> -> vector<32x256xbf16>
    %c0_31 = arith.constant 0 : index
    %c0_32 = arith.constant 0 : index
    %73 = vector.load %arg13[%c0_31, %c0_32] : memref<256x256xbf16, #tpu.memory_space<vmem>>, vector<256x256xbf16>
    %cst_33 = arith.constant dense<0.000000e+00> : vector<32x256xf32>
    %74 = tpu.matmul %72, %73, %cst_33 {dimension_numbers = #tpu.dot_dimension_numbers<[1], [0], [0], [1], [0, 0, 1, 1], [], []>} : vector<32x256xbf16>, vector<256x256xbf16>, vector<32x256xf32> -> vector<32x256xf32>
    %c0_34 = arith.constant 0 : index
    %c0_35 = arith.constant 0 : index
    %75 = vector.load %arg14[%c0_34, %c0_35] : memref<1x256xf32, #tpu.memory_space<vmem>>, vector<1x256xf32>
    %76 = vector.shape_cast %75 : vector<1x256xf32> to vector<256xf32>
    %77 = vector.shape_cast %76 : vector<256xf32> to vector<1x256xf32>
    %78 = vector.broadcast %77 : vector<1x256xf32> to vector<32x256xf32>
    %79 = arith.addf %74, %78 : vector<32x256xf32>
    %80 = arith.addf %4, %79 : vector<32x256xf32>
    %c0_36 = arith.constant 0 : index
    %c0_37 = arith.constant 0 : index
    %81 = vector.load %arg15[%c0_36, %c0_37] : memref<1x256xf32, #tpu.memory_space<vmem>>, vector<1x256xf32>
    %82 = vector.shape_cast %81 : vector<1x256xf32> to vector<256xf32>
    %c0_38 = arith.constant 0 : index
    %c0_39 = arith.constant 0 : index
    %83 = vector.load %arg16[%c0_38, %c0_39] : memref<1x256xf32, #tpu.memory_space<vmem>>, vector<1x256xf32>
    %84 = vector.shape_cast %83 : vector<1x256xf32> to vector<256xf32>
    %cst_40 = arith.constant dense<0.000000e+00> : vector<32xf32>
    %85 = vector.multi_reduction <add>, %80, %cst_40 [1] : vector<32x256xf32> to vector<32xf32>
    %86 = vector.shape_cast %85 : vector<32xf32> to vector<32x1xf32>
    %cst_41 = arith.constant 2.560000e+02 : f32
    %87 = vector.broadcast %cst_41 : f32 to vector<32x1xf32>
    %88 = arith.divf %86, %87 : vector<32x1xf32>
    %89 = vector.broadcast %88 : vector<32x1xf32> to vector<32x256xf32>
    %90 = arith.subf %80, %89 : vector<32x256xf32>
    %91 = arith.mulf %90, %90 : vector<32x256xf32>
    %cst_42 = arith.constant dense<0.000000e+00> : vector<32xf32>
    %92 = vector.multi_reduction <add>, %91, %cst_42 [1] : vector<32x256xf32> to vector<32xf32>
    %93 = vector.shape_cast %92 : vector<32xf32> to vector<32x1xf32>
    %cst_43 = arith.constant 2.560000e+02 : f32
    %94 = vector.broadcast %cst_43 : f32 to vector<32x1xf32>
    %95 = arith.divf %93, %94 : vector<32x1xf32>
    %cst_44 = arith.constant 9.99999996E-13 : f32
    %96 = vector.broadcast %cst_44 : f32 to vector<32x1xf32>
    %97 = arith.addf %95, %96 : vector<32x1xf32>
    %98 = math.rsqrt %97 : vector<32x1xf32>
    %99 = vector.broadcast %98 : vector<32x1xf32> to vector<32x256xf32>
    %100 = arith.mulf %90, %99 : vector<32x256xf32>
    %101 = vector.shape_cast %82 : vector<256xf32> to vector<1x256xf32>
    %102 = vector.broadcast %101 : vector<1x256xf32> to vector<32x256xf32>
    %103 = arith.mulf %100, %102 : vector<32x256xf32>
    %104 = vector.shape_cast %84 : vector<256xf32> to vector<1x256xf32>
    %105 = vector.broadcast %104 : vector<1x256xf32> to vector<32x256xf32>
    %106 = arith.addf %103, %105 : vector<32x256xf32>
    %107 = arith.truncf %106 : vector<32x256xf32> to vector<32x256xbf16>
    %c0_45 = arith.constant 0 : index
    %c0_46 = arith.constant 0 : index
    %108 = vector.load %arg17[%c0_45, %c0_46] : memref<256x512xbf16, #tpu.memory_space<vmem>>, vector<256x512xbf16>
    %cst_47 = arith.constant dense<0.000000e+00> : vector<32x512xf32>
    %109 = tpu.matmul %107, %108, %cst_47 {dimension_numbers = #tpu.dot_dimension_numbers<[1], [0], [0], [1], [0, 0, 1, 1], [], []>} : vector<32x256xbf16>, vector<256x512xbf16>, vector<32x512xf32> -> vector<32x512xf32>
    %c0_48 = arith.constant 0 : index
    %c0_49 = arith.constant 0 : index
    %110 = vector.load %arg18[%c0_48, %c0_49] : memref<1x512xf32, #tpu.memory_space<vmem>>, vector<1x512xf32>
    %111 = vector.shape_cast %110 : vector<1x512xf32> to vector<512xf32>
    %112 = vector.shape_cast %111 : vector<512xf32> to vector<1x512xf32>
    %113 = vector.broadcast %112 : vector<1x512xf32> to vector<32x512xf32>
    %114 = arith.addf %109, %113 : vector<32x512xf32>
    %cst_50 = arith.constant 5.000000e-01 : f32
    %115 = vector.broadcast %cst_50 : f32 to vector<32x512xf32>
    %116 = arith.mulf %115, %114 : vector<32x512xf32>
    %cst_51 = arith.constant 0.707106769 : f32
    %117 = vector.broadcast %cst_51 : f32 to vector<32x512xf32>
    %118 = arith.mulf %114, %117 : vector<32x512xf32>
    %119 = math.erf %118 : vector<32x512xf32>
    %cst_52 = arith.constant 1.000000e+00 : f32
    %120 = vector.broadcast %cst_52 : f32 to vector<32x512xf32>
    %121 = arith.addf %120, %119 : vector<32x512xf32>
    %122 = arith.mulf %116, %121 : vector<32x512xf32>
    %123 = arith.truncf %122 : vector<32x512xf32> to vector<32x512xbf16>
    %c0_53 = arith.constant 0 : index
    %c0_54 = arith.constant 0 : index
    %124 = vector.load %arg19[%c0_53, %c0_54] : memref<512x256xbf16, #tpu.memory_space<vmem>>, vector<512x256xbf16>
    %cst_55 = arith.constant dense<0.000000e+00> : vector<32x256xf32>
    %125 = tpu.matmul %123, %124, %cst_55 {dimension_numbers = #tpu.dot_dimension_numbers<[1], [0], [0], [1], [0, 0, 1, 1], [], []>} : vector<32x512xbf16>, vector<512x256xbf16>, vector<32x256xf32> -> vector<32x256xf32>
    %c0_56 = arith.constant 0 : index
    %c0_57 = arith.constant 0 : index
    %126 = vector.load %arg20[%c0_56, %c0_57] : memref<1x256xf32, #tpu.memory_space<vmem>>, vector<1x256xf32>
    %127 = vector.shape_cast %126 : vector<1x256xf32> to vector<256xf32>
    %128 = vector.shape_cast %127 : vector<256xf32> to vector<1x256xf32>
    %129 = vector.broadcast %128 : vector<1x256xf32> to vector<32x256xf32>
    %130 = arith.addf %125, %129 : vector<32x256xf32>
    %131 = arith.addf %80, %130 : vector<32x256xf32>
    %c0_58 = arith.constant 0 : index
    %c0_59 = arith.constant 0 : index
    %c0_60 = arith.constant 0 : index
    %132 = vector.load %arg21[%c0_58, %c0_59, %c0_60] : memref<1x32x256xf32, #tpu.memory_space<vmem>>, vector<1x32x256xf32>
    %133 = vector.shape_cast %132 : vector<1x32x256xf32> to vector<32x256xf32>
    %134 = vector.shape_cast %131 : vector<32x256xf32> to vector<1x32x256xf32>
    tpu.vector_store %arg21[%c0_58, %c0_59, %c0_60], %134 {strides = array<i32>} : memref<1x32x256xf32, #tpu.memory_space<vmem>>, vector<1x32x256xf32>,
    return
  }
  func.func @transform_0(%arg0: i32, %arg1: i32) -> (i32, i32, i32) {
    %c0_i32 = arith.constant 0 : i32
    %c0_i32_0 = arith.constant 0 : i32
    %c0_i32_1 = arith.constant 0 : i32
    return %arg0, %c0_i32, %c0_i32_0 : i32, i32, i32
  }
  func.func @transform_1(%arg0: i32, %arg1: i32) -> (i32, i32, i32) {
    %c0_i32 = arith.constant 0 : i32
    %c0_i32_0 = arith.constant 0 : i32
    return %arg0, %arg1, %c0_i32 : i32, i32, i32
  }
  func.func @transform_2(%arg0: i32, %arg1: i32) -> (i32, i32, i32) {
    %c0_i32 = arith.constant 0 : i32
    %c0_i32_0 = arith.constant 0 : i32
    return %arg0, %arg1, %c0_i32 : i32, i32, i32
  }
  func.func @transform_3(%arg0: i32, %arg1: i32) -> (i32, i32) {
    %c0_i32 = arith.constant 0 : i32
    %c0_i32_0 = arith.constant 0 : i32
    %c0_i32_1 = arith.constant 0 : i32
    return %c0_i32, %c0_i32_0 : i32, i32
  }
  func.func @transform_4(%arg0: i32, %arg1: i32) -> (i32, i32) {
    %c0_i32 = arith.constant 0 : i32
    %c0_i32_0 = arith.constant 0 : i32
    %c0_i32_1 = arith.constant 0 : i32
    return %c0_i32, %c0_i32_0 : i32, i32
  }
  func.func @transform_5(%arg0: i32, %arg1: i32) -> (i32, i32) {
    %c0_i32 = arith.constant 0 : i32
    %c0_i32_0 = arith.constant 0 : i32
    %c0_i32_1 = arith.constant 0 : i32
    return %c0_i32, %c0_i32_0 : i32, i32
  }
  func.func @transform_6(%arg0: i32, %arg1: i32) -> (i32, i32) {
    %c0_i32 = arith.constant 0 : i32
    %c0_i32_0 = arith.constant 0 : i32
    %c0_i32_1 = arith.constant 0 : i32
    return %c0_i32, %c0_i32_0 : i32, i32
  }
  func.func @transform_7(%arg0: i32, %arg1: i32) -> (i32, i32) {
    %c0_i32 = arith.constant 0 : i32
    %c0_i32_0 = arith.constant 0 : i32
    %c0_i32_1 = arith.constant 0 : i32
    return %c0_i32, %c0_i32_0 : i32, i32
  }
  func.func @transform_8(%arg0: i32, %arg1: i32) -> (i32, i32) {
    %c0_i32 = arith.constant 0 : i32
    %c0_i32_0 = arith.constant 0 : i32
    %c0_i32_1 = arith.constant 0 : i32
    return %c0_i32, %c0_i32_0 : i32, i32
  }
  func.func @transform_9(%arg0: i32, %arg1: i32) -> (i32, i32) {
    %c0_i32 = arith.constant 0 : i32
    %c0_i32_0 = arith.constant 0 : i32
    %c0_i32_1 = arith.constant 0 : i32
    return %c0_i32, %c0_i32_0 : i32, i32
  }
  func.func @transform_10(%arg0: i32, %arg1: i32) -> (i32, i32) {
    %c0_i32 = arith.constant 0 : i32
    %c0_i32_0 = arith.constant 0 : i32
    %c0_i32_1 = arith.constant 0 : i32
    return %c0_i32, %c0_i32_0 : i32, i32
  }
  func.func @transform_11(%arg0: i32, %arg1: i32) -> (i32, i32) {
    %c0_i32 = arith.constant 0 : i32
    %c0_i32_0 = arith.constant 0 : i32
    %c0_i32_1 = arith.constant 0 : i32
    return %c0_i32, %c0_i32_0 : i32, i32
  }
  func.func @transform_12(%arg0: i32, %arg1: i32) -> (i32, i32) {
    %c0_i32 = arith.constant 0 : i32
    %c0_i32_0 = arith.constant 0 : i32
    %c0_i32_1 = arith.constant 0 : i32
    return %c0_i32, %c0_i32_0 : i32, i32
  }
  func.func @transform_13(%arg0: i32, %arg1: i32) -> (i32, i32) {
    %c0_i32 = arith.constant 0 : i32
    %c0_i32_0 = arith.constant 0 : i32
    %c0_i32_1 = arith.constant 0 : i32
    return %c0_i32, %c0_i32_0 : i32, i32
  }
  func.func @transform_14(%arg0: i32, %arg1: i32) -> (i32, i32) {
    %c0_i32 = arith.constant 0 : i32
    %c0_i32_0 = arith.constant 0 : i32
    %c0_i32_1 = arith.constant 0 : i32
    return %c0_i32, %c0_i32_0 : i32, i32
  }
  func.func @transform_15(%arg0: i32, %arg1: i32) -> (i32, i32) {
    %c0_i32 = arith.constant 0 : i32
    %c0_i32_0 = arith.constant 0 : i32
    %c0_i32_1 = arith.constant 0 : i32
    return %c0_i32, %c0_i32_0 : i32, i32
  }
  func.func @transform_16(%arg0: i32, %arg1: i32) -> (i32, i32) {
    %c0_i32 = arith.constant 0 : i32
    %c0_i32_0 = arith.constant 0 : i32
    %c0_i32_1 = arith.constant 0 : i32
    return %c0_i32, %c0_i32_0 : i32, i32
  }
  func.func @transform_17(%arg0: i32, %arg1: i32) -> (i32, i32) {
    %c0_i32 = arith.constant 0 : i32
    %c0_i32_0 = arith.constant 0 : i32
    %c0_i32_1 = arith.constant 0 : i32
    return %c0_i32, %c0_i32_0 : i32, i32
  }
  func.func @transform_18(%arg0: i32, %arg1: i32) -> (i32, i32) {
    %c0_i32 = arith.constant 0 : i32
    %c0_i32_0 = arith.constant 0 : i32
    %c0_i32_1 = arith.constant 0 : i32
    return %c0_i32, %c0_i32_0 : i32, i32
  }
  func.func @transform_19(%arg0: i32, %arg1: i32) -> (i32, i32, i32) {
    %c0_i32 = arith.constant 0 : i32
    %c0_i32_0 = arith.constant 0 : i32
    return %arg0, %arg1, %c0_i32 : i32, i32, i32
  }
}

module attributes {stable_mosaic.version = 11 : i64} {
  func.func @kernel(%arg0: i32, %arg1: i32, %arg2: memref<1x64x256xf32, #tpu.memory_space<vmem>>, %arg3: memref<1x32x256xf32, #tpu.memory_space<vmem>>, %arg4: memref<1x32x64xi8, #tpu.memory_space<vmem>>, %arg5: memref<1x256xf32, #tpu.memory_space<vmem>>, %arg6: memref<1x256xf32, #tpu.memory_space<vmem>>, %arg7: memref<256x256xbf16, #tpu.memory_space<vmem>>, %arg8: memref<1x256xf32, #tpu.memory_space<vmem>>, %arg9: memref<256x256xbf16, #tpu.memory_space<vmem>>, %arg10: memref<1x256xf32, #tpu.memory_space<vmem>>, %arg11: memref<256x256xbf16, #tpu.memory_space<vmem>>, %arg12: memref<1x256xf32, #tpu.memory_space<vmem>>, %arg13: memref<256x256xbf16, #tpu.memory_space<vmem>>, %arg14: memref<1x256xf32, #tpu.memory_space<vmem>>, %arg15: memref<1x256xf32, #tpu.memory_space<vmem>>, %arg16: memref<1x256xf32, #tpu.memory_space<vmem>>, %arg17: memref<256x512xbf16, #tpu.memory_space<vmem>>, %arg18: memref<1x512xf32, #tpu.memory_space<vmem>>, %arg19: memref<512x256xbf16, #tpu.memory_space<vmem>>, %arg20: memref<1x256xf32, #tpu.memory_space<vmem>>, %arg21: memref<1x32x256xf32, #tpu.memory_space<vmem>>, %arg22: memref<2x128x64xbf16, #tpu.memory_space<vmem>>, %arg23: memref<2x64x128xbf16, #tpu.memory_space<vmem>>) attributes {dimension_semantics = [#tpu.dimension_semantics<parallel>, #tpu.dimension_semantics<arbitrary>], iteration_bounds = array<i64: 2, 2>, scalar_prefetch = 0 : i64, scratch_operands = 2 : i64, tpu.core_type = #tpu.core_type<tc>, window_params = [{transform_indices = @transform_0, window_bounds = array<i64: 1, 64, 256>}, {transform_indices = @transform_1, window_bounds = array<i64: 1, 32, 256>}, {transform_indices = @transform_2, window_bounds = array<i64: 1, 32, 64>}, {pipeline_mode = #tpu.pipeline_mode<synchronous>, transform_indices = @transform_3, window_bounds = array<i64: 1, 256>}, {pipeline_mode = #tpu.pipeline_mode<synchronous>, transform_indices = @transform_4, window_bounds = array<i64: 1, 256>}, {pipeline_mode = #tpu.pipeline_mode<synchronous>, transform_indices = @transform_5, window_bounds = array<i64: 256, 256>}, {pipeline_mode = #tpu.pipeline_mode<synchronous>, transform_indices = @transform_6, window_bounds = array<i64: 1, 256>}, {pipeline_mode = #tpu.pipeline_mode<synchronous>, transform_indices = @transform_7, window_bounds = array<i64: 256, 256>}, {pipeline_mode = #tpu.pipeline_mode<synchronous>, transform_indices = @transform_8, window_bounds = array<i64: 1, 256>}, {pipeline_mode = #tpu.pipeline_mode<synchronous>, transform_indices = @transform_9, window_bounds = array<i64: 256, 256>}, {pipeline_mode = #tpu.pipeline_mode<synchronous>, transform_indices = @transform_10, window_bounds = array<i64: 1, 256>}, {pipeline_mode = #tpu.pipeline_mode<synchronous>, transform_indices = @transform_11, window_bounds = array<i64: 256, 256>}, {pipeline_mode = #tpu.pipeline_mode<synchronous>, transform_indices = @transform_12, window_bounds = array<i64: 1, 256>}, {pipeline_mode = #tpu.pipeline_mode<synchronous>, transform_indices = @transform_13, window_bounds = array<i64: 1, 256>}, {pipeline_mode = #tpu.pipeline_mode<synchronous>, transform_indices = @transform_14, window_bounds = array<i64: 1, 256>}, {pipeline_mode = #tpu.pipeline_mode<synchronous>, transform_indices = @transform_15, window_bounds = array<i64: 256, 512>}, {pipeline_mode = #tpu.pipeline_mode<synchronous>, transform_indices = @transform_16, window_bounds = array<i64: 1, 512>}, {pipeline_mode = #tpu.pipeline_mode<synchronous>, transform_indices = @transform_17, window_bounds = array<i64: 512, 256>}, {pipeline_mode = #tpu.pipeline_mode<synchronous>, transform_indices = @transform_18, window_bounds = array<i64: 1, 256>}, {transform_indices = @transform_19, window_bounds = array<i64: 1, 32, 256>}]} {
    %c0_i32 = arith.constant 0 : i32
    %0 = arith.cmpi eq, %arg1, %c0_i32 : i32
    %1 = arith.extui %0 : i1 to i32
    %c0_i32_0 = arith.constant 0 : i32
    %2 = arith.cmpi ne, %1, %c0_i32_0 : i32
    scf.if %2 {
      %c0_61 = arith.constant 0 : index
      %c0_62 = arith.constant 0 : index
      %c0_63 = arith.constant 0 : index
      %135 = vector.load %arg2[%c0_61, %c0_62, %c0_63] : memref<1x64x256xf32, #tpu.memory_space<vmem>>, vector<1x64x256xf32>
      %136 = vector.shape_cast %135 : vector<1x64x256xf32> to vector<64x256xf32>
      %c0_64 = arith.constant 0 : index
      %c0_65 = arith.constant 0 : index
      %137 = vector.load %arg5[%c0_64, %c0_65] : memref<1x256xf32, #tpu.memory_space<vmem>>, vector<1x256xf32>
      %138 = vector.shape_cast %137 : vector<1x256xf32> to vector<256xf32>
      %c0_66 = arith.constant 0 : index
      %c0_67 = arith.constant 0 : index
      %139 = vector.load %arg6[%c0_66, %c0_67] : memref<1x256xf32, #tpu.memory_space<vmem>>, vector<1x256xf32>
      %140 = vector.shape_cast %139 : vector<1x256xf32> to vector<256xf32>
      %cst_68 = arith.constant dense<0.000000e+00> : vector<64xf32>
      %141 = vector.multi_reduction <add>, %136, %cst_68 [1] : vector<64x256xf32> to vector<64xf32>
      %142 = vector.shape_cast %141 : vector<64xf32> to vector<64x1xf32>
      %cst_69 = arith.constant 2.560000e+02 : f32
      %143 = vector.broadcast %cst_69 : f32 to vector<64x1xf32>
      %144 = arith.divf %142, %143 : vector<64x1xf32>
      %145 = vector.broadcast %144 : vector<64x1xf32> to vector<64x256xf32>
      %146 = arith.subf %136, %145 : vector<64x256xf32>
      %147 = arith.mulf %146, %146 : vector<64x256xf32>
      %cst_70 = arith.constant dense<0.000000e+00> : vector<64xf32>
      %148 = vector.multi_reduction <add>, %147, %cst_70 [1] : vector<64x256xf32> to vector<64xf32>
      %149 = vector.shape_cast %148 : vector<64xf32> to vector<64x1xf32>
      %cst_71 = arith.constant 2.560000e+02 : f32
      %150 = vector.broadcast %cst_71 : f32 to vector<64x1xf32>
      %151 = arith.divf %149, %150 : vector<64x1xf32>
      %cst_72 = arith.constant 9.99999996E-13 : f32
      %152 = vector.broadcast %cst_72 : f32 to vector<64x1xf32>
      %153 = arith.addf %151, %152 : vector<64x1xf32>
      %154 = math.rsqrt %153 : vector<64x1xf32>
      %155 = vector.broadcast %154 : vector<64x1xf32> to vector<64x256xf32>
      %156 = arith.mulf %146, %155 : vector<64x256xf32>
      %157 = vector.shape_cast %138 : vector<256xf32> to vector<1x256xf32>
      %158 = vector.broadcast %157 : vector<1x256xf32> to vector<64x256xf32>
      %159 = arith.mulf %156, %158 : vector<64x256xf32>
      %160 = vector.shape_cast %140 : vector<256xf32> to vector<1x256xf32>
      %161 = vector.broadcast %160 : vector<1x256xf32> to vector<64x256xf32>
      %162 = arith.addf %159, %161 : vector<64x256xf32>
      %163 = arith.truncf %162 : vector<64x256xf32> to vector<64x256xbf16>
      %c0_73 = arith.constant 0 : index
      %c0_74 = arith.constant 0 : index
      %164 = vector.load %arg9[%c0_73, %c0_74] : memref<256x256xbf16, #tpu.memory_space<vmem>>, vector<256x256xbf16>
      %cst_75 = arith.constant dense<0.000000e+00> : vector<64x256xf32>
      %165 = tpu.matmul %163, %164, %cst_75 {dimension_numbers = #tpu.dot_dimension_numbers<[1], [0], [0], [1], [0, 0, 1, 1], [], []>} : vector<64x256xbf16>, vector<256x256xbf16>, vector<64x256xf32> -> vector<64x256xf32>
      %c0_76 = arith.constant 0 : index
      %c0_77 = arith.constant 0 : index
      %166 = vector.load %arg10[%c0_76, %c0_77] : memref<1x256xf32, #tpu.memory_space<vmem>>, vector<1x256xf32>
      %167 = vector.shape_cast %166 : vector<1x256xf32> to vector<256xf32>
      %168 = vector.shape_cast %167 : vector<256xf32> to vector<1x256xf32>
      %169 = vector.broadcast %168 : vector<1x256xf32> to vector<64x256xf32>
      %170 = arith.addf %165, %169 : vector<64x256xf32>
      %171 = arith.truncf %170 : vector<64x256xf32> to vector<64x256xbf16>
      %c0_78 = arith.constant 0 : index
      %c0_79 = arith.constant 0 : index
      %172 = vector.load %arg11[%c0_78, %c0_79] : memref<256x256xbf16, #tpu.memory_space<vmem>>, vector<256x256xbf16>
      %cst_80 = arith.constant dense<0.000000e+00> : vector<64x256xf32>
      %173 = tpu.matmul %163, %172, %cst_80 {dimension_numbers = #tpu.dot_dimension_numbers<[1], [0], [0], [1], [0, 0, 1, 1], [], []>} : vector<64x256xbf16>, vector<256x256xbf16>, vector<64x256xf32> -> vector<64x256xf32>
      %c0_81 = arith.constant 0 : index
      %c0_82 = arith.constant 0 : index
      %174 = vector.load %arg12[%c0_81, %c0_82] : memref<1x256xf32, #tpu.memory_space<vmem>>, vector<1x256xf32>
      %175 = vector.shape_cast %174 : vector<1x256xf32> to vector<256xf32>
      %176 = vector.shape_cast %175 : vector<256xf32> to vector<1x256xf32>
      %177 = vector.broadcast %176 : vector<1x256xf32> to vector<64x256xf32>
      %178 = arith.addf %173, %177 : vector<64x256xf32>
      %179 = arith.truncf %178 : vector<64x256xf32> to vector<64x256xbf16>
      %180 = tpu.transpose %171, [1, 0] : vector<64x256xbf16> -> vector<256x64xbf16>
      %181 = vector.shape_cast %180 : vector<256x64xbf16> to vector<2x128x64xbf16>
      %c0_83 = arith.constant 0 : index
      %c0_84 = arith.constant 0 : index
      %c0_85 = arith.constant 0 : index
      %182 = vector.load %arg22[%c0_83, %c0_84, %c0_85] : memref<2x128x64xbf16, #tpu.memory_space<vmem>>, vector<2x128x64xbf16>
      tpu.vector_store %arg22[%c0_83, %c0_84, %c0_85], %181 {strides = array<i32>} : memref<2x128x64xbf16, #tpu.memory_space<vmem>>, vector<2x128x64xbf16>,
      %183 = tpu.transpose %179, [1, 0] : vector<64x256xbf16> -> vector<256x64xbf16>
      %184 = vector.shape_cast %183 : vector<256x64xbf16> to vector<2x128x64xbf16>
      %185 = tpu.transpose %184, [0, 2, 1] : vector<2x128x64xbf16> -> vector<2x64x128xbf16>
      %c0_86 = arith.constant 0 : index
      %c0_87 = arith.constant 0 : index
      %c0_88 = arith.constant 0 : index
      %186 = vector.load %arg23[%c0_86, %c0_87, %c0_88] : memref<2x64x128xbf16, #tpu.memory_space<vmem>>, vector<2x64x128xbf16>
      tpu.vector_store %arg23[%c0_86, %c0_87, %c0_88], %185 {strides = array<i32>} : memref<2x64x128xbf16, #tpu.memory_space<vmem>>, vector<2x64x128xbf16>,
    } else {
    }
    %c0 = arith.constant 0 : index
    %c0_1 = arith.constant 0 : index
    %c0_2 = arith.constant 0 : index
    %3 = vector.load %arg3[%c0, %c0_1, %c0_2] : memref<1x32x256xf32, #tpu.memory_space<vmem>>, vector<1x32x256xf32>
    %4 = vector.shape_cast %3 : vector<1x32x256xf32> to vector<32x256xf32>
    %c0_3 = arith.constant 0 : index
    %c0_4 = arith.constant 0 : index
    %5 = vector.load %arg5[%c0_3, %c0_4] : memref<1x256xf32, #tpu.memory_space<vmem>>, vector<1x256xf32>
    %6 = vector.shape_cast %5 : vector<1x256xf32> to vector<256xf32>
    %c0_5 = arith.constant 0 : index
    %c0_6 = arith.constant 0 : index
    %7 = vector.load %arg6[%c0_5, %c0_6] : memref<1x256xf32, #tpu.memory_space<vmem>>, vector<1x256xf32>
    %8 = vector.shape_cast %7 : vector<1x256xf32> to vector<256xf32>
    %cst = arith.constant dense<0.000000e+00> : vector<32xf32>
    %9 = vector.multi_reduction <add>, %4, %cst [1] : vector<32x256xf32> to vector<32xf32>
    %10 = vector.shape_cast %9 : vector<32xf32> to vector<32x1xf32>
    %cst_7 = arith.constant 2.560000e+02 : f32
    %11 = vector.broadcast %cst_7 : f32 to vector<32x1xf32>
    %12 = arith.divf %10, %11 : vector<32x1xf32>
    %13 = vector.broadcast %12 : vector<32x1xf32> to vector<32x256xf32>
    %14 = arith.subf %4, %13 : vector<32x256xf32>
    %15 = arith.mulf %14, %14 : vector<32x256xf32>
    %cst_8 = arith.constant dense<0.000000e+00> : vector<32xf32>
    %16 = vector.multi_reduction <add>, %15, %cst_8 [1] : vector<32x256xf32> to vector<32xf32>
    %17 = vector.shape_cast %16 : vector<32xf32> to vector<32x1xf32>
    %cst_9 = arith.constant 2.560000e+02 : f32
    %18 = vector.broadcast %cst_9 : f32 to vector<32x1xf32>
    %19 = arith.divf %17, %18 : vector<32x1xf32>
    %cst_10 = arith.constant 9.99999996E-13 : f32
    %20 = vector.broadcast %cst_10 : f32 to vector<32x1xf32>
    %21 = arith.addf %19, %20 : vector<32x1xf32>
    %22 = math.rsqrt %21 : vector<32x1xf32>
    %23 = vector.broadcast %22 : vector<32x1xf32> to vector<32x256xf32>
    %24 = arith.mulf %14, %23 : vector<32x256xf32>
    %25 = vector.shape_cast %6 : vector<256xf32> to vector<1x256xf32>
    %26 = vector.broadcast %25 : vector<1x256xf32> to vector<32x256xf32>
    %27 = arith.mulf %24, %26 : vector<32x256xf32>
    %28 = vector.shape_cast %8 : vector<256xf32> to vector<1x256xf32>
    %29 = vector.broadcast %28 : vector<1x256xf32> to vector<32x256xf32>
    %30 = arith.addf %27, %29 : vector<32x256xf32>
    %31 = arith.truncf %30 : vector<32x256xf32> to vector<32x256xbf16>
    %c0_11 = arith.constant 0 : index
    %c0_12 = arith.constant 0 : index
    %32 = vector.load %arg7[%c0_11, %c0_12] : memref<256x256xbf16, #tpu.memory_space<vmem>>, vector<256x256xbf16>
    %cst_13 = arith.constant dense<0.000000e+00> : vector<32x256xf32>
    %33 = tpu.matmul %31, %32, %cst_13 {dimension_numbers = #tpu.dot_dimension_numbers<[1], [0], [0], [1], [0, 0, 1, 1], [], []>} : vector<32x256xbf16>, vector<256x256xbf16>, vector<32x256xf32> -> vector<32x256xf32>
    %c0_14 = arith.constant 0 : index
    %c0_15 = arith.constant 0 : index
    %34 = vector.load %arg8[%c0_14, %c0_15] : memref<1x256xf32, #tpu.memory_space<vmem>>, vector<1x256xf32>
    %35 = vector.shape_cast %34 : vector<1x256xf32> to vector<256xf32>
    %36 = vector.shape_cast %35 : vector<256xf32> to vector<1x256xf32>
    %37 = vector.broadcast %36 : vector<1x256xf32> to vector<32x256xf32>
    %38 = arith.addf %33, %37 : vector<32x256xf32>
    %cst_16 = arith.constant 0.0883883461 : f32
    %39 = vector.broadcast %cst_16 : f32 to vector<32x256xf32>
    %40 = arith.mulf %38, %39 : vector<32x256xf32>
    %41 = arith.truncf %40 : vector<32x256xf32> to vector<32x256xbf16>
    %42 = tpu.transpose %41, [1, 0] : vector<32x256xbf16> -> vector<256x32xbf16>
    %43 = vector.shape_cast %42 : vector<256x32xbf16> to vector<2x128x32xbf16>
    %44 = tpu.transpose %43, [0, 2, 1] : vector<2x128x32xbf16> -> vector<2x32x128xbf16>
    %c0_17 = arith.constant 0 : index
    %c0_18 = arith.constant 0 : index
    %c0_19 = arith.constant 0 : index
    %45 = vector.load %arg22[%c0_17, %c0_18, %c0_19] : memref<2x128x64xbf16, #tpu.memory_space<vmem>>, vector<2x128x64xbf16>
    "tpu.trace_start"() <{level = 10 : i32, message = "hqd,hdk->hqk"}> : () -> ()
    %cst_20 = arith.constant dense<0.000000e+00> : vector<2x32x64xf32>
    %46 = tpu.matmul %44, %45, %cst_20 {dimension_numbers = #tpu.dot_dimension_numbers<[2], [1], [1], [2], [0, 0, 0, 1, 1, 2], [0], [0]>} : vector<2x32x128xbf16>, vector<2x128x64xbf16>, vector<2x32x64xf32> -> vector<2x32x64xf32>
    "tpu.trace_stop"() : () -> ()
    %c0_21 = arith.constant 0 : index
    %c0_22 = arith.constant 0 : index
    %c0_23 = arith.constant 0 : index
    %47 = vector.load %arg4[%c0_21, %c0_22, %c0_23] : memref<1x32x64xi8, #tpu.memory_space<vmem>>, vector<1x32x64xi8>
    %48 = vector.shape_cast %47 : vector<1x32x64xi8> to vector<32x64xi8>
    %c0_i8 = arith.constant 0 : i8
    %49 = vector.broadcast %c0_i8 : i8 to vector<32x64xi8>
    %50 = arith.cmpi ne, %48, %49 : vector<32x64xi8>
    %51 = vector.shape_cast %50 : vector<32x64xi1> to vector<1x32x64xi1>
    %cst_24 = arith.constant -1.000000e+09 : f32
    %52 = vector.shape_cast %51 : vector<1x32x64xi1> to vector<1x32x64xi1>
    %53 = vector.broadcast %52 : vector<1x32x64xi1> to vector<2x32x64xi1>
    %54 = vector.broadcast %cst_24 : f32 to vector<2x32x64xf32>
    %55 = arith.select %53, %46, %54 : vector<2x32x64xi1>, vector<2x32x64xf32>
    %cst_25 = arith.constant dense<0xFF800000> : vector<2x32xf32>
    %56 = vector.multi_reduction <maximumf>, %55, %cst_25 [2] : vector<2x32x64xf32> to vector<2x32xf32>
    %57 = vector.shape_cast %56 : vector<2x32xf32> to vector<2x32x1xf32>
    %58 = vector.broadcast %57 : vector<2x32x1xf32> to vector<2x32x64xf32>
    %59 = arith.subf %55, %58 : vector<2x32x64xf32>
    %60 = math.exp %59 : vector<2x32x64xf32>
    %cst_26 = arith.constant dense<0.000000e+00> : vector<2x32xf32>
    %61 = vector.multi_reduction <add>, %60, %cst_26 [2] : vector<2x32x64xf32> to vector<2x32xf32>
    %62 = vector.shape_cast %61 : vector<2x32xf32> to vector<2x32x1xf32>
    %63 = tpu.reciprocal %62 {approx = true} : vector<2x32x1xf32> -> vector<2x32x1xf32>
    %64 = vector.broadcast %63 : vector<2x32x1xf32> to vector<2x32x64xf32>
    %65 = arith.mulf %60, %64 : vector<2x32x64xf32>
    %66 = arith.truncf %65 : vector<2x32x64xf32> to vector<2x32x64xbf16>
    %c0_27 = arith.constant 0 : index
    %c0_28 = arith.constant 0 : index
    %c0_29 = arith.constant 0 : index
    %67 = vector.load %arg23[%c0_27, %c0_28, %c0_29] : memref<2x64x128xbf16, #tpu.memory_space<vmem>>, vector<2x64x128xbf16>
    "tpu.trace_start"() <{level = 10 : i32, message = "hqk,hkd->hqd"}> : () -> ()
    %cst_30 = arith.constant dense<0.000000e+00> : vector<2x32x128xf32>
    %68 = tpu.matmul %66, %67, %cst_30 {dimension_numbers = #tpu.dot_dimension_numbers<[2], [1], [1], [2], [0, 0, 0, 1, 1, 2], [0], [0]>} : vector<2x32x64xbf16>, vector<2x64x128xbf16>, vector<2x32x128xf32> -> vector<2x32x128xf32>
    "tpu.trace_stop"() : () -> ()
    %69 = arith.truncf %68 : vector<2x32x128xf32> to vector<2x32x128xbf16>
    %70 = tpu.transpose %69, [0, 2, 1] : vector<2x32x128xbf16> -> vector<2x128x32xbf16>
    %71 = vector.shape_cast %70 : vector<2x128x32xbf16> to vector<256x32xbf16>
    %72 = tpu.transpose %71, [1, 0] : vector<256x32xbf16> -> vector<32x256xbf16>
    %c0_31 = arith.constant 0 : index
    %c0_32 = arith.constant 0 : index
    %73 = vector.load %arg13[%c0_31, %c0_32] : memref<256x256xbf16, #tpu.memory_space<vmem>>, vector<256x256xbf16>
    %cst_33 = arith.constant dense<0.000000e+00> : vector<32x256xf32>
    %74 = tpu.matmul %72, %73, %cst_33 {dimension_numbers = #tpu.dot_dimension_numbers<[1], [0], [0], [1], [0, 0, 1, 1], [], []>} : vector<32x256xbf16>, vector<256x256xbf16>, vector<32x256xf32> -> vector<32x256xf32>
    %c0_34 = arith.constant 0 : index
    %c0_35 = arith.constant 0 : index
    %75 = vector.load %arg14[%c0_34, %c0_35] : memref<1x256xf32, #tpu.memory_space<vmem>>, vector<1x256xf32>
    %76 = vector.shape_cast %75 : vector<1x256xf32> to vector<256xf32>
    %77 = vector.shape_cast %76 : vector<256xf32> to vector<1x256xf32>
    %78 = vector.broadcast %77 : vector<1x256xf32> to vector<32x256xf32>
    %79 = arith.addf %74, %78 : vector<32x256xf32>
    %80 = arith.addf %4, %79 : vector<32x256xf32>
    %c0_36 = arith.constant 0 : index
    %c0_37 = arith.constant 0 : index
    %81 = vector.load %arg15[%c0_36, %c0_37] : memref<1x256xf32, #tpu.memory_space<vmem>>, vector<1x256xf32>
    %82 = vector.shape_cast %81 : vector<1x256xf32> to vector<256xf32>
    %c0_38 = arith.constant 0 : index
    %c0_39 = arith.constant 0 : index
    %83 = vector.load %arg16[%c0_38, %c0_39] : memref<1x256xf32, #tpu.memory_space<vmem>>, vector<1x256xf32>
    %84 = vector.shape_cast %83 : vector<1x256xf32> to vector<256xf32>
    %cst_40 = arith.constant dense<0.000000e+00> : vector<32xf32>
    %85 = vector.multi_reduction <add>, %80, %cst_40 [1] : vector<32x256xf32> to vector<32xf32>
    %86 = vector.shape_cast %85 : vector<32xf32> to vector<32x1xf32>
    %cst_41 = arith.constant 2.560000e+02 : f32
    %87 = vector.broadcast %cst_41 : f32 to vector<32x1xf32>
    %88 = arith.divf %86, %87 : vector<32x1xf32>
    %89 = vector.broadcast %88 : vector<32x1xf32> to vector<32x256xf32>
    %90 = arith.subf %80, %89 : vector<32x256xf32>
    %91 = arith.mulf %90, %90 : vector<32x256xf32>
    %cst_42 = arith.constant dense<0.000000e+00> : vector<32xf32>
    %92 = vector.multi_reduction <add>, %91, %cst_42 [1] : vector<32x256xf32> to vector<32xf32>
    %93 = vector.shape_cast %92 : vector<32xf32> to vector<32x1xf32>
    %cst_43 = arith.constant 2.560000e+02 : f32
    %94 = vector.broadcast %cst_43 : f32 to vector<32x1xf32>
    %95 = arith.divf %93, %94 : vector<32x1xf32>
    %cst_44 = arith.constant 9.99999996E-13 : f32
    %96 = vector.broadcast %cst_44 : f32 to vector<32x1xf32>
    %97 = arith.addf %95, %96 : vector<32x1xf32>
    %98 = math.rsqrt %97 : vector<32x1xf32>
    %99 = vector.broadcast %98 : vector<32x1xf32> to vector<32x256xf32>
    %100 = arith.mulf %90, %99 : vector<32x256xf32>
    %101 = vector.shape_cast %82 : vector<256xf32> to vector<1x256xf32>
    %102 = vector.broadcast %101 : vector<1x256xf32> to vector<32x256xf32>
    %103 = arith.mulf %100, %102 : vector<32x256xf32>
    %104 = vector.shape_cast %84 : vector<256xf32> to vector<1x256xf32>
    %105 = vector.broadcast %104 : vector<1x256xf32> to vector<32x256xf32>
    %106 = arith.addf %103, %105 : vector<32x256xf32>
    %107 = arith.truncf %106 : vector<32x256xf32> to vector<32x256xbf16>
    %c0_45 = arith.constant 0 : index
    %c0_46 = arith.constant 0 : index
    %108 = vector.load %arg17[%c0_45, %c0_46] : memref<256x512xbf16, #tpu.memory_space<vmem>>, vector<256x512xbf16>
    %cst_47 = arith.constant dense<0.000000e+00> : vector<32x512xf32>
    %109 = tpu.matmul %107, %108, %cst_47 {dimension_numbers = #tpu.dot_dimension_numbers<[1], [0], [0], [1], [0, 0, 1, 1], [], []>} : vector<32x256xbf16>, vector<256x512xbf16>, vector<32x512xf32> -> vector<32x512xf32>
    %c0_48 = arith.constant 0 : index
    %c0_49 = arith.constant 0 : index
    %110 = vector.load %arg18[%c0_48, %c0_49] : memref<1x512xf32, #tpu.memory_space<vmem>>, vector<1x512xf32>
    %111 = vector.shape_cast %110 : vector<1x512xf32> to vector<512xf32>
    %112 = vector.shape_cast %111 : vector<512xf32> to vector<1x512xf32>
    %113 = vector.broadcast %112 : vector<1x512xf32> to vector<32x512xf32>
    %114 = arith.addf %109, %113 : vector<32x512xf32>
    %cst_50 = arith.constant 5.000000e-01 : f32
    %115 = vector.broadcast %cst_50 : f32 to vector<32x512xf32>
    %116 = arith.mulf %115, %114 : vector<32x512xf32>
    %cst_51 = arith.constant 0.707106769 : f32
    %117 = vector.broadcast %cst_51 : f32 to vector<32x512xf32>
    %118 = arith.mulf %114, %117 : vector<32x512xf32>
    %119 = math.erf %118 : vector<32x512xf32>
    %cst_52 = arith.constant 1.000000e+00 : f32
    %120 = vector.broadcast %cst_52 : f32 to vector<32x512xf32>
    %121 = arith.addf %120, %119 : vector<32x512xf32>
    %122 = arith.mulf %116, %121 : vector<32x512xf32>
    %123 = arith.truncf %122 : vector<32x512xf32> to vector<32x512xbf16>
    %c0_53 = arith.constant 0 : index
    %c0_54 = arith.constant 0 : index
    %124 = vector.load %arg19[%c0_53, %c0_54] : memref<512x256xbf16, #tpu.memory_space<vmem>>, vector<512x256xbf16>
    %cst_55 = arith.constant dense<0.000000e+00> : vector<32x256xf32>
    %125 = tpu.matmul %123, %124, %cst_55 {dimension_numbers = #tpu.dot_dimension_numbers<[1], [0], [0], [1], [0, 0, 1, 1], [], []>} : vector<32x512xbf16>, vector<512x256xbf16>, vector<32x256xf32> -> vector<32x256xf32>
    %c0_56 = arith.constant 0 : index
    %c0_57 = arith.constant 0 : index
    %126 = vector.load %arg20[%c0_56, %c0_57] : memref<1x256xf32, #tpu.memory_space<vmem>>, vector<1x256xf32>
    %127 = vector.shape_cast %126 : vector<1x256xf32> to vector<256xf32>
    %128 = vector.shape_cast %127 : vector<256xf32> to vector<1x256xf32>
    %129 = vector.broadcast %128 : vector<1x256xf32> to vector<32x256xf32>
    %130 = arith.addf %125, %129 : vector<32x256xf32>
    %131 = arith.addf %80, %130 : vector<32x256xf32>
    %c0_58 = arith.constant 0 : index
    %c0_59 = arith.constant 0 : index
    %c0_60 = arith.constant 0 : index
    %132 = vector.load %arg21[%c0_58, %c0_59, %c0_60] : memref<1x32x256xf32, #tpu.memory_space<vmem>>, vector<1x32x256xf32>
    %133 = vector.shape_cast %132 : vector<1x32x256xf32> to vector<32x256xf32>
    %134 = vector.shape_cast %131 : vector<32x256xf32> to vector<1x32x256xf32>
    tpu.vector_store %arg21[%c0_58, %c0_59, %c0_60], %134 {strides = array<i32>} : memref<1x32x256xf32, #tpu.memory_space<vmem>>, vector<1x32x256xf32>,
    return
  }
  func.func @transform_0(%arg0: i32, %arg1: i32) -> (i32, i32, i32) {
    %c0_i32 = arith.constant 0 : i32
    %c0_i32_0 = arith.constant 0 : i32
    %c0_i32_1 = arith.constant 0 : i32
    return %arg0, %c0_i32, %c0_i32_0 : i32, i32, i32
  }
  func.func @transform_1(%arg0: i32, %arg1: i32) -> (i32, i32, i32) {
    %c0_i32 = arith.constant 0 : i32
    %c0_i32_0 = arith.constant 0 : i32
    return %arg0, %arg1, %c0_i32 : i32, i32, i32
  }
  func.func @transform_2(%arg0: i32, %arg1: i32) -> (i32, i32, i32) {
    %c0_i32 = arith.constant 0 : i32
    %c0_i32_0 = arith.constant 0 : i32
    return %arg0, %arg1, %c0_i32 : i32, i32, i32
  }
  func.func @transform_3(%arg0: i32, %arg1: i32) -> (i32, i32) {
    %c0_i32 = arith.constant 0 : i32
    %c0_i32_0 = arith.constant 0 : i32
    %c0_i32_1 = arith.constant 0 : i32
    return %c0_i32, %c0_i32_0 : i32, i32
  }
  func.func @transform_4(%arg0: i32, %arg1: i32) -> (i32, i32) {
    %c0_i32 = arith.constant 0 : i32
    %c0_i32_0 = arith.constant 0 : i32
    %c0_i32_1 = arith.constant 0 : i32
    return %c0_i32, %c0_i32_0 : i32, i32
  }
  func.func @transform_5(%arg0: i32, %arg1: i32) -> (i32, i32) {
    %c0_i32 = arith.constant 0 : i32
    %c0_i32_0 = arith.constant 0 : i32
    %c0_i32_1 = arith.constant 0 : i32
    return %c0_i32, %c0_i32_0 : i32, i32
  }
  func.func @transform_6(%arg0: i32, %arg1: i32) -> (i32, i32) {
    %c0_i32 = arith.constant 0 : i32
    %c0_i32_0 = arith.constant 0 : i32
    %c0_i32_1 = arith.constant 0 : i32
    return %c0_i32, %c0_i32_0 : i32, i32
  }
  func.func @transform_7(%arg0: i32, %arg1: i32) -> (i32, i32) {
    %c0_i32 = arith.constant 0 : i32
    %c0_i32_0 = arith.constant 0 : i32
    %c0_i32_1 = arith.constant 0 : i32
    return %c0_i32, %c0_i32_0 : i32, i32
  }
  func.func @transform_8(%arg0: i32, %arg1: i32) -> (i32, i32) {
    %c0_i32 = arith.constant 0 : i32
    %c0_i32_0 = arith.constant 0 : i32
    %c0_i32_1 = arith.constant 0 : i32
    return %c0_i32, %c0_i32_0 : i32, i32
  }
  func.func @transform_9(%arg0: i32, %arg1: i32) -> (i32, i32) {
    %c0_i32 = arith.constant 0 : i32
    %c0_i32_0 = arith.constant 0 : i32
    %c0_i32_1 = arith.constant 0 : i32
    return %c0_i32, %c0_i32_0 : i32, i32
  }
  func.func @transform_10(%arg0: i32, %arg1: i32) -> (i32, i32) {
    %c0_i32 = arith.constant 0 : i32
    %c0_i32_0 = arith.constant 0 : i32
    %c0_i32_1 = arith.constant 0 : i32
    return %c0_i32, %c0_i32_0 : i32, i32
  }
  func.func @transform_11(%arg0: i32, %arg1: i32) -> (i32, i32) {
    %c0_i32 = arith.constant 0 : i32
    %c0_i32_0 = arith.constant 0 : i32
    %c0_i32_1 = arith.constant 0 : i32
    return %c0_i32, %c0_i32_0 : i32, i32
  }
  func.func @transform_12(%arg0: i32, %arg1: i32) -> (i32, i32) {
    %c0_i32 = arith.constant 0 : i32
    %c0_i32_0 = arith.constant 0 : i32
    %c0_i32_1 = arith.constant 0 : i32
    return %c0_i32, %c0_i32_0 : i32, i32
  }
  func.func @transform_13(%arg0: i32, %arg1: i32) -> (i32, i32) {
    %c0_i32 = arith.constant 0 : i32
    %c0_i32_0 = arith.constant 0 : i32
    %c0_i32_1 = arith.constant 0 : i32
    return %c0_i32, %c0_i32_0 : i32, i32
  }
  func.func @transform_14(%arg0: i32, %arg1: i32) -> (i32, i32) {
    %c0_i32 = arith.constant 0 : i32
    %c0_i32_0 = arith.constant 0 : i32
    %c0_i32_1 = arith.constant 0 : i32
    return %c0_i32, %c0_i32_0 : i32, i32
  }
  func.func @transform_15(%arg0: i32, %arg1: i32) -> (i32, i32) {
    %c0_i32 = arith.constant 0 : i32
    %c0_i32_0 = arith.constant 0 : i32
    %c0_i32_1 = arith.constant 0 : i32
    return %c0_i32, %c0_i32_0 : i32, i32
  }
  func.func @transform_16(%arg0: i32, %arg1: i32) -> (i32, i32) {
    %c0_i32 = arith.constant 0 : i32
    %c0_i32_0 = arith.constant 0 : i32
    %c0_i32_1 = arith.constant 0 : i32
    return %c0_i32, %c0_i32_0 : i32, i32
  }
  func.func @transform_17(%arg0: i32, %arg1: i32) -> (i32, i32) {
    %c0_i32 = arith.constant 0 : i32
    %c0_i32_0 = arith.constant 0 : i32
    %c0_i32_1 = arith.constant 0 : i32
    return %c0_i32, %c0_i32_0 : i32, i32
  }
  func.func @transform_18(%arg0: i32, %arg1: i32) -> (i32, i32) {
    %c0_i32 = arith.constant 0 : i32
    %c0_i32_0 = arith.constant 0 : i32
    %c0_i32_1 = arith.constant 0 : i32
    return %c0_i32, %c0_i32_0 : i32, i32
  }
  func.func @transform_19(%arg0: i32, %arg1: i32) -> (i32, i32, i32) {
    %c0_i32 = arith.constant 0 : i32
    %c0_i32_0 = arith.constant 0 : i32
    return %arg0, %arg1, %c0_i32 : i32, i32, i32
  }
}

</mosaic_0001>

<bundles_post_ra>
// kernel: tpu_custom_call.1
= control target key start
LH: loop header
LB: loop body
LE: loop exit
PB: predicated region body
PF: predicated region fallthrough
CT: control target
= control target key end

     0   :  { %s7008_s0 = inlined_call_operand.hbm [shape: f32[2,64,256], index: 0, kind: input, shape index: {}]   ;;  %s7009_s1 = inlined_call_operand.hbm [shape: f32[2,64,256], index: 1, kind: input, shape index: {}]   ;;  %s7010_s2 = inlined_call_operand.hbm [shape: s8[2,64,64], index: 2, kind: input, shape index: {}]   ;;  %s7011_s3 = inlined_call_operand.vmem [shape: f32[1,256], index: 3, kind: input, shape index: {}]   ;;  %s7012_s4 = inlined_call_operand.vmem [shape: f32[1,256], index: 4, kind: input, shape index: {}]   ;;  %s7013_s5 = inlined_call_operand.hbm [shape: bf16[256,256], index: 5, kind: input, shape index: {}]   ;;  %s7014_s6 = inlined_call_operand.vmem [shape: f32[1,256], index: 6, kind: input, shape index: {}]   ;;  %s7015_s7 = inlined_call_operand.hbm [shape: bf16[256,256], index: 7, kind: input, shape index: {}]   ;;  %s7016_s8 = inlined_call_operand.vmem [shape: f32[1,256], index: 8, kind: input, shape index: {}]   ;;  %s7017_s9 = inlined_call_operand.hbm [shape: bf16[256,256], index: 9, kind: input, shape index: {}]   ;;  %s7018_s10 = inlined_call_operand.vmem [shape: f32[1,256], index: 10, kind: input, shape index: {}]   ;;  %s7019_s11 = inlined_call_operand.hbm [shape: bf16[256,256], index: 11, kind: input, shape index: {}]   ;;  %s7020_s12 = inlined_call_operand.vmem [shape: f32[1,256], index: 12, kind: input, shape index: {}]   ;;  %s7021_s13 = inlined_call_operand.vmem [shape: f32[1,256], index: 13, kind: input, shape index: {}]   ;;  %s7022_s14 = inlined_call_operand.vmem [shape: f32[1,256], index: 14, kind: input, shape index: {}]   ;;  %s7023_s15 = inlined_call_operand.hbm [shape: bf16[256,512], index: 15, kind: input, shape index: {}]   ;;  %s7024_s16 = inlined_call_operand.vmem [shape: f32[1,512], index: 16, kind: input, shape index: {}]   ;;  %s7025_s17 = inlined_call_operand.hbm [shape: bf16[512,256], index: 17, kind: input, shape index: {}]   ;;  %s7026_s18 = inlined_call_operand.vmem [shape: f32[1,256], index: 18, kind: input, shape index: {}]   ;;  %s7027_s19 = inlined_call_operand.hbm [shape: f32[2,64,256], index: 19, kind: output, shape index: {}]  }
   0x1   :  { %7072 = sst [smem:[#allocation37_spill]] %s7008_s0 }
   0x2   :  { %7073 = sst [smem:[#allocation38_spill]] %s7009_s1 }
   0x3   :  { %7074 = sst [smem:[#allocation39_spill]] %s7010_s2 }
   0x4   :  { %7075 = sst [smem:[#allocation40_spill]] %s7011_s3 }
   0x5   :  { %7076 = sst [smem:[#allocation41_spill]] %s7012_s4 }
   0x6   :  { %7077 = sst [smem:[#allocation42_spill]] %s7013_s5 }
   0x7   :  { %7078 = sst [smem:[#allocation43_spill]] %s7014_s6 }
   0x8   :  { %7079 = sst [smem:[#allocation44_spill]] %s7015_s7 }
   0x9   :  { %7080 = sst [smem:[#allocation45_spill]] %s7016_s8 }
   0xa   :  { %7081 = sst [smem:[#allocation46_spill]] %s7017_s9 }
   0xb   :  { %7082 = sst [smem:[#allocation47_spill]] %s7018_s10 }
   0xc   :  { %7083 = sst [smem:[#allocation48_spill]] %s7019_s11 }
   0xd   :  { %7084 = sst [smem:[#allocation49_spill]] %s7020_s12 }
   0xe   :  { %7085 = sst [smem:[#allocation50_spill]] %s7021_s13 }
   0xf   :  { %7086 = sst [smem:[#allocation51_spill]] %s7022_s14 }
  0x10   :  { %7087 = sst [smem:[#allocation52_spill]] %s7023_s15 }
  0x11   :  { %7088 = sst [smem:[#allocation53_spill]] %s7024_s16 }
  0x12   :  { %7089 = sst [smem:[#allocation54_spill]] %s7025_s17 }
  0x13   :  { %7090 = sst [smem:[#allocation55_spill]] %s7026_s18 }
  0x14   :  { %7091 = sst [smem:[#allocation56_spill]] %s7027_s19 }
  0x15   :  { %24 = vsyncpa [#allocation5], 0 }
  0x16   :  { %25 = vsyncpa [#allocation8], 0 }
  0x17   :  { %27 = vsyncpa [#allocation8 + $0x1], 0 }
  0x18   :  { %28 = vsyncpa [#allocation11], 0 }
  0x19   :  { %29 = vsyncpa [#allocation14], 0 }
  0x1a   :  { %30 = vsyncpa [#allocation17], 0 }
  0x1b   :  { %31 = vsyncpa [#allocation6], 0 }
  0x1c   :  { %33 = vsyncpa [#allocation6 + $0x1], 0  ;;  %s5876_s0 = smov 0   ;;  %s5878_s30 = smov 0  }
  0x1d   :  { %s5880_s20 = smov 0   ;;  %s5882_s21 = smov 0  }
  0x1e   :  { %s5884_s1 = smov 0   ;;  %s5886_s22 = smov 0  }
  0x1f   :  { %s5888_s2 = smov 0   ;;  %s5890_s23 = smov 0  }
  0x20   :  { %s5892_s24 = smov 0   ;;  %s5894_s25 = smov 0  }
  0x21   :  { %s5896_s3 = smov 0  }
  0x22 LB: > { %7092 = sst [smem:[#allocation26_spill]] %s5717_s0  ;;  %s5759_s26 = smov [#allocation10]   ;;  %s5757_s3 = sphi %s5896_s3, %s39_s3   ;;  %s5753_s25 = sphi %s5894_s25, %s7185_s25   ;;  %s5749_s24 = sphi %s5892_s24, %s7184_s24   ;;  %s5745_s23 = sphi %s5890_s23, %s7183_s23   ;;  %s5741_s2 = sphi %s5888_s2, %s7182_s2   ;;  %s5737_s22 = sphi %s5886_s22, %s7176_s22   ;;  %s5733_s1 = sphi %s5884_s1, %s7175_s1   ;;  %s5729_s21 = sphi %s5882_s21, %s7174_s21   ;;  %s5725_s20 = sphi %s5880_s20, %s7181_s20   ;;  %s5721_s30 = sphi %s5878_s30, %s7180_s30   ;;  %s5717_s0 = sphi %s5876_s0, %s7179_s0  }
  0x23   : > { %7093 = sst [smem:[#allocation27_spill]] %s5733_s1  ;;  %s536_s27 = sshll.u32 %s5759_s26, 4  ;;  %s5937_s27 = int_to_ptr.vmem [resolvable:$true] %s536_s27 }
  0x24   : > { %7094 = sst [smem:[#allocation28_spill]] %s5737_s22  ;;  %s5932_s28 = sadd.s32 4294967295, %s5757_s3  }
  0x25   : > { %7095 = sst [smem:[#allocation29_spill]] %s5741_s2  ;;  %p4280_p0 = scmp.ge.s32.totalorder %s5757_s3, 1 }
  0x26   : > { %7096 = sst [smem:[#allocation30_spill]] %s5757_s3  ;;  %p7036_p1 = scmp.eq.s32.totalorder %s5932_s28, 0 }
  0x27   : > { %p502_p2 = scmp.lt.s32.totalorder %s5757_s3, 5  ;;  %s5760_s19 = smov [#allocation13]  }
  0x28   : > { %s568_s18 = sshll.u32 %s5760_s19, 4  ;;  %s5761_s16 = smov [#allocation16]   ;;  %s5954_s18 = int_to_ptr.vmem [resolvable:$true] %s568_s18 }
  0x29   : > { %p5939_p3 = pnand %p4280_p0, %p502_p2  ;;  %s5956_s14 = sshll.u32 %s5761_s16, 4  ;;  %s607_s14 = int_to_ptr.vmem [resolvable:$true] %s5956_s14 }
  0x2a   : > { %s7099_s5 = sld [smem:[#allocation42_spill]] }
  0x2b   : > { %s7097_s29 = scalar_select %p5939_p3, 1, 0 }
  0x2c   : > { %p7032_p4 = pneg %p5939_p3 }
  0x2e   : > { %p5950_p5 = pnand %p7032_p4, %p7036_p1 }
  0x30   : > { %s7098_s26 = scalar_select %p5950_p5, 1, 0 }
  0x31   : > { %s5361_s6 = scalar_lea.hbm %s7099_s5, 4096  ;;  %p5966_p7 = pneg %p5950_p5 }
  0x32   : > { %p5362_p6 = scmp.ne.s32.totalorder %s7099_s5, %s5361_s6  ;;  %p5368_p10 = scmp.lt.u32.totalorder %s5361_s6, %s7099_s5 }
  0x33   : > { %s7100_s19 = scalar_select %p5966_p7, 1, 0 }
  0x34   : > { %p5364_p8 = pnand %p5966_p7, %p5362_p6 }
  0x36   : > { %p5365_p9 = pneg %p5364_p8 }
  0x38   : > { %p5370_p11 = pnand %p5368_p10, %p5365_p9 }
  0x3a   : > { %5373 = shalt.err (!%p5370_p11)
}
  0x3b   : > { %s5374_s8 = scalar_lea.vmem %s5937_s27, 4096  ;;  %p5382_p2 = scmp.lt.s32.totalorder %s5937_s27, %s5937_s27 }
  0x3c   : > { %p5375_p12 = scmp.ne.s32.totalorder %s5937_s27, %s5374_s8  ;;  %p5383_p4 = scmp.lt.s32.totalorder %s5374_s8, %s5374_s8 }
  0x3e   : > { %p5377_p13 = pnand %p5375_p12, %p5966_p7  ;;  %p5384_p6 = por %p5383_p4, %p5382_p2 }
  0x40   : > { %p5378_p0 = pneg %p5377_p13 }
  0x42   : > { %p5385_p8 = pnand %p5384_p6, %p5378_p0 }
  0x44   : > { %5388 = shalt.err (!%p5385_p8)
}
  0x45   : > { %s7039_s10 = smov 128   ;;  %s7041_s4 = smov 8  }
  0x46   : > { %4729 = dma.hbm_to_vmem [thread:$0]  (!%p5950_p5), %s7099_s5, 4096, %s5937_s27, [#allocation11], %s7039_s10, %s7039_s10, %s7041_s4  }
  0x47   : > { %s7101_s9 = sld [smem:[#allocation46_spill]] }
  0x4d   : > { %s5389_s8 = scalar_lea.hbm %s7101_s9, 4096 }
  0x4e   : > { %p5390_p4 = scmp.ne.s32.totalorder %s7101_s9, %s5389_s8  ;;  %p5396_p11 = scmp.lt.u32.totalorder %s5389_s8, %s7101_s9 }
  0x50   : > { %p5392_p9 = pnand %p5390_p4, %p5966_p7 }
  0x52   : > { %p5393_p10 = pneg %p5392_p9 }
  0x54   : > { %p5398_p12 = pnand %p5396_p11, %p5393_p10 }
  0x56   : > { %5401 = shalt.err (!%p5398_p12)
}
  0x57   : > { %s5402_s27 = scalar_lea.vmem %s5954_s18, 4096  ;;  %p5410_p6 = scmp.lt.s32.totalorder %s5954_s18, %s5954_s18 }
  0x58   : > { %p5403_p13 = scmp.ne.s32.totalorder %s5954_s18, %s5402_s27  ;;  %p5411_p8 = scmp.lt.s32.totalorder %s5402_s27, %s5402_s27 }
  0x5a   : > { %p5405_p0 = pnand %p5403_p13, %p5966_p7  ;;  %p5412_p4 = por %p5411_p8, %p5410_p6 }
  0x5c   : > { %p5406_p2 = pneg %p5405_p0 }
  0x5e   : > { %p5413_p9 = pnand %p5412_p4, %p5406_p2 }
  0x60   : > { %5416 = shalt.err (!%p5413_p9)
}
  0x61   : > { %4735 = dma.hbm_to_vmem [thread:$0]  (!%p5950_p5), %s7101_s9, 4096, %s5954_s18, [#allocation14], %s7039_s10, %s7039_s10, %s7041_s4  }
  0x62   : > { %s7102_s15 = sld [smem:[#allocation52_spill]] }
  0x68   : > { %s5417_s6 = scalar_lea.hbm %s7102_s15, 8192 }
  0x69   : > { %p5418_p10 = scmp.ne.s32.totalorder %s7102_s15, %s5417_s6  ;;  %p5424_p13 = scmp.lt.u32.totalorder %s5417_s6, %s7102_s15 }
  0x6b   : > { %p5420_p11 = pnand %p5418_p10, %p5966_p7 }
  0x6d   : > { %p5421_p12 = pneg %p5420_p11 }
  0x6f   : > { %p5426_p0 = pnand %p5424_p13, %p5421_p12 }
  0x71   : > { %5429 = shalt.err (!%p5426_p0)
}
  0x72   : > { %s5430_s27 = scalar_lea.vmem %s607_s14, 8192  ;;  %p5438_p4 = scmp.lt.s32.totalorder %s607_s14, %s607_s14 }
  0x73   : > { %p5431_p2 = scmp.ne.s32.totalorder %s607_s14, %s5430_s27  ;;  %p5439_p9 = scmp.lt.s32.totalorder %s5430_s27, %s5430_s27 }
  0x75   : > { %p5433_p6 = pnand %p5431_p2, %p5966_p7  ;;  %p5440_p1 = por %p5439_p9, %p5438_p4 }
  0x77   : > { %p5434_p8 = pneg %p5433_p6 }
  0x79   : > { %p5441_p3 = pnand %p5440_p1, %p5434_p8 }
  0x7b   : > { %5444 = shalt.err (!%p5441_p3)
}
  0x7c   : > { %s7043_s18 = smov 256   ;;  %s7045_s7 = smov 16  }
  0x7d   : > { %4741 = dma.hbm_to_vmem [thread:$0]  (!%p5950_p5), %s7102_s15, 8192, %s607_s14, [#allocation17], %s7043_s18, %s7043_s18, %s7045_s7  }
  0x7e   : > { %s4279_s2 = sadd.s32 4294967294, %s5757_s3   ;;  %s48_s6 = sadd.s32 1, %s5749_s24 }
  0x7f   : > { %s51_s12 = sadd.s32 1, %s5753_s25  ;;  %p49_p1 = scmp.ge.s32.totalorder %s48_s6, 2 }
  0x80   : > { %s58_s13 = sadd.s32 1, %s5737_s22  ;;  %s86_s16 = sadd.s32 1, %s5725_s20 }
  0x81   : > { %p93_p3 = scmp.ne.s32.totalorder %s5725_s20, %s5721_s30  ;;  %s7187_s6 = smov (%p49_p1, %s48_s6), 0 }
  0x82   : > { %7103 = sst [smem:[#allocation31_spill]] %s7187_s6  ;;  %s7189_s12 = smov (!%p49_p1, %s51_s12), %s5753_s25 }
  0x83   : > { %s82_s8 = ssub.s32 %s5749_s24, %s7187_s6  ;;  %p94_p10 = scmp.eq.s32.totalorder %s5757_s3, 0 }
  0x84   : > { %p53_p11 = scmp.ge.s32.totalorder %s7189_s12, 2  ;;  %p99_p12 = scmp.ne.s32.totalorder %s5721_s30, %s5717_s0 }
  0x85   : > { %p6053_p13 = por %p94_p10, %p93_p3  ;;  %p489_p0 = scmp.eq.s32.totalorder %s5932_s28, 3 }
  0x86   : > { %s7191_s12 = smov (%p53_p11, %s7189_s12), 0  ;;  %p7106_p2 = scmp.eq.s32.totalorder %s5932_s28, 0 }
  0x87   : > { %7105 = sst [smem:[#allocation32_spill]] %s7191_s12  ;;  %p6066_p8 = por %p489_p0, %p93_p3 }
  0x88   : > { %p6062_p6 = por %p99_p12, %p7106_p2  ;;  %s55_s17 = ssub.s32 %s5753_s25, %s7191_s12 }
  0x89   : > { %s7108_s11 = scalar_select %p6066_p8, 1, 0 }
  0x8a   : > { %s7107_s27 = scalar_select %p6062_p6, 1, 0 }
  0x8b   : > { %7109 = sst [smem:[#allocation33_spill]] %s7108_s11  ;;  %p495_p4 = scmp.eq.s32.totalorder %s4279_s2, 3 }
  0x8c   : > { %p56_p9 = scmp.eq.s32.totalorder %s55_s17, 0  ;;  %s83_s10 = sor.u32 %s82_s8, %s55_s17 }
  0x8d   : > { %p84_p1 = scmp.eq.s32.totalorder %s83_s10, 0  ;;  %p6072_p10 = por %p495_p4, %p99_p12 }
  0x8e   : > { %s6077_s18 = scalar_select %p56_p9, %s5737_s22, %s58_s13  }
  0x8f   : > { %s7110_s4 = scalar_select %p6072_p10, 1, 0 }
  0x90   : > { %7112 = sst [smem:[#allocation35_spill]] %s6077_s18  ;;  %p4762_p11 = scmp.lt.s32.totalorder %s5757_s3, 4 }
  0x91   : > { %7111 = sst [smem:[#allocation34_spill]] %s7110_s4  ;;  %s639_s5 = sand.u32 1, %s5757_s3  }
  0x92   : > { %s6080_s7 = scalar_select %p84_p1, %s5725_s20, %s86_s16  }
  0x93   : > { %s7057_s9 = sand.u32 1, %s5725_s20   ;;  %s4577_s6 = sshll.u32 %s5749_s24, 3 }
  0x94   : > { %7113 = sst [smem:[#allocation36_spill]] %s6080_s7  ;;  %s4290_s15 = sshll.u32 %s7057_s9, 6 }
  0x95   : > { %s4293_s12 = sshll.u32 %s5753_s25, 4  ;;  %s643_s0 = scalar_lea.vmem [#allocation7], %s4290_s15 }
  0x96   : > { %s650_s2 = sadd.s32 %s4577_s6, %s4293_s12  ;;  %s653_s8 = sshll.u32 %s643_s0, 4  ;;  %s6089_s8 = int_to_ptr.vmem [resolvable:$true] %s653_s8 }
  0x97   : > { %s4294_s10 = sshll.u32 %s650_s2, 7  ;;  %s7114_s4 = sld [smem:[#allocation38_spill]] }
  0x98   : > { %p6098_p3 = pnand %p4762_p11, %p6053_p13  ;;  %s6102_s15 = scalar_lea.sflag [#allocation8], %s639_s5 }
  0x9a   : > { %s7115_s16 = scalar_select %p6098_p3, 1, 0 }
  0x9b   : > { %p7061_p0 = pneg %p6098_p3 }
  0x9d   : > { %s6094_s13 = scalar_lea.hbm %s7114_s4, %s4294_s10  ;;  %s5450_s14 = scalar_lea.hbm %s7114_s4, 4096 }
  0x9e   : > { %s5445_s0 = scalar_lea.hbm %s6094_s13, 1024  ;;  %p5451_p13 = scmp.lt.u32.totalorder %s6094_s13, %s7114_s4 }
  0x9f   : > { %p5446_p12 = scmp.ne.s32.totalorder %s6094_s13, %s5445_s0  ;;  %p5452_p9 = scmp.lt.u32.totalorder %s5450_s14, %s5445_s0 }
  0xa0   : > { %p5454_p11 = scmp.lt.u32.totalorder %s5445_s0, %s6094_s13 }
  0xa1   : > { %p5448_p2 = pnand %p7061_p0, %p5446_p12  ;;  %p5453_p1 = por %p5452_p9, %p5451_p13 }
  0xa3   : > { %p5449_p4 = pneg %p5448_p2  ;;  %p5455_p10 = por %p5454_p11, %p5453_p1 }
  0xa5   : > { %p5456_p8 = pnand %p5455_p10, %p5449_p4 }
  0xa7   : > { %5459 = shalt.err (!%p5456_p8)
}
  0xa8   : > { %s5460_s5 = scalar_lea.vmem %s6089_s8, 1024  ;;  %s5766_s10 = smov [#allocation7]  }
  0xa9   : > { %p5461_p12 = scmp.ne.s32.totalorder %s6089_s8, %s5460_s5  ;;  %s5465_s17 = sshll.u32 %s5766_s10, 4  ;;  %s5466_s17 = int_to_ptr.vmem [resolvable:$false] %s5465_s17 }
  0xaa   : > { %s5467_s6 = scalar_lea.vmem %s5466_s17, 2048  ;;  %p5468_p5 = scmp.lt.s32.totalorder %s6089_s8, %s5466_s17 }
  0xab   : > { %p5463_p2 = pnand %p5461_p12, %p7061_p0  ;;  %p5469_p13 = scmp.lt.s32.totalorder %s5467_s6, %s5460_s5 }
  0xad   : > { %p5464_p6 = pneg %p5463_p2  ;;  %p5470_p9 = por %p5469_p13, %p5468_p5 }
  0xaf   : > { %p5471_p1 = pnand %p5470_p9, %p5464_p6 }
  0xb1   : > { %5474 = shalt.err (!%p5471_p1)
}
  0xb2   : > { %s7116_s0 = smov 16   ;;  %s7117_s12 = smov 256  }
  0xb3   : > { %4748 = dma.hbm_to_vmem [thread:$0]  (!%p6098_p3), %s6094_s13, 1024, %s6089_s8, %s6102_s15, %s7117_s12, %s7117_s12, %s7116_s0  }
  0xb4   : > { %s4576_s14 = sshll.u32 %s5745_s23, 11  ;;  %p71_p8 = scmp.ne.s32.totalorder %s5733_s1, %s5729_s21 }
  0xb5   : > { %s7118_s5 = sld [smem:[#allocation37_spill]]  ;;  %p7119_p5 = scmp.eq.s32.totalorder %s5932_s28, 0 }
  0xb6   : > { %s5767_s6 = smov [#allocation4]   ;;  %s5768_s4 = smov [#allocation12]  }
  0xb7   : > { %p6143_p6 = por %p7119_p5, %p71_p8  ;;  %s517_s9 = sshll.u32 %s5767_s6, 4  ;;  %s6147_s9 = int_to_ptr.vmem [resolvable:$true] %s517_s9 }
  0xb8   : > { %s552_s18 = sshll.u32 %s5768_s4, 4  ;;  %p7121_p10 = scmp.ne.s32.totalorder %s7097_s29, 0  ;;  %s553_s18 = int_to_ptr.vmem [resolvable:$true] %s552_s18 }
  0xb9   : > { %s7120_s17 = scalar_select %p6143_p6, 1, 0 }
  0xba   : > { %p7122_p4 = pneg %p7121_p10 }
  0xbb   : > { %s6139_s10 = scalar_lea.hbm %s7118_s5, %s4576_s14  ;;  %s7124_s14 = sld [smem:[#allocation44_spill]] }
  0xbc   : > { %p6154_p11 = pnand %p7122_p4, %p6143_p6 }
  0xc1   : > { %s5475_s11 = scalar_lea.hbm %s7124_s14, 4096 }
  0xc2   : > { %p5476_p12 = scmp.ne.s32.totalorder %s7124_s14, %s5475_s11  ;;  %p5482_p9 = scmp.lt.u32.totalorder %s5475_s11, %s7124_s14 }
  0xc4   : > { %p5478_p2 = pnand %p5476_p12, %p5966_p7 }
  0xc6   : > { %p5479_p13 = pneg %p5478_p2 }
  0xc8   : > { %p5484_p1 = pnand %p5482_p9, %p5479_p13 }
  0xca   : > { %5487 = shalt.err (!%p5484_p1)
}
  0xcb   : > { %s5488_s1 = scalar_lea.vmem %s553_s18, 4096  ;;  %p5496_p0 = scmp.lt.s32.totalorder %s553_s18, %s553_s18 }
  0xcc   : > { %p5489_p8 = scmp.ne.s32.totalorder %s553_s18, %s5488_s1  ;;  %p5497_p6 = scmp.lt.s32.totalorder %s5488_s1, %s5488_s1 }
  0xce   : > { %p5491_p5 = pnand %p5489_p8, %p5966_p7  ;;  %p5498_p10 = por %p5497_p6, %p5496_p0 }
  0xd0   : > { %p5492_p4 = pneg %p5491_p5 }
  0xd2   : > { %p5499_p3 = pnand %p5498_p10, %p5492_p4 }
  0xd4   : > { %5502 = shalt.err (!%p5499_p3)
}
  0xd5   : > { %p7125_p12 = scmp.ne.s32.totalorder %s7098_s26, 0  ;;  %s7126_s22 = smov 8  }
  0xd6   : > { %s7127_s8 = smov 128   ;;  %s5503_s2 = scalar_lea.hbm %s6139_s10, 2048 }
  0xd7   : > { %4732 = dma.hbm_to_vmem [thread:$0]  (!%p7125_p12), %s7124_s14, 4096, %s553_s18, [#allocation11], %s7127_s8, %s7127_s8, %s7126_s22  }
  0xd8   : > { %p5504_p2 = scmp.ne.s32.totalorder %s6139_s10, %s5503_s2  ;;  %p5505_p0 = pneg %p6154_p11 }
  0xd9   : > { %s5508_s6 = scalar_lea.hbm %s7118_s5, 4096  ;;  %p5509_p10 = scmp.lt.u32.totalorder %s6139_s10, %s7118_s5 }
  0xda   : > { %p5506_p3 = pnand %p5505_p0, %p5504_p2  ;;  %p5510_p13 = scmp.lt.u32.totalorder %s5508_s6, %s5503_s2 }
  0xdb   : > { %p5512_p1 = scmp.lt.u32.totalorder %s5503_s2, %s6139_s10 }
  0xdc   : > { %p5507_p6 = pneg %p5506_p3  ;;  %p5511_p9 = por %p5510_p13, %p5509_p10 }
  0xde   : > { %p5513_p8 = por %p5512_p1, %p5511_p9 }
  0xe0   : > { %p5514_p5 = pnand %p5513_p8, %p5507_p6 }
  0xe2   : > { %5517 = shalt.err (!%p5514_p5)
}
  0xe3   : > { %s5518_s18 = scalar_lea.vmem %s6147_s9, 2048  ;;  %p5526_p12 = scmp.lt.s32.totalorder %s6147_s9, %s6147_s9 }
  0xe4   : > { %p5519_p4 = scmp.ne.s32.totalorder %s6147_s9, %s5518_s18  ;;  %p5527_p7 = scmp.lt.s32.totalorder %s5518_s18, %s5518_s18 }
  0xe6   : > { %p5521_p2 = pnand %p5519_p4, %p5505_p0  ;;  %p5528_p10 = por %p5527_p7, %p5526_p12 }
  0xe8   : > { %p5522_p3 = pneg %p5521_p2 }
  0xea   : > { %p5529_p13 = pnand %p5528_p10, %p5522_p3 }
  0xec   : > { %5532 = shalt.err (!%p5529_p13)
}
  0xed   : > { %4726 = dma.hbm_to_vmem [thread:$0]  (!%p6154_p11), %s6139_s10, 2048, %s6147_s9, [#allocation5], %s7117_s12, %s7117_s12, %s7116_s0  }
  0xee   : > { %s5769_s2 = smov [#allocation15]   ;;  %s5770_s4 = smov [#allocation18]  }
  0xef   : > { %s584_s1 = sshll.u32 %s5769_s2, 4  ;;  %s622_s6 = sshll.u32 %s5770_s4, 4  ;;  %s585_s1 = int_to_ptr.vmem [resolvable:$true] %s584_s1  ;;  %s623_s6 = int_to_ptr.vmem [resolvable:$true] %s622_s6 }
  0xf0   : > { %s7128_s18 = sld [smem:[#allocation48_spill]]  ;;  %p7129_p12 = scmp.ne.s32.totalorder %s7100_s19, 0 }
  0xf6   : > { %s5533_s5 = scalar_lea.hbm %s7128_s18, 4096 }
  0xf7   : > { %p5534_p7 = scmp.ne.s32.totalorder %s7128_s18, %s5533_s5  ;;  %p5540_p11 = scmp.lt.u32.totalorder %s5533_s5, %s7128_s18 }
  0xf9   : > { %p5536_p0 = pnand %p5534_p7, %p7129_p12 }
  0xfb   : > { %p5537_p6 = pneg %p5536_p0 }
  0xfd   : > { %p5542_p9 = pnand %p5540_p11, %p5537_p6 }
  0xff   : > { %5545 = shalt.err (!%p5542_p9)
}
 0x100   : > { %s5546_s9 = scalar_lea.vmem %s585_s1, 4096  ;;  %p5554_p4 = scmp.lt.s32.totalorder %s585_s1, %s585_s1 }
 0x101   : > { %p5547_p1 = scmp.ne.s32.totalorder %s585_s1, %s5546_s9  ;;  %p5555_p2 = scmp.lt.s32.totalorder %s5546_s9, %s5546_s9 }
 0x103   : > { %p5549_p8 = pnand %p5547_p1, %p7129_p12  ;;  %p5556_p3 = por %p5555_p2, %p5554_p4 }
 0x105   : > { %p5550_p5 = pneg %p5549_p8 }
 0x107   : > { %p5557_p10 = pnand %p5556_p3, %p5550_p5 }
 0x109   : > { %5560 = shalt.err (!%p5557_p10)
}
 0x10a   : > { %p7130_p13 = scmp.ne.s32.totalorder %s7098_s26, 0  ;;  %s7131_s0 = sand.u32 1, %s5725_s20  }
 0x10b   : > { %s4295_s12 = sshll.u32 %s7131_s0, 3  ;;  %s7132_s14 = sld [smem:[#allocation54_spill]] }
 0x10c   : > { %4738 = dma.hbm_to_vmem [thread:$0]  (!%p7130_p13), %s7128_s18, 4096, %s585_s1, [#allocation14], %s7127_s8, %s7127_s8, %s7126_s22  }
 0x111   : > { %s5561_s2 = scalar_lea.hbm %s7132_s14, 8192 }
 0x112   : > { %p5562_p7 = scmp.ne.s32.totalorder %s7132_s14, %s5561_s2  ;;  %p5568_p11 = scmp.lt.u32.totalorder %s5561_s2, %s7132_s14 }
 0x114   : > { %p5564_p0 = pnand %p5562_p7, %p7129_p12 }
 0x116   : > { %p5565_p6 = pneg %p5564_p0 }
 0x118   : > { %p5570_p9 = pnand %p5568_p11, %p5565_p6 }
 0x11a   : > { %5573 = shalt.err (!%p5570_p9)
}
 0x11b   : > { %s5574_s1 = scalar_lea.vmem %s623_s6, 8192  ;;  %p5582_p4 = scmp.lt.s32.totalorder %s623_s6, %s623_s6 }
 0x11c   : > { %p5575_p1 = scmp.ne.s32.totalorder %s623_s6, %s5574_s1  ;;  %p5583_p2 = scmp.lt.s32.totalorder %s5574_s1, %s5574_s1 }
 0x11e   : > { %p5577_p8 = pnand %p5575_p1, %p7129_p12  ;;  %p5584_p3 = por %p5583_p2, %p5582_p4 }
 0x120   : > { %p5578_p5 = pneg %p5577_p8 }
 0x122   : > { %p5585_p10 = pnand %p5584_p3, %p5578_p5 }
 0x124   : > { %5588 = shalt.err (!%p5585_p10)
}
 0x125   : > { %4744 = dma.hbm_to_vmem [thread:$0]  (!%p7130_p13), %s7132_s14, 8192, %s623_s6, [#allocation17], %s7127_s8, %s7127_s8, %s7126_s22  }
 0x126   : > { %s4296_s19 = sshll.u32 %s5753_s25, 1  ;;  %s667_s0 = scalar_lea.vmem [#allocation9], %s4295_s12 }
 0x127   : > { %s672_s7 = sadd.s32 %s5749_s24, %s4296_s19  ;;  %s676_s5 = sshll.u32 %s667_s0, 4  ;;  %s677_s5 = int_to_ptr.vmem [resolvable:$true] %s676_s5 }
 0x128   : > { %s4297_s10 = sshll.u32 %s672_s7, 7  ;;  %s7133_s13 = sld [smem:[#allocation39_spill]] }
 0x129   : > { %p7134_p7 = scmp.ne.s32.totalorder %s7115_s16, 0 }
 0x12b   : > { %p7135_p0 = pneg %p7134_p7 }
 0x12e   : > { %s674_s26 = scalar_lea.hbm %s7133_s13, %s4297_s10  ;;  %s5594_s22 = scalar_lea.hbm %s7133_s13, 512 }
 0x12f   : > { %s5589_s11 = scalar_lea.hbm %s674_s26, 128  ;;  %p5595_p13 = scmp.lt.u32.totalorder %s674_s26, %s7133_s13 }
 0x130   : > { %p5590_p12 = scmp.ne.s32.totalorder %s674_s26, %s5589_s11  ;;  %p5596_p9 = scmp.lt.u32.totalorder %s5594_s22, %s5589_s11 }
 0x131   : > { %p5598_p8 = scmp.lt.u32.totalorder %s5589_s11, %s674_s26 }
 0x132   : > { %p5592_p6 = pnand %p5590_p12, %p7135_p0  ;;  %p5597_p1 = por %p5596_p9, %p5595_p13 }
 0x134   : > { %p5593_p11 = pneg %p5592_p6  ;;  %p5599_p5 = por %p5598_p8, %p5597_p1 }
 0x136   : > { %p5600_p4 = pnand %p5599_p5, %p5593_p11 }
 0x138   : > { %5603 = shalt.err (!%p5600_p4)
}
 0x139   : > { %s5604_s12 = scalar_lea.vmem %s677_s5, 128  ;;  %p7136_p3 = pmov %p7135_p0 }
 0x13a   : > { %p5605_p2 = scmp.ne.s32.totalorder %s677_s5, %s5604_s12  ;;  %s5771_s9 = smov [#allocation9]  }
 0x13b   : > { %s5609_s3 = sshll.u32 %s5771_s9, 4  ;;  %s5610_s3 = int_to_ptr.vmem [resolvable:$false] %s5609_s3 }
 0x13c   : > { %p5607_p10 = pnand %p5605_p2, %p7136_p3  ;;  %s5611_s19 = scalar_lea.vmem %s5610_s3, 256 }
 0x13d   : > { %p5612_p0 = scmp.lt.s32.totalorder %s677_s5, %s5610_s3  ;;  %p5613_p6 = scmp.lt.s32.totalorder %s5611_s19, %s5604_s12 }
 0x13e   : > { %p5608_p12 = pneg %p5607_p10 }
 0x13f   : > { %p5614_p9 = por %p5613_p6, %p5612_p0 }
 0x141   : > { %p5615_p13 = pnand %p5614_p9, %p5608_p12 }
 0x143   : > { %5618 = shalt.err (!%p5615_p13)
}
 0x144   : > { %4751 = dma.hbm_to_vmem [thread:$0]  (!%p7134_p7), %s674_s26, 128, %s677_s5, %s6102_s15  }
 0x145   : > { %p7137_p11 = scmp.ne.s32.totalorder %s7097_s29, 0 }
 0x146   : > { %p7138_p1 = scmp.ne.s32.totalorder (!%p7137_p11), %s7120_s17, 0 }
 0x147   : > { %685 = sbr.rel (%p7137_p11) target bundleno = 3969 (0xf81), region = 96 }
 0x14e   : > { %5692 = dma.done.wait (%p7138_p1), [#allocation5], 2048  }
 0x14f   : > { %5694 = vsyncadd (%p7138_p1), [#allocation5], 4294965248  ;;  %s691_s7 = sand.u32 1, %s5932_s28   ;;  %s6280_s0 = sand.u32 1, %s5721_s30  }
 0x150   : > { %s4299_s10 = sshll.u32 %s6280_s0, 6  ;;  %s692_s16 = scalar_lea.sflag [#allocation8], %s691_s7 }
 0x151   : > { %s6283_s2 = scalar_lea.vmem [#allocation7], %s4299_s10  ;;  %p7139_p7 = scmp.ne.s32.totalorder %s7107_s27, 0 }
 0x153   : > { %5696 = dma.done.wait (%p7139_p7), %s692_s16, 1152  }
 0x154   : > { %5698 = vsyncadd (%p7139_p7), %s692_s16, 4294966144  ;;  %s4300_s29 = sshll.u32 %s6280_s0, 3  ;;  %p7140_p8 = scmp.eq.s32.totalorder %s5932_s28, 0 }
 0x155   : > { %s6290_s15 = scalar_lea.vmem [#allocation9], %s4300_s29 }
 0x156   : > { %5700 = dma.done.wait (%p7140_p8), [#allocation11], 8192   ;;  %p7141_p5 = pmov %p7140_p8 }
 0x158   : > { %5702 = vsyncadd (%p7141_p5), [#allocation11], 4294959104  ;;  %p7142_p4 = pmov %p7141_p5 }
 0x15a   : > { %5704 = dma.done.wait (%p7142_p4), [#allocation14], 8192   ;;  %p7143_p2 = pmov %p7142_p4 }
 0x15c   : > { %5706 = vsyncadd (%p7143_p2), [#allocation14], 4294959104  ;;  %p7144_p3 = pmov %p7143_p2 }
 0x15d   : > { %p7145_p10 = pmov %p7143_p2 }
 0x15e   : > { %5708 = dma.done.wait (%p7144_p3), [#allocation17], 16384  }
 0x15f   : > { %5710 = vsyncadd (%p7145_p10), [#allocation17], 4294950912  ;;  %s6304_s27 = scalar_lea.vmem [#allocation19], %s4299_s10  ;;  %s7146_s17 = sld [smem:[#allocation29_spill]] }
 0x165   : > { %p4308_p12 = scmp.ne.s32.totalorder %s7146_s17, 0 }
 0x166   : > { %v6307_v0 = vld [vmem:[#allocation4] sm:$0xff] (!%p4308_p12)  ;;  %v6309_v1 = vld [vmem:[#allocation4 + $0x8] sm:$0xff] (!%p4308_p12)  ;;  %v6317_v5 = vld [vmem:[#allocation4 + $0x10] sm:$0xff] (!%p4308_p12)  ;;  %s7147_s4 = sld [smem:[#allocation40_spill]] (!%p4308_p12)  ;;  %s7148_s21 = sld [smem:[#allocation41_spill]] (!%p4308_p12)  ;;  %vm1608_vm0 = vcmask (!%p4308_p12), 523264  }
 0x167   : > { %796 = sbr.rel (%p4308_p12) target bundleno = 1162 (0x48a), region = 136  ;;  %v6311_v2 = vld [vmem:[#allocation4 + $0x20] sm:$0xff] (!%p4308_p12)  ;;  %v815_v3 = vadd.f32 (!%p4308_p12), %v6309_v1, %v6307_v0  ;;  %v6315_v4 = vld [vmem:[#allocation4 + $0x28] sm:$0xff] (!%p4308_p12)  ;;  %v6319_v6 = vld [vmem:[#allocation4 + $0x18] sm:$0xff] (!%p4308_p12)  ;;  %s7149_s8 = sld [smem:[#allocation45_spill]] (!%p4308_p12) }
 0x168   : > { %v821_v7 = vadd.f32 (!%p4308_p12), %v6315_v4, %v6311_v2  ;;  %v6323_v8 = vld [vmem:[#allocation4 + $0x30] sm:$0xff] (!%p4308_p12)  ;;  %v6325_v9 = vld [vmem:[#allocation4 + $0x38] sm:$0xff] (!%p4308_p12)  ;;  %v818_v10 = vadd.f32 (!%p4308_p12), %v6319_v6, %v6317_v5  ;;  %v6331_v12 = vld [vmem:[#allocation4 + $0x40] sm:$0xff] (!%p4308_p12)  ;;  %s7150_s9 = sld [smem:[#allocation47_spill]] (!%p4308_p12) }
 0x169   : > { %816 = vadd.xlane.f32.xlu0 (!%p4308_p12), %v815_v3  ;;  %v824_v11 = vadd.f32 (!%p4308_p12), %v6325_v9, %v6323_v8  ;;  %v6333_v13 = vld [vmem:[#allocation4 + $0x48] sm:$0xff] (!%p4308_p12)  ;;  %v6335_v14 = vld [vmem:[#allocation4 + $0x50] sm:$0xff] (!%p4308_p12)  ;;  %v6337_v15 = vld [vmem:[#allocation4 + $0x58] sm:$0xff] (!%p4308_p12) }
 0x16a   : > { %822 = vadd.xlane.f32.xlu1 (!%p4308_p12), %v821_v7  ;;  %v6339_v16 = vld [vmem:[#allocation4 + $0x60] sm:$0xff] (!%p4308_p12)  ;;  %v6341_v17 = vld [vmem:[#allocation4 + $0x68] sm:$0xff] (!%p4308_p12)  ;;  %v827_v18 = vadd.f32 (!%p4308_p12), %v6333_v13, %v6331_v12  ;;  %v6345_v19 = vld [vmem:[#allocation4 + $0x70] sm:$0xff] (!%p4308_p12)  ;;  %v830_v21 = vadd.f32 (!%p4308_p12), %v6337_v15, %v6335_v14 }
 0x16b   : > { %v6347_v20 = vld [vmem:[#allocation4 + $0x78] sm:$0xff] (!%p4308_p12)  ;;  %v833_v22 = vadd.f32 (!%p4308_p12), %v6341_v17, %v6339_v16  ;;  %v4879_v28 = vld [vmem:[#allocation12 + $0x14] ss:$8 sps:$4 sm:$0xff] (!%p4308_p12)   ;;  %v4883_v30 = vld [vmem:[#allocation12 + $0x10] ss:$8 sps:$4 sm:$0xff] (!%p4308_p12)  }
 0x16c   : > { %v836_v23 = vadd.f32 (!%p4308_p12), %v6347_v20, %v6345_v19  ;;  %v4873_v24 = vld [vmem:[#allocation12 + $0x4] ss:$8 sps:$4 sm:$0xff] (!%p4308_p12)   ;;  %v4877_v26 = vld [vmem:[#allocation12] ss:$8 sps:$4 sm:$0xff] (!%p4308_p12)   ;;  %v4881_v29 = vld [vmem:[#allocation13 + $0x14] ss:$8 sps:$4 sm:$0xff] (!%p4308_p12)  }
 0x16d   : > { %819 = vadd.xlane.f32.xlu0 (!%p4308_p12), %v818_v10  ;;  %v4875_v25 = vld [vmem:[#allocation13 + $0x4] ss:$8 sps:$4 sm:$0xff] (!%p4308_p12)   ;;  %v4878_v27 = vld [vmem:[#allocation13] ss:$8 sps:$4 sm:$0xff] (!%p4308_p12)   ;;  %1210 = vmatprep.subr.bf16.mxu0 (!%p4308_p12), %v4873_v24  ;;  %v4884_v31 = vld [vmem:[#allocation13 + $0x10] ss:$8 sps:$4 sm:$0xff] (!%p4308_p12)  }
 0x16e   : > { %825 = vadd.xlane.f32.xlu1 %v824_v11  ;;  %1495 = vmatprep.subr.bf16.mxu1 %v4875_v25  ;;  %v4885_v32 = vld [vmem:[#allocation12 + $0x24] ss:$8 sps:$4 sm:$0xff]   ;;  %v4889_v34 = vld [vmem:[#allocation12 + $0x20] ss:$8 sps:$4 sm:$0xff]   ;;  %v4891_v36 = vld [vmem:[#allocation12 + $0x34] ss:$8 sps:$4 sm:$0xff]  }
 0x16f   : > { %1211 = vmatpush1.bf16.msra.mxu0 %v4877_v26  ;;  %1496 = vmatpush1.bf16.msra.mxu1 %v4878_v27  ;;  %v4887_v33 = vld [vmem:[#allocation13 + $0x24] ss:$8 sps:$4 sm:$0xff]   ;;  %v4890_v35 = vld [vmem:[#allocation13 + $0x20] ss:$8 sps:$4 sm:$0xff]   ;;  %v4893_v37 = vld [vmem:[#allocation13 + $0x34] ss:$8 sps:$4 sm:$0xff]  }
 0x170   : > { %1212 = vmatprep.subr.bf16.mxu0 %v4879_v28  ;;  %1497 = vmatprep.subr.bf16.mxu1 %v4881_v29  ;;  %v4895_v38 = vld [vmem:[#allocation12 + $0x30] ss:$8 sps:$4 sm:$0xff]   ;;  %v4897_v40 = vld [vmem:[#allocation12 + $0x44] ss:$8 sps:$4 sm:$0xff]   ;;  %v4901_v42 = vld [vmem:[#allocation12 + $0x40] ss:$8 sps:$4 sm:$0xff]  }
 0x171   : > { %828 = vadd.xlane.f32.xlu0 %v827_v18  ;;  %v4896_v39 = vld [vmem:[#allocation13 + $0x30] ss:$8 sps:$4 sm:$0xff]   ;;  %v4899_v41 = vld [vmem:[#allocation13 + $0x44] ss:$8 sps:$4 sm:$0xff]   ;;  %v4902_v43 = vld [vmem:[#allocation13 + $0x40] ss:$8 sps:$4 sm:$0xff]  }
 0x172   : > { %831 = vadd.xlane.f32.xlu1 %v830_v21  ;;  %v4903_v44 = vld [vmem:[#allocation12 + $0x54] ss:$8 sps:$4 sm:$0xff]   ;;  %v4907_v46 = vld [vmem:[#allocation12 + $0x50] ss:$8 sps:$4 sm:$0xff]   ;;  %v4909_v48 = vld [vmem:[#allocation12 + $0x64] ss:$8 sps:$4 sm:$0xff]  }
 0x173   : > { %1213 = vmatpush1.bf16.msra.mxu0 %v4883_v30  ;;  %1498 = vmatpush1.bf16.msra.mxu1 %v4884_v31  ;;  %v4905_v45 = vld [vmem:[#allocation13 + $0x54] ss:$8 sps:$4 sm:$0xff]   ;;  %v4908_v47 = vld [vmem:[#allocation13 + $0x50] ss:$8 sps:$4 sm:$0xff]   ;;  %v4911_v49 = vld [vmem:[#allocation13 + $0x64] ss:$8 sps:$4 sm:$0xff]  }
 0x174   : > { %1214 = vmatprep.subr.bf16.mxu0 %v4885_v32  ;;  %1499 = vmatprep.subr.bf16.mxu1 %v4887_v33  ;;  %v4913_v50 = vld [vmem:[#allocation12 + $0x60] ss:$8 sps:$4 sm:$0xff]   ;;  %v4915_v52 = vld [vmem:[#allocation12 + $0x74] ss:$8 sps:$4 sm:$0xff]   ;;  %v4919_v54 = vld [vmem:[#allocation12 + $0x70] ss:$8 sps:$4 sm:$0xff]  }
 0x175   : > { %834 = vadd.xlane.f32.xlu0 %v833_v22  ;;  %v4914_v51 = vld [vmem:[#allocation13 + $0x60] ss:$8 sps:$4 sm:$0xff]   ;;  %v4917_v53 = vld [vmem:[#allocation13 + $0x74] ss:$8 sps:$4 sm:$0xff]   ;;  %v4920_v55 = vld [vmem:[#allocation13 + $0x70] ss:$8 sps:$4 sm:$0xff]  }
 0x176   : > { %837 = vadd.xlane.f32.xlu1 %v836_v23  ;;  %v4921_v56 = vld [vmem:[#allocation12 + $0x84] ss:$8 sps:$4 sm:$0xff]   ;;  %v4925_v58 = vld [vmem:[#allocation12 + $0x80] ss:$8 sps:$4 sm:$0xff]  }
 0x177   : > { %1215 = vmatpush1.bf16.msra.mxu0 %v4889_v34  ;;  %1500 = vmatpush1.bf16.msra.mxu1 %v4890_v35  ;;  %v4923_v57 = vld [vmem:[#allocation13 + $0x84] ss:$8 sps:$4 sm:$0xff]   ;;  %v4926_v59 = vld [vmem:[#allocation13 + $0x80] ss:$8 sps:$4 sm:$0xff]  }
 0x178   : > { %1216 = vmatprep.subr.bf16.mxu0 %v4891_v36  ;;  %1501 = vmatprep.subr.bf16.mxu1 %v4893_v37 }
 0x17b   : > { %1217 = vmatpush1.bf16.msra.mxu0 %v4895_v38  ;;  %1502 = vmatpush1.bf16.msra.mxu1 %v4896_v39 }
 0x17c   : > { %1218 = vmatprep.subr.bf16.mxu0 %v4897_v40  ;;  %1503 = vmatprep.subr.bf16.mxu1 %v4899_v41 }
 0x17f   : > { %1219 = vmatpush1.bf16.msra.mxu0 %v4901_v42  ;;  %1504 = vmatpush1.bf16.msra.mxu1 %v4902_v43 }
 0x180   : > { %1220 = vmatprep.subr.bf16.mxu0 %v4903_v44  ;;  %1505 = vmatprep.subr.bf16.mxu1 %v4905_v45 }
 0x183   : > { %1221 = vmatpush1.bf16.msra.mxu0 %v4907_v46  ;;  %1506 = vmatpush1.bf16.msra.mxu1 %v4908_v47 }
 0x184   : > { %1222 = vmatprep.subr.bf16.mxu0 %v4909_v48  ;;  %1507 = vmatprep.subr.bf16.mxu1 %v4911_v49 }
 0x187   : > { %1223 = vmatpush1.bf16.msra.mxu0 %v4913_v50  ;;  %1508 = vmatpush1.bf16.msra.mxu1 %v4914_v51 }
 0x188   : > { %1224 = vmatprep.subr.bf16.mxu0 %v4915_v52  ;;  %1509 = vmatprep.subr.bf16.mxu1 %v4917_v53  ;;  %v4927_v52 = vld [vmem:[#allocation12 + $0x94] ss:$8 sps:$4 sm:$0xff]  }
 0x189   : > { %v4929_v53 = vld [vmem:[#allocation13 + $0x94] ss:$8 sps:$4 sm:$0xff]  }
 0x18b   : > { %1225 = vmatpush1.bf16.msra.mxu0 %v4919_v54  ;;  %1510 = vmatpush1.bf16.msra.mxu1 %v4920_v55  ;;  %v4931_v54 = vld [vmem:[#allocation12 + $0x90] ss:$8 sps:$4 sm:$0xff]  }
 0x18c   : > { %1226 = vmatprep.subr.bf16.mxu0 %v4921_v56  ;;  %1511 = vmatprep.subr.bf16.mxu1 %v4923_v57  ;;  %v4932_v55 = vld [vmem:[#allocation13 + $0x90] ss:$8 sps:$4 sm:$0xff]   ;;  %v4933_v56 = vld [vmem:[#allocation12 + $0xa4] ss:$8 sps:$4 sm:$0xff]  }
 0x18d   : > { %v4935_v57 = vld [vmem:[#allocation13 + $0xa4] ss:$8 sps:$4 sm:$0xff]  }
 0x18f   : > { %1227 = vmatpush1.bf16.msra.mxu0 %v4925_v58  ;;  %1512 = vmatpush1.bf16.msra.mxu1 %v4926_v59  ;;  %v4937_v58 = vld [vmem:[#allocation12 + $0xa0] ss:$8 sps:$4 sm:$0xff]  }
 0x190   : > { %1228 = vmatprep.subr.bf16.mxu0 %v4927_v52  ;;  %1513 = vmatprep.subr.bf16.mxu1 %v4929_v53  ;;  %v4938_v59 = vld [vmem:[#allocation13 + $0xa0] ss:$8 sps:$4 sm:$0xff]   ;;  %v813_v53 = vld [vmem:[%s7147_s4] sm:$0x3] }
 0x193   : > { %1229 = vmatpush1.bf16.msra.mxu0 %v4931_v54  ;;  %1514 = vmatpush1.bf16.msra.mxu1 %v4932_v55 }
 0x194   : > { %1230 = vmatprep.subr.bf16.mxu0 %v4933_v56  ;;  %1515 = vmatprep.subr.bf16.mxu1 %v4935_v57 }
 0x197   : > { %1231 = vmatpush1.bf16.msra.mxu0 %v4937_v58  ;;  %1516 = vmatpush1.bf16.msra.mxu1 %v4938_v59  ;;  %v814_v58 = vld [vmem:[%s7148_s21] sm:$0x3] }
 0x1f6   : > { %v817_v60 = vpop.xlane.xlu0 %816 }
 0x1f7   : > { %v840_v61 = vmul.f32 0.00390625, %v817_v60  ;;  %v823_v62 = vpop.xlane.xlu1 %822  ;;  %v4939_v60 = vld [vmem:[#allocation12 + $0xb4] ss:$8 sps:$4 sm:$0xff]  }
 0x1f8   : > { %v842_v63 = vmul.f32 0.00390625, %v823_v62  ;;  %v4943_v62 = vld [vmem:[#allocation12 + $0xb0] ss:$8 sps:$4 sm:$0xff]   ;;  %1232 = vmatprep.subr.bf16.mxu0 %v4939_v60 }
 0x1f9   : > { %v6356_v3 = vsub.f32 %v6307_v0, %v840_v61  ;;  %v6359_v7 = vsub.f32 %v6309_v1, %v840_v61  ;;  %v4941_v61 = vld [vmem:[#allocation13 + $0xb4] ss:$8 sps:$4 sm:$0xff]   ;;  %1233 = vmatpush1.bf16.msra.mxu0 %v4943_v62 }
 0x1fa   : > { %v6362_v10 = vsub.f32 %v6311_v2, %v842_v63  ;;  %v6365_v11 = vsub.f32 %v6315_v4, %v842_v63  ;;  %v820_v18 = vpop.xlane.xlu0 %819  ;;  %v4944_v63 = vld [vmem:[#allocation13 + $0xb0] ss:$8 sps:$4 sm:$0xff]   ;;  %1517 = vmatprep.subr.bf16.mxu1 %v4941_v61 }
 0x1fb   : > { %v841_v21 = vmul.f32 0.00390625, %v820_v18  ;;  %v826_v22 = vpop.xlane.xlu1 %825  ;;  %v864_v23 = vmul.f32 %v6356_v3, %v6356_v3  ;;  %v865_v24 = vmul.f32 %v6359_v7, %v6359_v7  ;;  %1518 = vmatpush1.bf16.msra.mxu1 %v4944_v63  ;;  %v4945_v18 = vld [vmem:[#allocation12 + $0xc4] ss:$8 sps:$4 sm:$0xff]  }
 0x1fc   : > { %v843_v0 = vmul.f32 0.00390625, %v826_v22  ;;  %v868_v1 = vmul.f32 %v6362_v10, %v6362_v10  ;;  %v869_v2 = vmul.f32 %v6365_v11, %v6365_v11  ;;  %v4949_v22 = vld [vmem:[#allocation12 + $0xc0] ss:$8 sps:$4 sm:$0xff]   ;;  %1234 = vmatprep.subr.bf16.mxu0 %v4945_v18 }
 0x1fd   : > { %v6376_v25 = vsub.f32 %v6317_v5, %v841_v21  ;;  %v6379_v4 = vsub.f32 %v6319_v6, %v841_v21  ;;  %v880_v26 = vadd.f32 %v865_v24, %v864_v23  ;;  %v4947_v21 = vld [vmem:[#allocation13 + $0xc4] ss:$8 sps:$4 sm:$0xff]   ;;  %v4950_v23 = vld [vmem:[#allocation13 + $0xc0] ss:$8 sps:$4 sm:$0xff]   ;;  %1235 = vmatpush1.bf16.msra.mxu0 %v4949_v22  ;;  %v4951_v24 = vld [vmem:[#allocation12 + $0xd4] ss:$8 sps:$4 sm:$0xff]  }
 0x1fe   : > { %v6382_v27 = vsub.f32 %v6323_v8, %v843_v0  ;;  %v6385_v28 = vsub.f32 %v6325_v9, %v843_v0  ;;  %v829_v29 = vpop.xlane.xlu0 %828  ;;  %v886_v32 = vadd.f32 %v869_v2, %v868_v1  ;;  %1519 = vmatprep.subr.bf16.mxu1 %v4947_v21  ;;  %v4953_v0 = vld [vmem:[#allocation13 + $0xd4] ss:$8 sps:$4 sm:$0xff]   ;;  %v4955_v1 = vld [vmem:[#allocation12 + $0xd0] ss:$8 sps:$4 sm:$0xff]   ;;  %1236 = vmatprep.subr.bf16.mxu0 %v4951_v24 }
 0x1ff   : > { %v844_v30 = vmul.f32 0.00390625, %v829_v29  ;;  %881 = vadd.xlane.f32.xlu0 %v880_v26  ;;  %v832_v31 = vpop.xlane.xlu1 %831  ;;  %v866_v33 = vmul.f32 %v6376_v25, %v6376_v25  ;;  %v867_v5 = vmul.f32 %v6379_v4, %v6379_v4  ;;  %1520 = vmatpush1.bf16.msra.mxu1 %v4950_v23  ;;  %v4956_v2 = vld [vmem:[#allocation13 + $0xd0] ss:$8 sps:$4 sm:$0xff]   ;;  %v4957_v26 = vld [vmem:[#allocation12 + $0xe4] ss:$8 sps:$4 sm:$0xff]  }
 0x200   : > { %v845_v6 = vmul.f32 0.00390625, %v832_v31  ;;  %v870_v34 = vmul.f32 %v6382_v27, %v6382_v27  ;;  %v871_v8 = vmul.f32 %v6385_v28, %v6385_v28  ;;  %1521 = vmatprep.subr.bf16.mxu1 %v4953_v0  ;;  %v4959_v29 = vld [vmem:[#allocation13 + $0xe4] ss:$8 sps:$4 sm:$0xff]   ;;  %v4962_v31 = vld [vmem:[#allocation13 + $0xe0] ss:$8 sps:$4 sm:$0xff]  }
 0x201   : > { %v6396_v9 = vsub.f32 %v6331_v12, %v844_v30  ;;  %v6399_v35 = vsub.f32 %v6333_v13, %v844_v30  ;;  %v883_v36 = vadd.f32 %v867_v5, %v866_v33  ;;  %1237 = vmatpush1.bf16.msra.mxu0 %v4955_v1  ;;  %v4961_v30 = vld [vmem:[#allocation12 + $0xe0] ss:$8 sps:$4 sm:$0xff]   ;;  %v4965_v33 = vld [vmem:[#allocation13 + $0xf4] ss:$8 sps:$4 sm:$0xff]   ;;  %v4967_v5 = vld [vmem:[#allocation12 + $0xf0] ss:$8 sps:$4 sm:$0xff]  }
 0x202   : > { %v6402_v37 = vsub.f32 %v6335_v14, %v845_v6  ;;  %v6405_v38 = vsub.f32 %v6337_v15, %v845_v6  ;;  %v835_v39 = vpop.xlane.xlu0 %834  ;;  %v889_v42 = vadd.f32 %v871_v8, %v870_v34  ;;  %1238 = vmatprep.subr.bf16.mxu0 %v4957_v26  ;;  %v4968_v6 = vld [vmem:[#allocation13 + $0xf0] ss:$8 sps:$4 sm:$0xff]  }
 0x203   : > { %v846_v40 = vmul.f32 0.00390625, %v835_v39  ;;  %887 = vadd.xlane.f32.xlu0 %v886_v32  ;;  %884 = vadd.xlane.f32.xlu1 %v883_v36  ;;  %v838_v41 = vpop.xlane.xlu1 %837  ;;  %v872_v12 = vmul.f32 %v6396_v9, %v6396_v9  ;;  %v873_v13 = vmul.f32 %v6399_v35, %v6399_v35  ;;  %v4963_v32 = vld [vmem:[#allocation12 + $0xf4] ss:$8 sps:$4 sm:$0xff]   ;;  %v945_v39 = vlaneseq }
 0x204   : > { %v847_v43 = vmul.f32 0.00390625, %v838_v41  ;;  %v874_v14 = vmul.f32 %v6402_v37, %v6402_v37  ;;  %v875_v15 = vmul.f32 %v6405_v38, %v6405_v38  ;;  %1522 = vmatpush1.bf16.msra.mxu1 %v4956_v2 }
 0x205   : > { %v6416_v44 = vsub.f32 %v6339_v16, %v846_v40  ;;  %v6419_v45 = vsub.f32 %v6341_v17, %v846_v40  ;;  %v892_v46 = vadd.f32 %v873_v13, %v872_v12  ;;  %1523 = vmatprep.subr.bf16.mxu1 %v4959_v29  ;;  %1239 = vmatpush1.bf16.msra.mxu0 %v4961_v30 }
 0x206   : > { %v6422_v47 = vsub.f32 %v6345_v19, %v847_v43  ;;  %v6425_v48 = vsub.f32 %v6347_v20, %v847_v43  ;;  %v895_v49 = vadd.f32 %v875_v15, %v874_v14  ;;  %1240 = vmatprep.subr.bf16.mxu0 %v4963_v32  ;;  %v946_v14 = vshrl.u32 %v945_v39, 7 }
 0x207   : > { %890 = vadd.xlane.f32.xlu1 %v889_v42  ;;  %893 = vadd.xlane.f32.xlu0 %v892_v46  ;;  %v876_v50 = vmul.f32 %v6416_v44, %v6416_v44  ;;  %v877_v16 = vmul.f32 %v6419_v45, %v6419_v45 }
 0x208   : > { %v878_v17 = vmul.f32 %v6422_v47, %v6422_v47  ;;  %v879_v51 = vmul.f32 %v6425_v48, %v6425_v48  ;;  %1524 = vmatpush1.bf16.msra.mxu1 %v4962_v31 }
 0x209   : > { %v898_v19 = vadd.f32 %v877_v16, %v876_v50  ;;  %1525 = vmatprep.subr.bf16.mxu1 %v4965_v33  ;;  %1241 = vmatpush1.bf16.msra.mxu0 %v4967_v5 }
 0x20a   : > { %v901_v20 = vadd.f32 %v879_v51, %v878_v17  ;;  %v6435_v51 = vsub.s32 0, %v946_v14 }
 0x20b   : > { %896 = vadd.xlane.f32.xlu1 %v895_v49  ;;  %899 = vadd.xlane.f32.xlu0 %v898_v19  ;;  %v6437_v19 = vsub.s32 1, %v946_v14 }
 0x20c   : > { %1526 = vmatpush1.bf16.msra.mxu1 %v4968_v6  ;;  %v6446_v59 = vrot.slane %v813_v53, %v6435_v51  ;;  %v6454_v22 = vrot.slane %v814_v58, %v6435_v51 }
 0x20d   : > { %v6449_v60 = vrot.slane %v813_v53, %v6437_v19  ;;  %v6458_v1 = vrot.slane %v814_v58, %v6437_v19 }
 0x20f   : > { %902 = vadd.xlane.f32.xlu1 %v901_v20 }
 0x28c   : > { %v882_v34 = vpop.xlane.xlu0 %881 }
 0x28d   : > { %v904_v8 = vmul.f32 0.00390625, %v882_v34 }
 0x28f   : > { %v912_v36 = vadd.f32 1e-12, %v904_v8 }
 0x290   : > { %v885_v40 = vpop.xlane.xlu1 %884  ;;  %v888_v41 = vpop.xlane.xlu0 %887 }
 0x291   : > { %4969 = vrsqrt.f32 %v912_v36  ;;  %v905_v42 = vmul.f32 0.00390625, %v885_v40  ;;  %v906_v12 = vmul.f32 0.00390625, %v888_v41 }
 0x293   : > { %v913_v13 = vadd.f32 1e-12, %v905_v42  ;;  %v914_v43 = vadd.f32 1e-12, %v906_v12 }
 0x294   : > { %v891_v15 = vpop.xlane.xlu1 %890  ;;  %v894_v46 = vpop.xlane.xlu0 %893 }
 0x295   : > { %4971 = vrsqrt.f32 %v913_v13  ;;  %v907_v49 = vmul.f32 0.00390625, %v891_v15  ;;  %v908_v50 = vmul.f32 0.00390625, %v894_v46 }
 0x296   : > { %4973 = vrsqrt.f32 %v914_v43 }
 0x297   : > { %v915_v16 = vadd.f32 1e-12, %v907_v49  ;;  %v916_v17 = vadd.f32 1e-12, %v908_v50 }
 0x298   : > { %v897_v20 = vpop.xlane.xlu1 %896  ;;  %v900_v52 = vpop.xlane.xlu0 %899 }
 0x299   : > { %4975 = vrsqrt.f32 %v915_v16  ;;  %v909_v54 = vmul.f32 0.00390625, %v897_v20  ;;  %v910_v55 = vmul.f32 0.00390625, %v900_v52 }
 0x29a   : > { %4977 = vrsqrt.f32 %v916_v17 }
 0x29b   : > { %v4970_v56 = vpop.eup %4969  ;;  %v917_v57 = vadd.f32 1e-12, %v909_v54  ;;  %v918_v61 = vadd.f32 1e-12, %v910_v55 }
 0x29c   : > { %v903_v62 = vpop.xlane.xlu1 %902  ;;  %v929_v63 = vmul.f32 %v4970_v56, %v6359_v7  ;;  %v928_v18 = vmul.f32 %v4970_v56, %v6356_v3 }
 0x29d   : > { %4979 = vrsqrt.f32 %v917_v57  ;;  %v911_v21 = vmul.f32 0.00390625, %v903_v62 }
 0x29e   : > { %v956_v0 = vmul.f32 %v6449_v60, %v929_v63  ;;  %v955_v2 = vmul.f32 %v6446_v59, %v928_v18  ;;  %4981 = vrsqrt.f32 %v918_v61 }
 0x29f   : > { %v4972_v23 = vpop.eup %4971  ;;  %v919_v24 = vadd.f32 1e-12, %v911_v21 }
 0x2a0   : > { %v4974_v26 = vpop.eup %4973  ;;  %v931_v7 = vmul.f32 %v4972_v23, %v6379_v4  ;;  %v930_v3 = vmul.f32 %v4972_v23, %v6376_v25  ;;  %v983_v33 = vadd.f32 %v6458_v1, %v956_v0  ;;  %v982_v5 = vadd.f32 %v6454_v22, %v955_v2 }
 0x2a1   : > { %4983 = vrsqrt.f32 %v919_v24  ;;  %v933_v29 = vmul.f32 %v4974_v26, %v6365_v11  ;;  %v932_v36 = vmul.f32 %v4974_v26, %v6362_v10 }
 0x2a2   : > { %v958_v30 = vmul.f32 %v6449_v60, %v931_v7  ;;  %v957_v31 = vmul.f32 %v6446_v59, %v930_v3 }
 0x2a3   : > { %v4976_v32 = vpop.eup %4975  ;;  %v960_v6 = vmul.f32 %v6449_v60, %v933_v29  ;;  %v959_v10 = vmul.f32 %v6446_v59, %v932_v36 }
 0x2a4   : > { %v4978_v34 = vpop.eup %4977  ;;  %v985_v8 = vadd.f32 %v6458_v1, %v958_v30  ;;  %v984_v4 = vadd.f32 %v6454_v22, %v957_v31  ;;  %v935_v25 = vmul.f32 %v4976_v32, %v6385_v28  ;;  %v934_v11 = vmul.f32 %v4976_v32, %v6382_v27 }
 0x2a5   : > { %v937_v42 = vmul.f32 %v4978_v34, %v6399_v35  ;;  %v987_v43 = vadd.f32 %v6458_v1, %v960_v6  ;;  %v986_v20 = vadd.f32 %v6454_v22, %v959_v10  ;;  %v936_v52 = vmul.f32 %v4978_v34, %v6396_v9 }
 0x2a6   : > { %v999_v39 = vpack.c.bf16 %v985_v8, %v983_v33  ;;  %v998_v40 = vpack.c.bf16 %v984_v4, %v982_v5  ;;  %v962_v41 = vmul.f32 %v6449_v60, %v935_v25  ;;  %v961_v13 = vmul.f32 %v6446_v59, %v934_v11 }
 0x2a7   : > { %v4980_v12 = vpop.eup %4979  ;;  %v964_v46 = vmul.f32 %v6449_v60, %v937_v42  ;;  %v963_v58 = vmul.f32 %v6446_v59, %v936_v52 }
 0x2a8   : > { %1242 = vmatprep.mubr.bf16.mxu0 %v999_v39  ;;  %1527 = vmatprep.mubr.bf16.mxu1 %v999_v39  ;;  %v989_v14 = vadd.f32 %v6458_v1, %v962_v41  ;;  %v939_v28 = vmul.f32 %v4980_v12, %v6405_v38  ;;  %v4982_v27 = vpop.eup %4981  ;;  %v988_v50 = vadd.f32 %v6454_v22, %v961_v13 }
 0x2a9   : > { %1243 = vmatmul.mubr.bf16.vlgmr.msra.gmra.mrb[0].mxu0 %v998_v40  ;;  %1528 = vmatmul.mubr.bf16.vlgmr.msra.gmra.mrb[0].mxu1 %v998_v40  ;;  %v938_v16 = vmul.f32 %v4980_v12, %v6402_v37  ;;  %v991_v53 = vadd.f32 %v6458_v1, %v964_v46  ;;  %v941_v54 = vmul.f32 %v4982_v27, %v6419_v45 }
 0x2aa   : > { %v1001_v15 = vpack.c.bf16 %v989_v14, %v987_v43  ;;  %v966_v35 = vmul.f32 %v6449_v60, %v939_v28  ;;  %v1000_v55 = vpack.c.bf16 %v988_v50, %v986_v20  ;;  %v990_v62 = vadd.f32 %v6454_v22, %v963_v58 }
 0x2ab   : > { %v4984_v49 = vpop.eup %4983  ;;  %v965_v56 = vmul.f32 %v6446_v59, %v938_v16  ;;  %v940_v63 = vmul.f32 %v4982_v27, %v6416_v44  ;;  %v1038_v44 = vld [vmem:[%s7149_s8] sm:$0x3] }
 0x2ac   : > { %1252 = vmatprep.mubr.bf16.mxu0 %v1001_v15  ;;  %1537 = vmatprep.mubr.bf16.mxu1 %v1001_v15  ;;  %v993_v17 = vadd.f32 %v6458_v1, %v966_v35  ;;  %v943_v38 = vmul.f32 %v4984_v49, %v6425_v48  ;;  %v968_v48 = vmul.f32 %v6449_v60, %v941_v54 }
 0x2ad   : > { %v992_v9 = vadd.f32 %v6454_v22, %v965_v56  ;;  %v942_v61 = vmul.f32 %v4984_v49, %v6422_v47  ;;  %v6512_v26 = vrot.slane %v1038_v44, %v6435_v51 }
 0x2ae   : > { %v1003_v57 = vpack.c.bf16 %v993_v17, %v991_v53  ;;  %v970_v37 = vmul.f32 %v6449_v60, %v943_v38  ;;  %v995_v18 = vadd.f32 %v6458_v1, %v968_v48  ;;  %v967_v60 = vmul.f32 %v6446_v59, %v940_v63 }
 0x2af   : > { %v1002_v21 = vpack.c.bf16 %v992_v9, %v990_v62  ;;  %v969_v23 = vmul.f32 %v6446_v59, %v942_v61 }
 0x2b0   : > { %v997_v45 = vadd.f32 %v6458_v1, %v970_v37  ;;  %v994_v0 = vadd.f32 %v6454_v22, %v967_v60  ;;  %v1323_v1 = vld [vmem:[%s7150_s9] sm:$0x3] }
 0x2b1   : > { %1253 = vmatmul.mubr.bf16.gmra.mrb[4].mxu0 %v1000_v55  ;;  %1538 = vmatmul.mubr.bf16.gmra.mrb[4].mxu1 %v1000_v55  ;;  %v996_v47 = vadd.f32 %v6454_v22, %v969_v23  ;;  %v6515_v59 = vrot.slane %v1323_v1, %v6435_v51  ;;  %v6518_v22 = vrot.slane %v1038_v44, %v6437_v19 }
 0x2b2   : > { %1262 = vmatprep.mubr.bf16.mxu0 %v1003_v57  ;;  %1547 = vmatprep.mubr.bf16.mxu1 %v1003_v57  ;;  %v1005_v24 = vpack.c.bf16 %v997_v45, %v995_v18  ;;  %v6521_v29 = vrot.slane %v1323_v1, %v6437_v19 }
 0x2b3   : > { %v1004_v2 = vpack.c.bf16 %v996_v47, %v994_v0 }
 0x2b9   : > { %1263 = vmatmul.mubr.bf16.gmra.mrb[8].mxu0 %v1002_v21  ;;  %1548 = vmatmul.mubr.bf16.gmra.mrb[8].mxu1 %v1002_v21 }
 0x2ba   : > { %1272 = vmatprep.mubr.bf16.mxu0 %v1005_v24  ;;  %1557 = vmatprep.mubr.bf16.mxu1 %v1005_v24 }
 0x2c1   : > { %1273 = vmatmul.mubr.bf16.gmra.mrb[12].mxu0 %v1004_v2  ;;  %1558 = vmatmul.mubr.bf16.gmra.mrb[12].mxu1 %v1004_v2 }
 0x37c   : > { %v1244_v7 = vpop.f32.mrb[0].mxu0  ;;  %v1529_v3 = vpop.f32.mrb[0].mxu1 }
 0x37d   : > { %v1246_v30 = vpop.f32.mrb[1].mxu0  ;;  %v1531_v31 = vpop.f32.mrb[1].mxu1  ;;  %v1245_v5 = vadd.f32 %v1244_v7, %v6512_v26  ;;  %v1530_v6 = vadd.f32 %v1529_v3, %v6515_v59 }
 0x37e   : > { %v1248_v32 = vpop.f32.mrb[2].mxu0  ;;  %v1533_v33 = vpop.f32.mrb[2].mxu1  ;;  %v6528_v25 = vadd.f32 %v1246_v30, %v6518_v22  ;;  %v6531_v19 = vadd.f32 %v1531_v31, %v6521_v29 }
 0x37f   : > { %v1249_v34 = vadd.f32 %v1248_v32, %v6512_v26  ;;  %v1534_v51 = vadd.f32 %v1533_v33, %v6515_v59  ;;  %v1250_v8 = vpop.f32.mrb[3].mxu0  ;;  %v1535_v4 = vpop.f32.mrb[3].mxu1 }
 0x380   : > { %v6534_v11 = vadd.f32 %v1250_v8, %v6518_v22  ;;  %v6537_v36 = vadd.f32 %v1535_v4, %v6521_v29 }
 0x381   : > { %v1568_v39 = vpack.c.bf16 %v1534_v51, %v1530_v6  ;;  %v1283_v40 = vpack.c.bf16 %v1249_v34, %v1245_v5 }
 0x382   : > { %v1284_v41 = vpack.c.bf16 %v6534_v11, %v6528_v25  ;;  %v1569_v42 = vpack.c.bf16 %v6537_v36, %v6531_v19 }
 0x383   : > { %1625 = vxpose.xlu1.c.b16.start [1/4] (short) %v1568_v39, 128  ;;  %1576 = vxpose.xlu0.c.b16.start [1/4] (short) %v1283_v40, 128 }
 0x384   : > { %v1254_v12 = vpop.f32.mrb[4].mxu0  ;;  %v1539_v13 = vpop.f32.mrb[4].mxu1 }
 0x385   : > { %v1256_v43 = vpop.f32.mrb[5].mxu0  ;;  %v1541_v14 = vpop.f32.mrb[5].mxu1  ;;  %v1255_v27 = vadd.f32 %v1254_v12, %v6512_v26  ;;  %v1540_v15 = vadd.f32 %v1539_v13, %v6515_v59 }
 0x386   : > { %v1258_v28 = vpop.f32.mrb[6].mxu0  ;;  %v1543_v10 = vpop.f32.mrb[6].mxu1  ;;  %v1257_v16 = vadd.f32 %v1256_v43, %v6518_v22  ;;  %v1542_v17 = vadd.f32 %v1541_v14, %v6521_v29 }
 0x387   : > { %v1259_v46 = vadd.f32 %v1258_v28, %v6512_v26  ;;  %v1544_v35 = vadd.f32 %v1543_v10, %v6515_v59  ;;  %v1260_v49 = vpop.f32.mrb[7].mxu0  ;;  %v1545_v50 = vpop.f32.mrb[7].mxu1 }
 0x388   : > { %v1261_v38 = vadd.f32 %v1260_v49, %v6518_v22  ;;  %v1546_v20 = vadd.f32 %v1545_v50, %v6521_v29 }
 0x389   : > { %v1285_v52 = vpack.c.bf16 %v1259_v46, %v1255_v27  ;;  %v1570_v53 = vpack.c.bf16 %v1544_v35, %v1540_v15 }
 0x38a   : > { %v1286_v54 = vpack.c.bf16 %v1261_v38, %v1257_v16  ;;  %v1571_v55 = vpack.c.bf16 %v1546_v20, %v1542_v17 }
 0x38b   : > { %1626 = vxpose.xlu1.c.b16.cont [2/4] (short) %v1570_v53, 128  ;;  %1577 = vxpose.xlu0.c.b16.cont [2/4] (short) %v1285_v52, 128 }
 0x38c   : > { %v1264_v56 = vpop.f32.mrb[8].mxu0  ;;  %v1549_v57 = vpop.f32.mrb[8].mxu1 }
 0x38d   : > { %v1266_v37 = vpop.f32.mrb[9].mxu0  ;;  %v1551_v58 = vpop.f32.mrb[9].mxu1  ;;  %v1265_v61 = vadd.f32 %v1264_v56, %v6512_v26  ;;  %v1550_v45 = vadd.f32 %v1549_v57, %v6515_v59 }
 0x38e   : > { %v1268_v48 = vpop.f32.mrb[10].mxu0  ;;  %v1553_v9 = vpop.f32.mrb[10].mxu1  ;;  %v1267_v23 = vadd.f32 %v1266_v37, %v6518_v22  ;;  %v1552_v24 = vadd.f32 %v1551_v58, %v6521_v29 }
 0x38f   : > { %v1269_v62 = vadd.f32 %v1268_v48, %v6512_v26  ;;  %v1554_v63 = vadd.f32 %v1553_v9, %v6515_v59  ;;  %v1270_v18 = vpop.f32.mrb[11].mxu0  ;;  %v1555_v21 = vpop.f32.mrb[11].mxu1 }
 0x390   : > { %v1271_v60 = vadd.f32 %v1270_v18, %v6518_v22  ;;  %v1556_v47 = vadd.f32 %v1555_v21, %v6521_v29 }
 0x391   : > { %v1287_v0 = vpack.c.bf16 %v1269_v62, %v1265_v61  ;;  %v1572_v2 = vpack.c.bf16 %v1554_v63, %v1550_v45 }
 0x392   : > { %v1288_v44 = vpack.c.bf16 %v1271_v60, %v1267_v23  ;;  %v1573_v1 = vpack.c.bf16 %v1556_v47, %v1552_v24 }
 0x393   : > { %1627 = vxpose.xlu1.c.b16.cont [3/4] (short) %v1572_v2, 128  ;;  %1578 = vxpose.xlu0.c.b16.cont [3/4] (short) %v1287_v0, 128 }
 0x394   : > { %v1274_v7 = vpop.f32.mrb[12].mxu0  ;;  %v1559_v3 = vpop.f32.mrb[12].mxu1 }
 0x395   : > { %v1276_v30 = vpop.f32.mrb[13].mxu0  ;;  %v1561_v31 = vpop.f32.mrb[13].mxu1  ;;  %v1275_v5 = vadd.f32 %v1274_v7, %v6512_v26  ;;  %v1560_v6 = vadd.f32 %v1559_v3, %v6515_v59 }
 0x396   : > { %v1278_v32 = vpop.f32.mrb[14].mxu0  ;;  %v1563_v33 = vpop.f32.mrb[14].mxu1  ;;  %v1277_v39 = vadd.f32 %v1276_v30, %v6518_v22  ;;  %v1562_v40 = vadd.f32 %v1561_v31, %v6521_v29 }
 0x397   : > { %v1279_v34 = vadd.f32 %v1278_v32, %v6512_v26  ;;  %v1564_v51 = vadd.f32 %v1563_v33, %v6515_v59  ;;  %v1280_v8 = vpop.f32.mrb[15].mxu0  ;;  %v1565_v4 = vpop.f32.mrb[15].mxu1 }
 0x398   : > { %v1281_v12 = vadd.f32 %v1280_v8, %v6518_v22  ;;  %v1566_v13 = vadd.f32 %v1565_v4, %v6521_v29 }
 0x399   : > { %v1289_v43 = vpack.c.bf16 %v1279_v34, %v1275_v5  ;;  %v1574_v14 = vpack.c.bf16 %v1564_v51, %v1560_v6 }
 0x39a   : > { %v1290_v28 = vpack.c.bf16 %v1281_v12, %v1277_v39  ;;  %v1575_v10 = vpack.c.bf16 %v1566_v13, %v1562_v40 }
 0x39b   : > { %1628 = vxpose.xlu1.c.b16.end [4/4] (short) %v1574_v14, 128  ;;  %1579 = vxpose.xlu0.c.b16.end [4/4] (short) %v1289_v43, 128 }
 0x3ac   : > { %1592 = vxpose.xlu1.c.b16.start [1/4] (short) %v1284_v41, 128  ;;  %1641 = vxpose.xlu0.c.b16.start [1/4] (short) %v1569_v42, 128 }
 0x3b0   : > { %1593 = vxpose.xlu1.c.b16.cont [2/4] (short) %v1286_v54, 128  ;;  %1642 = vxpose.xlu0.c.b16.cont [2/4] (short) %v1571_v55, 128 }
 0x3b4   : > { %1594 = vxpose.xlu1.c.b16.cont [3/4] (short) %v1288_v44, 128  ;;  %1643 = vxpose.xlu0.c.b16.cont [3/4] (short) %v1573_v1, 128 }
 0x3b8   : > { %1595 = vxpose.xlu1.c.b16.end [4/4] (short) %v1290_v28, 128  ;;  %1644 = vxpose.xlu0.c.b16.end [4/4] (short) %v1575_v10, 128 }
 0x3f5   : > { %v1584_v26 = vpop.trf.xlu0  ;;  %v1633_v59 = vpop.trf.xlu1 }
 0x3f6   : > { %1609 = vst.msk [vmem:[#allocation2] sm:$0xff] %vm1608_vm0, %v1584_v26  ;;  %1657 = vxpose.xlu0.c.b16.start [1/8] (narrow) %v1633_v59, 64 }
 0x3f9   : > { %v1585_v22 = vpop.trf.xlu0  ;;  %v1634_v29 = vpop.trf.xlu1 }
 0x3fa   : > { %1610 = vst.msk [vmem:[#allocation2 + $0x8] sm:$0xff] %vm1608_vm0, %v1585_v22  ;;  %1658 = vxpose.xlu0.c.b16.cont [2/8] (narrow) %v1634_v29, 64 }
 0x3fd   : > { %v1586_v25 = vpop.trf.xlu0  ;;  %v1635_v19 = vpop.trf.xlu1 }
 0x3fe   : > { %1611 = vst.msk [vmem:[#allocation2 + $0x10] sm:$0xff] %vm1608_vm0, %v1586_v25  ;;  %1659 = vxpose.xlu0.c.b16.cont [3/8] (narrow) %v1635_v19, 64 }
 0x401   : > { %v1587_v11 = vpop.trf.xlu0  ;;  %v1636_v36 = vpop.trf.xlu1 }
 0x402   : > { %1612 = vst.msk [vmem:[#allocation2 + $0x18] sm:$0xff] %vm1608_vm0, %v1587_v11  ;;  %1660 = vxpose.xlu0.c.b16.cont [4/8] (narrow) %v1636_v36, 64 }
 0x405   : > { %v1588_v41 = vpop.trf.xlu0  ;;  %v1637_v42 = vpop.trf.xlu1 }
 0x406   : > { %1613 = vst.msk [vmem:[#allocation2 + $0x20] sm:$0xff] %vm1608_vm0, %v1588_v41  ;;  %1661 = vxpose.xlu0.c.b16.cont [5/8] (narrow) %v1637_v42, 64 }
 0x409   : > { %v1589_v27 = vpop.trf.xlu0  ;;  %v1638_v15 = vpop.trf.xlu1 }
 0x40a   : > { %1614 = vst.msk [vmem:[#allocation2 + $0x28] sm:$0xff] %vm1608_vm0, %v1589_v27  ;;  %1662 = vxpose.xlu0.c.b16.cont [6/8] (narrow) %v1638_v15, 64 }
 0x40d   : > { %v1590_v46 = vpop.trf.xlu0  ;;  %v1639_v35 = vpop.trf.xlu1 }
 0x40e   : > { %1615 = vst.msk [vmem:[#allocation2 + $0x30] sm:$0xff] %vm1608_vm0, %v1590_v46  ;;  %1663 = vxpose.xlu0.c.b16.cont [7/8] (narrow) %v1639_v35, 64 }
 0x411   : > { %v1591_v49 = vpop.trf.xlu0  ;;  %v1640_v50 = vpop.trf.xlu1 }
 0x412   : > { %1616 = vst.msk [vmem:[#allocation2 + $0x38] sm:$0xff] %vm1608_vm0, %v1591_v49  ;;  %1664 = vxpose.xlu0.c.b16.end [8/8] (narrow) %v1640_v50, 64 }
 0x415   : > { %v1649_v16 = vpop.trf.xlu0  ;;  %v1600_v17 = vpop.trf.xlu1 }
 0x416   : > { %1673 = vxpose.xlu1.c.b16.start [1/8] (narrow) %v1649_v16, 64  ;;  %1617 = vst.msk [vmem:[#allocation2 + $0x40] sm:$0xff] %vm1608_vm0, %v1600_v17 }
 0x419   : > { %v1650_v38 = vpop.trf.xlu0  ;;  %v1601_v20 = vpop.trf.xlu1 }
 0x41a   : > { %1674 = vxpose.xlu1.c.b16.cont [2/8] (narrow) %v1650_v38, 64  ;;  %1618 = vst.msk [vmem:[#allocation2 + $0x48] sm:$0xff] %vm1608_vm0, %v1601_v20 }
 0x41d   : > { %v1651_v52 = vpop.trf.xlu0  ;;  %v1602_v53 = vpop.trf.xlu1 }
 0x41e   : > { %1675 = vxpose.xlu1.c.b16.cont [3/8] (narrow) %v1651_v52, 64  ;;  %1619 = vst.msk [vmem:[#allocation2 + $0x50] sm:$0xff] %vm1608_vm0, %v1602_v53 }
 0x421   : > { %v1652_v54 = vpop.trf.xlu0  ;;  %v1603_v55 = vpop.trf.xlu1 }
 0x422   : > { %1676 = vxpose.xlu1.c.b16.cont [4/8] (narrow) %v1652_v54, 64  ;;  %1620 = vst.msk [vmem:[#allocation2 + $0x58] sm:$0xff] %vm1608_vm0, %v1603_v55 }
 0x425   : > { %v1653_v56 = vpop.trf.xlu0  ;;  %v1604_v57 = vpop.trf.xlu1 }
 0x426   : > { %1677 = vxpose.xlu1.c.b16.cont [5/8] (narrow) %v1653_v56, 64  ;;  %1621 = vst.msk [vmem:[#allocation2 + $0x60] sm:$0xff] %vm1608_vm0, %v1604_v57 }
 0x429   : > { %v1654_v37 = vpop.trf.xlu0  ;;  %v1605_v58 = vpop.trf.xlu1 }
 0x42a   : > { %1678 = vxpose.xlu1.c.b16.cont [6/8] (narrow) %v1654_v37, 64  ;;  %1622 = vst.msk [vmem:[#allocation2 + $0x68] sm:$0xff] %vm1608_vm0, %v1605_v58 }
 0x42d   : > { %v1655_v48 = vpop.trf.xlu0  ;;  %v1606_v9 = vpop.trf.xlu1 }
 0x42e   : > { %1679 = vxpose.xlu1.c.b16.cont [7/8] (narrow) %v1655_v48, 64  ;;  %1623 = vst.msk [vmem:[#allocation2 + $0x70] sm:$0xff] %vm1608_vm0, %v1606_v9 }
 0x431   : > { %v1656_v61 = vpop.trf.xlu0  ;;  %v1607_v45 = vpop.trf.xlu1 }
 0x432   : > { %1680 = vxpose.xlu1.c.b16.end [8/8] (narrow) %v1656_v61, 64  ;;  %1624 = vst.msk [vmem:[#allocation2 + $0x78] sm:$0xff] %vm1608_vm0, %v1607_v45 }
 0x45c   : > { %v1665_v62 = vpop.trf.xlu0 }
 0x45d   : > { %1689 = vst [vmem:[#allocation3] sm:$0xff] %v1665_v62 }
 0x460   : > { %v1666_v63 = vpop.trf.xlu0 }
 0x461   : > { %1690 = vst [vmem:[#allocation3 + $0x8] sm:$0xff] %v1666_v63 }
 0x464   : > { %v1667_v18 = vpop.trf.xlu0 }
 0x465   : > { %1691 = vst [vmem:[#allocation3 + $0x10] sm:$0xff] %v1667_v18 }
 0x468   : > { %v1668_v21 = vpop.trf.xlu0 }
 0x469   : > { %1692 = vst [vmem:[#allocation3 + $0x18] sm:$0xff] %v1668_v21 }
 0x47c   : > { %v1681_v23 = vpop.trf.xlu1 }
 0x47d   : > { %1693 = vst [vmem:[#allocation3 + $0x20] sm:$0xff] %v1681_v23 }
 0x480   : > { %v1682_v24 = vpop.trf.xlu1 }
 0x481   : > { %1694 = vst [vmem:[#allocation3 + $0x28] sm:$0xff] %v1682_v24 }
 0x484   : > { %v1683_v60 = vpop.trf.xlu1 }
 0x485   : > { %1695 = vst [vmem:[#allocation3 + $0x30] sm:$0xff] %v1683_v60 }
 0x488   : > { %v1684_v47 = vpop.trf.xlu1 }
 0x489   : > { %1696 = vst [vmem:[#allocation3 + $0x38] sm:$0xff] %v1684_v47 }
 0x48a PF: > { %v1697_v0 = vld [vmem:[%s6283_s2] sm:$0xff]  ;;  %v1698_v2 = vld [vmem:[%s6283_s2 + $0x8] sm:$0xff]  ;;  %v6594_v3 = vld [vmem:[%s6283_s2 + $0x10] sm:$0xff]  ;;  %s7151_s7 = sld [smem:[#allocation40_spill]]  ;;  %s7152_s29 = sld [smem:[#allocation41_spill]]  ;;  %vm2308_vm8 = vcmask 523264  }
 0x48b   : > { %v1701_v44 = vld [vmem:[%s6283_s2 + $0x20] sm:$0xff]  ;;  %v1707_v1 = vadd.f32 %v1698_v2, %v1697_v0  ;;  %v1702_v7 = vld [vmem:[%s6283_s2 + $0x28] sm:$0xff]  ;;  %v6597_v30 = vld [vmem:[%s6283_s2 + $0x18] sm:$0xff]  ;;  %s7153_s5 = sld [smem:[#allocation43_spill]]  ;;  %s7160_s26 = sld [smem:[#allocation49_spill]] }
 0x48c   : > { %v1713_v31 = vadd.f32 %v1702_v7, %v1701_v44  ;;  %v6600_v32 = vld [vmem:[%s6283_s2 + $0x30] sm:$0xff]  ;;  %v6603_v33 = vld [vmem:[%s6283_s2 + $0x38] sm:$0xff]  ;;  %v1710_v5 = vadd.f32 %v6597_v30, %v6594_v3  ;;  %v4988_v8 = vld [vmem:[#allocation10 + $0x14] ss:$8 sps:$4 sm:$0xff]   ;;  %s7161_s21 = sld [smem:[#allocation50_spill]]  ;;  %s7162_s8 = sld [smem:[#allocation51_spill]] }
 0x48d   : > { %1708 = vadd.xlane.f32.xlu0 %v1707_v1  ;;  %v1716_v6 = vadd.f32 %v6603_v33, %v6600_v32  ;;  %v4985_v34 = vld [vmem:[#allocation10 + $0x4] ss:$8 sps:$4 sm:$0xff]   ;;  %v4987_v51 = vld [vmem:[#allocation10] ss:$8 sps:$4 sm:$0xff]   ;;  %v4990_v4 = vld [vmem:[#allocation10 + $0x10] ss:$8 sps:$4 sm:$0xff]  }
 0x48e   : > { %1714 = vadd.xlane.f32.xlu1 %v1713_v31  ;;  %2018 = vmatprep.subr.bf16.mxu0 %v4985_v34  ;;  %v4991_v39 = vld [vmem:[#allocation10 + $0x24] ss:$8 sps:$4 sm:$0xff]   ;;  %v4993_v40 = vld [vmem:[#allocation10 + $0x20] ss:$8 sps:$4 sm:$0xff]   ;;  %v4994_v12 = vld [vmem:[#allocation10 + $0x34] ss:$8 sps:$4 sm:$0xff]  }
 0x48f   : > { %2019 = vmatpush1.bf16.msra.mxu0 %v4987_v51  ;;  %v4996_v13 = vld [vmem:[#allocation10 + $0x30] ss:$8 sps:$4 sm:$0xff]   ;;  %v4997_v43 = vld [vmem:[#allocation10 + $0x44] ss:$8 sps:$4 sm:$0xff]   ;;  %v4999_v14 = vld [vmem:[#allocation10 + $0x40] ss:$8 sps:$4 sm:$0xff]  }
 0x490   : > { %2020 = vmatprep.subr.bf16.mxu0 %v4988_v8  ;;  %v5000_v28 = vld [vmem:[#allocation10 + $0x54] ss:$8 sps:$4 sm:$0xff]   ;;  %v5002_v10 = vld [vmem:[#allocation10 + $0x50] ss:$8 sps:$4 sm:$0xff]   ;;  %v5003_v26 = vld [vmem:[#allocation10 + $0x64] ss:$8 sps:$4 sm:$0xff]  }
 0x491   : > { %1711 = vadd.xlane.f32.xlu0 %v1710_v5  ;;  %v5005_v59 = vld [vmem:[#allocation10 + $0x60] ss:$8 sps:$4 sm:$0xff]   ;;  %v5006_v22 = vld [vmem:[#allocation10 + $0x74] ss:$8 sps:$4 sm:$0xff]   ;;  %v5008_v29 = vld [vmem:[#allocation10 + $0x70] ss:$8 sps:$4 sm:$0xff]  }
 0x492   : > { %1717 = vadd.xlane.f32.xlu1 %v1716_v6  ;;  %v5009_v25 = vld [vmem:[#allocation10 + $0x84] ss:$8 sps:$4 sm:$0xff]   ;;  %v5011_v19 = vld [vmem:[#allocation10 + $0x80] ss:$8 sps:$4 sm:$0xff]   ;;  %v5012_v18 = vld [vmem:[#allocation10 + $0x94] ss:$8 sps:$4 sm:$0xff]   ;;  %v1773_v6 = vlaneseq }
 0x493   : > { %2021 = vmatpush1.bf16.msra.mxu0 %v4990_v4  ;;  %v5014_v21 = vld [vmem:[#allocation10 + $0x90] ss:$8 sps:$4 sm:$0xff]   ;;  %v5015_v23 = vld [vmem:[#allocation10 + $0xa4] ss:$8 sps:$4 sm:$0xff]   ;;  %v5017_v24 = vld [vmem:[#allocation10 + $0xa0] ss:$8 sps:$4 sm:$0xff]  }
 0x494   : > { %2022 = vmatprep.subr.bf16.mxu0 %v4991_v39  ;;  %v5018_v60 = vld [vmem:[#allocation10 + $0xb4] ss:$8 sps:$4 sm:$0xff]   ;;  %v5020_v47 = vld [vmem:[#allocation10 + $0xb0] ss:$8 sps:$4 sm:$0xff]   ;;  %s7163_s9 = sld [smem:[#allocation53_spill]]  ;;  %s7164_s3 = sld [smem:[#allocation29_spill]] }
 0x495   : > { %v5026_v1 = vld [vmem:[#allocation10 + $0xd0] ss:$8 sps:$4 sm:$0xff]   ;;  %s7165_s10 = sld [smem:[#allocation55_spill]]  ;;  %s4095_s28 = sshll.u32 %s6304_s27, 4  ;;  %s6941_s28 = int_to_ptr.vmem [resolvable:$true] %s4095_s28 }
 0x496   : > { %v5032_v31 = vld [vmem:[#allocation10 + $0xf0] ss:$8 sps:$4 sm:$0xff]   ;;  %s4079_s11 = scalar_lea.sflag [#allocation6], %s6280_s0  ;;  %s5773_s1 = smov [#allocation19]  }
 0x497   : > { %2023 = vmatpush1.bf16.msra.mxu0 %v4993_v40  ;;  %s5623_s22 = sshll.u32 %s5773_s1, 4  ;;  %s5624_s22 = int_to_ptr.vmem [resolvable:$false] %s5623_s22 }
 0x498   : > { %2024 = vmatprep.subr.bf16.mxu0 %v4994_v12  ;;  %v6645_v12 = vshrl.u32 %v1773_v6, 7  ;;  %p5626_p11 = scmp.lt.s32.totalorder %s6941_s28, %s5624_s22 }
 0x49a   : > { %s4578_s16 = sshll.u32 %s7164_s3, 3 }
 0x49b   : > { %2025 = vmatpush1.bf16.msra.mxu0 %v4996_v13 }
 0x49c   : > { %2026 = vmatprep.subr.bf16.mxu0 %v4997_v43 }
 0x49f   : > { %2027 = vmatpush1.bf16.msra.mxu0 %v4999_v14 }
 0x4a0   : > { %2028 = vmatprep.subr.bf16.mxu0 %v5000_v28  ;;  %v6648_v28 = vsub.s32 0, %v6645_v12 }
 0x4a3   : > { %2029 = vmatpush1.bf16.msra.mxu0 %v5002_v10  ;;  %v6651_v10 = vsub.s32 1, %v6645_v12 }
 0x4a4   : > { %2030 = vmatprep.subr.bf16.mxu0 %v5003_v26  ;;  %v1705_v26 = vld [vmem:[%s7151_s7] sm:$0x3] }
 0x4a7   : > { %2031 = vmatpush1.bf16.msra.mxu0 %v5005_v59 }
 0x4a8   : > { %2032 = vmatprep.subr.bf16.mxu0 %v5006_v22  ;;  %v1776_v22 = vrot.slane %v1705_v26, %v6648_v28 }
 0x4ab   : > { %2033 = vmatpush1.bf16.msra.mxu0 %v5008_v29  ;;  %v1780_v29 = vrot.slane %v1705_v26, %v6651_v10 }
 0x4ac   : > { %2034 = vmatprep.subr.bf16.mxu0 %v5009_v25  ;;  %v1706_v25 = vld [vmem:[%s7152_s29] sm:$0x3]  ;;  %s4572_s29 = sshll.u32 %s5745_s23, 4 }
 0x4ad   : > { %s4092_s17 = sadd.s32 %s4578_s16, %s4572_s29 }
 0x4ae   : > { %s4573_s23 = sshll.u32 %s4092_s17, 7 }
 0x4af   : > { %2035 = vmatpush1.bf16.msra.mxu0 %v5011_v19 }
 0x4b0   : > { %2036 = vmatprep.subr.bf16.mxu0 %v5012_v18 }
 0x4b3   : > { %2037 = vmatpush1.bf16.msra.mxu0 %v5014_v21 }
 0x4b4   : > { %2038 = vmatprep.subr.bf16.mxu0 %v5015_v23 }
 0x4b7   : > { %2039 = vmatpush1.bf16.msra.mxu0 %v5017_v24 }
 0x4b8   : > { %2040 = vmatprep.subr.bf16.mxu0 %v5018_v60 }
 0x4bb   : > { %2041 = vmatpush1.bf16.msra.mxu0 %v5020_v47 }
 0x51a   : > { %v1709_v11 = vpop.xlane.xlu0 %1708 }
 0x51b   : > { %v1720_v36 = vmul.f32 0.00390625, %v1709_v11  ;;  %v1715_v41 = vpop.xlane.xlu1 %1714 }
 0x51c   : > { %v1722_v42 = vmul.f32 0.00390625, %v1715_v41 }
 0x51d   : > { %v6609_v27 = vsub.f32 %v1697_v0, %v1720_v36  ;;  %v6611_v15 = vsub.f32 %v1698_v2, %v1720_v36  ;;  %v5021_v0 = vld [vmem:[#allocation10 + $0xc4] ss:$8 sps:$4 sm:$0xff]   ;;  %v5023_v2 = vld [vmem:[#allocation10 + $0xc0] ss:$8 sps:$4 sm:$0xff]  }
 0x51e   : > { %v6613_v46 = vsub.f32 %v1701_v44, %v1722_v42  ;;  %v6615_v35 = vsub.f32 %v1702_v7, %v1722_v42  ;;  %v1712_v49 = vpop.xlane.xlu0 %1711  ;;  %v5024_v44 = vld [vmem:[#allocation10 + $0xd4] ss:$8 sps:$4 sm:$0xff]   ;;  %2042 = vmatprep.subr.bf16.mxu0 %v5021_v0  ;;  %v5027_v7 = vld [vmem:[#allocation10 + $0xe4] ss:$8 sps:$4 sm:$0xff]   ;;  %v1795_v42 = vrot.slane %v1706_v25, %v6648_v28 }
 0x51f   : > { %v1721_v50 = vmul.f32 0.00390625, %v1712_v49  ;;  %v1718_v16 = vpop.xlane.xlu1 %1717  ;;  %v1732_v17 = vmul.f32 %v6609_v27, %v6609_v27  ;;  %v1733_v38 = vmul.f32 %v6611_v15, %v6611_v15  ;;  %2043 = vmatpush1.bf16.msra.mxu0 %v5023_v2  ;;  %v1799_v49 = vrot.slane %v1706_v25, %v6651_v10 }
 0x520   : > { %v1723_v20 = vmul.f32 0.00390625, %v1718_v16  ;;  %v1736_v52 = vmul.f32 %v6613_v46, %v6613_v46  ;;  %v1737_v53 = vmul.f32 %v6615_v35, %v6615_v35  ;;  %2044 = vmatprep.subr.bf16.mxu0 %v5024_v44 }
 0x521   : > { %v6626_v54 = vsub.f32 %v6594_v3, %v1721_v50  ;;  %v6629_v55 = vsub.f32 %v6597_v30, %v1721_v50  ;;  %v1740_v56 = vadd.f32 %v1733_v38, %v1732_v17  ;;  %v5029_v3 = vld [vmem:[#allocation10 + $0xe0] ss:$8 sps:$4 sm:$0xff]   ;;  %v5030_v30 = vld [vmem:[#allocation10 + $0xf4] ss:$8 sps:$4 sm:$0xff]  }
 0x522   : > { %v6632_v57 = vsub.f32 %v6600_v32, %v1723_v20  ;;  %v6635_v37 = vsub.f32 %v6603_v33, %v1723_v20  ;;  %v1746_v58 = vadd.f32 %v1737_v53, %v1736_v52 }
 0x523   : > { %1741 = vadd.xlane.f32.xlu0 %v1740_v56  ;;  %v1734_v48 = vmul.f32 %v6626_v54, %v6626_v54  ;;  %v1735_v9 = vmul.f32 %v6629_v55, %v6629_v55  ;;  %2045 = vmatpush1.bf16.msra.mxu0 %v5026_v1 }
 0x524   : > { %v1738_v61 = vmul.f32 %v6632_v57, %v6632_v57  ;;  %v1739_v45 = vmul.f32 %v6635_v37, %v6635_v37  ;;  %2046 = vmatprep.subr.bf16.mxu0 %v5027_v7 }
 0x525   : > { %v1743_v62 = vadd.f32 %v1735_v9, %v1734_v48 }
 0x526   : > { %v1749_v63 = vadd.f32 %v1739_v45, %v1738_v61 }
 0x527   : > { %1747 = vadd.xlane.f32.xlu0 %v1746_v58  ;;  %1744 = vadd.xlane.f32.xlu1 %v1743_v62 }
 0x528   : > { %2047 = vmatpush1.bf16.msra.mxu0 %v5029_v3 }
 0x529   : > { %2048 = vmatprep.subr.bf16.mxu0 %v5030_v30 }
 0x52b   : > { %1750 = vadd.xlane.f32.xlu1 %v1749_v63 }
 0x52c   : > { %2049 = vmatpush1.bf16.msra.mxu0 %v5032_v31 }
 0x5b0   : > { %v1742_v32 = vpop.xlane.xlu0 %1741 }
 0x5b1   : > { %v1752_v33 = vmul.f32 0.00390625, %v1742_v32 }
 0x5b3   : > { %v1756_v5 = vadd.f32 1e-12, %v1752_v33 }
 0x5b4   : > { %v1745_v34 = vpop.xlane.xlu1 %1744  ;;  %v1748_v51 = vpop.xlane.xlu0 %1747 }
 0x5b5   : > { %5273 = vrsqrt.f32 %v1756_v5  ;;  %v1753_v8 = vmul.f32 0.00390625, %v1745_v34  ;;  %v1754_v4 = vmul.f32 0.00390625, %v1748_v51 }
 0x5b7   : > { %v1757_v39 = vadd.f32 1e-12, %v1753_v8  ;;  %v1758_v40 = vadd.f32 1e-12, %v1754_v4 }
 0x5b8   : > { %v1751_v13 = vpop.xlane.xlu1 %1750 }
 0x5b9   : > { %5275 = vrsqrt.f32 %v1757_v39  ;;  %v1755_v43 = vmul.f32 0.00390625, %v1751_v13 }
 0x5ba   : > { %5277 = vrsqrt.f32 %v1758_v40 }
 0x5bb   : > { %v1759_v14 = vadd.f32 1e-12, %v1755_v43 }
 0x5bd   : > { %5279 = vrsqrt.f32 %v1759_v14 }
 0x5bf   : > { %v5274_v59 = vpop.eup %5273 }
 0x5c0   : > { %v1765_v19 = vmul.f32 %v5274_v59, %v6611_v15  ;;  %v1764_v11 = vmul.f32 %v5274_v59, %v6609_v27 }
 0x5c2   : > { %v1784_v41 = vmul.f32 %v1780_v29, %v1765_v19  ;;  %v1783_v50 = vmul.f32 %v1776_v22, %v1764_v11 }
 0x5c3   : > { %v5276_v36 = vpop.eup %5275 }
 0x5c4   : > { %v5278_v16 = vpop.eup %5277  ;;  %v1767_v17 = vmul.f32 %v5276_v36, %v6629_v55  ;;  %v1766_v38 = vmul.f32 %v5276_v36, %v6626_v54  ;;  %v1803_v15 = vadd.f32 %v1799_v49, %v1784_v41  ;;  %v1802_v58 = vadd.f32 %v1795_v42, %v1783_v50  ;;  %v2147_v41 = vld [vmem:[#allocation2] sm:$0xff]  ;;  %v2156_v50 = vld [vmem:[#allocation2 + $0x48] sm:$0xff] }
 0x5c5   : > { %v1769_v20 = vmul.f32 %v5278_v16, %v6615_v35  ;;  %v1768_v62 = vmul.f32 %v5278_v16, %v6613_v46  ;;  %4611 = vmatprep.subr.bf16.mxu0 %v2147_v41  ;;  %v2149_v16 = vld [vmem:[#allocation2 + $0x10] sm:$0xff] }
 0x5c6   : > { %v1786_v52 = vmul.f32 %v1780_v29, %v1767_v17  ;;  %v1785_v53 = vmul.f32 %v1776_v22, %v1766_v38  ;;  %v2157_v17 = vld [vmem:[#allocation2 + $0x50] sm:$0xff]  ;;  %v2150_v38 = vld [vmem:[#allocation2 + $0x18] sm:$0xff] }
 0x5c7   : > { %v5280_v56 = vpop.eup %5279  ;;  %v1788_v27 = vmul.f32 %v1780_v29, %v1769_v20  ;;  %v1787_v23 = vmul.f32 %v1776_v22, %v1768_v62  ;;  %v2158_v20 = vld [vmem:[#allocation2 + $0x58] sm:$0xff] }
 0x5c8   : > { %v1805_v48 = vadd.f32 %v1799_v49, %v1786_v52  ;;  %v1804_v9 = vadd.f32 %v1795_v42, %v1785_v53  ;;  %v1771_v61 = vmul.f32 %v5280_v56, %v6635_v37  ;;  %v1770_v45 = vmul.f32 %v5280_v56, %v6632_v57  ;;  %v1846_v57 = vld [vmem:[%s7153_s5] sm:$0x3]  ;;  %v2152_v56 = vld [vmem:[#allocation2 + $0x28] sm:$0xff]  ;;  %s7166_s5 = sld [smem:[#allocation33_spill]] }
 0x5c9   : > { %v1807_v35 = vadd.f32 %v1799_v49, %v1788_v27  ;;  %v1806_v47 = vadd.f32 %v1795_v42, %v1787_v23  ;;  %v1851_v46 = vrot.slane %v1846_v57, %v6648_v28  ;;  %v1855_v37 = vrot.slane %v1846_v57, %v6651_v10  ;;  %v2151_v52 = vld [vmem:[#allocation2 + $0x20] sm:$0xff]  ;;  %v2161_v27 = vld [vmem:[#allocation2 + $0x70] sm:$0xff] }
 0x5ca   : > { %v1811_v63 = vpack.c.bf16 %v1805_v48, %v1803_v15  ;;  %v1810_v55 = vpack.c.bf16 %v1804_v9, %v1802_v58  ;;  %v1790_v18 = vmul.f32 %v1780_v29, %v1771_v61  ;;  %v1789_v54 = vmul.f32 %v1776_v22, %v1770_v45  ;;  %v2159_v53 = vld [vmem:[#allocation2 + $0x60] sm:$0xff]  ;;  %v2160_v15 = vld [vmem:[#allocation2 + $0x68] sm:$0xff]  ;;  %v2153_v58 = vld [vmem:[#allocation2 + $0x30] sm:$0xff] }
 0x5cb   : > { %v2154_v48 = vld [vmem:[#allocation2 + $0x38] sm:$0xff] }
 0x5cc   : > { %2050 = vmatprep.mubr.bf16.mxu0 %v1811_v63  ;;  %v1809_v21 = vadd.f32 %v1799_v49, %v1790_v18  ;;  %v1808_v60 = vadd.f32 %v1795_v42, %v1789_v54  ;;  %v2155_v42 = vld [vmem:[#allocation2 + $0x40] sm:$0xff]  ;;  %v2148_v49 = vld [vmem:[#allocation2 + $0x8] sm:$0xff]  ;;  %v2162_v9 = vld [vmem:[#allocation2 + $0x78] sm:$0xff] }
 0x5cd   : > { %2051 = vmatmul.mubr.bf16.vlgmr.msra.gmra.mrb[0].mxu0 %v1810_v55  ;;  %4631 = vmatprep.subr.bf16.mxu1 %v2155_v42 }
 0x5ce   : > { %v1813_v24 = vpack.c.bf16 %v1809_v21, %v1807_v35  ;;  %v1812_v0 = vpack.c.bf16 %v1808_v60, %v1806_v47  ;;  %4612 = vmatpush3.bf16.msra.mxu0 %v2147_v41  ;;  %4632 = vmatpush3.bf16.msra.mxu1 %v2155_v42  ;;  %p7168_p6 = scmp.ne.s32.totalorder %s7166_s5, 0 }
 0x5cf   : > { %4613 = vmatprep.subr.bf16.mxu0 %v2148_v49  ;;  %4633 = vmatprep.subr.bf16.mxu1 %v2156_v50 }
 0x5d0   : > { %2060 = vmatprep.mubr.bf16.mxu0 %v1813_v24 }
 0x5d2   : > { %4614 = vmatpush3.bf16.msra.mxu0 %v2148_v49  ;;  %4634 = vmatpush3.bf16.msra.mxu1 %v2156_v50 }
 0x5d3   : > { %4615 = vmatprep.subr.bf16.mxu0 %v2149_v16  ;;  %4635 = vmatprep.subr.bf16.mxu1 %v2157_v17 }
 0x5d5   : > { %2061 = vmatmul.mubr.bf16.gmra.mrb[4].mxu0 %v1812_v0 }
 0x5d6   : > { %4616 = vmatpush3.bf16.msra.mxu0 %v2149_v16  ;;  %4636 = vmatpush3.bf16.msra.mxu1 %v2157_v17 }
 0x5d7   : > { %4617 = vmatprep.subr.bf16.mxu0 %v2150_v38  ;;  %4637 = vmatprep.subr.bf16.mxu1 %v2158_v20 }
 0x5da   : > { %4618 = vmatpush3.bf16.msra.mxu0 %v2150_v38  ;;  %4638 = vmatpush3.bf16.msra.mxu1 %v2158_v20 }
 0x5db   : > { %4619 = vmatprep.subr.bf16.mxu0 %v2151_v52  ;;  %4639 = vmatprep.subr.bf16.mxu1 %v2159_v53 }
 0x5de   : > { %4620 = vmatpush3.bf16.msra.mxu0 %v2151_v52  ;;  %4640 = vmatpush3.bf16.msra.mxu1 %v2159_v53 }
 0x5df   : > { %4621 = vmatprep.subr.bf16.mxu0 %v2152_v56  ;;  %4641 = vmatprep.subr.bf16.mxu1 %v2160_v15 }
 0x5e2   : > { %4622 = vmatpush3.bf16.msra.mxu0 %v2152_v56  ;;  %4642 = vmatpush3.bf16.msra.mxu1 %v2160_v15 }
 0x5e3   : > { %4623 = vmatprep.subr.bf16.mxu0 %v2153_v58  ;;  %4643 = vmatprep.subr.bf16.mxu1 %v2161_v27 }
 0x5e6   : > { %4624 = vmatpush3.bf16.msra.mxu0 %v2153_v58  ;;  %4644 = vmatpush3.bf16.msra.mxu1 %v2161_v27 }
 0x5e7   : > { %4625 = vmatprep.subr.bf16.mxu0 %v2154_v48  ;;  %4645 = vmatprep.subr.bf16.mxu1 %v2162_v9 }
 0x5ea   : > { %4626 = vmatpush3.bf16.msra.mxu0 %v2154_v48  ;;  %4646 = vmatpush3.bf16.msra.mxu1 %v2162_v9 }
 0x6a0   : > { %v2052_v2 = vpop.f32.mrb[0].mxu0 }
 0x6a1   : > { %v2053_v44 = vadd.f32 %v2052_v2, %v1851_v46  ;;  %v2054_v1 = vpop.f32.mrb[1].mxu0 }
 0x6a2   : > { %v2055_v7 = vadd.f32 %v2054_v1, %v1855_v37  ;;  %v2056_v3 = vpop.f32.mrb[2].mxu0 }
 0x6a3   : > { %v2057_v30 = vadd.f32 %v2056_v3, %v1851_v46  ;;  %v2058_v31 = vpop.f32.mrb[3].mxu0  ;;  %v2071_v33 = vmul.f32 0.088388346, %v2053_v44  ;;  %v5772_v3 = vmov 0  }
 0x6a4   : > { %v2059_v32 = vadd.f32 %v2058_v31, %v1855_v37  ;;  %v2072_v6 = vmul.f32 0.088388346, %v2055_v7  ;;  %v2261_v7 = vld [vmem:[%s6290_s15] sm:$0xff] }
 0x6a5   : > { %v2073_v5 = vmul.f32 0.088388346, %v2057_v30  ;;  %vm2262_vm1 = vnez %v2261_v7 }
 0x6a6   : > { %v2074_v34 = vmul.f32 0.088388346, %v2059_v32  ;;  %v2263_v30 = vsel %vm2262_vm1, 16843009, %v5772_v3 }
 0x6a7   : > { %v2079_v51 = vpack.c.bf16 %v2073_v5, %v2071_v33  ;;  %v2264_v31 = vunpack.c.0.s8 %v2263_v30  ;;  %v2265_v32 = vunpack.c.1.s8 %v2263_v30  ;;  %v2266_v33 = vunpack.c.2.s8 %v2263_v30 }
 0x6a8   : > { %v2062_v8 = vpop.f32.mrb[4].mxu0  ;;  %v2080_v4 = vpack.c.bf16 %v2074_v34, %v2072_v6  ;;  %v2267_v6 = vunpack.c.3.s8 %v2263_v30 }
 0x6a9   : > { %v2063_v39 = vadd.f32 %v2062_v8, %v1851_v46  ;;  %2083 = vxpose.xlu1.c.b16.start [1/2] (short) %v2079_v51, 128  ;;  %v2064_v40 = vpop.f32.mrb[5].mxu0  ;;  %v2268_v5 = vpack.c.b16 %v2264_v31, %v2264_v31  ;;  %v2270_v34 = vpack.c.b16 %v2265_v32, %v2265_v32  ;;  %v2272_v51 = vpack.c.b16 %v2266_v33, %v2266_v33 }
 0x6aa   : > { %v2065_v13 = vadd.f32 %v2064_v40, %v1855_v37  ;;  %2099 = vxpose.xlu0.c.b16.start [1/2] (short) %v2080_v4, 128  ;;  %v2066_v43 = vpop.f32.mrb[6].mxu0  ;;  %v2274_v4 = vpack.c.b16 %v2267_v6, %v2267_v6 }
 0x6ab   : > { %v2067_v14 = vadd.f32 %v2066_v43, %v1851_v46  ;;  %v2068_v26 = vpop.f32.mrb[7].mxu0  ;;  %v2075_v22 = vmul.f32 0.088388346, %v2063_v39  ;;  %v2269_v8 = vpack.c.b8 %v2268_v5, %v2268_v5  ;;  %v2271_v39 = vpack.c.b8 %v2270_v34, %v2270_v34 }
 0x6ac   : > { %v2069_v59 = vadd.f32 %v2068_v26, %v1855_v37  ;;  %v2076_v25 = vmul.f32 0.088388346, %v2065_v13  ;;  %v2273_v40 = vpack.c.b8 %v2272_v51, %v2272_v51  ;;  %v2275_v13 = vpack.c.b8 %v2274_v4, %v2274_v4 }
 0x6ad   : > { %v2077_v29 = vmul.f32 0.088388346, %v2067_v14  ;;  %vm2276_vm2 = vnez %v2269_v8  ;;  %vm2277_vm3 = vnez %v2271_v39 }
 0x6ae   : > { %v2078_v19 = vmul.f32 0.088388346, %v2069_v59  ;;  %vm2278_vm4 = vnez %v2273_v40  ;;  %v2280_v43 = vsel %vm2276_vm2, 16843009, %v5772_v3  ;;  %v2281_v14 = vsel %vm2277_vm3, 16843009, %v5772_v3 }
 0x6af   : > { %v2081_v11 = vpack.c.bf16 %v2077_v29, %v2075_v22  ;;  %v2282_v26 = vsel %vm2278_vm4, 16843009, %v5772_v3  ;;  %v2284_v59 = vunpack.c.0.s8 %v2280_v43  ;;  %vm2279_vm5 = vnez %v2275_v13 }
 0x6b0   : > { %v2082_v36 = vpack.c.bf16 %v2078_v19, %v2076_v25  ;;  %v2285_v22 = vunpack.c.0.s8 %v2281_v14  ;;  %v2286_v29 = vunpack.c.0.s8 %v2282_v26  ;;  %v2283_v25 = vsel %vm2279_vm5, 16843009, %v5772_v3 }
 0x6b1   : > { %2084 = vxpose.xlu1.c.b16.end [2/2] (short) %v2081_v11, 128  ;;  %vm6677_vm6 = vcmp.ne.s32.totalorder %v2284_v59, 0  ;;  %v2287_v41 = vunpack.c.0.s8 %v2283_v25 }
 0x6b2   : > { %2100 = vxpose.xlu0.c.b16.end [2/2] (short) %v2082_v36, 128  ;;  %vm6681_vm7 = vcmp.ne.s32.totalorder %v2285_v22, 0  ;;  %vm6685_vm9 = vcmp.ne.s32.totalorder %v2286_v29, 0 }
 0x6b3   : > { %vm2291_vm10 = vcmp.ne.s32.totalorder %v2287_v41, 0 }
 0x713   : > { %v2091_v61 = vpop.trf.xlu1 }
 0x714   : > { %2115 = vxpose.xlu1.c.b16.start [1/8] (narrow) %v2091_v61, 32  ;;  %v2107_v45 = vpop.trf.xlu0 }
 0x715   : > { %2131 = vxpose.xlu0.c.b16.start [1/8] (narrow) %v2107_v45, 32 }
 0x717   : > { %v2092_v62 = vpop.trf.xlu1 }
 0x718   : > { %2116 = vxpose.xlu1.c.b16.cont [2/8] (narrow) %v2092_v62, 32  ;;  %v2108_v63 = vpop.trf.xlu0 }
 0x719   : > { %2132 = vxpose.xlu0.c.b16.cont [2/8] (narrow) %v2108_v63, 32 }
 0x71b   : > { %v2093_v55 = vpop.trf.xlu1 }
 0x71c   : > { %2117 = vxpose.xlu1.c.b16.cont [3/8] (narrow) %v2093_v55, 32  ;;  %v2109_v18 = vpop.trf.xlu0 }
 0x71d   : > { %2133 = vxpose.xlu0.c.b16.cont [3/8] (narrow) %v2109_v18, 32 }
 0x71f   : > { %v2094_v54 = vpop.trf.xlu1 }
 0x720   : > { %2118 = vxpose.xlu1.c.b16.cont [4/8] (narrow) %v2094_v54, 32  ;;  %v2110_v35 = vpop.trf.xlu0 }
 0x721   : > { %2134 = vxpose.xlu0.c.b16.cont [4/8] (narrow) %v2110_v35, 32 }
 0x723   : > { %v2095_v21 = vpop.trf.xlu1 }
 0x724   : > { %2119 = vxpose.xlu1.c.b16.cont [5/8] (narrow) %v2095_v21, 32  ;;  %v2111_v23 = vpop.trf.xlu0 }
 0x725   : > { %2135 = vxpose.xlu0.c.b16.cont [5/8] (narrow) %v2111_v23, 32 }
 0x727   : > { %v2096_v24 = vpop.trf.xlu1 }
 0x728   : > { %2120 = vxpose.xlu1.c.b16.cont [6/8] (narrow) %v2096_v24, 32  ;;  %v2112_v60 = vpop.trf.xlu0 }
 0x729   : > { %2136 = vxpose.xlu0.c.b16.cont [6/8] (narrow) %v2112_v60, 32 }
 0x72b   : > { %v2097_v47 = vpop.trf.xlu1 }
 0x72c   : > { %2121 = vxpose.xlu1.c.b16.cont [7/8] (narrow) %v2097_v47, 32  ;;  %v2113_v0 = vpop.trf.xlu0 }
 0x72d   : > { %2137 = vxpose.xlu0.c.b16.cont [7/8] (narrow) %v2113_v0, 32 }
 0x72f   : > { %v2098_v57 = vpop.trf.xlu1 }
 0x730   : > { %2122 = vxpose.xlu1.c.b16.end [8/8] (narrow) %v2098_v57, 32  ;;  %v2114_v46 = vpop.trf.xlu0 }
 0x731   : > { %2138 = vxpose.xlu0.c.b16.end [8/8] (narrow) %v2114_v46, 32 }
 0x77a   : > { %v2123_v37 = vpop.trf.xlu1 }
 0x77b   : > { %4627 = vmatprep.mubr.bf16.mxu0 %v2123_v37  ;;  %v2139_v2 = vpop.trf.xlu0 }
 0x77c   : > { %4647 = vmatprep.mubr.bf16.mxu1 %v2139_v2 }
 0x77e   : > { %v2124_v44 = vpop.trf.xlu1 }
 0x77f   : > { %4628 = vmatmul.mubr.bf16.vlgmr.msra.gmra.mrb[8].mxu0 %v2124_v44  ;;  %v2140_v1 = vpop.trf.xlu0 }
 0x780   : > { %4648 = vmatmul.mubr.bf16.vlgmr.msra.gmra.mrb[0].mxu1 %v2140_v1 }
 0x852   : > { %v4629_v11 = vpop.f32.mrb[8].mxu0 }
 0x853   : > { %v2197_v36 = vpop.f32.mrb[9].mxu0  ;;  %v4649_v42 = vpop.f32.mrb[0].mxu1  ;;  %v2302_v55 = vsel %vm6685_vm9, %v4629_v11, -1e+09 }
 0x854   : > { %v2300_v16 = vsel %vm6677_vm6, %v2197_v36, -1e+09  ;;  %v4630_v17 = vpop.f32.mrb[10].mxu0  ;;  %v2246_v38 = vpop.f32.mrb[1].mxu1  ;;  %v2306_v20 = vsel %vm6685_vm9, %v4649_v42, -1e+09 }
 0x855   : > { %v2200_v52 = vpop.f32.mrb[11].mxu0  ;;  %v4650_v53 = vpop.f32.mrb[2].mxu1  ;;  %v2309_v15 = vsel %vm2308_vm8, %v2300_v16, -inf  ;;  %v2327_v9 = vsel %vm2308_vm8, %v2306_v20, -inf  ;;  %v2304_v61 = vsel %vm6677_vm6, %v2246_v38, -1e+09 }
 0x856   : > { %v2301_v56 = vsel %vm6681_vm7, %v2200_v52, -1e+09  ;;  %v2249_v58 = vpop.f32.mrb[3].mxu1  ;;  %2310 = vmax.xlane.f32.xlu0 %v2309_v15  ;;  %v2307_v48 = vsel %vm2291_vm10, %v4650_v53, -1e+09  ;;  %v2321_v63 = vsel %vm2308_vm8, %v2304_v61, -inf }
 0x857   : > { %v2312_v27 = vsel %vm2308_vm8, %v2301_v56, -inf  ;;  %v2330_v45 = vsel %vm2308_vm8, %v2307_v48, -inf  ;;  %v2305_v62 = vsel %vm6681_vm7, %v2249_v58, -1e+09  ;;  %v2303_v54 = vsel %vm2291_vm10, %v4630_v17, -1e+09 }
 0x858   : > { %2313 = vmax.xlane.f32.xlu1 %v2312_v27  ;;  %v2324_v18 = vsel %vm2308_vm8, %v2305_v62, -inf  ;;  %v2315_v35 = vsel %vm2308_vm8, %v2302_v55, -inf  ;;  %v2318_v21 = vsel %vm2308_vm8, %v2303_v54, -inf  ;;  %v2401_v17 = vld [vmem:[#allocation3] sm:$0xff]  ;;  %v2406_v38 = vld [vmem:[#allocation3 + $0x28] sm:$0xff]  ;;  %v2407_v52 = vld [vmem:[#allocation3 + $0x30] sm:$0xff] }
 0x859   : > { %4651 = vmatprep.subr.bf16.mxu0 %v2401_v17  ;;  %v2403_v53 = vld [vmem:[#allocation3 + $0x10] sm:$0xff]  ;;  %v2404_v15 = vld [vmem:[#allocation3 + $0x18] sm:$0xff] }
 0x85a   : > { %2328 = vmax.xlane.f32.xlu0 %v2327_v9  ;;  %4652 = vmatpush3.bf16.msra.mxu0 %v2401_v17  ;;  %v5056_v17 = vld [vmem:[#allocation15 + $0x74] ss:$8 sps:$4 sm:$0xff]  }
 0x85c   : > { %2331 = vmax.xlane.f32.xlu1 %v2330_v45 }
 0x85e   : > { %2322 = vmax.xlane.f32.xlu0 %v2321_v63 }
 0x860   : > { %2325 = vmax.xlane.f32.xlu1 %v2324_v18 }
 0x862   : > { %2316 = vmax.xlane.f32.xlu0 %v2315_v35 }
 0x864   : > { %2319 = vmax.xlane.f32.xlu1 %v2318_v21 }
 0x8e3   : > { %v2311_v23 = vpop.xlane.xlu0 %2310 }
 0x8e4   : > { %v2333_v24 = vsub.f32 %v2300_v16, %v2311_v23  ;;  %v2405_v16 = vld [vmem:[#allocation3 + $0x20] sm:$0xff] }
 0x8e5   : > { %v2314_v60 = vpop.xlane.xlu1 %2313  ;;  %4663 = vmatprep.subr.bf16.mxu1 %v2405_v16 }
 0x8e6   : > { %v2334_v47 = vsub.f32 %v2301_v56, %v2314_v60  ;;  %v2341_v0 = vmul.f32 1.442695, %v2333_v24  ;;  %4664 = vmatpush3.bf16.msra.mxu1 %v2405_v16  ;;  %v2408_v56 = vld [vmem:[#allocation3 + $0x38] sm:$0xff] }
 0x8e7   : > { %v2329_v46 = vpop.xlane.xlu0 %2328  ;;  %4665 = vmatprep.subr.bf16.mxu1 %v2406_v38  ;;  %v5051_v16 = vld [vmem:[#allocation15 + $0x60] ss:$8 sps:$4 sm:$0xff]  }
 0x8e8   : > { %v2343_v57 = vmul.f32 1.442695, %v2334_v47  ;;  %5281 = vpow2.f32 %v2341_v0  ;;  %v2339_v37 = vsub.f32 %v2306_v20, %v2329_v46  ;;  %v2402_v20 = vld [vmem:[#allocation3 + $0x8] sm:$0xff] }
 0x8e9   : > { %v2332_v2 = vpop.xlane.xlu1 %2331  ;;  %4653 = vmatprep.subr.bf16.mxu0 %v2402_v20 }
 0x8ea   : > { %5283 = vpow2.f32 %v2343_v57  ;;  %v2340_v44 = vsub.f32 %v2307_v48, %v2332_v2  ;;  %v2353_v1 = vmul.f32 1.442695, %v2339_v37  ;;  %4666 = vmatpush3.bf16.msra.mxu1 %v2406_v38  ;;  %4654 = vmatpush3.bf16.msra.mxu0 %v2402_v20  ;;  %v5054_v38 = vld [vmem:[#allocation15 + $0x70] ss:$8 sps:$4 sm:$0xff]   ;;  %v5059_v20 = vld [vmem:[#allocation15 + $0x84] ss:$8 sps:$4 sm:$0xff]  }
 0x8eb   : > { %v2323_v3 = vpop.xlane.xlu0 %2322  ;;  %4667 = vmatprep.subr.bf16.mxu1 %v2407_v52  ;;  %4655 = vmatprep.subr.bf16.mxu0 %v2403_v53 }
 0x8ec   : > { %v2355_v7 = vmul.f32 1.442695, %v2340_v44  ;;  %5285 = vpow2.f32 %v2353_v1  ;;  %v2337_v30 = vsub.f32 %v2304_v61, %v2323_v3 }
 0x8ed   : > { %v2326_v31 = vpop.xlane.xlu1 %2325 }
 0x8ee   : > { %5287 = vpow2.f32 %v2355_v7  ;;  %v2338_v32 = vsub.f32 %v2305_v62, %v2326_v31  ;;  %v2349_v33 = vmul.f32 1.442695, %v2337_v30  ;;  %4668 = vmatpush3.bf16.msra.mxu1 %v2407_v52  ;;  %4656 = vmatpush3.bf16.msra.mxu0 %v2403_v53  ;;  %v5057_v52 = vld [vmem:[#allocation15 + $0x80] ss:$8 sps:$4 sm:$0xff]   ;;  %v5062_v53 = vld [vmem:[#allocation15 + $0x94] ss:$8 sps:$4 sm:$0xff]  }
 0x8ef   : > { %v2317_v6 = vpop.xlane.xlu0 %2316  ;;  %4669 = vmatprep.subr.bf16.mxu1 %v2408_v56  ;;  %4657 = vmatprep.subr.bf16.mxu0 %v2404_v15 }
 0x8f0   : > { %v2351_v5 = vmul.f32 1.442695, %v2338_v32  ;;  %5289 = vpow2.f32 %v2349_v33  ;;  %v2335_v34 = vsub.f32 %v2302_v55, %v2317_v6 }
 0x8f1   : > { %v2320_v51 = vpop.xlane.xlu1 %2319 }
 0x8f2   : > { %5291 = vpow2.f32 %v2351_v5  ;;  %v2336_v8 = vsub.f32 %v2303_v54, %v2320_v51  ;;  %v6709_v4 = vpop.eup %5281  ;;  %v2345_v39 = vmul.f32 1.442695, %v2335_v34  ;;  %4670 = vmatpush3.bf16.msra.mxu1 %v2408_v56  ;;  %4658 = vmatpush3.bf16.msra.mxu0 %v2404_v15  ;;  %v5060_v56 = vld [vmem:[#allocation15 + $0x90] ss:$8 sps:$4 sm:$0xff]   ;;  %v5065_v15 = vld [vmem:[#allocation15 + $0xa4] ss:$8 sps:$4 sm:$0xff]  }
 0x8f3   : > { %v2357_v43 = vsel %vm2308_vm8, %v6709_v4, 0.0 }
 0x8f4   : > { %v6711_v40 = vpop.eup %5283  ;;  %v2347_v13 = vmul.f32 1.442695, %v2336_v8  ;;  %5293 = vpow2.f32 %v2345_v39  ;;  %2358 = vadd.xlane.f32.xlu0 %v2357_v43 }
 0x8f5   : > { %v2360_v14 = vsel %vm2308_vm8, %v6711_v40, 0.0 }
 0x8f6   : > { %5295 = vpow2.f32 %v2347_v13  ;;  %2361 = vadd.xlane.f32.xlu1 %v2360_v14  ;;  %v6717_v26 = vpop.eup %5285  ;;  %v5033_v14 = vld [vmem:[#allocation15] ss:$8 sps:$4 sm:$0xff]  }
 0x8f7   : > { %v2375_v22 = vsel %vm2308_vm8, %v6717_v26, 0.0 }
 0x8f8   : > { %v6719_v59 = vpop.eup %5287  ;;  %2376 = vadd.xlane.f32.xlu0 %v2375_v22  ;;  %v5036_v22 = vld [vmem:[#allocation15 + $0x10] ss:$8 sps:$4 sm:$0xff]  }
 0x8f9   : > { %v2378_v29 = vsel %vm2308_vm8, %v6719_v59, 0.0 }
 0x8fa   : > { %2379 = vadd.xlane.f32.xlu1 %v2378_v29  ;;  %v6725_v25 = vpop.eup %5289  ;;  %v5041_v29 = vld [vmem:[#allocation15 + $0x24] ss:$8 sps:$4 sm:$0xff]  }
 0x8fb   : > { %v2369_v11 = vsel %vm2308_vm8, %v6725_v25, 0.0 }
 0x8fc   : > { %v6727_v19 = vpop.eup %5291  ;;  %2370 = vadd.xlane.f32.xlu0 %v2369_v11  ;;  %v5042_v11 = vld [vmem:[#allocation15 + $0x30] ss:$8 sps:$4 sm:$0xff]  }
 0x8fd   : > { %v2372_v36 = vsel %vm2308_vm8, %v6727_v19, 0.0 }
 0x8fe   : > { %2373 = vadd.xlane.f32.xlu1 %v2372_v36  ;;  %v6733_v41 = vpop.eup %5293  ;;  %v5047_v36 = vld [vmem:[#allocation15 + $0x44] ss:$8 sps:$4 sm:$0xff]  }
 0x8ff   : > { %v2363_v49 = vsel %vm2308_vm8, %v6733_v41, 0.0 }
 0x900   : > { %v6735_v42 = vpop.eup %5295  ;;  %2364 = vadd.xlane.f32.xlu0 %v2363_v49  ;;  %v5048_v49 = vld [vmem:[#allocation15 + $0x50] ss:$8 sps:$4 sm:$0xff]  }
 0x901   : > { %v2366_v50 = vsel %vm2308_vm8, %v6735_v42, 0.0 }
 0x902   : > { %2367 = vadd.xlane.f32.xlu1 %v2366_v50  ;;  %v5053_v50 = vld [vmem:[#allocation15 + $0x64] ss:$8 sps:$4 sm:$0xff]  }
 0x981   : > { %v2359_v58 = vpop.xlane.xlu0 %2358 }
 0x982   : > { %5297 = vrcp.f32 %v2359_v58  ;;  %v5063_v58 = vld [vmem:[#allocation15 + $0xa0] ss:$8 sps:$4 sm:$0xff]  }
 0x983   : > { %v2362_v27 = vpop.xlane.xlu1 %2361 }
 0x984   : > { %5299 = vrcp.f32 %v2362_v27  ;;  %v5068_v27 = vld [vmem:[#allocation15 + $0xb4] ss:$8 sps:$4 sm:$0xff]  }
 0x985   : > { %v2377_v48 = vpop.xlane.xlu0 %2376 }
 0x987   : > { %v2380_v9 = vpop.xlane.xlu1 %2379 }
 0x988   : > { %5301 = vrcp.f32 %v2380_v9  ;;  %v5071_v9 = vld [vmem:[#allocation15 + $0xc4] ss:$8 sps:$4 sm:$0xff]  }
 0x989   : > { %5303 = vrcp.f32 %v2377_v48  ;;  %v2371_v61 = vpop.xlane.xlu0 %2370  ;;  %v5066_v48 = vld [vmem:[#allocation15 + $0xb0] ss:$8 sps:$4 sm:$0xff]  }
 0x98a   : > { %5305 = vrcp.f32 %v2371_v61  ;;  %v5069_v61 = vld [vmem:[#allocation15 + $0xc0] ss:$8 sps:$4 sm:$0xff]  }
 0x98b   : > { %v2374_v45 = vpop.xlane.xlu1 %2373 }
 0x98c   : > { %5307 = vrcp.f32 %v2374_v45  ;;  %v5298_v62 = vpop.eup %5297  ;;  %v5074_v45 = vld [vmem:[#allocation15 + $0xd4] ss:$8 sps:$4 sm:$0xff]  }
 0x98d   : > { %v2365_v55 = vpop.xlane.xlu0 %2364  ;;  %v2389_v54 = vmul.f32 %v5298_v62, %v6709_v4  ;;  %v5072_v62 = vld [vmem:[#allocation15 + $0xd0] ss:$8 sps:$4 sm:$0xff]  }
 0x98e   : > { %v5300_v63 = vpop.eup %5299  ;;  %5309 = vrcp.f32 %v2365_v55  ;;  %v5075_v55 = vld [vmem:[#allocation15 + $0xe0] ss:$8 sps:$4 sm:$0xff]  }
 0x98f   : > { %v2368_v18 = vpop.xlane.xlu1 %2367  ;;  %v2390_v35 = vmul.f32 %v5300_v63, %v6711_v40  ;;  %v5077_v63 = vld [vmem:[#allocation15 + $0xe4] ss:$8 sps:$4 sm:$0xff]  }
 0x990   : > { %5311 = vrcp.f32 %v2368_v18  ;;  %v5080_v18 = vld [vmem:[#allocation15 + $0xf4] ss:$8 sps:$4 sm:$0xff]  }
 0x991   : > { %v2397_v21 = vpack.c.bf16 %v2390_v35, %v2389_v54  ;;  %v5078_v54 = vld [vmem:[#allocation15 + $0xf0] ss:$8 sps:$4 sm:$0xff]  }
 0x992   : > { %v5302_v23 = vpop.eup %5301 }
 0x993   : > { %4659 = vmatprep.mubr.msk.bf16.mxu0 %vm2308_vm8, %v2397_v21  ;;  %v5304_v24 = vpop.eup %5303  ;;  %v2396_v0 = vmul.f32 %v5302_v23, %v6719_v59  ;;  %v5038_v59 = vld [vmem:[#allocation15 + $0x14] ss:$8 sps:$4 sm:$0xff]  }
 0x994   : > { %v5306_v60 = vpop.eup %5305  ;;  %v2395_v37 = vmul.f32 %v5304_v24, %v6717_v26  ;;  %v5035_v26 = vld [vmem:[#allocation15 + $0x4] ss:$8 sps:$4 sm:$0xff]  }
 0x995   : > { %v2393_v57 = vmul.f32 %v5306_v60, %v6725_v25  ;;  %2791 = vmatprep.subr.bf16.mxu0 %v5035_v26  ;;  %v5039_v25 = vld [vmem:[#allocation15 + $0x20] ss:$8 sps:$4 sm:$0xff]  }
 0x996   : > { %v5308_v47 = vpop.eup %5307  ;;  %v2400_v7 = vpack.c.bf16 %v2396_v0, %v2395_v37 }
 0x997   : > { %v2394_v46 = vmul.f32 %v5308_v47, %v6727_v19  ;;  %v5044_v19 = vld [vmem:[#allocation15 + $0x34] ss:$8 sps:$4 sm:$0xff]  }
 0x998   : > { %v5310_v2 = vpop.eup %5309 }
 0x999   : > { %v2399_v44 = vpack.c.bf16 %v2394_v46, %v2393_v57  ;;  %v2391_v3 = vmul.f32 %v5310_v2, %v6733_v41  ;;  %v5045_v41 = vld [vmem:[#allocation15 + $0x40] ss:$8 sps:$4 sm:$0xff]  }
 0x99a   : > { %v5312_v1 = vpop.eup %5311 }
 0x99b   : > { %v2392_v30 = vmul.f32 %v5312_v1, %v6735_v42  ;;  %4671 = vmatprep.mubr.msk.bf16.mxu1 %vm2308_vm8, %v2399_v44  ;;  %v5050_v42 = vld [vmem:[#allocation15 + $0x54] ss:$8 sps:$4 sm:$0xff]  }
 0x99c   : > { %4672 = vmatmul.mubr.msk.bf16.vlgmr.msra.gmra.mrb[4].mxu1 %vm2308_vm8, %v2400_v7 }
 0x99d   : > { %v2398_v31 = vpack.c.bf16 %v2392_v30, %v2391_v3 }
 0x99f   : > { %4660 = vmatmul.mubr.msk.bf16.vlgmr.msra.gmra.mrb[12].mxu0 %vm2308_vm8, %v2398_v31 }
 0x9a0   : > { %2792 = vmatpush1.bf16.msra.mxu0 %v5033_v14 }
 0x9a1   : > { %2793 = vmatprep.subr.bf16.mxu0 %v5038_v59 }
 0x9a4   : > { %2794 = vmatpush1.bf16.msra.mxu0 %v5036_v22  ;;  %v5354_v22 = vld [vmem:[%s6283_s2 + $0x8] sm:$0xff] }
 0x9a5   : > { %2795 = vmatprep.subr.bf16.mxu0 %v5041_v29 }
 0x9a8   : > { %2796 = vmatpush1.bf16.msra.mxu0 %v5039_v25 }
 0x9a9   : > { %2797 = vmatprep.subr.bf16.mxu0 %v5044_v19  ;;  %v5355_v19 = vld [vmem:[%s6283_s2 + $0x10] sm:$0xff] }
 0x9ac   : > { %2798 = vmatpush1.bf16.msra.mxu0 %v5042_v11 }
 0x9ad   : > { %2799 = vmatprep.subr.bf16.mxu0 %v5047_v36  ;;  %v5356_v36 = vld [vmem:[%s6283_s2 + $0x18] sm:$0xff] }
 0x9b0   : > { %2800 = vmatpush1.bf16.msra.mxu0 %v5045_v41 }
 0x9b1   : > { %2801 = vmatprep.subr.bf16.mxu0 %v5050_v42 }
 0x9b4   : > { %2802 = vmatpush1.bf16.msra.mxu0 %v5048_v49 }
 0x9b5   : > { %2803 = vmatprep.subr.bf16.mxu0 %v5053_v50 }
 0x9b8   : > { %2804 = vmatpush1.bf16.msra.mxu0 %v5051_v16 }
 0x9b9   : > { %2805 = vmatprep.subr.bf16.mxu0 %v5056_v17 }
 0x9bc   : > { %2806 = vmatpush1.bf16.msra.mxu0 %v5054_v38 }
 0x9bd   : > { %2807 = vmatprep.subr.bf16.mxu0 %v5059_v20 }
 0x9c0   : > { %2808 = vmatpush1.bf16.msra.mxu0 %v5057_v52  ;;  %v5357_v52 = vld [vmem:[%s6283_s2 + $0x20] sm:$0xff] }
 0x9c1   : > { %2809 = vmatprep.subr.bf16.mxu0 %v5062_v53 }
 0x9c4   : > { %2810 = vmatpush1.bf16.msra.mxu0 %v5060_v56 }
 0x9c5   : > { %2811 = vmatprep.subr.bf16.mxu0 %v5065_v15 }
 0x9c8   : > { %2812 = vmatpush1.bf16.msra.mxu0 %v5063_v58  ;;  %v5358_v58 = vld [vmem:[%s6283_s2 + $0x28] sm:$0xff] }
 0x9c9   : > { %2813 = vmatprep.subr.bf16.mxu0 %v5068_v27 }
 0x9cc   : > { %2814 = vmatpush1.bf16.msra.mxu0 %v5066_v48 }
 0x9cd   : > { %2815 = vmatprep.subr.bf16.mxu0 %v5071_v9  ;;  %v5359_v9 = vld [vmem:[%s6283_s2 + $0x30] sm:$0xff] }
 0x9d0   : > { %2816 = vmatpush1.bf16.msra.mxu0 %v5069_v61 }
 0x9d1   : > { %2817 = vmatprep.subr.bf16.mxu0 %v5074_v45  ;;  %v5360_v45 = vld [vmem:[%s6283_s2 + $0x38] sm:$0xff] }
 0x9d4   : > { %2818 = vmatpush1.bf16.msra.mxu0 %v5072_v62 }
 0x9d5   : > { %2819 = vmatprep.subr.bf16.mxu0 %v5077_v63 }
 0x9d8   : > { %2820 = vmatpush1.bf16.msra.mxu0 %v5075_v55 }
 0x9d9   : > { %2821 = vmatprep.subr.bf16.mxu0 %v5080_v18  ;;  %v5081_v18 = vld [vmem:[#allocation16] ss:$16 sps:$4 sm:$0xff]  }
 0x9dc   : > { %2822 = vmatpush1.bf16.msra.mxu0 %v5078_v54  ;;  %v5083_v54 = vld [vmem:[#allocation16 + $0x4] ss:$16 sps:$4 sm:$0xff]  }
 0x9dd   : > { %3366 = vmatprep.subr.bf16.mxu1 %v5083_v54 }
 0x9de   : > { %3367 = vmatpush1.bf16.msra.mxu1 %v5081_v18 }
 0xa6f   : > { %v4673_v32 = vpop.f32.mrb[4].mxu1 }
 0xa70   : > { %v2504_v33 = vpop.f32.mrb[5].mxu1 }
 0xa71   : > { %v4674_v5 = vpop.f32.mrb[6].mxu1 }
 0xa72   : > { %v2522_v6 = vpack.c.bf16 %v4674_v5, %v4673_v32  ;;  %v4661_v34 = vpop.f32.mrb[12].mxu0  ;;  %v2507_v51 = vpop.f32.mrb[7].mxu1 }
 0xa73   : > { %v2521_v8 = vpack.c.bf16 %v2507_v51, %v2504_v33  ;;  %v2449_v4 = vpop.f32.mrb[13].mxu0 }
 0xa74   : > { %v4662_v39 = vpop.f32.mrb[14].mxu0 }
 0xa75   : > { %v2520_v40 = vpack.c.bf16 %v4662_v39, %v4661_v34  ;;  %2539 = vxpose.xlu0.c.b16.start [1/2] (short) %v2521_v8, 128  ;;  %v2452_v13 = vpop.f32.mrb[15].mxu0 }
 0xa76   : > { %v2519_v43 = vpack.c.bf16 %v2452_v13, %v2449_v4 }
 0xa78   : > { %2523 = vxpose.xlu1.c.b16.start [1/2] (short) %v2519_v43, 128  ;;  %v5353_v43 = vld [vmem:[%s6283_s2] sm:$0xff] }
 0xa79   : > { %2540 = vxpose.xlu0.c.b16.end [2/2] (short) %v2522_v6, 128  ;;  %v2619_v6 = vld [vmem:[%s7160_s26] sm:$0x3]  ;;  %s7167_s26 = sld [smem:[#allocation56_spill]] }
 0xa7a   : > { %v2624_v34 = vrot.slane %v2619_v6, %v6648_v28  ;;  %v2628_v51 = vrot.slane %v2619_v6, %v6651_v10  ;;  %v5111_v6 = vld [vmem:[#allocation16 + $0xa0] ss:$16 sps:$4 sm:$0xff]  }
 0xa7c   : > { %2524 = vxpose.xlu1.c.b16.end [2/2] (short) %v2520_v40, 128 }
 0xa7f   : > { %s6939_s2 = scalar_lea.hbm %s7167_s26, %s4573_s23 }
 0xadb   : > { %v2547_v35 = vpop.trf.xlu0 }
 0xadc   : > { %2571 = vxpose.xlu0.c.b16.start [1/8] (narrow) %v2547_v35, 32  ;;  %v5084_v35 = vld [vmem:[#allocation16 + $0x8] ss:$16 sps:$4 sm:$0xff]  }
 0xade   : > { %v2531_v21 = vpop.trf.xlu1 }
 0xadf   : > { %2555 = vxpose.xlu1.c.b16.start [1/8] (narrow) %v2531_v21, 32  ;;  %v2548_v23 = vpop.trf.xlu0  ;;  %v5086_v21 = vld [vmem:[#allocation16 + $0xc] ss:$16 sps:$4 sm:$0xff]  }
 0xae0   : > { %2572 = vxpose.xlu0.c.b16.cont [2/8] (narrow) %v2548_v23, 32  ;;  %v5089_v23 = vld [vmem:[#allocation16 + $0x24] ss:$16 sps:$4 sm:$0xff]   ;;  %3419 = vmatprep.subr.bf16.mxu0 %v5086_v21 }
 0xae1   : > { %3368 = vmatprep.subr.bf16.mxu1 %v5089_v23 }
 0xae2   : > { %v2532_v24 = vpop.trf.xlu1 }
 0xae3   : > { %2556 = vxpose.xlu1.c.b16.cont [2/8] (narrow) %v2532_v24, 32  ;;  %v2549_v60 = vpop.trf.xlu0  ;;  %v5092_v24 = vld [vmem:[#allocation16 + $0x2c] ss:$16 sps:$4 sm:$0xff]  }
 0xae4   : > { %2573 = vxpose.xlu0.c.b16.cont [3/8] (narrow) %v2549_v60, 32  ;;  %v5087_v60 = vld [vmem:[#allocation16 + $0x20] ss:$16 sps:$4 sm:$0xff]  }
 0xae5   : > { %3369 = vmatpush1.bf16.msra.mxu1 %v5087_v60 }
 0xae6   : > { %v2533_v47 = vpop.trf.xlu1 }
 0xae7   : > { %2557 = vxpose.xlu1.c.b16.cont [3/8] (narrow) %v2533_v47, 32  ;;  %v2550_v0 = vpop.trf.xlu0  ;;  %v5090_v47 = vld [vmem:[#allocation16 + $0x28] ss:$16 sps:$4 sm:$0xff]  }
 0xae8   : > { %2574 = vxpose.xlu0.c.b16.cont [4/8] (narrow) %v2550_v0, 32  ;;  %v5095_v0 = vld [vmem:[#allocation16 + $0x44] ss:$16 sps:$4 sm:$0xff]  }
 0xae9   : > { %3370 = vmatprep.subr.bf16.mxu1 %v5095_v0 }
 0xaea   : > { %v2534_v57 = vpop.trf.xlu1 }
 0xaeb   : > { %2558 = vxpose.xlu1.c.b16.cont [4/8] (narrow) %v2534_v57, 32  ;;  %v2551_v46 = vpop.trf.xlu0  ;;  %v5098_v57 = vld [vmem:[#allocation16 + $0x4c] ss:$16 sps:$4 sm:$0xff]  }
 0xaec   : > { %2575 = vxpose.xlu0.c.b16.cont [5/8] (narrow) %v2551_v46, 32  ;;  %v5093_v46 = vld [vmem:[#allocation16 + $0x40] ss:$16 sps:$4 sm:$0xff]  }
 0xaed   : > { %3371 = vmatpush1.bf16.msra.mxu1 %v5093_v46 }
 0xaee   : > { %v2535_v37 = vpop.trf.xlu1 }
 0xaef   : > { %2559 = vxpose.xlu1.c.b16.cont [5/8] (narrow) %v2535_v37, 32  ;;  %v2552_v2 = vpop.trf.xlu0  ;;  %v5096_v37 = vld [vmem:[#allocation16 + $0x48] ss:$16 sps:$4 sm:$0xff]  }
 0xaf0   : > { %2576 = vxpose.xlu0.c.b16.cont [6/8] (narrow) %v2552_v2, 32  ;;  %v5101_v2 = vld [vmem:[#allocation16 + $0x64] ss:$16 sps:$4 sm:$0xff]  }
 0xaf1   : > { %3372 = vmatprep.subr.bf16.mxu1 %v5101_v2 }
 0xaf2   : > { %v2536_v44 = vpop.trf.xlu1 }
 0xaf3   : > { %2560 = vxpose.xlu1.c.b16.cont [6/8] (narrow) %v2536_v44, 32  ;;  %v2553_v1 = vpop.trf.xlu0  ;;  %v5104_v44 = vld [vmem:[#allocation16 + $0x6c] ss:$16 sps:$4 sm:$0xff]  }
 0xaf4   : > { %2577 = vxpose.xlu0.c.b16.cont [7/8] (narrow) %v2553_v1, 32  ;;  %v5099_v1 = vld [vmem:[#allocation16 + $0x60] ss:$16 sps:$4 sm:$0xff]  }
 0xaf5   : > { %3373 = vmatpush1.bf16.msra.mxu1 %v5099_v1 }
 0xaf6   : > { %v2537_v7 = vpop.trf.xlu1 }
 0xaf7   : > { %2561 = vxpose.xlu1.c.b16.cont [7/8] (narrow) %v2537_v7, 32  ;;  %v2554_v3 = vpop.trf.xlu0  ;;  %v5102_v7 = vld [vmem:[#allocation16 + $0x68] ss:$16 sps:$4 sm:$0xff]  }
 0xaf8   : > { %2578 = vxpose.xlu0.c.b16.end [8/8] (narrow) %v2554_v3, 32  ;;  %v5107_v3 = vld [vmem:[#allocation16 + $0x84] ss:$16 sps:$4 sm:$0xff]  }
 0xaf9   : > { %3374 = vmatprep.subr.bf16.mxu1 %v5107_v3  ;;  %v5146_v3 = vld [vmem:[#allocation16 + $0x14c] ss:$16 sps:$4 sm:$0xff]  }
 0xafa   : > { %v2538_v30 = vpop.trf.xlu1 }
 0xafb   : > { %2562 = vxpose.xlu1.c.b16.end [8/8] (narrow) %v2538_v30, 32  ;;  %v5110_v30 = vld [vmem:[#allocation16 + $0x8c] ss:$16 sps:$4 sm:$0xff]  }
 0xb42   : > { %v2579_v31 = vpop.trf.xlu0 }
 0xb43   : > { %2823 = vmatprep.mubr.bf16.mxu0 %v2579_v31  ;;  %v5105_v31 = vld [vmem:[#allocation16 + $0x80] ss:$16 sps:$4 sm:$0xff]  }
 0xb44   : > { %3375 = vmatpush1.bf16.msra.mxu1 %v5105_v31  ;;  %v5144_v31 = vld [vmem:[#allocation16 + $0x148] ss:$16 sps:$4 sm:$0xff]  }
 0xb45   : > { %v2563_v32 = vpop.trf.xlu1 }
 0xb46   : > { %2824 = vmatmul.mubr.bf16.vlgmr.msra.gmra.mrb[16].mxu0 %v2563_v32  ;;  %v2580_v33 = vpop.trf.xlu0  ;;  %v5108_v32 = vld [vmem:[#allocation16 + $0x88] ss:$16 sps:$4 sm:$0xff]  }
 0xb47   : > { %2833 = vmatprep.mubr.bf16.mxu0 %v2580_v33  ;;  %3420 = vmatpush1.bf16.msra.mxu0 %v5084_v35  ;;  %v5113_v33 = vld [vmem:[#allocation16 + $0xa4] ss:$16 sps:$4 sm:$0xff]  }
 0xb48   : > { %3421 = vmatprep.subr.bf16.mxu0 %v5092_v24  ;;  %3376 = vmatprep.subr.bf16.mxu1 %v5113_v33  ;;  %v5152_v33 = vld [vmem:[#allocation16 + $0x16c] ss:$16 sps:$4 sm:$0xff]  }
 0xb49   : > { %v2564_v5 = vpop.trf.xlu1  ;;  %3377 = vmatpush1.bf16.msra.mxu1 %v5111_v6  ;;  %v5150_v6 = vld [vmem:[#allocation16 + $0x168] ss:$16 sps:$4 sm:$0xff]  }
 0xb4b   : > { %3422 = vmatpush1.bf16.msra.mxu0 %v5090_v47 }
 0xb4c   : > { %3423 = vmatprep.subr.bf16.mxu0 %v5098_v57 }
 0xb4e   : > { %2834 = vmatmul.mubr.bf16.gmra.mrb[20].mxu0 %v2564_v5  ;;  %v5116_v5 = vld [vmem:[#allocation16 + $0xac] ss:$16 sps:$4 sm:$0xff]  }
 0xb4f   : > { %3424 = vmatpush1.bf16.msra.mxu0 %v5096_v37 }
 0xb50   : > { %3425 = vmatprep.subr.bf16.mxu0 %v5104_v44 }
 0xb53   : > { %3426 = vmatpush1.bf16.msra.mxu0 %v5102_v7  ;;  %v5143_v7 = vld [vmem:[#allocation16 + $0x144] ss:$16 sps:$4 sm:$0xff]  }
 0xb54   : > { %3427 = vmatprep.subr.bf16.mxu0 %v5110_v30  ;;  %v5141_v30 = vld [vmem:[#allocation16 + $0x140] ss:$16 sps:$4 sm:$0xff]  }
 0xb57   : > { %3428 = vmatpush1.bf16.msra.mxu0 %v5108_v32  ;;  %v5149_v32 = vld [vmem:[#allocation16 + $0x164] ss:$16 sps:$4 sm:$0xff]  }
 0xb58   : > { %3429 = vmatprep.subr.bf16.mxu0 %v5116_v5  ;;  %v5147_v5 = vld [vmem:[#allocation16 + $0x160] ss:$16 sps:$4 sm:$0xff]  }
 0xc19   : > { %v2825_v8 = vpop.f32.mrb[16].mxu0 }
 0xc1a   : > { %v2826_v4 = vadd.f32 %v2825_v8, %v2624_v34  ;;  %v2827_v39 = vpop.f32.mrb[17].mxu0  ;;  %v5122_v8 = vld [vmem:[#allocation16 + $0xcc] ss:$16 sps:$4 sm:$0xff]  }
 0xc1b   : > { %v2828_v40 = vadd.f32 %v2827_v39, %v2628_v51  ;;  %v2829_v13 = vpop.f32.mrb[18].mxu0  ;;  %v5120_v39 = vld [vmem:[#allocation16 + $0xc8] ss:$16 sps:$4 sm:$0xff]  }
 0xc1c   : > { %v6759_v14 = vadd.f32 %v5353_v43, %v2826_v4  ;;  %v2830_v26 = vadd.f32 %v2829_v13, %v2624_v34  ;;  %v2831_v59 = vpop.f32.mrb[19].mxu0  ;;  %v5117_v4 = vld [vmem:[#allocation16 + $0xc0] ss:$16 sps:$4 sm:$0xff]   ;;  %v5128_v13 = vld [vmem:[#allocation16 + $0xec] ss:$16 sps:$4 sm:$0xff]  }
 0xc1d   : > { %v6762_v29 = vadd.f32 %v5354_v22, %v2828_v40  ;;  %v2832_v25 = vadd.f32 %v2831_v59, %v2628_v51  ;;  %v5125_v40 = vld [vmem:[#allocation16 + $0xe4] ss:$16 sps:$4 sm:$0xff]   ;;  %v5123_v43 = vld [vmem:[#allocation16 + $0xe0] ss:$16 sps:$4 sm:$0xff]   ;;  %v5134_v22 = vld [vmem:[#allocation16 + $0x10c] ss:$16 sps:$4 sm:$0xff]  }
 0xc1e   : > { %v6765_v11 = vadd.f32 %v5355_v19, %v2830_v26  ;;  %v5126_v26 = vld [vmem:[#allocation16 + $0xe8] ss:$16 sps:$4 sm:$0xff]   ;;  %v5131_v59 = vld [vmem:[#allocation16 + $0x104] ss:$16 sps:$4 sm:$0xff]  }
 0xc1f   : > { %v6768_v41 = vadd.f32 %v5356_v36, %v2832_v25  ;;  %v2854_v42 = vadd.f32 %v6762_v29, %v6759_v14  ;;  %v5129_v25 = vld [vmem:[#allocation16 + $0x100] ss:$16 sps:$4 sm:$0xff]   ;;  %v5132_v19 = vld [vmem:[#allocation16 + $0x108] ss:$16 sps:$4 sm:$0xff]   ;;  %v5137_v36 = vld [vmem:[#allocation16 + $0x124] ss:$16 sps:$4 sm:$0xff]  }
 0xc21   : > { %2855 = vadd.xlane.f32.xlu0 %v2854_v42  ;;  %v2835_v49 = vpop.f32.mrb[20].mxu0  ;;  %v2857_v50 = vadd.f32 %v6768_v41, %v6765_v11  ;;  %v5140_v42 = vld [vmem:[#allocation16 + $0x12c] ss:$16 sps:$4 sm:$0xff]  }
 0xc22   : > { %v2836_v16 = vadd.f32 %v2835_v49, %v2624_v34  ;;  %v2837_v17 = vpop.f32.mrb[21].mxu0  ;;  %v5135_v49 = vld [vmem:[#allocation16 + $0x120] ss:$16 sps:$4 sm:$0xff]  }
 0xc23   : > { %v2838_v38 = vadd.f32 %v2837_v17, %v2628_v51  ;;  %2858 = vadd.xlane.f32.xlu1 %v2857_v50  ;;  %v2839_v20 = vpop.f32.mrb[22].mxu0  ;;  %v5138_v50 = vld [vmem:[#allocation16 + $0x128] ss:$16 sps:$4 sm:$0xff]  }
 0xc24   : > { %v6775_v53 = vadd.f32 %v5357_v52, %v2836_v16  ;;  %v2840_v56 = vadd.f32 %v2839_v20, %v2624_v34  ;;  %v2841_v15 = vpop.f32.mrb[23].mxu0  ;;  %v5114_v34 = vld [vmem:[#allocation16 + $0xa8] ss:$16 sps:$4 sm:$0xff]  }
 0xc25   : > { %v6778_v27 = vadd.f32 %v5358_v58, %v2838_v38  ;;  %v2842_v48 = vadd.f32 %v2841_v15, %v2628_v51  ;;  %v5119_v51 = vld [vmem:[#allocation16 + $0xc4] ss:$16 sps:$4 sm:$0xff]   ;;  %3430 = vmatpush1.bf16.msra.mxu0 %v5114_v34 }
 0xc26   : > { %v6781_v61 = vadd.f32 %v5359_v9, %v2840_v56  ;;  %3378 = vmatprep.subr.bf16.mxu1 %v5119_v51  ;;  %3431 = vmatprep.subr.bf16.mxu0 %v5122_v8  ;;  %v5155_v34 = vld [vmem:[#allocation16 + $0x184] ss:$16 sps:$4 sm:$0xff]   ;;  %v5158_v51 = vld [vmem:[#allocation16 + $0x18c] ss:$16 sps:$4 sm:$0xff]   ;;  %v5153_v8 = vld [vmem:[#allocation16 + $0x180] ss:$16 sps:$4 sm:$0xff]  }
 0xc27   : > { %v6784_v62 = vadd.f32 %v5360_v45, %v2842_v48  ;;  %v2860_v63 = vadd.f32 %v6778_v27, %v6775_v53  ;;  %3379 = vmatpush1.bf16.msra.mxu1 %v5117_v4  ;;  %v5156_v4 = vld [vmem:[#allocation16 + $0x188] ss:$16 sps:$4 sm:$0xff]  }
 0xc28   : > { %3380 = vmatprep.subr.bf16.mxu1 %v5125_v40  ;;  %v5164_v40 = vld [vmem:[#allocation16 + $0x1ac] ss:$16 sps:$4 sm:$0xff]  }
 0xc29   : > { %2861 = vadd.xlane.f32.xlu0 %v2860_v63  ;;  %v2863_v55 = vadd.f32 %v6784_v62, %v6781_v61  ;;  %3432 = vmatpush1.bf16.msra.mxu0 %v5120_v39  ;;  %v5161_v39 = vld [vmem:[#allocation16 + $0x1a4] ss:$16 sps:$4 sm:$0xff]  }
 0xc2a   : > { %3433 = vmatprep.subr.bf16.mxu0 %v5128_v13  ;;  %v5159_v13 = vld [vmem:[#allocation16 + $0x1a0] ss:$16 sps:$4 sm:$0xff]  }
 0xc2b   : > { %2864 = vadd.xlane.f32.xlu1 %v2863_v55  ;;  %3381 = vmatpush1.bf16.msra.mxu1 %v5123_v43  ;;  %v5162_v43 = vld [vmem:[#allocation16 + $0x1a8] ss:$16 sps:$4 sm:$0xff]  }
 0xc2c   : > { %3382 = vmatprep.subr.bf16.mxu1 %v5131_v59  ;;  %v5170_v59 = vld [vmem:[#allocation16 + $0x1cc] ss:$16 sps:$4 sm:$0xff]  }
 0xc2d   : > { %3434 = vmatpush1.bf16.msra.mxu0 %v5126_v26  ;;  %v5167_v26 = vld [vmem:[#allocation16 + $0x1c4] ss:$16 sps:$4 sm:$0xff]  }
 0xc2e   : > { %3435 = vmatprep.subr.bf16.mxu0 %v5134_v22  ;;  %v5165_v22 = vld [vmem:[#allocation16 + $0x1c0] ss:$16 sps:$4 sm:$0xff]  }
 0xc2f   : > { %3383 = vmatpush1.bf16.msra.mxu1 %v5129_v25  ;;  %v5168_v25 = vld [vmem:[#allocation16 + $0x1c8] ss:$16 sps:$4 sm:$0xff]  }
 0xc30   : > { %3384 = vmatprep.subr.bf16.mxu1 %v5137_v36  ;;  %v5176_v36 = vld [vmem:[#allocation16 + $0x1ec] ss:$16 sps:$4 sm:$0xff]  }
 0xc31   : > { %3436 = vmatpush1.bf16.msra.mxu0 %v5132_v19  ;;  %v5173_v19 = vld [vmem:[#allocation16 + $0x1e4] ss:$16 sps:$4 sm:$0xff]  }
 0xc32   : > { %3437 = vmatprep.subr.bf16.mxu0 %v5140_v42  ;;  %v5171_v42 = vld [vmem:[#allocation16 + $0x1e0] ss:$16 sps:$4 sm:$0xff]  }
 0xc33   : > { %3385 = vmatpush1.bf16.msra.mxu1 %v5135_v49  ;;  %v5174_v49 = vld [vmem:[#allocation16 + $0x1e8] ss:$16 sps:$4 sm:$0xff]  }
 0xc34   : > { %3386 = vmatprep.subr.bf16.mxu1 %v5143_v7 }
 0xc35   : > { %3438 = vmatpush1.bf16.msra.mxu0 %v5138_v50  ;;  %v5179_v50 = vld [vmem:[#allocation18 + $0x4] ss:$8 sps:$4 sm:$0xff]  }
 0xc36   : > { %3439 = vmatprep.subr.bf16.mxu0 %v5146_v3 }
 0xc37   : > { %3387 = vmatpush1.bf16.msra.mxu1 %v5141_v30 }
 0xc38   : > { %3388 = vmatprep.subr.bf16.mxu1 %v5149_v32 }
 0xc39   : > { %3440 = vmatpush1.bf16.msra.mxu0 %v5144_v31 }
 0xc3a   : > { %3441 = vmatprep.subr.bf16.mxu0 %v5152_v33 }
 0xc3b   : > { %3389 = vmatpush1.bf16.msra.mxu1 %v5147_v5 }
 0xc3c   : > { %3390 = vmatprep.subr.bf16.mxu1 %v5155_v34 }
 0xc3d   : > { %3442 = vmatpush1.bf16.msra.mxu0 %v5150_v6 }
 0xc3e   : > { %3443 = vmatprep.subr.bf16.mxu0 %v5158_v51 }
 0xc3f   : > { %3391 = vmatpush1.bf16.msra.mxu1 %v5153_v8 }
 0xc40   : > { %3392 = vmatprep.subr.bf16.mxu1 %v5161_v39 }
 0xc41   : > { %3444 = vmatpush1.bf16.msra.mxu0 %v5156_v4 }
 0xc42   : > { %3445 = vmatprep.subr.bf16.mxu0 %v5164_v40 }
 0xc43   : > { %3393 = vmatpush1.bf16.msra.mxu1 %v5159_v13 }
 0xc44   : > { %3394 = vmatprep.subr.bf16.mxu1 %v5167_v26 }
 0xc45   : > { %3446 = vmatpush1.bf16.msra.mxu0 %v5162_v43  ;;  %v5177_v43 = vld [vmem:[#allocation18] ss:$8 sps:$4 sm:$0xff]  }
 0xc46   : > { %3447 = vmatprep.subr.bf16.mxu0 %v5170_v59 }
 0xc47   : > { %3395 = vmatpush1.bf16.msra.mxu1 %v5165_v22 }
 0xc48   : > { %3396 = vmatprep.subr.bf16.mxu1 %v5173_v19 }
 0xc49   : > { %3448 = vmatpush1.bf16.msra.mxu0 %v5168_v25 }
 0xc4a   : > { %3449 = vmatprep.subr.bf16.mxu0 %v5176_v36 }
 0xc4b   : > { %3397 = vmatpush1.bf16.msra.mxu1 %v5171_v42  ;;  %v5180_v42 = vld [vmem:[#allocation18 + $0x10] ss:$8 sps:$4 sm:$0xff]  }
 0xc4c   : > { %3956 = vmatprep.subr.bf16.mxu1 %v5179_v50 }
 0xc4d   : > { %3450 = vmatpush1.bf16.msra.mxu0 %v5174_v49 }
 0xcae   : > { %v2856_v16 = vpop.xlane.xlu0 %2855 }
 0xcaf   : > { %v2866_v17 = vmul.f32 0.00390625, %v2856_v16 }
 0xcb0   : > { %v2859_v38 = vpop.xlane.xlu1 %2858 }
 0xcb1   : > { %v6791_v20 = vsub.f32 %v6759_v14, %v2866_v17  ;;  %v6794_v52 = vsub.f32 %v6762_v29, %v2866_v17  ;;  %v2867_v56 = vmul.f32 0.00390625, %v2859_v38 }
 0xcb3   : > { %v6797_v15 = vsub.f32 %v6765_v11, %v2867_v56  ;;  %v6800_v58 = vsub.f32 %v6768_v41, %v2867_v56  ;;  %v2878_v48 = vmul.f32 %v6791_v20, %v6791_v20  ;;  %v2879_v9 = vmul.f32 %v6794_v52, %v6794_v52 }
 0xcb5   : > { %v2886_v45 = vadd.f32 %v2879_v9, %v2878_v48  ;;  %v2880_v63 = vmul.f32 %v6797_v15, %v6797_v15  ;;  %v2881_v55 = vmul.f32 %v6800_v58, %v6800_v58 }
 0xcb6   : > { %v2862_v18 = vpop.xlane.xlu0 %2861 }
 0xcb7   : > { %v2868_v54 = vmul.f32 0.00390625, %v2862_v18  ;;  %2887 = vadd.xlane.f32.xlu0 %v2886_v45  ;;  %v2889_v35 = vadd.f32 %v2881_v55, %v2880_v63 }
 0xcb8   : > { %v2865_v21 = vpop.xlane.xlu1 %2864 }
 0xcb9   : > { %v6811_v23 = vsub.f32 %v6775_v53, %v2868_v54  ;;  %v6814_v24 = vsub.f32 %v6778_v27, %v2868_v54  ;;  %v2869_v60 = vmul.f32 0.00390625, %v2865_v21  ;;  %2890 = vadd.xlane.f32.xlu1 %v2889_v35  ;;  %v2852_v35 = vld [vmem:[%s7161_s21] sm:$0x3]  ;;  %s5619_s21 = scalar_lea.vmem %s6941_s28, 1024 }
 0xcba   : > { %p5620_p0 = scmp.ne.s32.totalorder %s6941_s28, %s5619_s21 }
 0xcbb   : > { %v6817_v47 = vsub.f32 %v6781_v61, %v2869_v60  ;;  %v6820_v0 = vsub.f32 %v6784_v62, %v2869_v60  ;;  %v2882_v57 = vmul.f32 %v6811_v23, %v6811_v23  ;;  %v2883_v46 = vmul.f32 %v6814_v24, %v6814_v24  ;;  %v2853_v60 = vld [vmem:[%s7162_s8] sm:$0x3]  ;;  %s5625_s8 = scalar_lea.vmem %s5624_s22, 2048 }
 0xcbc   : > { %v2941_v7 = vrot.slane %v2853_v60, %v6648_v28  ;;  %v2945_v3 = vrot.slane %v2853_v60, %v6651_v10  ;;  %v5201_v60 = vld [vmem:[#allocation18 + $0x80] ss:$8 sps:$4 sm:$0xff]   ;;  %p5621_p9 = pnand %p5620_p0, %p7168_p6  ;;  %p5627_p1 = scmp.lt.s32.totalorder %s5625_s8, %s5619_s21 }
 0xcbd   : > { %v2892_v37 = vadd.f32 %v2883_v46, %v2882_v57  ;;  %v2884_v2 = vmul.f32 %v6817_v47, %v6817_v47  ;;  %v2885_v44 = vmul.f32 %v6820_v0, %v6820_v0  ;;  %v2922_v57 = vrot.slane %v2852_v35, %v6648_v28 }
 0xcbe   : > { %v2926_v46 = vrot.slane %v2852_v35, %v6651_v10  ;;  %v5198_v35 = vld [vmem:[#allocation18 + $0x70] ss:$8 sps:$4 sm:$0xff]   ;;  %p5622_p13 = pneg %p5621_p9  ;;  %p5628_p7 = por %p5627_p1, %p5626_p11 }
 0xcbf   : > { %2893 = vadd.xlane.f32.xlu0 %v2892_v37  ;;  %v2895_v1 = vadd.f32 %v2885_v44, %v2884_v2 }
 0xcc0   : > { %p5629_p8 = pnand %p5628_p7, %p5622_p13 }
 0xcc1   : > { %2896 = vadd.xlane.f32.xlu1 %v2895_v1 }
 0xd44   : > { %v2888_v16 = vpop.xlane.xlu0 %2887 }
 0xd45   : > { %v2898_v17 = vmul.f32 0.00390625, %v2888_v16 }
 0xd46   : > { %v2891_v38 = vpop.xlane.xlu1 %2890 }
 0xd47   : > { %v2902_v56 = vadd.f32 1e-12, %v2898_v17  ;;  %v2899_v48 = vmul.f32 0.00390625, %v2891_v38 }
 0xd49   : > { %5313 = vrsqrt.f32 %v2902_v56  ;;  %v2903_v9 = vadd.f32 1e-12, %v2899_v48  ;;  %v5188_v56 = vld [vmem:[#allocation18 + $0x34] ss:$8 sps:$4 sm:$0xff]   ;;  %v5191_v48 = vld [vmem:[#allocation18 + $0x44] ss:$8 sps:$4 sm:$0xff]  }
 0xd4b   : > { %5315 = vrsqrt.f32 %v2903_v9  ;;  %v5189_v9 = vld [vmem:[#allocation18 + $0x40] ss:$8 sps:$4 sm:$0xff]  }
 0xd4c   : > { %v2894_v45 = vpop.xlane.xlu0 %2893 }
 0xd4d   : > { %v2900_v63 = vmul.f32 0.00390625, %v2894_v45  ;;  %v5194_v45 = vld [vmem:[#allocation18 + $0x54] ss:$8 sps:$4 sm:$0xff]  }
 0xd4e   : > { %v2897_v55 = vpop.xlane.xlu1 %2896 }
 0xd4f   : > { %v2904_v18 = vadd.f32 1e-12, %v2900_v63  ;;  %v2901_v54 = vmul.f32 0.00390625, %v2897_v55  ;;  %v5192_v63 = vld [vmem:[#allocation18 + $0x50] ss:$8 sps:$4 sm:$0xff]  }
 0xd50   : > { %v5197_v55 = vld [vmem:[#allocation18 + $0x64] ss:$8 sps:$4 sm:$0xff]  }
 0xd51   : > { %5317 = vrsqrt.f32 %v2904_v18  ;;  %v2905_v21 = vadd.f32 1e-12, %v2901_v54  ;;  %v5195_v18 = vld [vmem:[#allocation18 + $0x60] ss:$8 sps:$4 sm:$0xff]   ;;  %v5200_v54 = vld [vmem:[#allocation18 + $0x74] ss:$8 sps:$4 sm:$0xff]  }
 0xd53   : > { %v5314_v37 = vpop.eup %5313  ;;  %5319 = vrsqrt.f32 %v2905_v21  ;;  %v5203_v21 = vld [vmem:[#allocation18 + $0x84] ss:$8 sps:$4 sm:$0xff]  }
 0xd54   : > { %v2910_v2 = vmul.f32 %v5314_v37, %v6791_v20  ;;  %v2911_v44 = vmul.f32 %v5314_v37, %v6794_v52  ;;  %v5209_v37 = vld [vmem:[#allocation18 + $0xa4] ss:$8 sps:$4 sm:$0xff]  }
 0xd55   : > { %v5316_v1 = vpop.eup %5315 }
 0xd56   : > { %v2912_v30 = vmul.f32 %v5316_v1, %v6797_v15  ;;  %v2913_v31 = vmul.f32 %v5316_v1, %v6800_v58  ;;  %v2930_v32 = vmul.f32 %v2926_v46, %v2911_v44  ;;  %v2929_v33 = vmul.f32 %v2922_v57, %v2910_v2  ;;  %v5182_v15 = vld [vmem:[#allocation18 + $0x14] ss:$8 sps:$4 sm:$0xff]   ;;  %v5207_v2 = vld [vmem:[#allocation18 + $0xa0] ss:$8 sps:$4 sm:$0xff]   ;;  %v5210_v1 = vld [vmem:[#allocation18 + $0xb0] ss:$8 sps:$4 sm:$0xff]  }
 0xd57   : > { %v5212_v44 = vld [vmem:[#allocation18 + $0xb4] ss:$8 sps:$4 sm:$0xff]  }
 0xd58   : > { %v2932_v5 = vmul.f32 %v2926_v46, %v2913_v31  ;;  %v2931_v6 = vmul.f32 %v2922_v57, %v2912_v30  ;;  %v2949_v34 = vadd.f32 %v2945_v3, %v2930_v32  ;;  %v2948_v8 = vadd.f32 %v2941_v7, %v2929_v33  ;;  %v5218_v30 = vld [vmem:[#allocation18 + $0xd4] ss:$8 sps:$4 sm:$0xff]   ;;  %v5216_v31 = vld [vmem:[#allocation18 + $0xd0] ss:$8 sps:$4 sm:$0xff]   ;;  %v5221_v32 = vld [vmem:[#allocation18 + $0xe4] ss:$8 sps:$4 sm:$0xff]  }
 0xd59   : > { %v5219_v33 = vld [vmem:[#allocation18 + $0xe0] ss:$8 sps:$4 sm:$0xff]  }
 0xd5a   : > { %v2951_v51 = vadd.f32 %v2945_v3, %v2932_v5  ;;  %v2950_v4 = vadd.f32 %v2941_v7, %v2931_v6  ;;  %v5224_v5 = vld [vmem:[#allocation18 + $0xf4] ss:$8 sps:$4 sm:$0xff]   ;;  %v5222_v6 = vld [vmem:[#allocation18 + $0xf0] ss:$8 sps:$4 sm:$0xff]  }
 0xd5b   : > { %v5318_v20 = vpop.eup %5317 }
 0xd5c   : > { %v2957_v39 = vpack.c.bf16 %v2951_v51, %v2949_v34  ;;  %v2956_v52 = vpack.c.bf16 %v2950_v4, %v2948_v8  ;;  %v2915_v40 = vmul.f32 %v5318_v20, %v6814_v24  ;;  %v2914_v13 = vmul.f32 %v5318_v20, %v6811_v23  ;;  %v5185_v24 = vld [vmem:[#allocation18 + $0x24] ss:$8 sps:$4 sm:$0xff]   ;;  %v3024_v8 = vld [vmem:[%s7163_s9] sm:$0xf] }
 0xd5d   : > { %v5320_v26 = vpop.eup %5319  ;;  %v5227_v34 = vld [vmem:[#allocation18 + $0x104] ss:$8 sps:$4 sm:$0xff]   ;;  %v3036_v51 = vsub.s32 2, %v6645_v12  ;;  %v3040_v4 = vsub.s32 3, %v6645_v12  ;;  %v3029_v20 = vrot.slane %v3024_v8, %v6648_v28 }
 0xd5e   : > { %3398 = vmatprep.mubr.bf16.mxu1 %v2957_v39  ;;  %3451 = vmatprep.mubr.bf16.mxu0 %v2957_v39  ;;  %v2917_v58 = vmul.f32 %v5320_v26, %v6820_v0  ;;  %v2934_v59 = vmul.f32 %v2926_v46, %v2915_v40  ;;  %v2916_v22 = vmul.f32 %v5320_v26, %v6817_v47  ;;  %v5183_v0 = vld [vmem:[#allocation18 + $0x20] ss:$8 sps:$4 sm:$0xff]   ;;  %v5186_v47 = vld [vmem:[#allocation18 + $0x30] ss:$8 sps:$4 sm:$0xff]  }
 0xd5f   : > { %3399 = vmatmul.mubr.bf16.vlgmr.msra.gmra.mrb[8].mxu1 %v2956_v52  ;;  %3452 = vmatmul.mubr.bf16.vlgmr.msra.gmra.mrb[24].mxu0 %v2956_v52  ;;  %v2933_v25 = vmul.f32 %v2922_v57, %v2914_v13  ;;  %v3037_v39 = vrot.slane %v3024_v8, %v3036_v51  ;;  %v3033_v52 = vrot.slane %v3024_v8, %v6651_v10 }
 0xd60   : > { %v2936_v19 = vmul.f32 %v2926_v46, %v2917_v58  ;;  %v2935_v36 = vmul.f32 %v2922_v57, %v2916_v22  ;;  %3957 = vmatpush1.bf16.msra.mxu1 %v5177_v43  ;;  %v2953_v23 = vadd.f32 %v2945_v3, %v2934_v59  ;;  %v5206_v57 = vld [vmem:[#allocation18 + $0x94] ss:$8 sps:$4 sm:$0xff]   ;;  %v5204_v46 = vld [vmem:[#allocation18 + $0x90] ss:$8 sps:$4 sm:$0xff]   ;;  %v3041_v40 = vrot.slane %v3024_v8, %v3040_v4 }
 0xd61   : > { %3958 = vmatprep.subr.bf16.mxu1 %v5182_v15  ;;  %v2952_v50 = vadd.f32 %v2941_v7, %v2933_v25 }
 0xd62   : > { %v2955_v49 = vadd.f32 %v2945_v3, %v2936_v19  ;;  %v2954_v16 = vadd.f32 %v2941_v7, %v2935_v36  ;;  %v5215_v7 = vld [vmem:[#allocation18 + $0xc4] ss:$8 sps:$4 sm:$0xff]   ;;  %v5213_v3 = vld [vmem:[#allocation18 + $0xc0] ss:$8 sps:$4 sm:$0xff]  }
 0xd64   : > { %v2959_v17 = vpack.c.bf16 %v2955_v49, %v2953_v23  ;;  %v2958_v38 = vpack.c.bf16 %v2954_v16, %v2952_v50  ;;  %3959 = vmatpush1.bf16.msra.mxu1 %v5180_v42 }
 0xd65   : > { %3960 = vmatprep.subr.bf16.mxu1 %v5185_v24 }
 0xd66   : > { %3408 = vmatprep.mubr.bf16.mxu1 %v2959_v17  ;;  %3461 = vmatprep.mubr.bf16.mxu0 %v2959_v17 }
 0xd67   : > { %3409 = vmatmul.mubr.bf16.gmra.mrb[12].mxu1 %v2958_v38  ;;  %3462 = vmatmul.mubr.bf16.gmra.mrb[28].mxu0 %v2958_v38 }
 0xd68   : > { %3961 = vmatpush1.bf16.msra.mxu1 %v5183_v0 }
 0xd69   : > { %3962 = vmatprep.subr.bf16.mxu1 %v5188_v56 }
 0xd6c   : > { %3963 = vmatpush1.bf16.msra.mxu1 %v5186_v47 }
 0xd6d   : > { %3964 = vmatprep.subr.bf16.mxu1 %v5191_v48 }
 0xd70   : > { %3965 = vmatpush1.bf16.msra.mxu1 %v5189_v9 }
 0xd71   : > { %3966 = vmatprep.subr.bf16.mxu1 %v5194_v45 }
 0xd74   : > { %3967 = vmatpush1.bf16.msra.mxu1 %v5192_v63 }
 0xd75   : > { %3968 = vmatprep.subr.bf16.mxu1 %v5197_v55 }
 0xd78   : > { %3969 = vmatpush1.bf16.msra.mxu1 %v5195_v18 }
 0xd79   : > { %3970 = vmatprep.subr.bf16.mxu1 %v5200_v54 }
 0xd7c   : > { %3971 = vmatpush1.bf16.msra.mxu1 %v5198_v35 }
 0xd7d   : > { %3972 = vmatprep.subr.bf16.mxu1 %v5203_v21 }
 0xd80   : > { %3973 = vmatpush1.bf16.msra.mxu1 %v5201_v60 }
 0xd81   : > { %3974 = vmatprep.subr.bf16.mxu1 %v5206_v57 }
 0xd84   : > { %3975 = vmatpush1.bf16.msra.mxu1 %v5204_v46 }
 0xd85   : > { %3976 = vmatprep.subr.bf16.mxu1 %v5209_v37 }
 0xd88   : > { %3977 = vmatpush1.bf16.msra.mxu1 %v5207_v2 }
 0xd89   : > { %3978 = vmatprep.subr.bf16.mxu1 %v5212_v44 }
 0xd8c   : > { %3979 = vmatpush1.bf16.msra.mxu1 %v5210_v1 }
 0xd8d   : > { %3980 = vmatprep.subr.bf16.mxu1 %v5215_v7 }
 0xd90   : > { %3981 = vmatpush1.bf16.msra.mxu1 %v5213_v3 }
 0xd91   : > { %3982 = vmatprep.subr.bf16.mxu1 %v5218_v30 }
 0xd94   : > { %3983 = vmatpush1.bf16.msra.mxu1 %v5216_v31 }
 0xd95   : > { %3984 = vmatprep.subr.bf16.mxu1 %v5221_v32 }
 0xd98   : > { %3985 = vmatpush1.bf16.msra.mxu1 %v5219_v33 }
 0xd99   : > { %3986 = vmatprep.subr.bf16.mxu1 %v5224_v5 }
 0xd9c   : > { %3987 = vmatpush1.bf16.msra.mxu1 %v5222_v6 }
 0xd9d   : > { %4009 = vmatprep.subr.bf16.mxu1 %v5227_v34 }
 0xe32   : > { %v3400_v13 = vpop.f32.mrb[8].mxu1  ;;  %v3453_v43 = vpop.f32.mrb[24].mxu0 }
 0xe33   : > { %v3401_v26 = vadd.f32 %v3400_v13, %v3029_v20  ;;  %v3454_v15 = vadd.f32 %v3453_v43, %v3037_v39  ;;  %v3402_v58 = vpop.f32.mrb[9].mxu1  ;;  %v3455_v59 = vpop.f32.mrb[25].mxu0 }
 0xe34   : > { %v3403_v22 = vadd.f32 %v3402_v58, %v3033_v52  ;;  %v3456_v25 = vadd.f32 %v3455_v59, %v3041_v40  ;;  %v3404_v19 = vpop.f32.mrb[10].mxu1  ;;  %v3457_v36 = vpop.f32.mrb[26].mxu0 }
 0xe35   : > { %v3488_v42 = vmul.f32 0.70710677, %v3401_v26  ;;  %v3490_v24 = vmul.f32 0.70710677, %v3454_v15  ;;  %v3405_v49 = vadd.f32 %v3404_v19, %v3029_v20  ;;  %v6855_v50 = vadd.f32 %v3457_v36, %v3037_v39  ;;  %v3406_v16 = vpop.f32.mrb[11].mxu1  ;;  %v3459_v17 = vpop.f32.mrb[27].mxu0 }
 0xe36   : > { %v3489_v23 = vmul.f32 0.70710677, %v3403_v22  ;;  %v3491_v12 = vmul.f32 0.70710677, %v3456_v25  ;;  %v3407_v38 = vadd.f32 %v3406_v16, %v3033_v52  ;;  %v6857_v0 = vadd.f32 %v3459_v17, %v3041_v40 }
 0xe37   : > { %5321 = verf.f32 %v3488_v42  ;;  %v3492_v56 = vmul.f32 0.70710677, %v3405_v49  ;;  %v3494_v47 = vmul.f32 0.70710677, %v6855_v50  ;;  %v3472_v8 = vmul.f32 0.5, %v3401_v26 }
 0xe38   : > { %5323 = verf.f32 %v3490_v24  ;;  %v3493_v48 = vmul.f32 0.70710677, %v3407_v38  ;;  %v3495_v45 = vmul.f32 0.70710677, %v6857_v0  ;;  %v3474_v4 = vmul.f32 0.5, %v3454_v15 }
 0xe39   : > { %5325 = verf.f32 %v3489_v23  ;;  %v3475_v19 = vmul.f32 0.5, %v3456_v25  ;;  %v3476_v36 = vmul.f32 0.5, %v3405_v49 }
 0xe3a   : > { %5327 = verf.f32 %v3491_v12  ;;  %v3410_v9 = vpop.f32.mrb[12].mxu1  ;;  %v3463_v55 = vpop.f32.mrb[28].mxu0  ;;  %v3478_v12 = vmul.f32 0.5, %v6855_v50 }
 0xe3b   : > { %5329 = verf.f32 %v3492_v56  ;;  %v6861_v63 = vadd.f32 %v3410_v9, %v3029_v20  ;;  %v3412_v18 = vpop.f32.mrb[13].mxu1  ;;  %v6863_v54 = vadd.f32 %v3463_v55, %v3037_v39  ;;  %v3465_v21 = vpop.f32.mrb[29].mxu0  ;;  %v3479_v9 = vmul.f32 0.5, %v6857_v0 }
 0xe3c   : > { %5331 = verf.f32 %v3494_v47  ;;  %v6865_v35 = vadd.f32 %v3412_v18, %v3033_v52  ;;  %v3414_v60 = vpop.f32.mrb[14].mxu1  ;;  %v6868_v46 = vadd.f32 %v3465_v21, %v3041_v40  ;;  %v3467_v37 = vpop.f32.mrb[30].mxu0 }
 0xe3d   : > { %5333 = verf.f32 %v3493_v48  ;;  %v3496_v57 = vmul.f32 0.70710677, %v6861_v63  ;;  %v3416_v2 = vpop.f32.mrb[15].mxu1  ;;  %v3498_v44 = vmul.f32 0.70710677, %v6863_v54  ;;  %v3469_v1 = vpop.f32.mrb[31].mxu0  ;;  %v6873_v30 = vadd.f32 %v3414_v60, %v3029_v20 }
 0xe3e   : > { %5335 = verf.f32 %v3495_v45  ;;  %v3497_v7 = vmul.f32 0.70710677, %v6865_v35  ;;  %v3499_v3 = vmul.f32 0.70710677, %v6868_v46  ;;  %v6875_v31 = vadd.f32 %v3467_v37, %v3037_v39 }
 0xe3f   : > { %5337 = verf.f32 %v3496_v57  ;;  %v6877_v32 = vadd.f32 %v3416_v2, %v3033_v52  ;;  %v3500_v6 = vmul.f32 0.70710677, %v6873_v30  ;;  %v6880_v34 = vadd.f32 %v3469_v1, %v3041_v40  ;;  %v5225_v1 = vld [vmem:[#allocation18 + $0x100] ss:$8 sps:$4 sm:$0xff]  }
 0xe40   : > { %5339 = verf.f32 %v3498_v44  ;;  %v3502_v13 = vmul.f32 0.70710677, %v6875_v31  ;;  %v3473_v39 = vmul.f32 0.5, %v3403_v22  ;;  %v3477_v22 = vmul.f32 0.5, %v3407_v38 }
 0xe41   : > { %v5322_v33 = vpop.eup %5321  ;;  %5341 = verf.f32 %v3497_v7  ;;  %v3501_v52 = vmul.f32 0.70710677, %v6877_v32  ;;  %v3503_v26 = vmul.f32 0.70710677, %v6880_v34  ;;  %v3480_v0 = vmul.f32 0.5, %v6861_v63 }
 0xe42   : > { %v5324_v5 = vpop.eup %5323  ;;  %5343 = verf.f32 %v3499_v3  ;;  %v3520_v43 = vadd.f32 1.0, %v5322_v33  ;;  %v5230_v33 = vld [vmem:[#allocation18 + $0x114] ss:$8 sps:$4 sm:$0xff]   ;;  %v5228_v63 = vld [vmem:[#allocation18 + $0x110] ss:$8 sps:$4 sm:$0xff]  }
 0xe43   : > { %v5326_v51 = vpop.eup %5325  ;;  %5345 = verf.f32 %v3500_v6  ;;  %v3522_v59 = vadd.f32 1.0, %v5324_v5 }
 0xe44   : > { %v5328_v20 = vpop.eup %5327  ;;  %5347 = verf.f32 %v3502_v13  ;;  %v3521_v40 = vadd.f32 1.0, %v5326_v51  ;;  %v3536_v56 = vmul.f32 %v3520_v43, %v3472_v8 }
 0xe45   : > { %v5330_v58 = vpop.eup %5329  ;;  %5349 = verf.f32 %v3501_v52  ;;  %v3523_v23 = vadd.f32 1.0, %v5328_v20  ;;  %v6886_v25 = vmul.f32 %v3522_v59, %v3474_v4  ;;  %v3482_v4 = vmul.f32 0.5, %v6863_v54  ;;  %v5233_v54 = vld [vmem:[#allocation18 + $0x124] ss:$8 sps:$4 sm:$0xff]  }
 0xe46   : > { %v5332_v42 = vpop.eup %5331  ;;  %v3524_v24 = vadd.f32 1.0, %v5330_v58  ;;  %5351 = verf.f32 %v3503_v26  ;;  %v3537_v18 = vmul.f32 %v3521_v40, %v3473_v39  ;;  %v3484_v20 = vmul.f32 0.5, %v6873_v30 }
 0xe47   : > { %v5334_v15 = vpop.eup %5333  ;;  %v3526_v16 = vadd.f32 1.0, %v5332_v42  ;;  %v3539_v50 = vmul.f32 %v3523_v23, %v3475_v19  ;;  %v3481_v52 = vmul.f32 0.5, %v6865_v35  ;;  %v3486_v58 = vmul.f32 0.5, %v6875_v31 }
 0xe48   : > { %v5336_v17 = vpop.eup %5335  ;;  %v3540_v47 = vmul.f32 %v3524_v24, %v3476_v36  ;;  %v3525_v48 = vadd.f32 1.0, %v5334_v15  ;;  %v3485_v19 = vmul.f32 0.5, %v6877_v32  ;;  %v3483_v15 = vmul.f32 0.5, %v6868_v46 }
 0xe49   : > { %v6888_v49 = vmul.f32 %v3526_v16, %v3478_v12  ;;  %v3527_v45 = vadd.f32 1.0, %v5336_v17  ;;  %v5338_v55 = vpop.eup %5337  ;;  %v3487_v35 = vmul.f32 0.5, %v6880_v34  ;;  %v5234_v34 = vld [vmem:[#allocation18 + $0x130] ss:$8 sps:$4 sm:$0xff]  }
 0xe4a   : > { %v3552_v21 = vpack.c.bf16 %v3540_v47, %v3536_v56  ;;  %v3541_v60 = vmul.f32 %v3525_v48, %v3477_v22  ;;  %v5340_v57 = vpop.eup %5339  ;;  %v3528_v3 = vadd.f32 1.0, %v5338_v55  ;;  %v5231_v48 = vld [vmem:[#allocation18 + $0x120] ss:$8 sps:$4 sm:$0xff]  }
 0xe4b   : > { %v3554_v38 = vpack.c.bf16 %v6888_v49, %v6886_v25  ;;  %v3543_v37 = vmul.f32 %v3527_v45, %v3479_v9  ;;  %v5342_v2 = vpop.eup %5341  ;;  %v3530_v51 = vadd.f32 1.0, %v5340_v57  ;;  %v5236_v9 = vld [vmem:[#allocation18 + $0x134] ss:$8 sps:$4 sm:$0xff]   ;;  %v5239_v45 = vld [vmem:[#allocation18 + $0x144] ss:$8 sps:$4 sm:$0xff]  }
 0xe4c   : > { %v3553_v44 = vpack.c.bf16 %v3541_v60, %v3537_v18  ;;  %v5344_v7 = vpop.eup %5343  ;;  %v3529_v13 = vadd.f32 1.0, %v5342_v2  ;;  %v3544_v36 = vmul.f32 %v3528_v3, %v3480_v0  ;;  %v5237_v55 = vld [vmem:[#allocation18 + $0x140] ss:$8 sps:$4 sm:$0xff]   ;;  %v5242_v18 = vld [vmem:[#allocation18 + $0x154] ss:$8 sps:$4 sm:$0xff]  }
 0xe4d   : > { %v3555_v5 = vpack.c.bf16 %v3543_v37, %v3539_v50  ;;  %v5346_v6 = vpop.eup %5345  ;;  %v3531_v42 = vadd.f32 1.0, %v5344_v7  ;;  %v6899_v30 = vmul.f32 %v3530_v51, %v3482_v4  ;;  %v5245_v60 = vld [vmem:[#allocation18 + $0x164] ss:$8 sps:$4 sm:$0xff]   ;;  %v5243_v57 = vld [vmem:[#allocation18 + $0x160] ss:$8 sps:$4 sm:$0xff]  }
 0xe4e   : > { %3988 = vmatprep.mubr.bf16.mxu1 %v3553_v44  ;;  %v5348_v8 = vpop.eup %5347  ;;  %v3532_v43 = vadd.f32 1.0, %v5346_v6  ;;  %v3545_v31 = vmul.f32 %v3529_v13, %v3481_v52  ;;  %v5248_v50 = vld [vmem:[#allocation18 + $0x174] ss:$8 sps:$4 sm:$0xff]   ;;  %v5246_v37 = vld [vmem:[#allocation18 + $0x170] ss:$8 sps:$4 sm:$0xff]  }
 0xe4f   : > { %3989 = vmatmul.mubr.bf16.vlgmr.msra.gmra.mrb[16].mxu1 %v3552_v21  ;;  %v5350_v39 = vpop.eup %5349  ;;  %v3534_v59 = vadd.f32 1.0, %v5348_v8  ;;  %v6907_v17 = vmul.f32 %v3531_v42, %v3483_v15  ;;  %v5240_v21 = vld [vmem:[#allocation18 + $0x150] ss:$8 sps:$4 sm:$0xff]   ;;  %v5251_v2 = vld [vmem:[#allocation18 + $0x184] ss:$8 sps:$4 sm:$0xff]  }
 0xe50   : > { %4010 = vmatpush1.bf16.msra.mxu1 %v5225_v1  ;;  %v3548_v40 = vmul.f32 %v3532_v43, %v3484_v20  ;;  %v3533_v24 = vadd.f32 1.0, %v5350_v39  ;;  %v5352_v26 = vpop.eup %5351  ;;  %v5249_v44 = vld [vmem:[#allocation18 + $0x180] ss:$8 sps:$4 sm:$0xff]   ;;  %v5254_v1 = vld [vmem:[#allocation18 + $0x194] ss:$8 sps:$4 sm:$0xff]  }
 0xe51   : > { %4011 = vmatprep.subr.bf16.mxu1 %v5230_v33  ;;  %v6902_v23 = vmul.f32 %v3534_v59, %v3486_v58  ;;  %v3535_v32 = vadd.f32 1.0, %v5352_v26  ;;  %v5252_v7 = vld [vmem:[#allocation18 + $0x190] ss:$8 sps:$4 sm:$0xff]   ;;  %v5257_v3 = vld [vmem:[#allocation18 + $0x1a4] ss:$8 sps:$4 sm:$0xff]  }
 0xe52   : > { %v3549_v12 = vmul.f32 %v3533_v24, %v3485_v19  ;;  %v3556_v16 = vpack.c.bf16 %v3548_v40, %v3544_v36  ;;  %v5255_v33 = vld [vmem:[#allocation18 + $0x1a0] ss:$8 sps:$4 sm:$0xff]   ;;  %v5258_v6 = vld [vmem:[#allocation18 + $0x1b0] ss:$8 sps:$4 sm:$0xff]   ;;  %v5263_v0 = vld [vmem:[#allocation18 + $0x1c4] ss:$8 sps:$4 sm:$0xff]  }
 0xe53   : > { %v3558_v22 = vpack.c.bf16 %v6902_v23, %v6899_v30  ;;  %v3551_v56 = vmul.f32 %v3535_v32, %v3487_v35  ;;  %v5261_v51 = vld [vmem:[#allocation18 + $0x1c0] ss:$8 sps:$4 sm:$0xff]   ;;  %v5266_v8 = vld [vmem:[#allocation18 + $0x1d4] ss:$8 sps:$4 sm:$0xff]   ;;  %v5264_v4 = vld [vmem:[#allocation18 + $0x1d0] ss:$8 sps:$4 sm:$0xff]  }
 0xe54   : > { %4012 = vmatpush1.bf16.msra.mxu1 %v5228_v63  ;;  %v3557_v47 = vpack.c.bf16 %v3549_v12, %v3545_v31  ;;  %v5269_v13 = vld [vmem:[#allocation18 + $0x1e4] ss:$8 sps:$4 sm:$0xff]   ;;  %v5267_v20 = vld [vmem:[#allocation18 + $0x1e0] ss:$8 sps:$4 sm:$0xff]   ;;  %v5272_v43 = vld [vmem:[#allocation18 + $0x1f4] ss:$8 sps:$4 sm:$0xff]  }
 0xe55   : > { %4013 = vmatprep.subr.bf16.mxu1 %v5233_v54  ;;  %v3559_v46 = vpack.c.bf16 %v3551_v56, %v6907_v17  ;;  %v5270_v39 = vld [vmem:[#allocation18 + $0x1f0] ss:$8 sps:$4 sm:$0xff]  }
 0xe56   : > { %3998 = vmatprep.mubr.bf16.mxu1 %v3557_v47  ;;  %v3624_v52 = vld [vmem:[%s7165_s10] sm:$0x3] }
 0xe57   : > { %3999 = vmatmul.mubr.bf16.gmra.mrb[20].mxu1 %v3556_v16  ;;  %v3629_v58 = vrot.slane %v3624_v52, %v6648_v28  ;;  %v3633_v59 = vrot.slane %v3624_v52, %v6651_v10 }
 0xe58   : > { %4014 = vmatpush1.bf16.msra.mxu1 %v5231_v48  ;;  %4041 = vmatprep.mubr.bf16.mxu1 %v3555_v5  ;;  %v5260_v5 = vld [vmem:[#allocation18 + $0x1b4] ss:$8 sps:$4 sm:$0xff]  }
 0xe59   : > { %4015 = vmatprep.subr.bf16.mxu1 %v5236_v9 }
 0xe5c   : > { %4016 = vmatpush1.bf16.msra.mxu1 %v5234_v34 }
 0xe5d   : > { %4017 = vmatprep.subr.bf16.mxu1 %v5239_v45 }
 0xe60   : > { %4018 = vmatpush1.bf16.msra.mxu1 %v5237_v55 }
 0xe61   : > { %4019 = vmatprep.subr.bf16.mxu1 %v5242_v18 }
 0xe64   : > { %4020 = vmatpush1.bf16.msra.mxu1 %v5240_v21 }
 0xe65   : > { %4021 = vmatprep.subr.bf16.mxu1 %v5245_v60 }
 0xe68   : > { %4022 = vmatpush1.bf16.msra.mxu1 %v5243_v57 }
 0xe69   : > { %4023 = vmatprep.subr.bf16.mxu1 %v5248_v50 }
 0xe6c   : > { %4024 = vmatpush1.bf16.msra.mxu1 %v5246_v37 }
 0xe6d   : > { %4025 = vmatprep.subr.bf16.mxu1 %v5251_v2 }
 0xe70   : > { %4026 = vmatpush1.bf16.msra.mxu1 %v5249_v44 }
 0xe71   : > { %4027 = vmatprep.subr.bf16.mxu1 %v5254_v1 }
 0xe74   : > { %4028 = vmatpush1.bf16.msra.mxu1 %v5252_v7 }
 0xe75   : > { %4029 = vmatprep.subr.bf16.mxu1 %v5257_v3 }
 0xe78   : > { %4030 = vmatpush1.bf16.msra.mxu1 %v5255_v33 }
 0xe79   : > { %4031 = vmatprep.subr.bf16.mxu1 %v5260_v5 }
 0xe7c   : > { %4032 = vmatpush1.bf16.msra.mxu1 %v5258_v6 }
 0xe7d   : > { %4033 = vmatprep.subr.bf16.mxu1 %v5263_v0 }
 0xe80   : > { %4034 = vmatpush1.bf16.msra.mxu1 %v5261_v51 }
 0xe81   : > { %4035 = vmatprep.subr.bf16.mxu1 %v5266_v8 }
 0xe84   : > { %4036 = vmatpush1.bf16.msra.mxu1 %v5264_v4 }
 0xe85   : > { %4037 = vmatprep.subr.bf16.mxu1 %v5269_v13 }
 0xe88   : > { %4038 = vmatpush1.bf16.msra.mxu1 %v5267_v20 }
 0xe89   : > { %4039 = vmatprep.subr.bf16.mxu1 %v5272_v43 }
 0xe8c   : > { %4040 = vmatpush1.bf16.msra.mxu1 %v5270_v39 }
 0xe8f   : > { %4042 = vmatmul.mubr.bf16.vlgmr.msra.gmra.mrb[16].mxu1 %v3554_v38 }
 0xe90   : > { %4051 = vmatprep.mubr.bf16.mxu1 %v3559_v46 }
 0xe97   : > { %4052 = vmatmul.mubr.bf16.gmra.mrb[20].mxu1 %v3558_v22 }
 0xf62   : > { %v4043_v19 = vpop.f32.mrb[16].mxu1 }
 0xf63   : > { %v4675_v25 = vadd.f32 %v4043_v19, %v3629_v58  ;;  %v4045_v49 = vpop.f32.mrb[17].mxu1 }
 0xf64   : > { %v4676_v38 = vadd.f32 %v4045_v49, %v3633_v59  ;;  %v4047_v63 = vpop.f32.mrb[18].mxu1 }
 0xf65   : > { %v4062_v36 = vadd.f32 %v4675_v25, %v6759_v14  ;;  %v4677_v42 = vadd.f32 %v4047_v63, %v3629_v58  ;;  %v4049_v40 = vpop.f32.mrb[19].mxu1 }
 0xf66   : > { %v4063_v24 = vadd.f32 %v4676_v38, %v6762_v29  ;;  %v4678_v54 = vadd.f32 %v4049_v40, %v3633_v59 }
 0xf67   : > { %4070 = vst [vmem:[%s6304_s27] sm:$0xff] %v4062_v36  ;;  %v4064_v28 = vadd.f32 %v4677_v42, %v6765_v11 }
 0xf68   : > { %4071 = vst [vmem:[%s6304_s27 + $0x8] sm:$0xff] %v4063_v24  ;;  %v4065_v10 = vadd.f32 %v4678_v54, %v6768_v41 }
 0xf69   : > { %4072 = vst [vmem:[%s6304_s27 + $0x10] sm:$0xff] %v4064_v28 }
 0xf6a   : > { %4073 = vst [vmem:[%s6304_s27 + $0x18] sm:$0xff] %v4065_v10  ;;  %v4053_v26 = vpop.f32.mrb[20].mxu1 }
 0xf6b   : > { %v4679_v14 = vadd.f32 %v4053_v26, %v3629_v58  ;;  %v4055_v30 = vpop.f32.mrb[21].mxu1 }
 0xf6c   : > { %v4680_v29 = vadd.f32 %v4055_v30, %v3633_v59  ;;  %v4057_v15 = vpop.f32.mrb[22].mxu1 }
 0xf6d   : > { %v4066_v11 = vadd.f32 %v4679_v14, %v6775_v53  ;;  %v4681_v23 = vadd.f32 %v4057_v15, %v3629_v58  ;;  %v4059_v41 = vpop.f32.mrb[23].mxu1 }
 0xf6e   : > { %v4067_v35 = vadd.f32 %v4680_v29, %v6778_v27  ;;  %v4682_v31 = vadd.f32 %v4059_v41, %v3633_v59 }
 0xf6f   : > { %4074 = vst [vmem:[%s6304_s27 + $0x20] sm:$0xff] %v4066_v11  ;;  %v4068_v12 = vadd.f32 %v4681_v23, %v6781_v61 }
 0xf70   : > { %4075 = vst [vmem:[%s6304_s27 + $0x28] sm:$0xff] %v4067_v35  ;;  %v4069_v53 = vadd.f32 %v4682_v31, %v6784_v62 }
 0xf71   : > { %4076 = vst [vmem:[%s6304_s27 + $0x30] sm:$0xff] %v4068_v12 }
 0xf72   : > { %4077 = vst [vmem:[%s6304_s27 + $0x38] sm:$0xff] %v4069_v53 }
 0xf73   : > { %5632 = shalt.err (!%p5629_p8)
}
 0xf74   : > { %s5633_s27 = scalar_lea.hbm %s6939_s2, 1024  ;;  %s5637_s9 = scalar_lea.hbm %s7167_s26, 4096 }
 0xf75   : > { %p5634_p5 = scmp.ne.s32.totalorder %s6939_s2, %s5633_s27  ;;  %p5638_p3 = scmp.lt.u32.totalorder %s6939_s2, %s7167_s26 }
 0xf76   : > { %p5639_p10 = scmp.lt.u32.totalorder %s5637_s9, %s5633_s27  ;;  %p5641_p0 = scmp.lt.u32.totalorder %s5633_s27, %s6939_s2 }
 0xf77   : > { %p5635_p4 = pnand %p5634_p5, %p7168_p6 }
 0xf78   : > { %p5640_p12 = por %p5639_p10, %p5638_p3 }
 0xf79   : > { %p5636_p2 = pneg %p5635_p4 }
 0xf7a   : > { %p5642_p9 = por %p5641_p0, %p5640_p12 }
 0xf7c   : > { %p5643_p13 = pnand %p5642_p9, %p5636_p2 }
 0xf7e   : > { %5646 = shalt.err (!%p5643_p13)
}
 0xf7f   : > { %s5774_s7 = smov 256   ;;  %s5775_s10 = smov 16  }
 0xf80   : > { %4721 = dma.vmem_to_hbm [thread:$0]  (%p7168_p6), %s6941_s28, 1024, %s6939_s2, %s4079_s11, %s5774_s7, %s5774_s7, %s5775_s10  }
 0xf81 PF: > { %s7169_s16 = sld [smem:[#allocation30_spill]]  ;;  %s7170_s29 = sld [smem:[#allocation26_spill]] }
 0xf82   : > { %s7171_s17 = sld [smem:[#allocation34_spill]] }
 0xf87   : > { %p4769_p11 = scmp.ge.s32.totalorder %s7169_s16, 2  ;;  %s4110_s23 = sand.u32 1, %s7170_s29  }
 0xf88   : > { %p7172_p1 = scmp.ne.s32.totalorder %s7171_s17, 0  ;;  %s4111_s15 = scalar_lea.sflag [#allocation6], %s4110_s23 }
 0xf8a   : > { %p4753_p7 = pnand %p4769_p11, %p7172_p1 }
 0xf8c   : > { %5712 = dma.done.wait (!%p4753_p7), %s4111_s15, 1024  }
 0xf8d   : > { %5714 = vsyncadd (!%p4753_p7), %s4111_s15, 4294966272  ;;  %s39_s3 = sadd.s32 1, %s7169_s16   ;;  %s7173_s4 = sld [smem:[#allocation36_spill]] }
 0xf8e   : > { %p36_p8 = scmp.ge.s32.totalorder %s39_s3, 6   ;;  %s7174_s21 = sld [smem:[#allocation27_spill]] }
 0xf8f   : > { %s7175_s1 = sld [smem:[#allocation28_spill]]  ;;  %s7176_s22 = sld [smem:[#allocation35_spill]] }
 0xf90   : > { %s7177_s28 = sld [smem:[#allocation31_spill]]  ;;  %s7178_s5 = sld [smem:[#allocation32_spill]] }
 0xf91   : > { %s7179_s0 = smov %s5721_s30  ;;  %s7180_s30 = smov %s5725_s20 }
 0xf92   : > { %s7182_s2 = smov %s5749_s24  ;;  %s7183_s23 = smov %s5753_s25 }
 0xf93   : > { %s7181_s20 = smov %s7173_s4  ;;  %38 = sbr.rel (!%p36_p8) target bundleno = 34 (0x22), region = 186 }
 0xf96   : > { %s7184_s24 = smov %s7177_s28  ;;  %s7185_s25 = smov %s7178_s5 }
 0xf9a   :  { %4116 = vsyncpa [#allocation5], 1 }
 0xf9b   :  { %4118 = vsyncpa [#allocation5 + $0x1], 1 }
 0xf9c   :  { %4119 = vsyncpa [#allocation8], 1 }
 0xf9d   :  { %4121 = vsyncpa [#allocation8 + $0x1], 1 }
 0xf9e   :  { %4122 = vsyncpa [#allocation11], 1 }
 0xf9f   :  { %4123 = vsyncpa [#allocation14], 1 }
 0xfa0   :  { %4124 = vsyncpa [#allocation17], 1 }
 0xfa1   :  { %4125 = vsyncpa [#allocation6], 1 }
 0xfa2   :  { %4127 = vsyncpa [#allocation6 + $0x1], 1 }

// kernel: tpu_custom_call.1
= control target key start
LH: loop header
LB: loop body
LE: loop exit
PB: predicated region body
PF: predicated region fallthrough
CT: control target
= control target key end

     0   :  { %s7077_s0 = inlined_call_operand.hbm [shape: f32[2,64,256], index: 0, kind: input, shape index: {}]   ;;  %s7078_s1 = inlined_call_operand.hbm [shape: f32[2,64,256], index: 1, kind: input, shape index: {}]   ;;  %s7079_s2 = inlined_call_operand.hbm [shape: s8[2,64,64], index: 2, kind: input, shape index: {}]   ;;  %s7080_s3 = inlined_call_operand.vmem [shape: f32[1,256], index: 3, kind: input, shape index: {}]   ;;  %s7081_s4 = inlined_call_operand.vmem [shape: f32[1,256], index: 4, kind: input, shape index: {}]   ;;  %s7082_s5 = inlined_call_operand.hbm [shape: bf16[256,256], index: 5, kind: input, shape index: {}]   ;;  %s7083_s6 = inlined_call_operand.vmem [shape: f32[1,256], index: 6, kind: input, shape index: {}]   ;;  %s7084_s7 = inlined_call_operand.hbm [shape: bf16[256,256], index: 7, kind: input, shape index: {}]   ;;  %s7085_s8 = inlined_call_operand.vmem [shape: f32[1,256], index: 8, kind: input, shape index: {}]   ;;  %s7086_s9 = inlined_call_operand.hbm [shape: bf16[256,256], index: 9, kind: input, shape index: {}]   ;;  %s7087_s10 = inlined_call_operand.vmem [shape: f32[1,256], index: 10, kind: input, shape index: {}]   ;;  %s7088_s11 = inlined_call_operand.hbm [shape: bf16[256,256], index: 11, kind: input, shape index: {}]   ;;  %s7089_s12 = inlined_call_operand.vmem [shape: f32[1,256], index: 12, kind: input, shape index: {}]   ;;  %s7090_s13 = inlined_call_operand.vmem [shape: f32[1,256], index: 13, kind: input, shape index: {}]   ;;  %s7091_s14 = inlined_call_operand.vmem [shape: f32[1,256], index: 14, kind: input, shape index: {}]   ;;  %s7092_s15 = inlined_call_operand.hbm [shape: bf16[256,512], index: 15, kind: input, shape index: {}]   ;;  %s7093_s16 = inlined_call_operand.vmem [shape: f32[1,512], index: 16, kind: input, shape index: {}]   ;;  %s7094_s17 = inlined_call_operand.hbm [shape: bf16[512,256], index: 17, kind: input, shape index: {}]   ;;  %s7095_s18 = inlined_call_operand.vmem [shape: f32[1,256], index: 18, kind: input, shape index: {}]   ;;  %s7096_s19 = inlined_call_operand.hbm [shape: f32[2,64,256], index: 19, kind: output, shape index: {}]  }
   0x1   :  { %7133 = sst [smem:[#allocation39_spill]] %s7077_s0 }
   0x2   :  { %7134 = sst [smem:[#allocation40_spill]] %s7078_s1 }
   0x3   :  { %7135 = sst [smem:[#allocation41_spill]] %s7079_s2 }
   0x4   :  { %7136 = sst [smem:[#allocation42_spill]] %s7080_s3 }
   0x5   :  { %7137 = sst [smem:[#allocation43_spill]] %s7081_s4 }
   0x6   :  { %7138 = sst [smem:[#allocation44_spill]] %s7082_s5 }
   0x7   :  { %7139 = sst [smem:[#allocation45_spill]] %s7083_s6 }
   0x8   :  { %7140 = sst [smem:[#allocation46_spill]] %s7084_s7 }
   0x9   :  { %7141 = sst [smem:[#allocation47_spill]] %s7085_s8 }
   0xa   :  { %7142 = sst [smem:[#allocation48_spill]] %s7086_s9 }
   0xb   :  { %7143 = sst [smem:[#allocation49_spill]] %s7087_s10 }
   0xc   :  { %7144 = sst [smem:[#allocation50_spill]] %s7089_s12 }
   0xd   :  { %7145 = sst [smem:[#allocation51_spill]] %s7090_s13 }
   0xe   :  { %7146 = sst [smem:[#allocation52_spill]] %s7091_s14 }
   0xf   :  { %7147 = sst [smem:[#allocation53_spill]] %s7092_s15 }
  0x10   :  { %7148 = sst [smem:[#allocation54_spill]] %s7093_s16 }
  0x11   :  { %7149 = sst [smem:[#allocation55_spill]] %s7095_s18 }
  0x12   :  { %7150 = sst [smem:[#allocation56_spill]] %s7096_s19 }
  0x13   :  { %24 = vsyncpa [#allocation5], 0 }
  0x14   :  { %26 = vsyncpa [#allocation5 + $0x1], 0 }
  0x15   :  { %27 = vsyncpa [#allocation8], 0 }
  0x16   :  { %29 = vsyncpa [#allocation8 + $0x1], 0 }
  0x17   :  { %30 = vsyncpa [#allocation11], 0 }
  0x18   :  { %31 = vsyncpa [#allocation14], 0 }
  0x19   :  { %32 = vsyncpa [#allocation17], 0 }
  0x1a   :  { %33 = vsyncpa [#allocation6], 0 }
  0x1b   :  { %35 = vsyncpa [#allocation6 + $0x1], 0  ;;  %s5903_s0 = smov 0   ;;  %s5905_s30 = smov 0  }
  0x1c   :  { %s5907_s20 = smov 0   ;;  %s5909_s21 = smov 0  }
  0x1d   :  { %s5911_s1 = smov 0   ;;  %s5913_s22 = smov 0  }
  0x1e   :  { %s5915_s2 = smov 0   ;;  %s5917_s23 = smov 0  }
  0x1f   :  { %s5919_s24 = smov 0   ;;  %s5921_s25 = smov 0  }
  0x20   :  { %s5923_s3 = smov 0  }
  0x21 LB: > { %7151 = sst [smem:[#allocation26_spill]] %s5744_s0  ;;  %s5959_s26 = sadd.s32 4294967295, %s5784_s3   ;;  %s5784_s3 = sphi %s5923_s3, %s41_s3   ;;  %s5780_s25 = sphi %s5921_s25, %s7249_s25   ;;  %s5776_s24 = sphi %s5919_s24, %s7248_s24   ;;  %s5772_s23 = sphi %s5917_s23, %s7247_s23   ;;  %s5768_s2 = sphi %s5915_s2, %s7246_s2   ;;  %s5764_s22 = sphi %s5913_s22, %s7245_s22   ;;  %s5760_s1 = sphi %s5911_s1, %s7244_s1   ;;  %s5756_s21 = sphi %s5909_s21, %s7243_s21   ;;  %s5752_s20 = sphi %s5907_s20, %s7242_s20   ;;  %s5748_s30 = sphi %s5905_s30, %s7241_s30   ;;  %s5744_s0 = sphi %s5903_s0, %s7236_s0  }
  0x22   : > { %7152 = sst [smem:[#allocation27_spill]] %s5748_s30  ;;  %p4306_p0 = scmp.ge.s32.totalorder %s5784_s3, 1 }
  0x23   : > { %7153 = sst [smem:[#allocation28_spill]] %s5756_s21  ;;  %p7102_p1 = scmp.eq.s32.totalorder %s5959_s26, 0 }
  0x24   : > { %7154 = sst [smem:[#allocation29_spill]] %s5768_s2  ;;  %p504_p2 = scmp.lt.s32.totalorder %s5784_s3, 5 }
  0x25   : > { %7155 = sst [smem:[#allocation30_spill]] %s5772_s23  ;;  %s5786_s28 = smov [#allocation10]  }
  0x26   : > { %p5964_p3 = pnand %p4306_p0, %p504_p2  ;;  %s522_s29 = sshll.u32 %s5786_s28, 4  ;;  %s5968_s29 = int_to_ptr.vmem [resolvable:$true] %s522_s29 }
  0x27   : > { %s5787_s18 = smov [#allocation13]   ;;  %s5788_s16 = smov [#allocation16]  }
  0x28   : > { %s7156_s27 = scalar_select %p5964_p3, 1, 0 }
  0x29   : > { %p4751_p4 = pneg %p5964_p3  ;;  %s554_s23 = sshll.u32 %s5787_s18, 4  ;;  %s5978_s23 = int_to_ptr.vmem [resolvable:$true] %s554_s23 }
  0x2a   : > { %7157 = sst [smem:[#allocation31_spill]] %s7156_s27  ;;  %s5980_s14 = sshll.u32 %s5788_s16, 4  ;;  %s593_s14 = int_to_ptr.vmem [resolvable:$true] %s5980_s14 }
  0x2b   : > { %p5974_p5 = pnand %p4751_p4, %p7102_p1  ;;  %s7159_s5 = sld [smem:[#allocation44_spill]] }
  0x2d   : > { %s7158_s19 = scalar_select %p5974_p5, 1, 0 }
  0x2e   : > { %p5990_p7 = pneg %p5974_p5 }
  0x31   : > { %s5388_s28 = scalar_lea.hbm %s7159_s5, 4096 }
  0x32   : > { %p5389_p6 = scmp.ne.s32.totalorder %s7159_s5, %s5388_s28  ;;  %p5395_p10 = scmp.lt.u32.totalorder %s5388_s28, %s7159_s5 }
  0x34   : > { %p5391_p8 = pnand %p5990_p7, %p5389_p6 }
  0x36   : > { %p5392_p9 = pneg %p5391_p8 }
  0x38   : > { %p5397_p11 = pnand %p5395_p10, %p5392_p9 }
  0x3a   : > { %5400 = shalt.err (!%p5397_p11)
}
  0x3b   : > { %s5401_s6 = scalar_lea.vmem %s5968_s29, 4096  ;;  %p5409_p2 = scmp.lt.s32.totalorder %s5968_s29, %s5968_s29 }
  0x3c   : > { %p5402_p12 = scmp.ne.s32.totalorder %s5968_s29, %s5401_s6  ;;  %p5410_p4 = scmp.lt.s32.totalorder %s5401_s6, %s5401_s6 }
  0x3e   : > { %p5404_p13 = pnand %p5402_p12, %p5990_p7  ;;  %p5411_p6 = por %p5410_p4, %p5409_p2 }
  0x40   : > { %p5405_p0 = pneg %p5404_p13 }
  0x42   : > { %p5412_p8 = pnand %p5411_p6, %p5405_p0 }
  0x44   : > { %5415 = shalt.err (!%p5412_p8)
}
  0x45   : > { %s7104_s10 = smov 128   ;;  %s7106_s12 = smov 8  }
  0x46   : > { %4754 = dma.hbm_to_vmem [thread:$0]  (!%p5974_p5), %s7159_s5, 4096, %s5968_s29, [#allocation11], %s7104_s10, %s7104_s10, %s7106_s12  }
  0x47   : > { %s7161_s9 = sld [smem:[#allocation48_spill]] }
  0x4d   : > { %s5416_s6 = scalar_lea.hbm %s7161_s9, 4096 }
  0x4e   : > { %p5417_p9 = scmp.ne.s32.totalorder %s7161_s9, %s5416_s6  ;;  %p5423_p12 = scmp.lt.u32.totalorder %s5416_s6, %s7161_s9 }
  0x50   : > { %p5419_p10 = pnand %p5417_p9, %p5990_p7 }
  0x52   : > { %p5420_p11 = pneg %p5419_p10 }
  0x54   : > { %p5425_p13 = pnand %p5423_p12, %p5420_p11 }
  0x56   : > { %5428 = shalt.err (!%p5425_p13)
}
  0x57   : > { %s5429_s29 = scalar_lea.vmem %s5978_s23, 4096  ;;  %p5437_p6 = scmp.lt.s32.totalorder %s5978_s23, %s5978_s23 }
  0x58   : > { %p5430_p0 = scmp.ne.s32.totalorder %s5978_s23, %s5429_s29  ;;  %p5438_p8 = scmp.lt.s32.totalorder %s5429_s29, %s5429_s29 }
  0x5a   : > { %p5432_p2 = pnand %p5430_p0, %p5990_p7  ;;  %p5439_p9 = por %p5438_p8, %p5437_p6 }
  0x5c   : > { %p5433_p4 = pneg %p5432_p2 }
  0x5e   : > { %p5440_p10 = pnand %p5439_p9, %p5433_p4 }
  0x60   : > { %5443 = shalt.err (!%p5440_p10)
}
  0x61   : > { %4760 = dma.hbm_to_vmem [thread:$0]  (!%p5974_p5), %s7161_s9, 4096, %s5978_s23, [#allocation14], %s7104_s10, %s7104_s10, %s7106_s12  }
  0x62   : > { %s7162_s15 = sld [smem:[#allocation53_spill]] }
  0x68   : > { %s5444_s13 = scalar_lea.hbm %s7162_s15, 8192 }
  0x69   : > { %p5445_p11 = scmp.ne.s32.totalorder %s7162_s15, %s5444_s13  ;;  %p5451_p0 = scmp.lt.u32.totalorder %s5444_s13, %s7162_s15 }
  0x6b   : > { %p5447_p12 = pnand %p5445_p11, %p5990_p7 }
  0x6d   : > { %p5448_p13 = pneg %p5447_p12 }
  0x6f   : > { %p5453_p2 = pnand %p5451_p0, %p5448_p13 }
  0x71   : > { %5456 = shalt.err (!%p5453_p2)
}
  0x72   : > { %s5457_s29 = scalar_lea.vmem %s593_s14, 8192  ;;  %p5465_p9 = scmp.lt.s32.totalorder %s593_s14, %s593_s14 }
  0x73   : > { %p5458_p4 = scmp.ne.s32.totalorder %s593_s14, %s5457_s29  ;;  %p5466_p10 = scmp.lt.s32.totalorder %s5457_s29, %s5457_s29 }
  0x75   : > { %p5460_p6 = pnand %p5458_p4, %p5990_p7  ;;  %p5467_p1 = por %p5466_p10, %p5465_p9 }
  0x77   : > { %p5461_p8 = pneg %p5460_p6 }
  0x79   : > { %p5468_p3 = pnand %p5467_p1, %p5461_p8 }
  0x7b   : > { %5471 = shalt.err (!%p5468_p3)
}
  0x7c   : > { %s7108_s23 = smov 256   ;;  %s7110_s4 = smov 16  }
  0x7d   : > { %4766 = dma.hbm_to_vmem [thread:$0]  (!%p5974_p5), %s7162_s15, 8192, %s593_s14, [#allocation17], %s7108_s23, %s7108_s23, %s7110_s4  }
  0x7e   : > { %s4305_s27 = sadd.s32 4294967294, %s5784_s3   ;;  %s50_s13 = sadd.s32 1, %s5776_s24 }
  0x7f   : > { %s53_s28 = sadd.s32 1, %s5780_s25  ;;  %p51_p1 = scmp.ge.s32.totalorder %s50_s13, 2 }
  0x80   : > { %p7118_p3 = scmp.eq.s32.totalorder %s5784_s3, 0  ;;  %s88_s18 = sadd.s32 1, %s5752_s20 }
  0x81   : > { %p95_p11 = scmp.ne.s32.totalorder %s5752_s20, %s5748_s30  ;;  %s7251_s13 = smov (%p51_p1, %s50_s13), 0 }
  0x82   : > { %7163 = sst [smem:[#allocation32_spill]] %s7251_s13  ;;  %s7253_s28 = smov (!%p51_p1, %s53_s28), %s5780_s25 }
  0x83   : > { %s84_s16 = ssub.s32 %s5776_s24, %s7251_s13  ;;  %p6076_p12 = por %p95_p11, %p7118_p3 }
  0x84   : > { %p55_p13 = scmp.ge.s32.totalorder %s7253_s28, 2  ;;  %p101_p0 = scmp.ne.s32.totalorder %s5748_s30, %s5744_s0 }
  0x85   : > { %p491_p2 = scmp.eq.s32.totalorder %s5959_s26, 3  ;;  %p497_p4 = scmp.eq.s32.totalorder %s4305_s27, 3 }
  0x86   : > { %s7255_s28 = smov (%p55_p13, %s7253_s28), 0  ;;  %p7166_p6 = scmp.eq.s32.totalorder %s5959_s26, 0 }
  0x87   : > { %7165 = sst [smem:[#allocation33_spill]] %s7255_s28  ;;  %p6091_p9 = por %p491_p2, %p95_p11 }
  0x88   : > { %p6087_p8 = por %p101_p0, %p7166_p6  ;;  %s6097_s21 = ssub.s32 %s5780_s25, %s7255_s28 }
  0x89   : > { %s7169_s29 = scalar_select %p6091_p9, 1, 0 }
  0x8a   : > { %s7167_s6 = scalar_select %p6087_p8, 1, 0 }
  0x8b   : > { %7170 = sst [smem:[#allocation35_spill]] %s7169_s29  ;;  %p6099_p10 = por %p497_p4, %p101_p0 }
  0x8c   : > { %7168 = sst [smem:[#allocation34_spill]] %s7167_s6  ;;  %s85_s27 = sor.u32 %s84_s16, %s6097_s21 }
  0x8d   : > { %s7171_s2 = scalar_select %p6099_p10, 1, 0 }
  0x8e   : > { %p86_p13 = scmp.eq.s32.totalorder %s85_s27, 0  ;;  %p7117_p6 = scmp.lt.s32.totalorder %s5784_s3, 4 }
  0x8f   : > { %7172 = sst [smem:[#allocation36_spill]] %s7171_s2  ;;  %s646_s10 = sand.u32 1, %s5784_s3  }
  0x90   : > { %s7116_s12 = sand.u32 1, %s5752_s20   ;;  %s4605_s5 = sshll.u32 %s5776_s24, 3 }
  0x91   : > { %s6109_s23 = scalar_select %p86_p13, %s5752_s20, %s88_s18  }
  0x92   : > { %s4317_s4 = sshll.u32 %s7116_s12, 6  ;;  %s4320_s9 = sshll.u32 %s5780_s25, 4 }
  0x93   : > { %7173 = sst [smem:[#allocation37_spill]] %s6109_s23  ;;  %s650_s15 = scalar_lea.vmem [#allocation7], %s4317_s4 }
  0x94   : > { %s660_s28 = sshll.u32 %s650_s15, 4  ;;  %s657_s13 = sadd.s32 %s4605_s5, %s4320_s9  ;;  %s6115_s28 = int_to_ptr.vmem [resolvable:$true] %s660_s28 }
  0x95   : > { %s4321_s2 = sshll.u32 %s657_s13, 7  ;;  %p6121_p11 = pnand %p7117_p6, %p6076_p12 }
  0x96   : > { %s7175_s18 = sld [smem:[#allocation40_spill]]  ;;  %s5793_s5 = smov [#allocation12]  }
  0x97   : > { %s7174_s16 = scalar_select %p6121_p11, 1, 0 }
  0x98   : > { %s6130_s9 = sshll.u32 %s5793_s5, 4  ;;  %s6132_s15 = scalar_lea.sflag [#allocation8], %s646_s10  ;;  %s539_s9 = int_to_ptr.vmem [resolvable:$true] %s6130_s9 }
  0x99   : > { %7176 = sst [smem:[#allocation38_spill]] %s6132_s15  ;;  %p7124_p0 = pneg %p6121_p11 }
  0x9c   : > { %s6128_s12 = scalar_lea.hbm %s7175_s18, %s4321_s2  ;;  %s5477_s14 = scalar_lea.hbm %s7175_s18, 4096 }
  0x9d   : > { %s5472_s4 = scalar_lea.hbm %s6128_s12, 1024  ;;  %p5478_p13 = scmp.lt.u32.totalorder %s6128_s12, %s7175_s18 }
  0x9e   : > { %p5473_p12 = scmp.ne.s32.totalorder %s6128_s12, %s5472_s4  ;;  %p5479_p6 = scmp.lt.u32.totalorder %s5477_s14, %s5472_s4 }
  0x9f   : > { %p5481_p1 = scmp.lt.u32.totalorder %s5472_s4, %s6128_s12 }
  0xa0   : > { %p5475_p2 = pnand %p7124_p0, %p5473_p12  ;;  %p5480_p3 = por %p5479_p6, %p5478_p13 }
  0xa2   : > { %p5476_p4 = pneg %p5475_p2  ;;  %p5482_p10 = por %p5481_p1, %p5480_p3 }
  0xa4   : > { %p5483_p9 = pnand %p5482_p10, %p5476_p4 }
  0xa6   : > { %5486 = shalt.err (!%p5483_p9)
}
  0xa7   : > { %s5487_s10 = scalar_lea.vmem %s6115_s28, 1024  ;;  %s5794_s5 = smov [#allocation7]  }
  0xa8   : > { %p5488_p12 = scmp.ne.s32.totalorder %s6115_s28, %s5487_s10  ;;  %s5492_s0 = sshll.u32 %s5794_s5, 4  ;;  %s5493_s0 = int_to_ptr.vmem [resolvable:$false] %s5492_s0 }
  0xa9   : > { %s5494_s13 = scalar_lea.vmem %s5493_s0, 2048  ;;  %p5495_p5 = scmp.lt.s32.totalorder %s6115_s28, %s5493_s0 }
  0xaa   : > { %p5490_p2 = pnand %p5488_p12, %p7124_p0  ;;  %p5496_p6 = scmp.lt.s32.totalorder %s5494_s13, %s5487_s10 }
  0xac   : > { %p5491_p8 = pneg %p5490_p2  ;;  %p5497_p13 = por %p5496_p6, %p5495_p5 }
  0xae   : > { %p5498_p3 = pnand %p5497_p13, %p5491_p8 }
  0xb0   : > { %5501 = shalt.err (!%p5498_p3)
}
  0xb1   : > { %s7177_s4 = smov 16   ;;  %s7178_s14 = smov 256  }
  0xb2   : > { %4776 = dma.hbm_to_vmem [thread:$0]  (!%p6121_p11), %s6128_s12, 1024, %s6115_s28, %s6132_s15, %s7178_s14, %s7178_s14, %s7177_s4  }
  0xb3   : > { %s7179_s7 = sld [smem:[#allocation46_spill]] }
  0xb9   : > { %s5502_s5 = scalar_lea.hbm %s7179_s7, 4096 }
  0xba   : > { %p5503_p5 = scmp.ne.s32.totalorder %s7179_s7, %s5502_s5  ;;  %p5509_p10 = scmp.lt.u32.totalorder %s5502_s5, %s7179_s7 }
  0xbc   : > { %p5505_p8 = pnand %p5503_p5, %p5990_p7 }
  0xbe   : > { %p5506_p9 = pneg %p5505_p8 }
  0xc0   : > { %p5511_p1 = pnand %p5509_p10, %p5506_p9 }
  0xc2   : > { %5514 = shalt.err (!%p5511_p1)
}
  0xc3   : > { %s5515_s23 = scalar_lea.vmem %s539_s9, 4096  ;;  %p5523_p6 = scmp.lt.s32.totalorder %s539_s9, %s539_s9 }
  0xc4   : > { %p5516_p4 = scmp.ne.s32.totalorder %s539_s9, %s5515_s23  ;;  %p5524_p13 = scmp.lt.s32.totalorder %s5515_s23, %s5515_s23 }
  0xc6   : > { %p5518_p12 = pnand %p5516_p4, %p5990_p7  ;;  %p5525_p3 = por %p5524_p13, %p5523_p6 }
  0xc8   : > { %p5519_p2 = pneg %p5518_p12 }
  0xca   : > { %p5526_p0 = pnand %p5525_p3, %p5519_p2 }
  0xcc   : > { %5529 = shalt.err (!%p5526_p0)
}
  0xcd   : > { %p7180_p5 = scmp.ne.s32.totalorder %s7158_s19, 0  ;;  %s7181_s12 = smov 8  }
  0xce   : > { %s7182_s28 = smov 128   ;;  %s5795_s27 = smov [#allocation15]  }
  0xcf   : > { %4757 = dma.hbm_to_vmem [thread:$0]  (!%p7180_p5), %s7179_s7, 4096, %s539_s9, [#allocation11], %s7182_s28, %s7182_s28, %s7181_s12  }
  0xd0   : > { %s570_s5 = sshll.u32 %s5795_s27, 4  ;;  %s5796_s10 = smov [#allocation18]   ;;  %s571_s5 = int_to_ptr.vmem [resolvable:$true] %s570_s5 }
  0xd1   : > { %s608_s0 = sshll.u32 %s5796_s10, 4  ;;  %s5530_s29 = scalar_lea.hbm %s7088_s11, 4096  ;;  %s609_s0 = int_to_ptr.vmem [resolvable:$true] %s608_s0 }
  0xd2   : > { %p5531_p0 = scmp.ne.s32.totalorder %s7088_s11, %s5530_s29  ;;  %p5537_p10 = scmp.lt.u32.totalorder %s5530_s29, %s7088_s11 }
  0xd4   : > { %p5533_p8 = pnand %p5531_p0, %p5990_p7 }
  0xd6   : > { %p5534_p9 = pneg %p5533_p8 }
  0xd8   : > { %p5539_p1 = pnand %p5537_p10, %p5534_p9 }
  0xda   : > { %5542 = shalt.err (!%p5539_p1)
}
  0xdb   : > { %s5543_s9 = scalar_lea.vmem %s571_s5, 4096  ;;  %p5551_p6 = scmp.lt.s32.totalorder %s571_s5, %s571_s5 }
  0xdc   : > { %p5544_p4 = scmp.ne.s32.totalorder %s571_s5, %s5543_s9  ;;  %p5552_p13 = scmp.lt.s32.totalorder %s5543_s9, %s5543_s9 }
  0xde   : > { %p5546_p12 = pnand %p5544_p4, %p5990_p7  ;;  %p5553_p3 = por %p5552_p13, %p5551_p6 }
  0xe0   : > { %p5547_p2 = pneg %p5546_p12 }
  0xe2   : > { %p5554_p11 = pnand %p5553_p3, %p5547_p2 }
  0xe4   : > { %5557 = shalt.err (!%p5554_p11)
}
  0xe5   : > { %4763 = dma.hbm_to_vmem [thread:$0]  (!%p7180_p5), %s7088_s11, 4096, %s571_s5, [#allocation14], %s7182_s28, %s7182_s28, %s7181_s12  }
  0xe6   : > { %s5558_s2 = scalar_lea.hbm %s7094_s17, 8192 }
  0xe7   : > { %p5559_p0 = scmp.ne.s32.totalorder %s7094_s17, %s5558_s2  ;;  %p5565_p9 = scmp.lt.u32.totalorder %s5558_s2, %s7094_s17 }
  0xe9   : > { %p5561_p11 = pnand %p5559_p0, %p5990_p7 }
  0xeb   : > { %p5562_p8 = pneg %p5561_p11 }
  0xed   : > { %p5567_p10 = pnand %p5565_p9, %p5562_p8 }
  0xef   : > { %5570 = shalt.err (!%p5567_p10)
}
  0xf0   : > { %s5571_s18 = scalar_lea.vmem %s609_s0, 8192  ;;  %p5579_p2 = scmp.lt.s32.totalorder %s609_s0, %s609_s0 }
  0xf1   : > { %p5572_p1 = scmp.ne.s32.totalorder %s609_s0, %s5571_s18  ;;  %p5580_p6 = scmp.lt.s32.totalorder %s5571_s18, %s5571_s18 }
  0xf3   : > { %p5574_p4 = pnand %p5572_p1, %p5990_p7  ;;  %p5581_p13 = por %p5580_p6, %p5579_p2 }
  0xf5   : > { %p5575_p12 = pneg %p5574_p4 }
  0xf7   : > { %p5582_p3 = pnand %p5581_p13, %p5575_p12 }
  0xf9   : > { %5585 = shalt.err (!%p5582_p3)
}
  0xfa   : > { %s7183_s8 = sld [smem:[#allocation28_spill]]  ;;  %s60_s19 = sadd.s32 1, %s5764_s22 }
  0xfb   : > { %4769 = dma.hbm_to_vmem [thread:$0]  (!%p7180_p5), %s7094_s17, 8192, %s609_s0, [#allocation17], %s7182_s28, %s7182_s28, %s7181_s12  }
  0xfc   : > { %p7184_p7 = scmp.eq.s32.totalorder %s6097_s21, 0  ;;  %p67_p0 = scmp.ne.s32.totalorder %s5764_s22, %s5760_s1 }
  0xfd   : > { %s625_s6 = sand.u32 1, %s5764_s22   ;;  %s4604_s29 = sshll.u32 %s5780_s25, 11 }
  0xfe   : > { %s6231_s30 = scalar_select %p7184_p7, %s5764_s22, %s60_s19  }
  0xff   : > { %p7185_p8 = scmp.eq.s32.totalorder %s5784_s3, 0  ;;  %p7186_p10 = scmp.eq.s32.totalorder %s5959_s26, 0 }
 0x100   : > { %p73_p11 = scmp.ne.s32.totalorder %s5760_s1, %s7183_s8  ;;  %s4314_s2 = sshll.u32 %s625_s6, 7 }
 0x101   : > { %p69_p9 = por %p7185_p8, %p67_p0  ;;  %s7188_s13 = sld [smem:[#allocation39_spill]] }
 0x102   : > { %p6243_p1 = por %p7186_p10, %p73_p11  ;;  %s629_s21 = scalar_lea.vmem [#allocation4], %s4314_s2 }
 0x103   : > { %s636_s28 = sshll.u32 %s629_s21, 4  ;;  %p7189_p5 = scmp.lt.s32.totalorder %s5784_s3, 4  ;;  %s6258_s28 = int_to_ptr.vmem [resolvable:$true] %s636_s28 }
 0x104   : > { %s7191_s23 = sand.u32 1, %s5752_s20   ;;  %s6264_s5 = scalar_lea.sflag [#allocation5], %s625_s6 }
 0x105   : > { %p6254_p4 = pnand %p7189_p5, %p69_p9  ;;  %s6262_s18 = sshll.u32 %s7191_s23, 3 }
 0x107   : > { %s6250_s12 = scalar_lea.hbm %s7188_s13, %s4604_s29  ;;  %p5588_p2 = pneg %p6254_p4 }
 0x108   : > { %s5586_s9 = scalar_lea.hbm %s6250_s12, 2048  ;;  %s5591_s29 = scalar_lea.hbm %s7188_s13, 4096 }
 0x109   : > { %p5587_p12 = scmp.ne.s32.totalorder %s6250_s12, %s5586_s9  ;;  %p5592_p3 = scmp.lt.u32.totalorder %s6250_s12, %s7188_s13 }
 0x10a   : > { %p5593_p7 = scmp.lt.u32.totalorder %s5591_s29, %s5586_s9  ;;  %p5595_p11 = scmp.lt.u32.totalorder %s5586_s9, %s6250_s12 }
 0x10b   : > { %p5589_p6 = pnand %p5588_p2, %p5587_p12 }
 0x10c   : > { %p5594_p0 = por %p5593_p7, %p5592_p3 }
 0x10d   : > { %p5590_p13 = pneg %p5589_p6 }
 0x10e   : > { %p5596_p8 = por %p5595_p11, %p5594_p0 }
 0x110   : > { %p5597_p9 = pnand %p5596_p8, %p5590_p13 }
 0x112   : > { %5600 = shalt.err (!%p5597_p9)
}
 0x113   : > { %s5601_s6 = scalar_lea.vmem %s6258_s28, 2048  ;;  %s5797_s10 = smov [#allocation4]  }
 0x114   : > { %p5602_p10 = scmp.ne.s32.totalorder %s6258_s28, %s5601_s6  ;;  %s5606_s21 = sshll.u32 %s5797_s10, 4  ;;  %s5607_s21 = int_to_ptr.vmem [resolvable:$false] %s5606_s21 }
 0x115   : > { %s5608_s23 = scalar_lea.vmem %s5607_s21, 4096  ;;  %p5609_p6 = scmp.lt.s32.totalorder %s6258_s28, %s5607_s21 }
 0x116   : > { %p5604_p5 = pnand %p5602_p10, %p5588_p2  ;;  %p5610_p3 = scmp.lt.s32.totalorder %s5608_s23, %s5601_s6 }
 0x118   : > { %p5605_p12 = pneg %p5604_p5  ;;  %p5611_p7 = por %p5610_p3, %p5609_p6 }
 0x11a   : > { %p5612_p0 = pnand %p5611_p7, %p5605_p12 }
 0x11c   : > { %5615 = shalt.err (!%p5612_p0)
}
 0x11d   : > { %4773 = dma.hbm_to_vmem [thread:$0]  (!%p6254_p4), %s6250_s12, 2048, %s6258_s28, %s6264_s5, %s7178_s14, %s7178_s14, %s7177_s4  }
 0x11e   : > { %s4323_s9 = sshll.u32 %s5780_s25, 1  ;;  %s674_s8 = scalar_lea.vmem [#allocation9], %s6262_s18 }
 0x11f   : > { %s683_s19 = sshll.u32 %s674_s8, 4  ;;  %s679_s29 = sadd.s32 %s5776_s24, %s4323_s9  ;;  %s6298_s19 = int_to_ptr.vmem [resolvable:$true] %s683_s19 }
 0x120   : > { %s4324_s2 = sshll.u32 %s679_s29, 7  ;;  %s7192_s6 = sld [smem:[#allocation41_spill]] }
 0x121   : > { %p7193_p13 = scmp.ne.s32.totalorder %s7174_s16, 0 }
 0x123   : > { %p7194_p11 = pneg %p7193_p13 }
 0x126   : > { %s681_s10 = scalar_lea.hbm %s7192_s6, %s4324_s2  ;;  %s5621_s4 = scalar_lea.hbm %s7192_s6, 512 }
 0x127   : > { %s5616_s21 = scalar_lea.hbm %s681_s10, 128  ;;  %p5622_p4 = scmp.lt.u32.totalorder %s681_s10, %s7192_s6 }
 0x128   : > { %p5617_p2 = scmp.ne.s32.totalorder %s681_s10, %s5616_s21  ;;  %p5623_p10 = scmp.lt.u32.totalorder %s5621_s4, %s5616_s21 }
 0x129   : > { %p5625_p12 = scmp.lt.u32.totalorder %s5616_s21, %s681_s10 }
 0x12a   : > { %p5619_p8 = pnand %p5617_p2, %p7194_p11  ;;  %p5624_p5 = por %p5623_p10, %p5622_p4 }
 0x12c   : > { %p5620_p9 = pneg %p5619_p8  ;;  %p5626_p6 = por %p5625_p12, %p5624_p5 }
 0x12e   : > { %p5627_p3 = pnand %p5626_p6, %p5620_p9 }
 0x130   : > { %5630 = shalt.err (!%p5627_p3)
}
 0x131   : > { %s5631_s28 = scalar_lea.vmem %s6298_s19, 128  ;;  %p7195_p0 = pmov %p7194_p11 }
 0x132   : > { %p5632_p7 = scmp.ne.s32.totalorder %s6298_s19, %s5631_s28  ;;  %s5798_s7 = smov [#allocation9]  }
 0x133   : > { %s5636_s18 = sshll.u32 %s5798_s7, 4  ;;  %s5637_s18 = int_to_ptr.vmem [resolvable:$false] %s5636_s18 }
 0x134   : > { %p5634_p2 = pnand %p5632_p7, %p7195_p0  ;;  %s5638_s5 = scalar_lea.vmem %s5637_s18, 256 }
 0x135   : > { %p5639_p8 = scmp.lt.s32.totalorder %s6298_s19, %s5637_s18  ;;  %p5640_p4 = scmp.lt.s32.totalorder %s5638_s5, %s5631_s28 }
 0x136   : > { %p5635_p11 = pneg %p5634_p2 }
 0x137   : > { %p5641_p10 = por %p5640_p4, %p5639_p8 }
 0x139   : > { %p5642_p5 = pnand %p5641_p10, %p5635_p11 }
 0x13b   : > { %5645 = shalt.err (!%p5642_p5)
}
 0x13c   : > { %s7196_s9 = sld [smem:[#allocation38_spill]]  ;;  %s7197_s8 = sld [smem:[#allocation31_spill]] }
 0x142   : > { %4779 = dma.hbm_to_vmem [thread:$0]  (!%p7193_p13), %s681_s10, 128, %s6298_s19, %s7196_s9  }
 0x143   : > { %p7198_p9 = scmp.ne.s32.totalorder %s7197_s8, 0 }
 0x144   : > { %s694_s29 = sand.u32 (!%p7198_p9), 1, %s5760_s1  }
 0x145   : > { %692 = sbr.rel (%p7198_p9) target bundleno = 3970 (0xf82), region = 96  ;;  %s4326_s2 = sshll.u32 (!%p7198_p9), %s694_s29, 7 }
 0x146   : > { %s695_s27 = scalar_lea.sflag (!%p7198_p9), [#allocation5], %s694_s29  ;;  %s6325_s0 = scalar_lea.vmem (!%p7198_p9), [#allocation4], %s4326_s2 }
 0x14c   : > { %5719 = dma.done.wait (%p6243_p1), %s695_s27, 2048  }
 0x14d   : > { %5721 = vsyncadd (%p6243_p1), %s695_s27, 4294965248  ;;  %s7199_s16 = sld [smem:[#allocation27_spill]]  ;;  %s7200_s21 = sld [smem:[#allocation34_spill]] }
 0x14e   : > { %s703_s23 = sand.u32 1, %s5959_s26  }
 0x14f   : > { %s704_s4 = scalar_lea.sflag [#allocation8], %s703_s23 }
 0x153   : > { %s6333_s19 = sand.u32 1, %s7199_s16   ;;  %p7201_p13 = scmp.ne.s32.totalorder %s7200_s21, 0 }
 0x154   : > { %s4327_s10 = sshll.u32 %s6333_s19, 6 }
 0x155   : > { %s6336_s14 = scalar_lea.vmem [#allocation7], %s4327_s10 }
 0x156   : > { %5723 = dma.done.wait (%p7201_p13), %s704_s4, 1152  }
 0x157   : > { %5725 = vsyncadd (%p7201_p13), %s704_s4, 4294966144  ;;  %s4328_s15 = sshll.u32 %s6333_s19, 3  ;;  %p7202_p1 = scmp.eq.s32.totalorder %s5959_s26, 0 }
 0x158   : > { %s6343_s12 = scalar_lea.vmem [#allocation9], %s4328_s15 }
 0x159   : > { %5727 = dma.done.wait (%p7202_p1), [#allocation11], 8192   ;;  %p7203_p12 = pmov %p7202_p1 }
 0x15a   : > { %p7204_p6 = pmov %p7202_p1 }
 0x15b   : > { %5729 = vsyncadd (%p7203_p12), [#allocation11], 4294959104 }
 0x15c   : > { %5731 = dma.done.wait (%p7204_p6), [#allocation14], 8192   ;;  %p7205_p3 = pmov %p7202_p1 }
 0x15d   : > { %p7206_p7 = pmov %p7202_p1 }
 0x15e   : > { %5733 = vsyncadd (%p7205_p3), [#allocation14], 4294959104 }
 0x15f   : > { %5735 = dma.done.wait (%p7206_p7), [#allocation17], 16384   ;;  %p7207_p0 = pmov %p7202_p1 }
 0x160   : > { %s6357_s28 = scalar_lea.vmem [#allocation19], %s4327_s10  ;;  %s7208_s7 = sld [smem:[#allocation29_spill]] }
 0x161   : > { %5737 = vsyncadd (%p7207_p0), [#allocation17], 4294950912 }
 0x166   : > { %p4336_p2 = scmp.ne.s32.totalorder %s7208_s7, 0 }
 0x167   : > { %v6361_v0 = vld [vmem:[%s6325_s0] sm:$0xff] (!%p4336_p2)  ;;  %v6364_v1 = vld [vmem:[%s6325_s0 + $0x8] sm:$0xff] (!%p4336_p2)  ;;  %v6375_v5 = vld [vmem:[%s6325_s0 + $0x10] sm:$0xff] (!%p4336_p2)  ;;  %s7209_s5 = sld [smem:[#allocation42_spill]] (!%p4336_p2)  ;;  %s7210_s29 = sld [smem:[#allocation43_spill]] (!%p4336_p2)  ;;  %vm1625_vm0 = vcmask (!%p4336_p2), 523264  }
 0x168   : > { %813 = sbr.rel (%p4336_p2) target bundleno = 1163 (0x48b), region = 136  ;;  %v6367_v2 = vld [vmem:[%s6325_s0 + $0x20] sm:$0xff] (!%p4336_p2)  ;;  %v832_v3 = vadd.f32 (!%p4336_p2), %v6364_v1, %v6361_v0  ;;  %v6372_v4 = vld [vmem:[%s6325_s0 + $0x28] sm:$0xff] (!%p4336_p2)  ;;  %v6378_v6 = vld [vmem:[%s6325_s0 + $0x18] sm:$0xff] (!%p4336_p2)  ;;  %s7212_s23 = sld [smem:[#allocation49_spill]] (!%p4336_p2) }
 0x169   : > { %v838_v7 = vadd.f32 (!%p4336_p2), %v6372_v4, %v6367_v2  ;;  %v6383_v8 = vld [vmem:[%s6325_s0 + $0x30] sm:$0xff] (!%p4336_p2)  ;;  %v6386_v9 = vld [vmem:[%s6325_s0 + $0x38] sm:$0xff] (!%p4336_p2)  ;;  %v835_v10 = vadd.f32 (!%p4336_p2), %v6378_v6, %v6375_v5  ;;  %v6393_v12 = vld [vmem:[%s6325_s0 + $0x40] sm:$0xff] (!%p4336_p2) }
 0x16a   : > { %833 = vadd.xlane.f32.xlu0 (!%p4336_p2), %v832_v3  ;;  %v841_v11 = vadd.f32 (!%p4336_p2), %v6386_v9, %v6383_v8  ;;  %v6396_v13 = vld [vmem:[%s6325_s0 + $0x48] sm:$0xff] (!%p4336_p2)  ;;  %v6399_v14 = vld [vmem:[%s6325_s0 + $0x50] sm:$0xff] (!%p4336_p2)  ;;  %v6402_v15 = vld [vmem:[%s6325_s0 + $0x58] sm:$0xff] (!%p4336_p2) }
 0x16b   : > { %839 = vadd.xlane.f32.xlu1 (!%p4336_p2), %v838_v7  ;;  %v6405_v16 = vld [vmem:[%s6325_s0 + $0x60] sm:$0xff] (!%p4336_p2)  ;;  %v6408_v17 = vld [vmem:[%s6325_s0 + $0x68] sm:$0xff] (!%p4336_p2)  ;;  %v844_v18 = vadd.f32 (!%p4336_p2), %v6396_v13, %v6393_v12  ;;  %v6413_v19 = vld [vmem:[%s6325_s0 + $0x70] sm:$0xff] (!%p4336_p2)  ;;  %v847_v21 = vadd.f32 (!%p4336_p2), %v6402_v15, %v6399_v14 }
 0x16c   : > { %v6416_v20 = vld [vmem:[%s6325_s0 + $0x78] sm:$0xff] (!%p4336_p2)  ;;  %v850_v22 = vadd.f32 (!%p4336_p2), %v6408_v17, %v6405_v16  ;;  %v4906_v28 = vld [vmem:[#allocation12 + $0x14] ss:$8 sps:$4 sm:$0xff] (!%p4336_p2)   ;;  %v4910_v30 = vld [vmem:[#allocation12 + $0x10] ss:$8 sps:$4 sm:$0xff] (!%p4336_p2)   ;;  %s7211_s0 = sld [smem:[#allocation47_spill]] (!%p4336_p2) }
 0x16d   : > { %v853_v23 = vadd.f32 (!%p4336_p2), %v6416_v20, %v6413_v19  ;;  %v4900_v24 = vld [vmem:[#allocation12 + $0x4] ss:$8 sps:$4 sm:$0xff] (!%p4336_p2)   ;;  %v4904_v26 = vld [vmem:[#allocation12] ss:$8 sps:$4 sm:$0xff] (!%p4336_p2)   ;;  %v4908_v29 = vld [vmem:[#allocation13 + $0x14] ss:$8 sps:$4 sm:$0xff] (!%p4336_p2)  }
 0x16e   : > { %836 = vadd.xlane.f32.xlu0 (!%p4336_p2), %v835_v10  ;;  %v4902_v25 = vld [vmem:[#allocation13 + $0x4] ss:$8 sps:$4 sm:$0xff] (!%p4336_p2)   ;;  %v4905_v27 = vld [vmem:[#allocation13] ss:$8 sps:$4 sm:$0xff] (!%p4336_p2)   ;;  %1227 = vmatprep.subr.bf16.mxu0 (!%p4336_p2), %v4900_v24  ;;  %v4911_v31 = vld [vmem:[#allocation13 + $0x10] ss:$8 sps:$4 sm:$0xff] (!%p4336_p2)  }
 0x16f   : > { %842 = vadd.xlane.f32.xlu1 %v841_v11  ;;  %1512 = vmatprep.subr.bf16.mxu1 %v4902_v25  ;;  %v4912_v32 = vld [vmem:[#allocation12 + $0x24] ss:$8 sps:$4 sm:$0xff]   ;;  %v4916_v34 = vld [vmem:[#allocation12 + $0x20] ss:$8 sps:$4 sm:$0xff]   ;;  %v4918_v36 = vld [vmem:[#allocation12 + $0x34] ss:$8 sps:$4 sm:$0xff]  }
 0x170   : > { %1228 = vmatpush1.bf16.msra.mxu0 %v4904_v26  ;;  %1513 = vmatpush1.bf16.msra.mxu1 %v4905_v27  ;;  %v4914_v33 = vld [vmem:[#allocation13 + $0x24] ss:$8 sps:$4 sm:$0xff]   ;;  %v4917_v35 = vld [vmem:[#allocation13 + $0x20] ss:$8 sps:$4 sm:$0xff]   ;;  %v4920_v37 = vld [vmem:[#allocation13 + $0x34] ss:$8 sps:$4 sm:$0xff]  }
 0x171   : > { %1229 = vmatprep.subr.bf16.mxu0 %v4906_v28  ;;  %1514 = vmatprep.subr.bf16.mxu1 %v4908_v29  ;;  %v4922_v38 = vld [vmem:[#allocation12 + $0x30] ss:$8 sps:$4 sm:$0xff]   ;;  %v4924_v40 = vld [vmem:[#allocation12 + $0x44] ss:$8 sps:$4 sm:$0xff]   ;;  %v4928_v42 = vld [vmem:[#allocation12 + $0x40] ss:$8 sps:$4 sm:$0xff]  }
 0x172   : > { %845 = vadd.xlane.f32.xlu0 %v844_v18  ;;  %v4923_v39 = vld [vmem:[#allocation13 + $0x30] ss:$8 sps:$4 sm:$0xff]   ;;  %v4926_v41 = vld [vmem:[#allocation13 + $0x44] ss:$8 sps:$4 sm:$0xff]   ;;  %v4929_v43 = vld [vmem:[#allocation13 + $0x40] ss:$8 sps:$4 sm:$0xff]  }
 0x173   : > { %848 = vadd.xlane.f32.xlu1 %v847_v21  ;;  %v4930_v44 = vld [vmem:[#allocation12 + $0x54] ss:$8 sps:$4 sm:$0xff]   ;;  %v4934_v46 = vld [vmem:[#allocation12 + $0x50] ss:$8 sps:$4 sm:$0xff]   ;;  %v4936_v48 = vld [vmem:[#allocation12 + $0x64] ss:$8 sps:$4 sm:$0xff]  }
 0x174   : > { %1230 = vmatpush1.bf16.msra.mxu0 %v4910_v30  ;;  %1515 = vmatpush1.bf16.msra.mxu1 %v4911_v31  ;;  %v4932_v45 = vld [vmem:[#allocation13 + $0x54] ss:$8 sps:$4 sm:$0xff]   ;;  %v4935_v47 = vld [vmem:[#allocation13 + $0x50] ss:$8 sps:$4 sm:$0xff]   ;;  %v4938_v49 = vld [vmem:[#allocation13 + $0x64] ss:$8 sps:$4 sm:$0xff]  }
 0x175   : > { %1231 = vmatprep.subr.bf16.mxu0 %v4912_v32  ;;  %1516 = vmatprep.subr.bf16.mxu1 %v4914_v33  ;;  %v4940_v50 = vld [vmem:[#allocation12 + $0x60] ss:$8 sps:$4 sm:$0xff]   ;;  %v4942_v52 = vld [vmem:[#allocation12 + $0x74] ss:$8 sps:$4 sm:$0xff]   ;;  %v4946_v54 = vld [vmem:[#allocation12 + $0x70] ss:$8 sps:$4 sm:$0xff]  }
 0x176   : > { %851 = vadd.xlane.f32.xlu0 %v850_v22  ;;  %v4941_v51 = vld [vmem:[#allocation13 + $0x60] ss:$8 sps:$4 sm:$0xff]   ;;  %v4944_v53 = vld [vmem:[#allocation13 + $0x74] ss:$8 sps:$4 sm:$0xff]   ;;  %v4947_v55 = vld [vmem:[#allocation13 + $0x70] ss:$8 sps:$4 sm:$0xff]  }
 0x177   : > { %854 = vadd.xlane.f32.xlu1 %v853_v23  ;;  %v4948_v56 = vld [vmem:[#allocation12 + $0x84] ss:$8 sps:$4 sm:$0xff]   ;;  %v4952_v58 = vld [vmem:[#allocation12 + $0x80] ss:$8 sps:$4 sm:$0xff]  }
 0x178   : > { %1232 = vmatpush1.bf16.msra.mxu0 %v4916_v34  ;;  %1517 = vmatpush1.bf16.msra.mxu1 %v4917_v35  ;;  %v4950_v57 = vld [vmem:[#allocation13 + $0x84] ss:$8 sps:$4 sm:$0xff]   ;;  %v4953_v59 = vld [vmem:[#allocation13 + $0x80] ss:$8 sps:$4 sm:$0xff]  }
 0x179   : > { %1233 = vmatprep.subr.bf16.mxu0 %v4918_v36  ;;  %1518 = vmatprep.subr.bf16.mxu1 %v4920_v37 }
 0x17c   : > { %1234 = vmatpush1.bf16.msra.mxu0 %v4922_v38  ;;  %1519 = vmatpush1.bf16.msra.mxu1 %v4923_v39 }
 0x17d   : > { %1235 = vmatprep.subr.bf16.mxu0 %v4924_v40  ;;  %1520 = vmatprep.subr.bf16.mxu1 %v4926_v41 }
 0x180   : > { %1236 = vmatpush1.bf16.msra.mxu0 %v4928_v42  ;;  %1521 = vmatpush1.bf16.msra.mxu1 %v4929_v43 }
 0x181   : > { %1237 = vmatprep.subr.bf16.mxu0 %v4930_v44  ;;  %1522 = vmatprep.subr.bf16.mxu1 %v4932_v45 }
 0x184   : > { %1238 = vmatpush1.bf16.msra.mxu0 %v4934_v46  ;;  %1523 = vmatpush1.bf16.msra.mxu1 %v4935_v47 }
 0x185   : > { %1239 = vmatprep.subr.bf16.mxu0 %v4936_v48  ;;  %1524 = vmatprep.subr.bf16.mxu1 %v4938_v49 }
 0x188   : > { %1240 = vmatpush1.bf16.msra.mxu0 %v4940_v50  ;;  %1525 = vmatpush1.bf16.msra.mxu1 %v4941_v51 }
 0x189   : > { %1241 = vmatprep.subr.bf16.mxu0 %v4942_v52  ;;  %1526 = vmatprep.subr.bf16.mxu1 %v4944_v53  ;;  %v4954_v52 = vld [vmem:[#allocation12 + $0x94] ss:$8 sps:$4 sm:$0xff]  }
 0x18a   : > { %v4956_v53 = vld [vmem:[#allocation13 + $0x94] ss:$8 sps:$4 sm:$0xff]  }
 0x18c   : > { %1242 = vmatpush1.bf16.msra.mxu0 %v4946_v54  ;;  %1527 = vmatpush1.bf16.msra.mxu1 %v4947_v55  ;;  %v4958_v54 = vld [vmem:[#allocation12 + $0x90] ss:$8 sps:$4 sm:$0xff]  }
 0x18d   : > { %1243 = vmatprep.subr.bf16.mxu0 %v4948_v56  ;;  %1528 = vmatprep.subr.bf16.mxu1 %v4950_v57  ;;  %v4959_v55 = vld [vmem:[#allocation13 + $0x90] ss:$8 sps:$4 sm:$0xff]   ;;  %v4960_v56 = vld [vmem:[#allocation12 + $0xa4] ss:$8 sps:$4 sm:$0xff]  }
 0x18e   : > { %v4962_v57 = vld [vmem:[#allocation13 + $0xa4] ss:$8 sps:$4 sm:$0xff]  }
 0x190   : > { %1244 = vmatpush1.bf16.msra.mxu0 %v4952_v58  ;;  %1529 = vmatpush1.bf16.msra.mxu1 %v4953_v59  ;;  %v4964_v58 = vld [vmem:[#allocation12 + $0xa0] ss:$8 sps:$4 sm:$0xff]  }
 0x191   : > { %1245 = vmatprep.subr.bf16.mxu0 %v4954_v52  ;;  %1530 = vmatprep.subr.bf16.mxu1 %v4956_v53  ;;  %v4965_v59 = vld [vmem:[#allocation13 + $0xa0] ss:$8 sps:$4 sm:$0xff]   ;;  %v830_v53 = vld [vmem:[%s7209_s5] sm:$0x3] }
 0x194   : > { %1246 = vmatpush1.bf16.msra.mxu0 %v4958_v54  ;;  %1531 = vmatpush1.bf16.msra.mxu1 %v4959_v55 }
 0x195   : > { %1247 = vmatprep.subr.bf16.mxu0 %v4960_v56  ;;  %1532 = vmatprep.subr.bf16.mxu1 %v4962_v57 }
 0x198   : > { %1248 = vmatpush1.bf16.msra.mxu0 %v4964_v58  ;;  %1533 = vmatpush1.bf16.msra.mxu1 %v4965_v59  ;;  %v831_v58 = vld [vmem:[%s7210_s29] sm:$0x3] }
 0x1f7   : > { %v834_v60 = vpop.xlane.xlu0 %833 }
 0x1f8   : > { %v857_v61 = vmul.f32 0.00390625, %v834_v60  ;;  %v840_v62 = vpop.xlane.xlu1 %839  ;;  %v4966_v60 = vld [vmem:[#allocation12 + $0xb4] ss:$8 sps:$4 sm:$0xff]  }
 0x1f9   : > { %v859_v63 = vmul.f32 0.00390625, %v840_v62  ;;  %v4970_v62 = vld [vmem:[#allocation12 + $0xb0] ss:$8 sps:$4 sm:$0xff]   ;;  %1249 = vmatprep.subr.bf16.mxu0 %v4966_v60 }
 0x1fa   : > { %v6425_v3 = vsub.f32 %v6361_v0, %v857_v61  ;;  %v6428_v7 = vsub.f32 %v6364_v1, %v857_v61  ;;  %v4968_v61 = vld [vmem:[#allocation13 + $0xb4] ss:$8 sps:$4 sm:$0xff]   ;;  %1250 = vmatpush1.bf16.msra.mxu0 %v4970_v62 }
 0x1fb   : > { %v6431_v10 = vsub.f32 %v6367_v2, %v859_v63  ;;  %v6434_v11 = vsub.f32 %v6372_v4, %v859_v63  ;;  %v837_v18 = vpop.xlane.xlu0 %836  ;;  %v4971_v63 = vld [vmem:[#allocation13 + $0xb0] ss:$8 sps:$4 sm:$0xff]   ;;  %1534 = vmatprep.subr.bf16.mxu1 %v4968_v61 }
 0x1fc   : > { %v858_v21 = vmul.f32 0.00390625, %v837_v18  ;;  %v843_v22 = vpop.xlane.xlu1 %842  ;;  %v881_v23 = vmul.f32 %v6425_v3, %v6425_v3  ;;  %v882_v24 = vmul.f32 %v6428_v7, %v6428_v7  ;;  %1535 = vmatpush1.bf16.msra.mxu1 %v4971_v63  ;;  %v4972_v18 = vld [vmem:[#allocation12 + $0xc4] ss:$8 sps:$4 sm:$0xff]  }
 0x1fd   : > { %v860_v0 = vmul.f32 0.00390625, %v843_v22  ;;  %v885_v1 = vmul.f32 %v6431_v10, %v6431_v10  ;;  %v886_v2 = vmul.f32 %v6434_v11, %v6434_v11  ;;  %v4976_v22 = vld [vmem:[#allocation12 + $0xc0] ss:$8 sps:$4 sm:$0xff]   ;;  %1251 = vmatprep.subr.bf16.mxu0 %v4972_v18 }
 0x1fe   : > { %v6445_v25 = vsub.f32 %v6375_v5, %v858_v21  ;;  %v6448_v4 = vsub.f32 %v6378_v6, %v858_v21  ;;  %v897_v26 = vadd.f32 %v882_v24, %v881_v23  ;;  %v4974_v21 = vld [vmem:[#allocation13 + $0xc4] ss:$8 sps:$4 sm:$0xff]   ;;  %v4977_v23 = vld [vmem:[#allocation13 + $0xc0] ss:$8 sps:$4 sm:$0xff]   ;;  %1252 = vmatpush1.bf16.msra.mxu0 %v4976_v22  ;;  %v4978_v24 = vld [vmem:[#allocation12 + $0xd4] ss:$8 sps:$4 sm:$0xff]  }
 0x1ff   : > { %v6451_v27 = vsub.f32 %v6383_v8, %v860_v0  ;;  %v6454_v28 = vsub.f32 %v6386_v9, %v860_v0  ;;  %v846_v29 = vpop.xlane.xlu0 %845  ;;  %v903_v32 = vadd.f32 %v886_v2, %v885_v1  ;;  %1536 = vmatprep.subr.bf16.mxu1 %v4974_v21  ;;  %v4980_v0 = vld [vmem:[#allocation13 + $0xd4] ss:$8 sps:$4 sm:$0xff]   ;;  %v4982_v1 = vld [vmem:[#allocation12 + $0xd0] ss:$8 sps:$4 sm:$0xff]   ;;  %1253 = vmatprep.subr.bf16.mxu0 %v4978_v24 }
 0x200   : > { %v861_v30 = vmul.f32 0.00390625, %v846_v29  ;;  %898 = vadd.xlane.f32.xlu0 %v897_v26  ;;  %v849_v31 = vpop.xlane.xlu1 %848  ;;  %v883_v33 = vmul.f32 %v6445_v25, %v6445_v25  ;;  %v884_v5 = vmul.f32 %v6448_v4, %v6448_v4  ;;  %1537 = vmatpush1.bf16.msra.mxu1 %v4977_v23  ;;  %v4983_v2 = vld [vmem:[#allocation13 + $0xd0] ss:$8 sps:$4 sm:$0xff]   ;;  %v4984_v26 = vld [vmem:[#allocation12 + $0xe4] ss:$8 sps:$4 sm:$0xff]  }
 0x201   : > { %v862_v6 = vmul.f32 0.00390625, %v849_v31  ;;  %v887_v34 = vmul.f32 %v6451_v27, %v6451_v27  ;;  %v888_v8 = vmul.f32 %v6454_v28, %v6454_v28  ;;  %1538 = vmatprep.subr.bf16.mxu1 %v4980_v0  ;;  %v4986_v29 = vld [vmem:[#allocation13 + $0xe4] ss:$8 sps:$4 sm:$0xff]   ;;  %v4989_v31 = vld [vmem:[#allocation13 + $0xe0] ss:$8 sps:$4 sm:$0xff]  }
 0x202   : > { %v6465_v9 = vsub.f32 %v6393_v12, %v861_v30  ;;  %v6468_v35 = vsub.f32 %v6396_v13, %v861_v30  ;;  %v900_v36 = vadd.f32 %v884_v5, %v883_v33  ;;  %1254 = vmatpush1.bf16.msra.mxu0 %v4982_v1  ;;  %v4988_v30 = vld [vmem:[#allocation12 + $0xe0] ss:$8 sps:$4 sm:$0xff]   ;;  %v4992_v33 = vld [vmem:[#allocation13 + $0xf4] ss:$8 sps:$4 sm:$0xff]   ;;  %v4994_v5 = vld [vmem:[#allocation12 + $0xf0] ss:$8 sps:$4 sm:$0xff]  }
 0x203   : > { %v6471_v37 = vsub.f32 %v6399_v14, %v862_v6  ;;  %v6474_v38 = vsub.f32 %v6402_v15, %v862_v6  ;;  %v852_v39 = vpop.xlane.xlu0 %851  ;;  %v906_v42 = vadd.f32 %v888_v8, %v887_v34  ;;  %1255 = vmatprep.subr.bf16.mxu0 %v4984_v26  ;;  %v4995_v6 = vld [vmem:[#allocation13 + $0xf0] ss:$8 sps:$4 sm:$0xff]  }
 0x204   : > { %v863_v40 = vmul.f32 0.00390625, %v852_v39  ;;  %904 = vadd.xlane.f32.xlu0 %v903_v32  ;;  %901 = vadd.xlane.f32.xlu1 %v900_v36  ;;  %v855_v41 = vpop.xlane.xlu1 %854  ;;  %v889_v12 = vmul.f32 %v6465_v9, %v6465_v9  ;;  %v890_v13 = vmul.f32 %v6468_v35, %v6468_v35  ;;  %v4990_v32 = vld [vmem:[#allocation12 + $0xf4] ss:$8 sps:$4 sm:$0xff]   ;;  %v962_v39 = vlaneseq }
 0x205   : > { %v864_v43 = vmul.f32 0.00390625, %v855_v41  ;;  %v891_v14 = vmul.f32 %v6471_v37, %v6471_v37  ;;  %v892_v15 = vmul.f32 %v6474_v38, %v6474_v38  ;;  %1539 = vmatpush1.bf16.msra.mxu1 %v4983_v2 }
 0x206   : > { %v6485_v44 = vsub.f32 %v6405_v16, %v863_v40  ;;  %v6488_v45 = vsub.f32 %v6408_v17, %v863_v40  ;;  %v909_v46 = vadd.f32 %v890_v13, %v889_v12  ;;  %1540 = vmatprep.subr.bf16.mxu1 %v4986_v29  ;;  %1256 = vmatpush1.bf16.msra.mxu0 %v4988_v30 }
 0x207   : > { %v6491_v47 = vsub.f32 %v6413_v19, %v864_v43  ;;  %v6494_v48 = vsub.f32 %v6416_v20, %v864_v43  ;;  %v912_v49 = vadd.f32 %v892_v15, %v891_v14  ;;  %1257 = vmatprep.subr.bf16.mxu0 %v4990_v32  ;;  %v963_v14 = vshrl.u32 %v962_v39, 7 }
 0x208   : > { %907 = vadd.xlane.f32.xlu1 %v906_v42  ;;  %910 = vadd.xlane.f32.xlu0 %v909_v46  ;;  %v893_v50 = vmul.f32 %v6485_v44, %v6485_v44  ;;  %v894_v16 = vmul.f32 %v6488_v45, %v6488_v45 }
 0x209   : > { %v895_v17 = vmul.f32 %v6491_v47, %v6491_v47  ;;  %v896_v51 = vmul.f32 %v6494_v48, %v6494_v48  ;;  %1541 = vmatpush1.bf16.msra.mxu1 %v4989_v31 }
 0x20a   : > { %v915_v19 = vadd.f32 %v894_v16, %v893_v50  ;;  %1542 = vmatprep.subr.bf16.mxu1 %v4992_v33  ;;  %1258 = vmatpush1.bf16.msra.mxu0 %v4994_v5 }
 0x20b   : > { %v918_v20 = vadd.f32 %v896_v51, %v895_v17  ;;  %v6504_v51 = vsub.s32 0, %v963_v14 }
 0x20c   : > { %913 = vadd.xlane.f32.xlu1 %v912_v49  ;;  %916 = vadd.xlane.f32.xlu0 %v915_v19  ;;  %v6506_v19 = vsub.s32 1, %v963_v14 }
 0x20d   : > { %1543 = vmatpush1.bf16.msra.mxu1 %v4995_v6  ;;  %v6515_v59 = vrot.slane %v830_v53, %v6504_v51  ;;  %v6523_v22 = vrot.slane %v831_v58, %v6504_v51 }
 0x20e   : > { %v6518_v60 = vrot.slane %v830_v53, %v6506_v19  ;;  %v6527_v1 = vrot.slane %v831_v58, %v6506_v19 }
 0x210   : > { %919 = vadd.xlane.f32.xlu1 %v918_v20 }
 0x28d   : > { %v899_v34 = vpop.xlane.xlu0 %898 }
 0x28e   : > { %v921_v8 = vmul.f32 0.00390625, %v899_v34 }
 0x290   : > { %v929_v36 = vadd.f32 1e-12, %v921_v8 }
 0x291   : > { %v902_v40 = vpop.xlane.xlu1 %901  ;;  %v905_v41 = vpop.xlane.xlu0 %904 }
 0x292   : > { %4996 = vrsqrt.f32 %v929_v36  ;;  %v922_v42 = vmul.f32 0.00390625, %v902_v40  ;;  %v923_v12 = vmul.f32 0.00390625, %v905_v41 }
 0x294   : > { %v930_v13 = vadd.f32 1e-12, %v922_v42  ;;  %v931_v43 = vadd.f32 1e-12, %v923_v12 }
 0x295   : > { %v908_v15 = vpop.xlane.xlu1 %907  ;;  %v911_v46 = vpop.xlane.xlu0 %910 }
 0x296   : > { %4998 = vrsqrt.f32 %v930_v13  ;;  %v924_v49 = vmul.f32 0.00390625, %v908_v15  ;;  %v925_v50 = vmul.f32 0.00390625, %v911_v46 }
 0x297   : > { %5000 = vrsqrt.f32 %v931_v43 }
 0x298   : > { %v932_v16 = vadd.f32 1e-12, %v924_v49  ;;  %v933_v17 = vadd.f32 1e-12, %v925_v50 }
 0x299   : > { %v914_v20 = vpop.xlane.xlu1 %913  ;;  %v917_v52 = vpop.xlane.xlu0 %916 }
 0x29a   : > { %5002 = vrsqrt.f32 %v932_v16  ;;  %v926_v54 = vmul.f32 0.00390625, %v914_v20  ;;  %v927_v55 = vmul.f32 0.00390625, %v917_v52 }
 0x29b   : > { %5004 = vrsqrt.f32 %v933_v17 }
 0x29c   : > { %v4997_v56 = vpop.eup %4996  ;;  %v934_v57 = vadd.f32 1e-12, %v926_v54  ;;  %v935_v61 = vadd.f32 1e-12, %v927_v55 }
 0x29d   : > { %v920_v62 = vpop.xlane.xlu1 %919  ;;  %v946_v63 = vmul.f32 %v4997_v56, %v6428_v7  ;;  %v945_v18 = vmul.f32 %v4997_v56, %v6425_v3 }
 0x29e   : > { %5006 = vrsqrt.f32 %v934_v57  ;;  %v928_v21 = vmul.f32 0.00390625, %v920_v62 }
 0x29f   : > { %v973_v0 = vmul.f32 %v6518_v60, %v946_v63  ;;  %v972_v2 = vmul.f32 %v6515_v59, %v945_v18  ;;  %5008 = vrsqrt.f32 %v935_v61 }
 0x2a0   : > { %v4999_v23 = vpop.eup %4998  ;;  %v936_v24 = vadd.f32 1e-12, %v928_v21 }
 0x2a1   : > { %v5001_v26 = vpop.eup %5000  ;;  %v948_v7 = vmul.f32 %v4999_v23, %v6448_v4  ;;  %v947_v3 = vmul.f32 %v4999_v23, %v6445_v25  ;;  %v1000_v33 = vadd.f32 %v6527_v1, %v973_v0  ;;  %v999_v5 = vadd.f32 %v6523_v22, %v972_v2 }
 0x2a2   : > { %5010 = vrsqrt.f32 %v936_v24  ;;  %v950_v29 = vmul.f32 %v5001_v26, %v6434_v11  ;;  %v949_v36 = vmul.f32 %v5001_v26, %v6431_v10 }
 0x2a3   : > { %v975_v30 = vmul.f32 %v6518_v60, %v948_v7  ;;  %v974_v31 = vmul.f32 %v6515_v59, %v947_v3 }
 0x2a4   : > { %v5003_v32 = vpop.eup %5002  ;;  %v977_v6 = vmul.f32 %v6518_v60, %v950_v29  ;;  %v976_v10 = vmul.f32 %v6515_v59, %v949_v36 }
 0x2a5   : > { %v5005_v34 = vpop.eup %5004  ;;  %v1002_v8 = vadd.f32 %v6527_v1, %v975_v30  ;;  %v1001_v4 = vadd.f32 %v6523_v22, %v974_v31  ;;  %v952_v25 = vmul.f32 %v5003_v32, %v6454_v28  ;;  %v951_v11 = vmul.f32 %v5003_v32, %v6451_v27 }
 0x2a6   : > { %v954_v42 = vmul.f32 %v5005_v34, %v6468_v35  ;;  %v1004_v43 = vadd.f32 %v6527_v1, %v977_v6  ;;  %v1003_v20 = vadd.f32 %v6523_v22, %v976_v10  ;;  %v953_v52 = vmul.f32 %v5005_v34, %v6465_v9 }
 0x2a7   : > { %v1016_v39 = vpack.c.bf16 %v1002_v8, %v1000_v33  ;;  %v1015_v40 = vpack.c.bf16 %v1001_v4, %v999_v5  ;;  %v979_v41 = vmul.f32 %v6518_v60, %v952_v25  ;;  %v978_v13 = vmul.f32 %v6515_v59, %v951_v11 }
 0x2a8   : > { %v5007_v12 = vpop.eup %5006  ;;  %v981_v46 = vmul.f32 %v6518_v60, %v954_v42  ;;  %v980_v58 = vmul.f32 %v6515_v59, %v953_v52 }
 0x2a9   : > { %1259 = vmatprep.mubr.bf16.mxu0 %v1016_v39  ;;  %1544 = vmatprep.mubr.bf16.mxu1 %v1016_v39  ;;  %v1006_v14 = vadd.f32 %v6527_v1, %v979_v41  ;;  %v956_v28 = vmul.f32 %v5007_v12, %v6474_v38  ;;  %v5009_v27 = vpop.eup %5008  ;;  %v1005_v50 = vadd.f32 %v6523_v22, %v978_v13 }
 0x2aa   : > { %1260 = vmatmul.mubr.bf16.vlgmr.msra.gmra.mrb[0].mxu0 %v1015_v40  ;;  %1545 = vmatmul.mubr.bf16.vlgmr.msra.gmra.mrb[0].mxu1 %v1015_v40  ;;  %v955_v16 = vmul.f32 %v5007_v12, %v6471_v37  ;;  %v1008_v53 = vadd.f32 %v6527_v1, %v981_v46  ;;  %v958_v54 = vmul.f32 %v5009_v27, %v6488_v45 }
 0x2ab   : > { %v1018_v15 = vpack.c.bf16 %v1006_v14, %v1004_v43  ;;  %v983_v35 = vmul.f32 %v6518_v60, %v956_v28  ;;  %v1017_v55 = vpack.c.bf16 %v1005_v50, %v1003_v20  ;;  %v1007_v62 = vadd.f32 %v6523_v22, %v980_v58 }
 0x2ac   : > { %v5011_v49 = vpop.eup %5010  ;;  %v982_v56 = vmul.f32 %v6515_v59, %v955_v16  ;;  %v957_v63 = vmul.f32 %v5009_v27, %v6485_v44  ;;  %v1055_v44 = vld [vmem:[%s7211_s0] sm:$0x3] }
 0x2ad   : > { %1269 = vmatprep.mubr.bf16.mxu0 %v1018_v15  ;;  %1554 = vmatprep.mubr.bf16.mxu1 %v1018_v15  ;;  %v1010_v17 = vadd.f32 %v6527_v1, %v983_v35  ;;  %v960_v38 = vmul.f32 %v5011_v49, %v6494_v48  ;;  %v985_v48 = vmul.f32 %v6518_v60, %v958_v54 }
 0x2ae   : > { %v1009_v9 = vadd.f32 %v6523_v22, %v982_v56  ;;  %v959_v61 = vmul.f32 %v5011_v49, %v6491_v47  ;;  %v6581_v26 = vrot.slane %v1055_v44, %v6504_v51 }
 0x2af   : > { %v1020_v57 = vpack.c.bf16 %v1010_v17, %v1008_v53  ;;  %v987_v37 = vmul.f32 %v6518_v60, %v960_v38  ;;  %v1012_v18 = vadd.f32 %v6527_v1, %v985_v48  ;;  %v984_v60 = vmul.f32 %v6515_v59, %v957_v63 }
 0x2b0   : > { %v1019_v21 = vpack.c.bf16 %v1009_v9, %v1007_v62  ;;  %v986_v23 = vmul.f32 %v6515_v59, %v959_v61 }
 0x2b1   : > { %v1014_v45 = vadd.f32 %v6527_v1, %v987_v37  ;;  %v1011_v0 = vadd.f32 %v6523_v22, %v984_v60  ;;  %v1340_v1 = vld [vmem:[%s7212_s23] sm:$0x3] }
 0x2b2   : > { %1270 = vmatmul.mubr.bf16.gmra.mrb[4].mxu0 %v1017_v55  ;;  %1555 = vmatmul.mubr.bf16.gmra.mrb[4].mxu1 %v1017_v55  ;;  %v1013_v47 = vadd.f32 %v6523_v22, %v986_v23  ;;  %v6584_v59 = vrot.slane %v1340_v1, %v6504_v51  ;;  %v6587_v22 = vrot.slane %v1055_v44, %v6506_v19 }
 0x2b3   : > { %1279 = vmatprep.mubr.bf16.mxu0 %v1020_v57  ;;  %1564 = vmatprep.mubr.bf16.mxu1 %v1020_v57  ;;  %v1022_v24 = vpack.c.bf16 %v1014_v45, %v1012_v18  ;;  %v6590_v29 = vrot.slane %v1340_v1, %v6506_v19 }
 0x2b4   : > { %v1021_v2 = vpack.c.bf16 %v1013_v47, %v1011_v0 }
 0x2ba   : > { %1280 = vmatmul.mubr.bf16.gmra.mrb[8].mxu0 %v1019_v21  ;;  %1565 = vmatmul.mubr.bf16.gmra.mrb[8].mxu1 %v1019_v21 }
 0x2bb   : > { %1289 = vmatprep.mubr.bf16.mxu0 %v1022_v24  ;;  %1574 = vmatprep.mubr.bf16.mxu1 %v1022_v24 }
 0x2c2   : > { %1290 = vmatmul.mubr.bf16.gmra.mrb[12].mxu0 %v1021_v2  ;;  %1575 = vmatmul.mubr.bf16.gmra.mrb[12].mxu1 %v1021_v2 }
 0x37d   : > { %v1261_v7 = vpop.f32.mrb[0].mxu0  ;;  %v1546_v3 = vpop.f32.mrb[0].mxu1 }
 0x37e   : > { %v1263_v30 = vpop.f32.mrb[1].mxu0  ;;  %v1548_v31 = vpop.f32.mrb[1].mxu1  ;;  %v1262_v5 = vadd.f32 %v1261_v7, %v6581_v26  ;;  %v1547_v6 = vadd.f32 %v1546_v3, %v6584_v59 }
 0x37f   : > { %v1265_v32 = vpop.f32.mrb[2].mxu0  ;;  %v1550_v33 = vpop.f32.mrb[2].mxu1  ;;  %v6597_v25 = vadd.f32 %v1263_v30, %v6587_v22  ;;  %v6600_v19 = vadd.f32 %v1548_v31, %v6590_v29 }
 0x380   : > { %v1266_v34 = vadd.f32 %v1265_v32, %v6581_v26  ;;  %v1551_v51 = vadd.f32 %v1550_v33, %v6584_v59  ;;  %v1267_v8 = vpop.f32.mrb[3].mxu0  ;;  %v1552_v4 = vpop.f32.mrb[3].mxu1 }
 0x381   : > { %v6603_v11 = vadd.f32 %v1267_v8, %v6587_v22  ;;  %v6606_v36 = vadd.f32 %v1552_v4, %v6590_v29 }
 0x382   : > { %v1585_v39 = vpack.c.bf16 %v1551_v51, %v1547_v6  ;;  %v1300_v40 = vpack.c.bf16 %v1266_v34, %v1262_v5 }
 0x383   : > { %v1301_v41 = vpack.c.bf16 %v6603_v11, %v6597_v25  ;;  %v1586_v42 = vpack.c.bf16 %v6606_v36, %v6600_v19 }
 0x384   : > { %1642 = vxpose.xlu1.c.b16.start [1/4] (short) %v1585_v39, 128  ;;  %1593 = vxpose.xlu0.c.b16.start [1/4] (short) %v1300_v40, 128 }
 0x385   : > { %v1271_v12 = vpop.f32.mrb[4].mxu0  ;;  %v1556_v13 = vpop.f32.mrb[4].mxu1 }
 0x386   : > { %v1273_v43 = vpop.f32.mrb[5].mxu0  ;;  %v1558_v14 = vpop.f32.mrb[5].mxu1  ;;  %v1272_v27 = vadd.f32 %v1271_v12, %v6581_v26  ;;  %v1557_v15 = vadd.f32 %v1556_v13, %v6584_v59 }
 0x387   : > { %v1275_v28 = vpop.f32.mrb[6].mxu0  ;;  %v1560_v10 = vpop.f32.mrb[6].mxu1  ;;  %v1274_v16 = vadd.f32 %v1273_v43, %v6587_v22  ;;  %v1559_v17 = vadd.f32 %v1558_v14, %v6590_v29 }
 0x388   : > { %v1276_v46 = vadd.f32 %v1275_v28, %v6581_v26  ;;  %v1561_v35 = vadd.f32 %v1560_v10, %v6584_v59  ;;  %v1277_v49 = vpop.f32.mrb[7].mxu0  ;;  %v1562_v50 = vpop.f32.mrb[7].mxu1 }
 0x389   : > { %v1278_v38 = vadd.f32 %v1277_v49, %v6587_v22  ;;  %v1563_v20 = vadd.f32 %v1562_v50, %v6590_v29 }
 0x38a   : > { %v1302_v52 = vpack.c.bf16 %v1276_v46, %v1272_v27  ;;  %v1587_v53 = vpack.c.bf16 %v1561_v35, %v1557_v15 }
 0x38b   : > { %v1303_v54 = vpack.c.bf16 %v1278_v38, %v1274_v16  ;;  %v1588_v55 = vpack.c.bf16 %v1563_v20, %v1559_v17 }
 0x38c   : > { %1643 = vxpose.xlu1.c.b16.cont [2/4] (short) %v1587_v53, 128  ;;  %1594 = vxpose.xlu0.c.b16.cont [2/4] (short) %v1302_v52, 128 }
 0x38d   : > { %v1281_v56 = vpop.f32.mrb[8].mxu0  ;;  %v1566_v57 = vpop.f32.mrb[8].mxu1 }
 0x38e   : > { %v1283_v37 = vpop.f32.mrb[9].mxu0  ;;  %v1568_v58 = vpop.f32.mrb[9].mxu1  ;;  %v1282_v61 = vadd.f32 %v1281_v56, %v6581_v26  ;;  %v1567_v45 = vadd.f32 %v1566_v57, %v6584_v59 }
 0x38f   : > { %v1285_v48 = vpop.f32.mrb[10].mxu0  ;;  %v1570_v9 = vpop.f32.mrb[10].mxu1  ;;  %v1284_v23 = vadd.f32 %v1283_v37, %v6587_v22  ;;  %v1569_v24 = vadd.f32 %v1568_v58, %v6590_v29 }
 0x390   : > { %v1286_v62 = vadd.f32 %v1285_v48, %v6581_v26  ;;  %v1571_v63 = vadd.f32 %v1570_v9, %v6584_v59  ;;  %v1287_v18 = vpop.f32.mrb[11].mxu0  ;;  %v1572_v21 = vpop.f32.mrb[11].mxu1 }
 0x391   : > { %v1288_v60 = vadd.f32 %v1287_v18, %v6587_v22  ;;  %v1573_v47 = vadd.f32 %v1572_v21, %v6590_v29 }
 0x392   : > { %v1304_v0 = vpack.c.bf16 %v1286_v62, %v1282_v61  ;;  %v1589_v2 = vpack.c.bf16 %v1571_v63, %v1567_v45 }
 0x393   : > { %v1305_v44 = vpack.c.bf16 %v1288_v60, %v1284_v23  ;;  %v1590_v1 = vpack.c.bf16 %v1573_v47, %v1569_v24 }
 0x394   : > { %1644 = vxpose.xlu1.c.b16.cont [3/4] (short) %v1589_v2, 128  ;;  %1595 = vxpose.xlu0.c.b16.cont [3/4] (short) %v1304_v0, 128 }
 0x395   : > { %v1291_v7 = vpop.f32.mrb[12].mxu0  ;;  %v1576_v3 = vpop.f32.mrb[12].mxu1 }
 0x396   : > { %v1293_v30 = vpop.f32.mrb[13].mxu0  ;;  %v1578_v31 = vpop.f32.mrb[13].mxu1  ;;  %v1292_v5 = vadd.f32 %v1291_v7, %v6581_v26  ;;  %v1577_v6 = vadd.f32 %v1576_v3, %v6584_v59 }
 0x397   : > { %v1295_v32 = vpop.f32.mrb[14].mxu0  ;;  %v1580_v33 = vpop.f32.mrb[14].mxu1  ;;  %v1294_v39 = vadd.f32 %v1293_v30, %v6587_v22  ;;  %v1579_v40 = vadd.f32 %v1578_v31, %v6590_v29 }
 0x398   : > { %v1296_v34 = vadd.f32 %v1295_v32, %v6581_v26  ;;  %v1581_v51 = vadd.f32 %v1580_v33, %v6584_v59  ;;  %v1297_v8 = vpop.f32.mrb[15].mxu0  ;;  %v1582_v4 = vpop.f32.mrb[15].mxu1 }
 0x399   : > { %v1298_v12 = vadd.f32 %v1297_v8, %v6587_v22  ;;  %v1583_v13 = vadd.f32 %v1582_v4, %v6590_v29 }
 0x39a   : > { %v1306_v43 = vpack.c.bf16 %v1296_v34, %v1292_v5  ;;  %v1591_v14 = vpack.c.bf16 %v1581_v51, %v1577_v6 }
 0x39b   : > { %v1307_v28 = vpack.c.bf16 %v1298_v12, %v1294_v39  ;;  %v1592_v10 = vpack.c.bf16 %v1583_v13, %v1579_v40 }
 0x39c   : > { %1645 = vxpose.xlu1.c.b16.end [4/4] (short) %v1591_v14, 128  ;;  %1596 = vxpose.xlu0.c.b16.end [4/4] (short) %v1306_v43, 128 }
 0x3ad   : > { %1609 = vxpose.xlu1.c.b16.start [1/4] (short) %v1301_v41, 128  ;;  %1658 = vxpose.xlu0.c.b16.start [1/4] (short) %v1586_v42, 128 }
 0x3b1   : > { %1610 = vxpose.xlu1.c.b16.cont [2/4] (short) %v1303_v54, 128  ;;  %1659 = vxpose.xlu0.c.b16.cont [2/4] (short) %v1588_v55, 128 }
 0x3b5   : > { %1611 = vxpose.xlu1.c.b16.cont [3/4] (short) %v1305_v44, 128  ;;  %1660 = vxpose.xlu0.c.b16.cont [3/4] (short) %v1590_v1, 128 }
 0x3b9   : > { %1612 = vxpose.xlu1.c.b16.end [4/4] (short) %v1307_v28, 128  ;;  %1661 = vxpose.xlu0.c.b16.end [4/4] (short) %v1592_v10, 128 }
 0x3f6   : > { %v1601_v26 = vpop.trf.xlu0  ;;  %v1650_v59 = vpop.trf.xlu1 }
 0x3f7   : > { %1626 = vst.msk [vmem:[#allocation2] sm:$0xff] %vm1625_vm0, %v1601_v26  ;;  %1674 = vxpose.xlu0.c.b16.start [1/8] (narrow) %v1650_v59, 64 }
 0x3fa   : > { %v1602_v22 = vpop.trf.xlu0  ;;  %v1651_v29 = vpop.trf.xlu1 }
 0x3fb   : > { %1627 = vst.msk [vmem:[#allocation2 + $0x8] sm:$0xff] %vm1625_vm0, %v1602_v22  ;;  %1675 = vxpose.xlu0.c.b16.cont [2/8] (narrow) %v1651_v29, 64 }
 0x3fe   : > { %v1603_v25 = vpop.trf.xlu0  ;;  %v1652_v19 = vpop.trf.xlu1 }
 0x3ff   : > { %1628 = vst.msk [vmem:[#allocation2 + $0x10] sm:$0xff] %vm1625_vm0, %v1603_v25  ;;  %1676 = vxpose.xlu0.c.b16.cont [3/8] (narrow) %v1652_v19, 64 }
 0x402   : > { %v1604_v11 = vpop.trf.xlu0  ;;  %v1653_v36 = vpop.trf.xlu1 }
 0x403   : > { %1629 = vst.msk [vmem:[#allocation2 + $0x18] sm:$0xff] %vm1625_vm0, %v1604_v11  ;;  %1677 = vxpose.xlu0.c.b16.cont [4/8] (narrow) %v1653_v36, 64 }
 0x406   : > { %v1605_v41 = vpop.trf.xlu0  ;;  %v1654_v42 = vpop.trf.xlu1 }
 0x407   : > { %1630 = vst.msk [vmem:[#allocation2 + $0x20] sm:$0xff] %vm1625_vm0, %v1605_v41  ;;  %1678 = vxpose.xlu0.c.b16.cont [5/8] (narrow) %v1654_v42, 64 }
 0x40a   : > { %v1606_v27 = vpop.trf.xlu0  ;;  %v1655_v15 = vpop.trf.xlu1 }
 0x40b   : > { %1631 = vst.msk [vmem:[#allocation2 + $0x28] sm:$0xff] %vm1625_vm0, %v1606_v27  ;;  %1679 = vxpose.xlu0.c.b16.cont [6/8] (narrow) %v1655_v15, 64 }
 0x40e   : > { %v1607_v46 = vpop.trf.xlu0  ;;  %v1656_v35 = vpop.trf.xlu1 }
 0x40f   : > { %1632 = vst.msk [vmem:[#allocation2 + $0x30] sm:$0xff] %vm1625_vm0, %v1607_v46  ;;  %1680 = vxpose.xlu0.c.b16.cont [7/8] (narrow) %v1656_v35, 64 }
 0x412   : > { %v1608_v49 = vpop.trf.xlu0  ;;  %v1657_v50 = vpop.trf.xlu1 }
 0x413   : > { %1633 = vst.msk [vmem:[#allocation2 + $0x38] sm:$0xff] %vm1625_vm0, %v1608_v49  ;;  %1681 = vxpose.xlu0.c.b16.end [8/8] (narrow) %v1657_v50, 64 }
 0x416   : > { %v1666_v16 = vpop.trf.xlu0  ;;  %v1617_v17 = vpop.trf.xlu1 }
 0x417   : > { %1690 = vxpose.xlu1.c.b16.start [1/8] (narrow) %v1666_v16, 64  ;;  %1634 = vst.msk [vmem:[#allocation2 + $0x40] sm:$0xff] %vm1625_vm0, %v1617_v17 }
 0x41a   : > { %v1667_v38 = vpop.trf.xlu0  ;;  %v1618_v20 = vpop.trf.xlu1 }
 0x41b   : > { %1691 = vxpose.xlu1.c.b16.cont [2/8] (narrow) %v1667_v38, 64  ;;  %1635 = vst.msk [vmem:[#allocation2 + $0x48] sm:$0xff] %vm1625_vm0, %v1618_v20 }
 0x41e   : > { %v1668_v52 = vpop.trf.xlu0  ;;  %v1619_v53 = vpop.trf.xlu1 }
 0x41f   : > { %1692 = vxpose.xlu1.c.b16.cont [3/8] (narrow) %v1668_v52, 64  ;;  %1636 = vst.msk [vmem:[#allocation2 + $0x50] sm:$0xff] %vm1625_vm0, %v1619_v53 }
 0x422   : > { %v1669_v54 = vpop.trf.xlu0  ;;  %v1620_v55 = vpop.trf.xlu1 }
 0x423   : > { %1693 = vxpose.xlu1.c.b16.cont [4/8] (narrow) %v1669_v54, 64  ;;  %1637 = vst.msk [vmem:[#allocation2 + $0x58] sm:$0xff] %vm1625_vm0, %v1620_v55 }
 0x426   : > { %v1670_v56 = vpop.trf.xlu0  ;;  %v1621_v57 = vpop.trf.xlu1 }
 0x427   : > { %1694 = vxpose.xlu1.c.b16.cont [5/8] (narrow) %v1670_v56, 64  ;;  %1638 = vst.msk [vmem:[#allocation2 + $0x60] sm:$0xff] %vm1625_vm0, %v1621_v57 }
 0x42a   : > { %v1671_v37 = vpop.trf.xlu0  ;;  %v1622_v58 = vpop.trf.xlu1 }
 0x42b   : > { %1695 = vxpose.xlu1.c.b16.cont [6/8] (narrow) %v1671_v37, 64  ;;  %1639 = vst.msk [vmem:[#allocation2 + $0x68] sm:$0xff] %vm1625_vm0, %v1622_v58 }
 0x42e   : > { %v1672_v48 = vpop.trf.xlu0  ;;  %v1623_v9 = vpop.trf.xlu1 }
 0x42f   : > { %1696 = vxpose.xlu1.c.b16.cont [7/8] (narrow) %v1672_v48, 64  ;;  %1640 = vst.msk [vmem:[#allocation2 + $0x70] sm:$0xff] %vm1625_vm0, %v1623_v9 }
 0x432   : > { %v1673_v61 = vpop.trf.xlu0  ;;  %v1624_v45 = vpop.trf.xlu1 }
 0x433   : > { %1697 = vxpose.xlu1.c.b16.end [8/8] (narrow) %v1673_v61, 64  ;;  %1641 = vst.msk [vmem:[#allocation2 + $0x78] sm:$0xff] %vm1625_vm0, %v1624_v45 }
 0x45d   : > { %v1682_v62 = vpop.trf.xlu0 }
 0x45e   : > { %1706 = vst [vmem:[#allocation3] sm:$0xff] %v1682_v62 }
 0x461   : > { %v1683_v63 = vpop.trf.xlu0 }
 0x462   : > { %1707 = vst [vmem:[#allocation3 + $0x8] sm:$0xff] %v1683_v63 }
 0x465   : > { %v1684_v18 = vpop.trf.xlu0 }
 0x466   : > { %1708 = vst [vmem:[#allocation3 + $0x10] sm:$0xff] %v1684_v18 }
 0x469   : > { %v1685_v21 = vpop.trf.xlu0 }
 0x46a   : > { %1709 = vst [vmem:[#allocation3 + $0x18] sm:$0xff] %v1685_v21 }
 0x47d   : > { %v1698_v23 = vpop.trf.xlu1 }
 0x47e   : > { %1710 = vst [vmem:[#allocation3 + $0x20] sm:$0xff] %v1698_v23 }
 0x481   : > { %v1699_v24 = vpop.trf.xlu1 }
 0x482   : > { %1711 = vst [vmem:[#allocation3 + $0x28] sm:$0xff] %v1699_v24 }
 0x485   : > { %v1700_v60 = vpop.trf.xlu1 }
 0x486   : > { %1712 = vst [vmem:[#allocation3 + $0x30] sm:$0xff] %v1700_v60 }
 0x489   : > { %v1701_v47 = vpop.trf.xlu1 }
 0x48a   : > { %1713 = vst [vmem:[#allocation3 + $0x38] sm:$0xff] %v1701_v47 }
 0x48b PF: > { %v1714_v0 = vld [vmem:[%s6336_s14] sm:$0xff]  ;;  %v1715_v2 = vld [vmem:[%s6336_s14 + $0x8] sm:$0xff]  ;;  %v6663_v3 = vld [vmem:[%s6336_s14 + $0x10] sm:$0xff]  ;;  %s7213_s15 = sld [smem:[#allocation42_spill]]  ;;  %s7214_s18 = sld [smem:[#allocation43_spill]]  ;;  %vm2325_vm8 = vcmask 523264  }
 0x48c   : > { %v1718_v44 = vld [vmem:[%s6336_s14 + $0x20] sm:$0xff]  ;;  %v1724_v1 = vadd.f32 %v1715_v2, %v1714_v0  ;;  %v1719_v7 = vld [vmem:[%s6336_s14 + $0x28] sm:$0xff]  ;;  %v6666_v30 = vld [vmem:[%s6336_s14 + $0x18] sm:$0xff]  ;;  %s7215_s8 = sld [smem:[#allocation45_spill]]  ;;  %s7222_s2 = sld [smem:[#allocation50_spill]] }
 0x48d   : > { %v1730_v31 = vadd.f32 %v1719_v7, %v1718_v44  ;;  %v6669_v32 = vld [vmem:[%s6336_s14 + $0x30] sm:$0xff]  ;;  %v6672_v33 = vld [vmem:[%s6336_s14 + $0x38] sm:$0xff]  ;;  %v1727_v5 = vadd.f32 %v6666_v30, %v6663_v3  ;;  %v5015_v8 = vld [vmem:[#allocation10 + $0x14] ss:$8 sps:$4 sm:$0xff]   ;;  %s7223_s0 = sld [smem:[#allocation51_spill]]  ;;  %s7224_s23 = sld [smem:[#allocation52_spill]] }
 0x48e   : > { %1725 = vadd.xlane.f32.xlu0 %v1724_v1  ;;  %v1733_v6 = vadd.f32 %v6672_v33, %v6669_v32  ;;  %v5012_v34 = vld [vmem:[#allocation10 + $0x4] ss:$8 sps:$4 sm:$0xff]   ;;  %v5014_v51 = vld [vmem:[#allocation10] ss:$8 sps:$4 sm:$0xff]   ;;  %v5017_v4 = vld [vmem:[#allocation10 + $0x10] ss:$8 sps:$4 sm:$0xff]  }
 0x48f   : > { %1731 = vadd.xlane.f32.xlu1 %v1730_v31  ;;  %2035 = vmatprep.subr.bf16.mxu0 %v5012_v34  ;;  %v5018_v39 = vld [vmem:[#allocation10 + $0x24] ss:$8 sps:$4 sm:$0xff]   ;;  %v5020_v40 = vld [vmem:[#allocation10 + $0x20] ss:$8 sps:$4 sm:$0xff]   ;;  %v5021_v12 = vld [vmem:[#allocation10 + $0x34] ss:$8 sps:$4 sm:$0xff]  }
 0x490   : > { %2036 = vmatpush1.bf16.msra.mxu0 %v5014_v51  ;;  %v5023_v13 = vld [vmem:[#allocation10 + $0x30] ss:$8 sps:$4 sm:$0xff]   ;;  %v5024_v43 = vld [vmem:[#allocation10 + $0x44] ss:$8 sps:$4 sm:$0xff]   ;;  %v5026_v14 = vld [vmem:[#allocation10 + $0x40] ss:$8 sps:$4 sm:$0xff]  }
 0x491   : > { %2037 = vmatprep.subr.bf16.mxu0 %v5015_v8  ;;  %v5027_v28 = vld [vmem:[#allocation10 + $0x54] ss:$8 sps:$4 sm:$0xff]   ;;  %v5029_v10 = vld [vmem:[#allocation10 + $0x50] ss:$8 sps:$4 sm:$0xff]   ;;  %v5030_v26 = vld [vmem:[#allocation10 + $0x64] ss:$8 sps:$4 sm:$0xff]  }
 0x492   : > { %1728 = vadd.xlane.f32.xlu0 %v1727_v5  ;;  %v5032_v59 = vld [vmem:[#allocation10 + $0x60] ss:$8 sps:$4 sm:$0xff]   ;;  %v5033_v22 = vld [vmem:[#allocation10 + $0x74] ss:$8 sps:$4 sm:$0xff]   ;;  %v5035_v29 = vld [vmem:[#allocation10 + $0x70] ss:$8 sps:$4 sm:$0xff]  }
 0x493   : > { %1734 = vadd.xlane.f32.xlu1 %v1733_v6  ;;  %v5036_v25 = vld [vmem:[#allocation10 + $0x84] ss:$8 sps:$4 sm:$0xff]   ;;  %v5038_v19 = vld [vmem:[#allocation10 + $0x80] ss:$8 sps:$4 sm:$0xff]   ;;  %v5039_v18 = vld [vmem:[#allocation10 + $0x94] ss:$8 sps:$4 sm:$0xff]   ;;  %v1790_v6 = vlaneseq }
 0x494   : > { %2038 = vmatpush1.bf16.msra.mxu0 %v5017_v4  ;;  %v5041_v21 = vld [vmem:[#allocation10 + $0x90] ss:$8 sps:$4 sm:$0xff]   ;;  %v5042_v23 = vld [vmem:[#allocation10 + $0xa4] ss:$8 sps:$4 sm:$0xff]   ;;  %v5044_v24 = vld [vmem:[#allocation10 + $0xa0] ss:$8 sps:$4 sm:$0xff]  }
 0x495   : > { %2039 = vmatprep.subr.bf16.mxu0 %v5018_v39  ;;  %v5045_v60 = vld [vmem:[#allocation10 + $0xb4] ss:$8 sps:$4 sm:$0xff]   ;;  %v5047_v47 = vld [vmem:[#allocation10 + $0xb0] ss:$8 sps:$4 sm:$0xff]   ;;  %s7226_s7 = sld [smem:[#allocation29_spill]]  ;;  %s7227_s26 = sld [smem:[#allocation30_spill]] }
 0x496   : > { %v5053_v1 = vld [vmem:[#allocation10 + $0xd0] ss:$8 sps:$4 sm:$0xff]   ;;  %s7228_s9 = sld [smem:[#allocation55_spill]]  ;;  %s7229_s27 = sld [smem:[#allocation35_spill]] }
 0x497   : > { %v5059_v31 = vld [vmem:[#allocation10 + $0xf0] ss:$8 sps:$4 sm:$0xff]   ;;  %s7230_s21 = sld [smem:[#allocation56_spill]]  ;;  %s4096_s4 = scalar_lea.sflag [#allocation6], %s6333_s19 }
 0x498   : > { %2040 = vmatpush1.bf16.msra.mxu0 %v5020_v40 }
 0x499   : > { %2041 = vmatprep.subr.bf16.mxu0 %v5021_v12  ;;  %v6714_v12 = vshrl.u32 %v1790_v6, 7 }
 0x49c   : > { %2042 = vmatpush1.bf16.msra.mxu0 %v5023_v13  ;;  %p7232_p8 = scmp.ne.s32.totalorder %s7229_s27, 0 }
 0x49d   : > { %2043 = vmatprep.subr.bf16.mxu0 %v5024_v43  ;;  %s7231_s10 = smov %s7230_s21 }
 0x4a0   : > { %2044 = vmatpush1.bf16.msra.mxu0 %v5026_v14 }
 0x4a1   : > { %2045 = vmatprep.subr.bf16.mxu0 %v5027_v28  ;;  %v6717_v28 = vsub.s32 0, %v6714_v12 }
 0x4a4   : > { %2046 = vmatpush1.bf16.msra.mxu0 %v5029_v10  ;;  %v6720_v10 = vsub.s32 1, %v6714_v12 }
 0x4a5   : > { %2047 = vmatprep.subr.bf16.mxu0 %v5030_v26  ;;  %v1722_v26 = vld [vmem:[%s7213_s15] sm:$0x3]  ;;  %s7225_s15 = sld [smem:[#allocation54_spill]] }
 0x4a8   : > { %2048 = vmatpush1.bf16.msra.mxu0 %v5032_v59 }
 0x4a9   : > { %2049 = vmatprep.subr.bf16.mxu0 %v5033_v22  ;;  %v1793_v22 = vrot.slane %v1722_v26, %v6717_v28 }
 0x4ac   : > { %2050 = vmatpush1.bf16.msra.mxu0 %v5035_v29  ;;  %v1797_v29 = vrot.slane %v1722_v26, %v6720_v10 }
 0x4ad   : > { %2051 = vmatprep.subr.bf16.mxu0 %v5036_v25  ;;  %v1723_v25 = vld [vmem:[%s7214_s18] sm:$0x3] }
 0x4b0   : > { %2052 = vmatpush1.bf16.msra.mxu0 %v5038_v19 }
 0x4b1   : > { %2053 = vmatprep.subr.bf16.mxu0 %v5039_v18 }
 0x4b4   : > { %2054 = vmatpush1.bf16.msra.mxu0 %v5041_v21 }
 0x4b5   : > { %2055 = vmatprep.subr.bf16.mxu0 %v5042_v23 }
 0x4b8   : > { %2056 = vmatpush1.bf16.msra.mxu0 %v5044_v24 }
 0x4b9   : > { %2057 = vmatprep.subr.bf16.mxu0 %v5045_v60 }
 0x4bc   : > { %2058 = vmatpush1.bf16.msra.mxu0 %v5047_v47 }
 0x51b   : > { %v1726_v11 = vpop.xlane.xlu0 %1725 }
 0x51c   : > { %v1737_v36 = vmul.f32 0.00390625, %v1726_v11  ;;  %v1732_v41 = vpop.xlane.xlu1 %1731 }
 0x51d   : > { %v1739_v42 = vmul.f32 0.00390625, %v1732_v41 }
 0x51e   : > { %v6678_v27 = vsub.f32 %v1714_v0, %v1737_v36  ;;  %v6680_v15 = vsub.f32 %v1715_v2, %v1737_v36  ;;  %v5048_v0 = vld [vmem:[#allocation10 + $0xc4] ss:$8 sps:$4 sm:$0xff]   ;;  %v5050_v2 = vld [vmem:[#allocation10 + $0xc0] ss:$8 sps:$4 sm:$0xff]  }
 0x51f   : > { %v6682_v46 = vsub.f32 %v1718_v44, %v1739_v42  ;;  %v6684_v35 = vsub.f32 %v1719_v7, %v1739_v42  ;;  %v1729_v49 = vpop.xlane.xlu0 %1728  ;;  %v5051_v44 = vld [vmem:[#allocation10 + $0xd4] ss:$8 sps:$4 sm:$0xff]   ;;  %2059 = vmatprep.subr.bf16.mxu0 %v5048_v0  ;;  %v5054_v7 = vld [vmem:[#allocation10 + $0xe4] ss:$8 sps:$4 sm:$0xff]   ;;  %v1812_v42 = vrot.slane %v1723_v25, %v6717_v28 }
 0x520   : > { %v1738_v50 = vmul.f32 0.00390625, %v1729_v49  ;;  %v1735_v16 = vpop.xlane.xlu1 %1734  ;;  %v1749_v17 = vmul.f32 %v6678_v27, %v6678_v27  ;;  %v1750_v38 = vmul.f32 %v6680_v15, %v6680_v15  ;;  %2060 = vmatpush1.bf16.msra.mxu0 %v5050_v2  ;;  %v1816_v49 = vrot.slane %v1723_v25, %v6720_v10 }
 0x521   : > { %v1740_v20 = vmul.f32 0.00390625, %v1735_v16  ;;  %v1753_v52 = vmul.f32 %v6682_v46, %v6682_v46  ;;  %v1754_v53 = vmul.f32 %v6684_v35, %v6684_v35  ;;  %2061 = vmatprep.subr.bf16.mxu0 %v5051_v44 }
 0x522   : > { %v6695_v54 = vsub.f32 %v6663_v3, %v1738_v50  ;;  %v6698_v55 = vsub.f32 %v6666_v30, %v1738_v50  ;;  %v1757_v56 = vadd.f32 %v1750_v38, %v1749_v17  ;;  %v5056_v3 = vld [vmem:[#allocation10 + $0xe0] ss:$8 sps:$4 sm:$0xff]   ;;  %v5057_v30 = vld [vmem:[#allocation10 + $0xf4] ss:$8 sps:$4 sm:$0xff]  }
 0x523   : > { %v6701_v57 = vsub.f32 %v6669_v32, %v1740_v20  ;;  %v6704_v37 = vsub.f32 %v6672_v33, %v1740_v20  ;;  %v1763_v58 = vadd.f32 %v1754_v53, %v1753_v52 }
 0x524   : > { %1758 = vadd.xlane.f32.xlu0 %v1757_v56  ;;  %v1751_v48 = vmul.f32 %v6695_v54, %v6695_v54  ;;  %v1752_v9 = vmul.f32 %v6698_v55, %v6698_v55  ;;  %2062 = vmatpush1.bf16.msra.mxu0 %v5053_v1 }
 0x525   : > { %v1755_v61 = vmul.f32 %v6701_v57, %v6701_v57  ;;  %v1756_v45 = vmul.f32 %v6704_v37, %v6704_v37  ;;  %2063 = vmatprep.subr.bf16.mxu0 %v5054_v7 }
 0x526   : > { %v1760_v62 = vadd.f32 %v1752_v9, %v1751_v48 }
 0x527   : > { %v1766_v63 = vadd.f32 %v1756_v45, %v1755_v61 }
 0x528   : > { %1764 = vadd.xlane.f32.xlu0 %v1763_v58  ;;  %1761 = vadd.xlane.f32.xlu1 %v1760_v62 }
 0x529   : > { %2064 = vmatpush1.bf16.msra.mxu0 %v5056_v3 }
 0x52a   : > { %2065 = vmatprep.subr.bf16.mxu0 %v5057_v30 }
 0x52c   : > { %1767 = vadd.xlane.f32.xlu1 %v1766_v63 }
 0x52d   : > { %2066 = vmatpush1.bf16.msra.mxu0 %v5059_v31 }
 0x5b1   : > { %v1759_v32 = vpop.xlane.xlu0 %1758 }
 0x5b2   : > { %v1769_v33 = vmul.f32 0.00390625, %v1759_v32 }
 0x5b4   : > { %v1773_v5 = vadd.f32 1e-12, %v1769_v33 }
 0x5b5   : > { %v1762_v34 = vpop.xlane.xlu1 %1761  ;;  %v1765_v51 = vpop.xlane.xlu0 %1764 }
 0x5b6   : > { %5300 = vrsqrt.f32 %v1773_v5  ;;  %v1770_v8 = vmul.f32 0.00390625, %v1762_v34  ;;  %v1771_v4 = vmul.f32 0.00390625, %v1765_v51 }
 0x5b8   : > { %v1774_v39 = vadd.f32 1e-12, %v1770_v8  ;;  %v1775_v40 = vadd.f32 1e-12, %v1771_v4 }
 0x5b9   : > { %v1768_v13 = vpop.xlane.xlu1 %1767 }
 0x5ba   : > { %5302 = vrsqrt.f32 %v1774_v39  ;;  %v1772_v43 = vmul.f32 0.00390625, %v1768_v13 }
 0x5bb   : > { %5304 = vrsqrt.f32 %v1775_v40 }
 0x5bc   : > { %v1776_v14 = vadd.f32 1e-12, %v1772_v43 }
 0x5be   : > { %5306 = vrsqrt.f32 %v1776_v14 }
 0x5c0   : > { %v5301_v59 = vpop.eup %5300 }
 0x5c1   : > { %v1782_v19 = vmul.f32 %v5301_v59, %v6680_v15  ;;  %v1781_v11 = vmul.f32 %v5301_v59, %v6678_v27 }
 0x5c3   : > { %v1801_v41 = vmul.f32 %v1797_v29, %v1782_v19  ;;  %v1800_v50 = vmul.f32 %v1793_v22, %v1781_v11 }
 0x5c4   : > { %v5303_v36 = vpop.eup %5302 }
 0x5c5   : > { %v5305_v16 = vpop.eup %5304  ;;  %v1784_v17 = vmul.f32 %v5303_v36, %v6698_v55  ;;  %v1783_v38 = vmul.f32 %v5303_v36, %v6695_v54  ;;  %v1820_v15 = vadd.f32 %v1816_v49, %v1801_v41  ;;  %v1819_v58 = vadd.f32 %v1812_v42, %v1800_v50  ;;  %v2164_v41 = vld [vmem:[#allocation2] sm:$0xff]  ;;  %v2173_v50 = vld [vmem:[#allocation2 + $0x48] sm:$0xff] }
 0x5c6   : > { %v1786_v20 = vmul.f32 %v5305_v16, %v6684_v35  ;;  %v1785_v62 = vmul.f32 %v5305_v16, %v6682_v46  ;;  %4639 = vmatprep.subr.bf16.mxu0 %v2164_v41  ;;  %v2166_v16 = vld [vmem:[#allocation2 + $0x10] sm:$0xff] }
 0x5c7   : > { %v1803_v52 = vmul.f32 %v1797_v29, %v1784_v17  ;;  %v1802_v53 = vmul.f32 %v1793_v22, %v1783_v38  ;;  %v2174_v17 = vld [vmem:[#allocation2 + $0x50] sm:$0xff]  ;;  %v2167_v38 = vld [vmem:[#allocation2 + $0x18] sm:$0xff] }
 0x5c8   : > { %v5307_v56 = vpop.eup %5306  ;;  %v1805_v27 = vmul.f32 %v1797_v29, %v1786_v20  ;;  %v1804_v23 = vmul.f32 %v1793_v22, %v1785_v62  ;;  %v2175_v20 = vld [vmem:[#allocation2 + $0x58] sm:$0xff] }
 0x5c9   : > { %v1822_v48 = vadd.f32 %v1816_v49, %v1803_v52  ;;  %v1821_v9 = vadd.f32 %v1812_v42, %v1802_v53  ;;  %v1788_v61 = vmul.f32 %v5307_v56, %v6704_v37  ;;  %v1787_v45 = vmul.f32 %v5307_v56, %v6701_v57  ;;  %v1863_v57 = vld [vmem:[%s7215_s8] sm:$0x3]  ;;  %v2169_v56 = vld [vmem:[#allocation2 + $0x28] sm:$0xff]  ;;  %s4606_s8 = sshll.u32 %s7226_s7, 3  ;;  %s5800_s7 = smov [#allocation19]  }
 0x5ca   : > { %v1824_v35 = vadd.f32 %v1816_v49, %v1805_v27  ;;  %v1823_v47 = vadd.f32 %v1812_v42, %v1804_v23  ;;  %v1868_v46 = vrot.slane %v1863_v57, %v6717_v28  ;;  %v1872_v37 = vrot.slane %v1863_v57, %v6720_v10  ;;  %v2168_v52 = vld [vmem:[#allocation2 + $0x20] sm:$0xff]  ;;  %v2178_v27 = vld [vmem:[#allocation2 + $0x70] sm:$0xff] }
 0x5cb   : > { %v1828_v63 = vpack.c.bf16 %v1822_v48, %v1820_v15  ;;  %v1827_v55 = vpack.c.bf16 %v1821_v9, %v1819_v58  ;;  %v1807_v18 = vmul.f32 %v1797_v29, %v1788_v61  ;;  %v1806_v54 = vmul.f32 %v1793_v22, %v1787_v45  ;;  %v2176_v53 = vld [vmem:[#allocation2 + $0x60] sm:$0xff]  ;;  %v2177_v15 = vld [vmem:[#allocation2 + $0x68] sm:$0xff]  ;;  %v2170_v58 = vld [vmem:[#allocation2 + $0x30] sm:$0xff] }
 0x5cc   : > { %v2171_v48 = vld [vmem:[#allocation2 + $0x38] sm:$0xff] }
 0x5cd   : > { %2067 = vmatprep.mubr.bf16.mxu0 %v1828_v63  ;;  %v1826_v21 = vadd.f32 %v1816_v49, %v1807_v18  ;;  %v1825_v60 = vadd.f32 %v1812_v42, %v1806_v54  ;;  %v2172_v42 = vld [vmem:[#allocation2 + $0x40] sm:$0xff]  ;;  %v2165_v49 = vld [vmem:[#allocation2 + $0x8] sm:$0xff]  ;;  %v2179_v9 = vld [vmem:[#allocation2 + $0x78] sm:$0xff] }
 0x5ce   : > { %2068 = vmatmul.mubr.bf16.vlgmr.msra.gmra.mrb[0].mxu0 %v1827_v55  ;;  %4659 = vmatprep.subr.bf16.mxu1 %v2172_v42 }
 0x5cf   : > { %v1830_v24 = vpack.c.bf16 %v1826_v21, %v1824_v35  ;;  %v1829_v0 = vpack.c.bf16 %v1825_v60, %v1823_v47  ;;  %4640 = vmatpush3.bf16.msra.mxu0 %v2164_v41  ;;  %4660 = vmatpush3.bf16.msra.mxu1 %v2172_v42 }
 0x5d0   : > { %4641 = vmatprep.subr.bf16.mxu0 %v2165_v49  ;;  %4661 = vmatprep.subr.bf16.mxu1 %v2173_v50 }
 0x5d1   : > { %2077 = vmatprep.mubr.bf16.mxu0 %v1830_v24 }
 0x5d3   : > { %4642 = vmatpush3.bf16.msra.mxu0 %v2165_v49  ;;  %4662 = vmatpush3.bf16.msra.mxu1 %v2173_v50 }
 0x5d4   : > { %4643 = vmatprep.subr.bf16.mxu0 %v2166_v16  ;;  %4663 = vmatprep.subr.bf16.mxu1 %v2174_v17 }
 0x5d6   : > { %2078 = vmatmul.mubr.bf16.gmra.mrb[4].mxu0 %v1829_v0 }
 0x5d7   : > { %4644 = vmatpush3.bf16.msra.mxu0 %v2166_v16  ;;  %4664 = vmatpush3.bf16.msra.mxu1 %v2174_v17 }
 0x5d8   : > { %4645 = vmatprep.subr.bf16.mxu0 %v2167_v38  ;;  %4665 = vmatprep.subr.bf16.mxu1 %v2175_v20 }
 0x5db   : > { %4646 = vmatpush3.bf16.msra.mxu0 %v2167_v38  ;;  %4666 = vmatpush3.bf16.msra.mxu1 %v2175_v20 }
 0x5dc   : > { %4647 = vmatprep.subr.bf16.mxu0 %v2168_v52  ;;  %4667 = vmatprep.subr.bf16.mxu1 %v2176_v53 }
 0x5df   : > { %4648 = vmatpush3.bf16.msra.mxu0 %v2168_v52  ;;  %4668 = vmatpush3.bf16.msra.mxu1 %v2176_v53 }
 0x5e0   : > { %4649 = vmatprep.subr.bf16.mxu0 %v2169_v56  ;;  %4669 = vmatprep.subr.bf16.mxu1 %v2177_v15 }
 0x5e3   : > { %4650 = vmatpush3.bf16.msra.mxu0 %v2169_v56  ;;  %4670 = vmatpush3.bf16.msra.mxu1 %v2177_v15 }
 0x5e4   : > { %4651 = vmatprep.subr.bf16.mxu0 %v2170_v58  ;;  %4671 = vmatprep.subr.bf16.mxu1 %v2178_v27 }
 0x5e7   : > { %4652 = vmatpush3.bf16.msra.mxu0 %v2170_v58  ;;  %4672 = vmatpush3.bf16.msra.mxu1 %v2178_v27 }
 0x5e8   : > { %4653 = vmatprep.subr.bf16.mxu0 %v2171_v48  ;;  %4673 = vmatprep.subr.bf16.mxu1 %v2179_v9 }
 0x5eb   : > { %4654 = vmatpush3.bf16.msra.mxu0 %v2171_v48  ;;  %4674 = vmatpush3.bf16.msra.mxu1 %v2179_v9 }
 0x6a1   : > { %v2069_v2 = vpop.f32.mrb[0].mxu0 }
 0x6a2   : > { %v2070_v44 = vadd.f32 %v2069_v2, %v1868_v46  ;;  %v2071_v1 = vpop.f32.mrb[1].mxu0 }
 0x6a3   : > { %v2072_v7 = vadd.f32 %v2071_v1, %v1872_v37  ;;  %v2073_v3 = vpop.f32.mrb[2].mxu0 }
 0x6a4   : > { %v2074_v30 = vadd.f32 %v2073_v3, %v1868_v46  ;;  %v2075_v31 = vpop.f32.mrb[3].mxu0  ;;  %v2088_v33 = vmul.f32 0.088388346, %v2070_v44  ;;  %v5799_v3 = vmov 0  }
 0x6a5   : > { %v2076_v32 = vadd.f32 %v2075_v31, %v1872_v37  ;;  %v2089_v6 = vmul.f32 0.088388346, %v2072_v7  ;;  %v2278_v7 = vld [vmem:[%s6343_s12] sm:$0xff]  ;;  %s4600_s12 = sshll.u32 %s7227_s26, 4  ;;  %s5650_s26 = sshll.u32 %s5800_s7, 4  ;;  %s5651_s26 = int_to_ptr.vmem [resolvable:$false] %s5650_s26 }
 0x6a6   : > { %v2090_v5 = vmul.f32 0.088388346, %v2074_v30  ;;  %vm2279_vm1 = vnez %v2278_v7  ;;  %s4109_s29 = sadd.s32 %s4606_s8, %s4600_s12  ;;  %s5652_s18 = scalar_lea.vmem %s5651_s26, 2048 }
 0x6a7   : > { %v2091_v34 = vmul.f32 0.088388346, %v2076_v32  ;;  %v2280_v30 = vsel %vm2279_vm1, 16843009, %v5799_v3 }
 0x6a8   : > { %v2096_v51 = vpack.c.bf16 %v2090_v5, %v2088_v33  ;;  %v2281_v31 = vunpack.c.0.s8 %v2280_v30  ;;  %v2282_v32 = vunpack.c.1.s8 %v2280_v30  ;;  %v2283_v33 = vunpack.c.2.s8 %v2280_v30 }
 0x6a9   : > { %v2079_v8 = vpop.f32.mrb[4].mxu0  ;;  %v2097_v4 = vpack.c.bf16 %v2091_v34, %v2089_v6  ;;  %v2284_v6 = vunpack.c.3.s8 %v2280_v30 }
 0x6aa   : > { %v2080_v39 = vadd.f32 %v2079_v8, %v1868_v46  ;;  %2100 = vxpose.xlu1.c.b16.start [1/2] (short) %v2096_v51, 128  ;;  %v2081_v40 = vpop.f32.mrb[5].mxu0  ;;  %v2285_v5 = vpack.c.b16 %v2281_v31, %v2281_v31  ;;  %v2287_v34 = vpack.c.b16 %v2282_v32, %v2282_v32  ;;  %v2289_v51 = vpack.c.b16 %v2283_v33, %v2283_v33 }
 0x6ab   : > { %v2082_v13 = vadd.f32 %v2081_v40, %v1872_v37  ;;  %2116 = vxpose.xlu0.c.b16.start [1/2] (short) %v2097_v4, 128  ;;  %v2083_v43 = vpop.f32.mrb[6].mxu0  ;;  %v2291_v4 = vpack.c.b16 %v2284_v6, %v2284_v6 }
 0x6ac   : > { %v2084_v14 = vadd.f32 %v2083_v43, %v1868_v46  ;;  %v2085_v26 = vpop.f32.mrb[7].mxu0  ;;  %v2092_v22 = vmul.f32 0.088388346, %v2080_v39  ;;  %v2286_v8 = vpack.c.b8 %v2285_v5, %v2285_v5  ;;  %v2288_v39 = vpack.c.b8 %v2287_v34, %v2287_v34 }
 0x6ad   : > { %v2086_v59 = vadd.f32 %v2085_v26, %v1872_v37  ;;  %v2093_v25 = vmul.f32 0.088388346, %v2082_v13  ;;  %v2290_v40 = vpack.c.b8 %v2289_v51, %v2289_v51  ;;  %v2292_v13 = vpack.c.b8 %v2291_v4, %v2291_v4 }
 0x6ae   : > { %v2094_v29 = vmul.f32 0.088388346, %v2084_v14  ;;  %vm2293_vm2 = vnez %v2286_v8  ;;  %vm2294_vm3 = vnez %v2288_v39 }
 0x6af   : > { %v2095_v19 = vmul.f32 0.088388346, %v2086_v59  ;;  %vm2295_vm4 = vnez %v2290_v40  ;;  %v2297_v43 = vsel %vm2293_vm2, 16843009, %v5799_v3  ;;  %v2298_v14 = vsel %vm2294_vm3, 16843009, %v5799_v3 }
 0x6b0   : > { %v2098_v11 = vpack.c.bf16 %v2094_v29, %v2092_v22  ;;  %v2299_v26 = vsel %vm2295_vm4, 16843009, %v5799_v3  ;;  %v2301_v59 = vunpack.c.0.s8 %v2297_v43  ;;  %vm2296_vm5 = vnez %v2292_v13 }
 0x6b1   : > { %v2099_v36 = vpack.c.bf16 %v2095_v19, %v2093_v25  ;;  %v2302_v22 = vunpack.c.0.s8 %v2298_v14  ;;  %v2303_v29 = vunpack.c.0.s8 %v2299_v26  ;;  %v2300_v25 = vsel %vm2296_vm5, 16843009, %v5799_v3 }
 0x6b2   : > { %2101 = vxpose.xlu1.c.b16.end [2/2] (short) %v2098_v11, 128  ;;  %vm6746_vm6 = vcmp.ne.s32.totalorder %v2301_v59, 0  ;;  %v2304_v41 = vunpack.c.0.s8 %v2300_v25 }
 0x6b3   : > { %2117 = vxpose.xlu0.c.b16.end [2/2] (short) %v2099_v36, 128  ;;  %vm6750_vm7 = vcmp.ne.s32.totalorder %v2302_v22, 0  ;;  %vm6754_vm9 = vcmp.ne.s32.totalorder %v2303_v29, 0 }
 0x6b4   : > { %vm2308_vm10 = vcmp.ne.s32.totalorder %v2304_v41, 0 }
 0x714   : > { %v2108_v61 = vpop.trf.xlu1 }
 0x715   : > { %2132 = vxpose.xlu1.c.b16.start [1/8] (narrow) %v2108_v61, 32  ;;  %v2124_v45 = vpop.trf.xlu0 }
 0x716   : > { %2148 = vxpose.xlu0.c.b16.start [1/8] (narrow) %v2124_v45, 32 }
 0x718   : > { %v2109_v62 = vpop.trf.xlu1 }
 0x719   : > { %2133 = vxpose.xlu1.c.b16.cont [2/8] (narrow) %v2109_v62, 32  ;;  %v2125_v63 = vpop.trf.xlu0 }
 0x71a   : > { %2149 = vxpose.xlu0.c.b16.cont [2/8] (narrow) %v2125_v63, 32 }
 0x71c   : > { %v2110_v55 = vpop.trf.xlu1 }
 0x71d   : > { %2134 = vxpose.xlu1.c.b16.cont [3/8] (narrow) %v2110_v55, 32  ;;  %v2126_v18 = vpop.trf.xlu0 }
 0x71e   : > { %2150 = vxpose.xlu0.c.b16.cont [3/8] (narrow) %v2126_v18, 32 }
 0x720   : > { %v2111_v54 = vpop.trf.xlu1 }
 0x721   : > { %2135 = vxpose.xlu1.c.b16.cont [4/8] (narrow) %v2111_v54, 32  ;;  %v2127_v35 = vpop.trf.xlu0 }
 0x722   : > { %2151 = vxpose.xlu0.c.b16.cont [4/8] (narrow) %v2127_v35, 32 }
 0x724   : > { %v2112_v21 = vpop.trf.xlu1 }
 0x725   : > { %2136 = vxpose.xlu1.c.b16.cont [5/8] (narrow) %v2112_v21, 32  ;;  %v2128_v23 = vpop.trf.xlu0 }
 0x726   : > { %2152 = vxpose.xlu0.c.b16.cont [5/8] (narrow) %v2128_v23, 32 }
 0x728   : > { %v2113_v24 = vpop.trf.xlu1 }
 0x729   : > { %2137 = vxpose.xlu1.c.b16.cont [6/8] (narrow) %v2113_v24, 32  ;;  %v2129_v60 = vpop.trf.xlu0 }
 0x72a   : > { %2153 = vxpose.xlu0.c.b16.cont [6/8] (narrow) %v2129_v60, 32 }
 0x72c   : > { %v2114_v47 = vpop.trf.xlu1 }
 0x72d   : > { %2138 = vxpose.xlu1.c.b16.cont [7/8] (narrow) %v2114_v47, 32  ;;  %v2130_v0 = vpop.trf.xlu0 }
 0x72e   : > { %2154 = vxpose.xlu0.c.b16.cont [7/8] (narrow) %v2130_v0, 32 }
 0x730   : > { %v2115_v57 = vpop.trf.xlu1 }
 0x731   : > { %2139 = vxpose.xlu1.c.b16.end [8/8] (narrow) %v2115_v57, 32  ;;  %v2131_v46 = vpop.trf.xlu0 }
 0x732   : > { %2155 = vxpose.xlu0.c.b16.end [8/8] (narrow) %v2131_v46, 32 }
 0x77b   : > { %v2140_v37 = vpop.trf.xlu1 }
 0x77c   : > { %4655 = vmatprep.mubr.bf16.mxu0 %v2140_v37  ;;  %v2156_v2 = vpop.trf.xlu0 }
 0x77d   : > { %4675 = vmatprep.mubr.bf16.mxu1 %v2156_v2 }
 0x77f   : > { %v2141_v44 = vpop.trf.xlu1 }
 0x780   : > { %4656 = vmatmul.mubr.bf16.vlgmr.msra.gmra.mrb[8].mxu0 %v2141_v44  ;;  %v2157_v1 = vpop.trf.xlu0 }
 0x781   : > { %4676 = vmatmul.mubr.bf16.vlgmr.msra.gmra.mrb[0].mxu1 %v2157_v1 }
 0x853   : > { %v4657_v11 = vpop.f32.mrb[8].mxu0 }
 0x854   : > { %v2214_v36 = vpop.f32.mrb[9].mxu0  ;;  %v4677_v42 = vpop.f32.mrb[0].mxu1  ;;  %v2319_v55 = vsel %vm6754_vm9, %v4657_v11, -1e+09 }
 0x855   : > { %v2317_v16 = vsel %vm6746_vm6, %v2214_v36, -1e+09  ;;  %v4658_v17 = vpop.f32.mrb[10].mxu0  ;;  %v2263_v38 = vpop.f32.mrb[1].mxu1  ;;  %v2323_v20 = vsel %vm6754_vm9, %v4677_v42, -1e+09 }
 0x856   : > { %v2217_v52 = vpop.f32.mrb[11].mxu0  ;;  %v4678_v53 = vpop.f32.mrb[2].mxu1  ;;  %v2326_v15 = vsel %vm2325_vm8, %v2317_v16, -inf  ;;  %v2344_v9 = vsel %vm2325_vm8, %v2323_v20, -inf  ;;  %v2321_v61 = vsel %vm6746_vm6, %v2263_v38, -1e+09 }
 0x857   : > { %v2318_v56 = vsel %vm6750_vm7, %v2217_v52, -1e+09  ;;  %v2266_v58 = vpop.f32.mrb[3].mxu1  ;;  %2327 = vmax.xlane.f32.xlu0 %v2326_v15  ;;  %v2324_v48 = vsel %vm2308_vm10, %v4678_v53, -1e+09  ;;  %v2338_v63 = vsel %vm2325_vm8, %v2321_v61, -inf }
 0x858   : > { %v2329_v27 = vsel %vm2325_vm8, %v2318_v56, -inf  ;;  %v2347_v45 = vsel %vm2325_vm8, %v2324_v48, -inf  ;;  %v2322_v62 = vsel %vm6750_vm7, %v2266_v58, -1e+09  ;;  %v2320_v54 = vsel %vm2308_vm10, %v4658_v17, -1e+09 }
 0x859   : > { %2330 = vmax.xlane.f32.xlu1 %v2329_v27  ;;  %v2341_v18 = vsel %vm2325_vm8, %v2322_v62, -inf  ;;  %v2332_v35 = vsel %vm2325_vm8, %v2319_v55, -inf  ;;  %v2335_v21 = vsel %vm2325_vm8, %v2320_v54, -inf  ;;  %v2418_v17 = vld [vmem:[#allocation3] sm:$0xff]  ;;  %v2423_v38 = vld [vmem:[#allocation3 + $0x28] sm:$0xff]  ;;  %v2424_v52 = vld [vmem:[#allocation3 + $0x30] sm:$0xff] }
 0x85a   : > { %4679 = vmatprep.subr.bf16.mxu0 %v2418_v17  ;;  %v2420_v53 = vld [vmem:[#allocation3 + $0x10] sm:$0xff]  ;;  %v2421_v15 = vld [vmem:[#allocation3 + $0x18] sm:$0xff] }
 0x85b   : > { %2345 = vmax.xlane.f32.xlu0 %v2344_v9  ;;  %4680 = vmatpush3.bf16.msra.mxu0 %v2418_v17  ;;  %v5083_v17 = vld [vmem:[#allocation15 + $0x74] ss:$8 sps:$4 sm:$0xff]  }
 0x85d   : > { %2348 = vmax.xlane.f32.xlu1 %v2347_v45 }
 0x85f   : > { %2339 = vmax.xlane.f32.xlu0 %v2338_v63 }
 0x861   : > { %2342 = vmax.xlane.f32.xlu1 %v2341_v18 }
 0x863   : > { %2333 = vmax.xlane.f32.xlu0 %v2332_v35 }
 0x865   : > { %2336 = vmax.xlane.f32.xlu1 %v2335_v21 }
 0x8e4   : > { %v2328_v23 = vpop.xlane.xlu0 %2327 }
 0x8e5   : > { %v2350_v24 = vsub.f32 %v2317_v16, %v2328_v23  ;;  %v2422_v16 = vld [vmem:[#allocation3 + $0x20] sm:$0xff] }
 0x8e6   : > { %v2331_v60 = vpop.xlane.xlu1 %2330  ;;  %4691 = vmatprep.subr.bf16.mxu1 %v2422_v16 }
 0x8e7   : > { %v2351_v47 = vsub.f32 %v2318_v56, %v2331_v60  ;;  %v2358_v0 = vmul.f32 1.442695, %v2350_v24  ;;  %4692 = vmatpush3.bf16.msra.mxu1 %v2422_v16  ;;  %v2425_v56 = vld [vmem:[#allocation3 + $0x38] sm:$0xff] }
 0x8e8   : > { %v2346_v46 = vpop.xlane.xlu0 %2345  ;;  %4693 = vmatprep.subr.bf16.mxu1 %v2423_v38  ;;  %v5078_v16 = vld [vmem:[#allocation15 + $0x60] ss:$8 sps:$4 sm:$0xff]  }
 0x8e9   : > { %v2360_v57 = vmul.f32 1.442695, %v2351_v47  ;;  %5308 = vpow2.f32 %v2358_v0  ;;  %v2356_v37 = vsub.f32 %v2323_v20, %v2346_v46  ;;  %v2419_v20 = vld [vmem:[#allocation3 + $0x8] sm:$0xff] }
 0x8ea   : > { %v2349_v2 = vpop.xlane.xlu1 %2348  ;;  %4681 = vmatprep.subr.bf16.mxu0 %v2419_v20 }
 0x8eb   : > { %5310 = vpow2.f32 %v2360_v57  ;;  %v2357_v44 = vsub.f32 %v2324_v48, %v2349_v2  ;;  %v2370_v1 = vmul.f32 1.442695, %v2356_v37  ;;  %4694 = vmatpush3.bf16.msra.mxu1 %v2423_v38  ;;  %4682 = vmatpush3.bf16.msra.mxu0 %v2419_v20  ;;  %v5081_v38 = vld [vmem:[#allocation15 + $0x70] ss:$8 sps:$4 sm:$0xff]   ;;  %v5086_v20 = vld [vmem:[#allocation15 + $0x84] ss:$8 sps:$4 sm:$0xff]  }
 0x8ec   : > { %v2340_v3 = vpop.xlane.xlu0 %2339  ;;  %4695 = vmatprep.subr.bf16.mxu1 %v2424_v52  ;;  %4683 = vmatprep.subr.bf16.mxu0 %v2420_v53 }
 0x8ed   : > { %v2372_v7 = vmul.f32 1.442695, %v2357_v44  ;;  %5312 = vpow2.f32 %v2370_v1  ;;  %v2354_v30 = vsub.f32 %v2321_v61, %v2340_v3 }
 0x8ee   : > { %v2343_v31 = vpop.xlane.xlu1 %2342 }
 0x8ef   : > { %5314 = vpow2.f32 %v2372_v7  ;;  %v2355_v32 = vsub.f32 %v2322_v62, %v2343_v31  ;;  %v2366_v33 = vmul.f32 1.442695, %v2354_v30  ;;  %4696 = vmatpush3.bf16.msra.mxu1 %v2424_v52  ;;  %4684 = vmatpush3.bf16.msra.mxu0 %v2420_v53  ;;  %v5084_v52 = vld [vmem:[#allocation15 + $0x80] ss:$8 sps:$4 sm:$0xff]   ;;  %v5089_v53 = vld [vmem:[#allocation15 + $0x94] ss:$8 sps:$4 sm:$0xff]  }
 0x8f0   : > { %v2334_v6 = vpop.xlane.xlu0 %2333  ;;  %4697 = vmatprep.subr.bf16.mxu1 %v2425_v56  ;;  %4685 = vmatprep.subr.bf16.mxu0 %v2421_v15 }
 0x8f1   : > { %v2368_v5 = vmul.f32 1.442695, %v2355_v32  ;;  %5316 = vpow2.f32 %v2366_v33  ;;  %v2352_v34 = vsub.f32 %v2319_v55, %v2334_v6 }
 0x8f2   : > { %v2337_v51 = vpop.xlane.xlu1 %2336 }
 0x8f3   : > { %5318 = vpow2.f32 %v2368_v5  ;;  %v2353_v8 = vsub.f32 %v2320_v54, %v2337_v51  ;;  %v6778_v4 = vpop.eup %5308  ;;  %v2362_v39 = vmul.f32 1.442695, %v2352_v34  ;;  %4698 = vmatpush3.bf16.msra.mxu1 %v2425_v56  ;;  %4686 = vmatpush3.bf16.msra.mxu0 %v2421_v15  ;;  %v5087_v56 = vld [vmem:[#allocation15 + $0x90] ss:$8 sps:$4 sm:$0xff]   ;;  %v5092_v15 = vld [vmem:[#allocation15 + $0xa4] ss:$8 sps:$4 sm:$0xff]  }
 0x8f4   : > { %v2374_v43 = vsel %vm2325_vm8, %v6778_v4, 0.0 }
 0x8f5   : > { %v6780_v40 = vpop.eup %5310  ;;  %v2364_v13 = vmul.f32 1.442695, %v2353_v8  ;;  %5320 = vpow2.f32 %v2362_v39  ;;  %2375 = vadd.xlane.f32.xlu0 %v2374_v43 }
 0x8f6   : > { %v2377_v14 = vsel %vm2325_vm8, %v6780_v40, 0.0 }
 0x8f7   : > { %5322 = vpow2.f32 %v2364_v13  ;;  %2378 = vadd.xlane.f32.xlu1 %v2377_v14  ;;  %v6786_v26 = vpop.eup %5312  ;;  %v5060_v14 = vld [vmem:[#allocation15] ss:$8 sps:$4 sm:$0xff]  }
 0x8f8   : > { %v2392_v22 = vsel %vm2325_vm8, %v6786_v26, 0.0 }
 0x8f9   : > { %v6788_v59 = vpop.eup %5314  ;;  %2393 = vadd.xlane.f32.xlu0 %v2392_v22  ;;  %v5063_v22 = vld [vmem:[#allocation15 + $0x10] ss:$8 sps:$4 sm:$0xff]  }
 0x8fa   : > { %v2395_v29 = vsel %vm2325_vm8, %v6788_v59, 0.0 }
 0x8fb   : > { %2396 = vadd.xlane.f32.xlu1 %v2395_v29  ;;  %v6794_v25 = vpop.eup %5316  ;;  %v5068_v29 = vld [vmem:[#allocation15 + $0x24] ss:$8 sps:$4 sm:$0xff]  }
 0x8fc   : > { %v2386_v11 = vsel %vm2325_vm8, %v6794_v25, 0.0 }
 0x8fd   : > { %v6796_v19 = vpop.eup %5318  ;;  %2387 = vadd.xlane.f32.xlu0 %v2386_v11  ;;  %v5069_v11 = vld [vmem:[#allocation15 + $0x30] ss:$8 sps:$4 sm:$0xff]  }
 0x8fe   : > { %v2389_v36 = vsel %vm2325_vm8, %v6796_v19, 0.0 }
 0x8ff   : > { %2390 = vadd.xlane.f32.xlu1 %v2389_v36  ;;  %v6802_v41 = vpop.eup %5320  ;;  %v5074_v36 = vld [vmem:[#allocation15 + $0x44] ss:$8 sps:$4 sm:$0xff]  }
 0x900   : > { %v2380_v49 = vsel %vm2325_vm8, %v6802_v41, 0.0 }
 0x901   : > { %v6804_v42 = vpop.eup %5322  ;;  %2381 = vadd.xlane.f32.xlu0 %v2380_v49  ;;  %v5075_v49 = vld [vmem:[#allocation15 + $0x50] ss:$8 sps:$4 sm:$0xff]  }
 0x902   : > { %v2383_v50 = vsel %vm2325_vm8, %v6804_v42, 0.0 }
 0x903   : > { %2384 = vadd.xlane.f32.xlu1 %v2383_v50  ;;  %v5080_v50 = vld [vmem:[#allocation15 + $0x64] ss:$8 sps:$4 sm:$0xff]  }
 0x982   : > { %v2376_v58 = vpop.xlane.xlu0 %2375 }
 0x983   : > { %5324 = vrcp.f32 %v2376_v58  ;;  %v5090_v58 = vld [vmem:[#allocation15 + $0xa0] ss:$8 sps:$4 sm:$0xff]  }
 0x984   : > { %v2379_v27 = vpop.xlane.xlu1 %2378 }
 0x985   : > { %5326 = vrcp.f32 %v2379_v27  ;;  %v5095_v27 = vld [vmem:[#allocation15 + $0xb4] ss:$8 sps:$4 sm:$0xff]  }
 0x986   : > { %v2394_v48 = vpop.xlane.xlu0 %2393 }
 0x988   : > { %v2397_v9 = vpop.xlane.xlu1 %2396 }
 0x989   : > { %5328 = vrcp.f32 %v2397_v9  ;;  %v5098_v9 = vld [vmem:[#allocation15 + $0xc4] ss:$8 sps:$4 sm:$0xff]  }
 0x98a   : > { %5330 = vrcp.f32 %v2394_v48  ;;  %v2388_v61 = vpop.xlane.xlu0 %2387  ;;  %v5093_v48 = vld [vmem:[#allocation15 + $0xb0] ss:$8 sps:$4 sm:$0xff]  }
 0x98b   : > { %5332 = vrcp.f32 %v2388_v61  ;;  %v5096_v61 = vld [vmem:[#allocation15 + $0xc0] ss:$8 sps:$4 sm:$0xff]  }
 0x98c   : > { %v2391_v45 = vpop.xlane.xlu1 %2390 }
 0x98d   : > { %5334 = vrcp.f32 %v2391_v45  ;;  %v5325_v62 = vpop.eup %5324  ;;  %v5101_v45 = vld [vmem:[#allocation15 + $0xd4] ss:$8 sps:$4 sm:$0xff]  }
 0x98e   : > { %v2382_v55 = vpop.xlane.xlu0 %2381  ;;  %v2406_v54 = vmul.f32 %v5325_v62, %v6778_v4  ;;  %v5099_v62 = vld [vmem:[#allocation15 + $0xd0] ss:$8 sps:$4 sm:$0xff]  }
 0x98f   : > { %v5327_v63 = vpop.eup %5326  ;;  %5336 = vrcp.f32 %v2382_v55  ;;  %v5102_v55 = vld [vmem:[#allocation15 + $0xe0] ss:$8 sps:$4 sm:$0xff]  }
 0x990   : > { %v2385_v18 = vpop.xlane.xlu1 %2384  ;;  %v2407_v35 = vmul.f32 %v5327_v63, %v6780_v40  ;;  %v5104_v63 = vld [vmem:[#allocation15 + $0xe4] ss:$8 sps:$4 sm:$0xff]  }
 0x991   : > { %5338 = vrcp.f32 %v2385_v18  ;;  %v5107_v18 = vld [vmem:[#allocation15 + $0xf4] ss:$8 sps:$4 sm:$0xff]  }
 0x992   : > { %v2414_v21 = vpack.c.bf16 %v2407_v35, %v2406_v54  ;;  %v5105_v54 = vld [vmem:[#allocation15 + $0xf0] ss:$8 sps:$4 sm:$0xff]  }
 0x993   : > { %v5329_v23 = vpop.eup %5328 }
 0x994   : > { %4687 = vmatprep.mubr.msk.bf16.mxu0 %vm2325_vm8, %v2414_v21  ;;  %v5331_v24 = vpop.eup %5330  ;;  %v2413_v0 = vmul.f32 %v5329_v23, %v6788_v59  ;;  %v5065_v59 = vld [vmem:[#allocation15 + $0x14] ss:$8 sps:$4 sm:$0xff]  }
 0x995   : > { %v5333_v60 = vpop.eup %5332  ;;  %v2412_v37 = vmul.f32 %v5331_v24, %v6786_v26  ;;  %v5062_v26 = vld [vmem:[#allocation15 + $0x4] ss:$8 sps:$4 sm:$0xff]  }
 0x996   : > { %v2410_v57 = vmul.f32 %v5333_v60, %v6794_v25  ;;  %2808 = vmatprep.subr.bf16.mxu0 %v5062_v26  ;;  %v5066_v25 = vld [vmem:[#allocation15 + $0x20] ss:$8 sps:$4 sm:$0xff]  }
 0x997   : > { %v5335_v47 = vpop.eup %5334  ;;  %v2417_v7 = vpack.c.bf16 %v2413_v0, %v2412_v37 }
 0x998   : > { %v2411_v46 = vmul.f32 %v5335_v47, %v6796_v19  ;;  %v5071_v19 = vld [vmem:[#allocation15 + $0x34] ss:$8 sps:$4 sm:$0xff]  }
 0x999   : > { %v5337_v2 = vpop.eup %5336 }
 0x99a   : > { %v2416_v44 = vpack.c.bf16 %v2411_v46, %v2410_v57  ;;  %v2408_v3 = vmul.f32 %v5337_v2, %v6802_v41  ;;  %v5072_v41 = vld [vmem:[#allocation15 + $0x40] ss:$8 sps:$4 sm:$0xff]  }
 0x99b   : > { %v5339_v1 = vpop.eup %5338 }
 0x99c   : > { %v2409_v30 = vmul.f32 %v5339_v1, %v6804_v42  ;;  %4699 = vmatprep.mubr.msk.bf16.mxu1 %vm2325_vm8, %v2416_v44  ;;  %v5077_v42 = vld [vmem:[#allocation15 + $0x54] ss:$8 sps:$4 sm:$0xff]  }
 0x99d   : > { %4700 = vmatmul.mubr.msk.bf16.vlgmr.msra.gmra.mrb[4].mxu1 %vm2325_vm8, %v2417_v7 }
 0x99e   : > { %v2415_v31 = vpack.c.bf16 %v2409_v30, %v2408_v3 }
 0x9a0   : > { %4688 = vmatmul.mubr.msk.bf16.vlgmr.msra.gmra.mrb[12].mxu0 %vm2325_vm8, %v2415_v31 }
 0x9a1   : > { %2809 = vmatpush1.bf16.msra.mxu0 %v5060_v14 }
 0x9a2   : > { %2810 = vmatprep.subr.bf16.mxu0 %v5065_v59 }
 0x9a5   : > { %2811 = vmatpush1.bf16.msra.mxu0 %v5063_v22  ;;  %v5381_v22 = vld [vmem:[%s6336_s14 + $0x8] sm:$0xff] }
 0x9a6   : > { %2812 = vmatprep.subr.bf16.mxu0 %v5068_v29 }
 0x9a9   : > { %2813 = vmatpush1.bf16.msra.mxu0 %v5066_v25 }
 0x9aa   : > { %2814 = vmatprep.subr.bf16.mxu0 %v5071_v19  ;;  %v5382_v19 = vld [vmem:[%s6336_s14 + $0x10] sm:$0xff] }
 0x9ad   : > { %2815 = vmatpush1.bf16.msra.mxu0 %v5069_v11 }
 0x9ae   : > { %2816 = vmatprep.subr.bf16.mxu0 %v5074_v36  ;;  %v5383_v36 = vld [vmem:[%s6336_s14 + $0x18] sm:$0xff] }
 0x9b1   : > { %2817 = vmatpush1.bf16.msra.mxu0 %v5072_v41 }
 0x9b2   : > { %2818 = vmatprep.subr.bf16.mxu0 %v5077_v42 }
 0x9b5   : > { %2819 = vmatpush1.bf16.msra.mxu0 %v5075_v49 }
 0x9b6   : > { %2820 = vmatprep.subr.bf16.mxu0 %v5080_v50 }
 0x9b9   : > { %2821 = vmatpush1.bf16.msra.mxu0 %v5078_v16 }
 0x9ba   : > { %2822 = vmatprep.subr.bf16.mxu0 %v5083_v17 }
 0x9bd   : > { %2823 = vmatpush1.bf16.msra.mxu0 %v5081_v38 }
 0x9be   : > { %2824 = vmatprep.subr.bf16.mxu0 %v5086_v20 }
 0x9c1   : > { %2825 = vmatpush1.bf16.msra.mxu0 %v5084_v52  ;;  %v5384_v52 = vld [vmem:[%s6336_s14 + $0x20] sm:$0xff] }
 0x9c2   : > { %2826 = vmatprep.subr.bf16.mxu0 %v5089_v53 }
 0x9c5   : > { %2827 = vmatpush1.bf16.msra.mxu0 %v5087_v56 }
 0x9c6   : > { %2828 = vmatprep.subr.bf16.mxu0 %v5092_v15 }
 0x9c9   : > { %2829 = vmatpush1.bf16.msra.mxu0 %v5090_v58  ;;  %v5385_v58 = vld [vmem:[%s6336_s14 + $0x28] sm:$0xff] }
 0x9ca   : > { %2830 = vmatprep.subr.bf16.mxu0 %v5095_v27 }
 0x9cd   : > { %2831 = vmatpush1.bf16.msra.mxu0 %v5093_v48 }
 0x9ce   : > { %2832 = vmatprep.subr.bf16.mxu0 %v5098_v9  ;;  %v5386_v9 = vld [vmem:[%s6336_s14 + $0x30] sm:$0xff] }
 0x9d1   : > { %2833 = vmatpush1.bf16.msra.mxu0 %v5096_v61 }
 0x9d2   : > { %2834 = vmatprep.subr.bf16.mxu0 %v5101_v45  ;;  %v5387_v45 = vld [vmem:[%s6336_s14 + $0x38] sm:$0xff] }
 0x9d5   : > { %2835 = vmatpush1.bf16.msra.mxu0 %v5099_v62 }
 0x9d6   : > { %2836 = vmatprep.subr.bf16.mxu0 %v5104_v63 }
 0x9d9   : > { %2837 = vmatpush1.bf16.msra.mxu0 %v5102_v55 }
 0x9da   : > { %2838 = vmatprep.subr.bf16.mxu0 %v5107_v18  ;;  %v5108_v18 = vld [vmem:[#allocation16] ss:$16 sps:$4 sm:$0xff]  }
 0x9dd   : > { %2839 = vmatpush1.bf16.msra.mxu0 %v5105_v54  ;;  %v5110_v54 = vld [vmem:[#allocation16 + $0x4] ss:$16 sps:$4 sm:$0xff]  }
 0x9de   : > { %3383 = vmatprep.subr.bf16.mxu1 %v5110_v54 }
 0x9df   : > { %3384 = vmatpush1.bf16.msra.mxu1 %v5108_v18 }
 0xa70   : > { %v4701_v32 = vpop.f32.mrb[4].mxu1 }
 0xa71   : > { %v2521_v33 = vpop.f32.mrb[5].mxu1 }
 0xa72   : > { %v4702_v5 = vpop.f32.mrb[6].mxu1 }
 0xa73   : > { %v2539_v6 = vpack.c.bf16 %v4702_v5, %v4701_v32  ;;  %v4689_v34 = vpop.f32.mrb[12].mxu0  ;;  %v2524_v51 = vpop.f32.mrb[7].mxu1 }
 0xa74   : > { %v2538_v8 = vpack.c.bf16 %v2524_v51, %v2521_v33  ;;  %v2466_v4 = vpop.f32.mrb[13].mxu0 }
 0xa75   : > { %v4690_v39 = vpop.f32.mrb[14].mxu0 }
 0xa76   : > { %v2537_v40 = vpack.c.bf16 %v4690_v39, %v4689_v34  ;;  %2556 = vxpose.xlu0.c.b16.start [1/2] (short) %v2538_v8, 128  ;;  %v2469_v13 = vpop.f32.mrb[15].mxu0 }
 0xa77   : > { %v2536_v43 = vpack.c.bf16 %v2469_v13, %v2466_v4 }
 0xa79   : > { %2540 = vxpose.xlu1.c.b16.start [1/2] (short) %v2536_v43, 128  ;;  %v5380_v43 = vld [vmem:[%s6336_s14] sm:$0xff]  ;;  %s4112_s14 = sshll.u32 %s6357_s28, 4  ;;  %s7010_s14 = int_to_ptr.vmem [resolvable:$true] %s4112_s14 }
 0xa7a   : > { %2557 = vxpose.xlu0.c.b16.end [2/2] (short) %v2539_v6, 128  ;;  %v2636_v6 = vld [vmem:[%s7222_s2] sm:$0x3]  ;;  %s4601_s2 = sshll.u32 %s4109_s29, 7  ;;  %p5653_p5 = scmp.lt.s32.totalorder %s7010_s14, %s5651_s26 }
 0xa7b   : > { %v2641_v34 = vrot.slane %v2636_v6, %v6717_v28  ;;  %v2645_v51 = vrot.slane %v2636_v6, %v6720_v10  ;;  %v5138_v6 = vld [vmem:[#allocation16 + $0xa0] ss:$16 sps:$4 sm:$0xff]  }
 0xa7d   : > { %2541 = vxpose.xlu1.c.b16.end [2/2] (short) %v2537_v40, 128 }
 0xadc   : > { %v2564_v35 = vpop.trf.xlu0 }
 0xadd   : > { %2588 = vxpose.xlu0.c.b16.start [1/8] (narrow) %v2564_v35, 32  ;;  %v5111_v35 = vld [vmem:[#allocation16 + $0x8] ss:$16 sps:$4 sm:$0xff]  }
 0xadf   : > { %v2548_v21 = vpop.trf.xlu1 }
 0xae0   : > { %2572 = vxpose.xlu1.c.b16.start [1/8] (narrow) %v2548_v21, 32  ;;  %v2565_v23 = vpop.trf.xlu0  ;;  %v5113_v21 = vld [vmem:[#allocation16 + $0xc] ss:$16 sps:$4 sm:$0xff]  }
 0xae1   : > { %2589 = vxpose.xlu0.c.b16.cont [2/8] (narrow) %v2565_v23, 32  ;;  %v5116_v23 = vld [vmem:[#allocation16 + $0x24] ss:$16 sps:$4 sm:$0xff]   ;;  %3436 = vmatprep.subr.bf16.mxu0 %v5113_v21 }
 0xae2   : > { %3385 = vmatprep.subr.bf16.mxu1 %v5116_v23 }
 0xae3   : > { %v2549_v24 = vpop.trf.xlu1 }
 0xae4   : > { %2573 = vxpose.xlu1.c.b16.cont [2/8] (narrow) %v2549_v24, 32  ;;  %v2566_v60 = vpop.trf.xlu0  ;;  %v5119_v24 = vld [vmem:[#allocation16 + $0x2c] ss:$16 sps:$4 sm:$0xff]  }
 0xae5   : > { %2590 = vxpose.xlu0.c.b16.cont [3/8] (narrow) %v2566_v60, 32  ;;  %v5114_v60 = vld [vmem:[#allocation16 + $0x20] ss:$16 sps:$4 sm:$0xff]  }
 0xae6   : > { %3386 = vmatpush1.bf16.msra.mxu1 %v5114_v60 }
 0xae7   : > { %v2550_v47 = vpop.trf.xlu1 }
 0xae8   : > { %2574 = vxpose.xlu1.c.b16.cont [3/8] (narrow) %v2550_v47, 32  ;;  %v2567_v0 = vpop.trf.xlu0  ;;  %v5117_v47 = vld [vmem:[#allocation16 + $0x28] ss:$16 sps:$4 sm:$0xff]  }
 0xae9   : > { %2591 = vxpose.xlu0.c.b16.cont [4/8] (narrow) %v2567_v0, 32  ;;  %v5122_v0 = vld [vmem:[#allocation16 + $0x44] ss:$16 sps:$4 sm:$0xff]  }
 0xaea   : > { %3387 = vmatprep.subr.bf16.mxu1 %v5122_v0 }
 0xaeb   : > { %v2551_v57 = vpop.trf.xlu1 }
 0xaec   : > { %2575 = vxpose.xlu1.c.b16.cont [4/8] (narrow) %v2551_v57, 32  ;;  %v2568_v46 = vpop.trf.xlu0  ;;  %v5125_v57 = vld [vmem:[#allocation16 + $0x4c] ss:$16 sps:$4 sm:$0xff]  }
 0xaed   : > { %2592 = vxpose.xlu0.c.b16.cont [5/8] (narrow) %v2568_v46, 32  ;;  %v5120_v46 = vld [vmem:[#allocation16 + $0x40] ss:$16 sps:$4 sm:$0xff]  }
 0xaee   : > { %3388 = vmatpush1.bf16.msra.mxu1 %v5120_v46 }
 0xaef   : > { %v2552_v37 = vpop.trf.xlu1 }
 0xaf0   : > { %2576 = vxpose.xlu1.c.b16.cont [5/8] (narrow) %v2552_v37, 32  ;;  %v2569_v2 = vpop.trf.xlu0  ;;  %v5123_v37 = vld [vmem:[#allocation16 + $0x48] ss:$16 sps:$4 sm:$0xff]  }
 0xaf1   : > { %2593 = vxpose.xlu0.c.b16.cont [6/8] (narrow) %v2569_v2, 32  ;;  %v5128_v2 = vld [vmem:[#allocation16 + $0x64] ss:$16 sps:$4 sm:$0xff]  }
 0xaf2   : > { %3389 = vmatprep.subr.bf16.mxu1 %v5128_v2 }
 0xaf3   : > { %v2553_v44 = vpop.trf.xlu1 }
 0xaf4   : > { %2577 = vxpose.xlu1.c.b16.cont [6/8] (narrow) %v2553_v44, 32  ;;  %v2570_v1 = vpop.trf.xlu0  ;;  %v5131_v44 = vld [vmem:[#allocation16 + $0x6c] ss:$16 sps:$4 sm:$0xff]  }
 0xaf5   : > { %2594 = vxpose.xlu0.c.b16.cont [7/8] (narrow) %v2570_v1, 32  ;;  %v5126_v1 = vld [vmem:[#allocation16 + $0x60] ss:$16 sps:$4 sm:$0xff]  }
 0xaf6   : > { %3390 = vmatpush1.bf16.msra.mxu1 %v5126_v1 }
 0xaf7   : > { %v2554_v7 = vpop.trf.xlu1 }
 0xaf8   : > { %2578 = vxpose.xlu1.c.b16.cont [7/8] (narrow) %v2554_v7, 32  ;;  %v2571_v3 = vpop.trf.xlu0  ;;  %v5129_v7 = vld [vmem:[#allocation16 + $0x68] ss:$16 sps:$4 sm:$0xff]  }
 0xaf9   : > { %2595 = vxpose.xlu0.c.b16.end [8/8] (narrow) %v2571_v3, 32  ;;  %v5134_v3 = vld [vmem:[#allocation16 + $0x84] ss:$16 sps:$4 sm:$0xff]  }
 0xafa   : > { %3391 = vmatprep.subr.bf16.mxu1 %v5134_v3  ;;  %v5173_v3 = vld [vmem:[#allocation16 + $0x14c] ss:$16 sps:$4 sm:$0xff]  }
 0xafb   : > { %v2555_v30 = vpop.trf.xlu1 }
 0xafc   : > { %2579 = vxpose.xlu1.c.b16.end [8/8] (narrow) %v2555_v30, 32  ;;  %v5137_v30 = vld [vmem:[#allocation16 + $0x8c] ss:$16 sps:$4 sm:$0xff]  }
 0xb43   : > { %v2596_v31 = vpop.trf.xlu0 }
 0xb44   : > { %2840 = vmatprep.mubr.bf16.mxu0 %v2596_v31  ;;  %v5132_v31 = vld [vmem:[#allocation16 + $0x80] ss:$16 sps:$4 sm:$0xff]  }
 0xb45   : > { %3392 = vmatpush1.bf16.msra.mxu1 %v5132_v31  ;;  %v5171_v31 = vld [vmem:[#allocation16 + $0x148] ss:$16 sps:$4 sm:$0xff]  }
 0xb46   : > { %v2580_v32 = vpop.trf.xlu1 }
 0xb47   : > { %2841 = vmatmul.mubr.bf16.vlgmr.msra.gmra.mrb[16].mxu0 %v2580_v32  ;;  %v2597_v33 = vpop.trf.xlu0  ;;  %v5135_v32 = vld [vmem:[#allocation16 + $0x88] ss:$16 sps:$4 sm:$0xff]  }
 0xb48   : > { %2850 = vmatprep.mubr.bf16.mxu0 %v2597_v33  ;;  %3437 = vmatpush1.bf16.msra.mxu0 %v5111_v35  ;;  %v5140_v33 = vld [vmem:[#allocation16 + $0xa4] ss:$16 sps:$4 sm:$0xff]  }
 0xb49   : > { %3438 = vmatprep.subr.bf16.mxu0 %v5119_v24  ;;  %3393 = vmatprep.subr.bf16.mxu1 %v5140_v33  ;;  %v5179_v33 = vld [vmem:[#allocation16 + $0x16c] ss:$16 sps:$4 sm:$0xff]  }
 0xb4a   : > { %v2581_v5 = vpop.trf.xlu1  ;;  %3394 = vmatpush1.bf16.msra.mxu1 %v5138_v6  ;;  %v5177_v6 = vld [vmem:[#allocation16 + $0x168] ss:$16 sps:$4 sm:$0xff]  }
 0xb4c   : > { %3439 = vmatpush1.bf16.msra.mxu0 %v5117_v47 }
 0xb4d   : > { %3440 = vmatprep.subr.bf16.mxu0 %v5125_v57 }
 0xb4f   : > { %2851 = vmatmul.mubr.bf16.gmra.mrb[20].mxu0 %v2581_v5  ;;  %v5143_v5 = vld [vmem:[#allocation16 + $0xac] ss:$16 sps:$4 sm:$0xff]  }
 0xb50   : > { %3441 = vmatpush1.bf16.msra.mxu0 %v5123_v37 }
 0xb51   : > { %3442 = vmatprep.subr.bf16.mxu0 %v5131_v44 }
 0xb54   : > { %3443 = vmatpush1.bf16.msra.mxu0 %v5129_v7  ;;  %v5170_v7 = vld [vmem:[#allocation16 + $0x144] ss:$16 sps:$4 sm:$0xff]  }
 0xb55   : > { %3444 = vmatprep.subr.bf16.mxu0 %v5137_v30  ;;  %v5168_v30 = vld [vmem:[#allocation16 + $0x140] ss:$16 sps:$4 sm:$0xff]  }
 0xb58   : > { %3445 = vmatpush1.bf16.msra.mxu0 %v5135_v32  ;;  %v5176_v32 = vld [vmem:[#allocation16 + $0x164] ss:$16 sps:$4 sm:$0xff]  }
 0xb59   : > { %3446 = vmatprep.subr.bf16.mxu0 %v5143_v5  ;;  %v5174_v5 = vld [vmem:[#allocation16 + $0x160] ss:$16 sps:$4 sm:$0xff]  }
 0xc1a   : > { %v2842_v8 = vpop.f32.mrb[16].mxu0 }
 0xc1b   : > { %v2843_v4 = vadd.f32 %v2842_v8, %v2641_v34  ;;  %v2844_v39 = vpop.f32.mrb[17].mxu0  ;;  %v5149_v8 = vld [vmem:[#allocation16 + $0xcc] ss:$16 sps:$4 sm:$0xff]  }
 0xc1c   : > { %v2845_v40 = vadd.f32 %v2844_v39, %v2645_v51  ;;  %v2846_v13 = vpop.f32.mrb[18].mxu0  ;;  %v5147_v39 = vld [vmem:[#allocation16 + $0xc8] ss:$16 sps:$4 sm:$0xff]  }
 0xc1d   : > { %v6828_v14 = vadd.f32 %v5380_v43, %v2843_v4  ;;  %v2847_v26 = vadd.f32 %v2846_v13, %v2641_v34  ;;  %v2848_v59 = vpop.f32.mrb[19].mxu0  ;;  %v5144_v4 = vld [vmem:[#allocation16 + $0xc0] ss:$16 sps:$4 sm:$0xff]   ;;  %v5155_v13 = vld [vmem:[#allocation16 + $0xec] ss:$16 sps:$4 sm:$0xff]  }
 0xc1e   : > { %v6831_v29 = vadd.f32 %v5381_v22, %v2845_v40  ;;  %v2849_v25 = vadd.f32 %v2848_v59, %v2645_v51  ;;  %v5152_v40 = vld [vmem:[#allocation16 + $0xe4] ss:$16 sps:$4 sm:$0xff]   ;;  %v5150_v43 = vld [vmem:[#allocation16 + $0xe0] ss:$16 sps:$4 sm:$0xff]   ;;  %v5161_v22 = vld [vmem:[#allocation16 + $0x10c] ss:$16 sps:$4 sm:$0xff]  }
 0xc1f   : > { %v6834_v11 = vadd.f32 %v5382_v19, %v2847_v26  ;;  %v5153_v26 = vld [vmem:[#allocation16 + $0xe8] ss:$16 sps:$4 sm:$0xff]   ;;  %v5158_v59 = vld [vmem:[#allocation16 + $0x104] ss:$16 sps:$4 sm:$0xff]  }
 0xc20   : > { %v6837_v41 = vadd.f32 %v5383_v36, %v2849_v25  ;;  %v2871_v42 = vadd.f32 %v6831_v29, %v6828_v14  ;;  %v5156_v25 = vld [vmem:[#allocation16 + $0x100] ss:$16 sps:$4 sm:$0xff]   ;;  %v5159_v19 = vld [vmem:[#allocation16 + $0x108] ss:$16 sps:$4 sm:$0xff]   ;;  %v5164_v36 = vld [vmem:[#allocation16 + $0x124] ss:$16 sps:$4 sm:$0xff]  }
 0xc22   : > { %2872 = vadd.xlane.f32.xlu0 %v2871_v42  ;;  %v2852_v49 = vpop.f32.mrb[20].mxu0  ;;  %v2874_v50 = vadd.f32 %v6837_v41, %v6834_v11  ;;  %v5167_v42 = vld [vmem:[#allocation16 + $0x12c] ss:$16 sps:$4 sm:$0xff]  }
 0xc23   : > { %v2853_v16 = vadd.f32 %v2852_v49, %v2641_v34  ;;  %v2854_v17 = vpop.f32.mrb[21].mxu0  ;;  %v5162_v49 = vld [vmem:[#allocation16 + $0x120] ss:$16 sps:$4 sm:$0xff]  }
 0xc24   : > { %v2855_v38 = vadd.f32 %v2854_v17, %v2645_v51  ;;  %2875 = vadd.xlane.f32.xlu1 %v2874_v50  ;;  %v2856_v20 = vpop.f32.mrb[22].mxu0  ;;  %v5165_v50 = vld [vmem:[#allocation16 + $0x128] ss:$16 sps:$4 sm:$0xff]  }
 0xc25   : > { %v6844_v53 = vadd.f32 %v5384_v52, %v2853_v16  ;;  %v2857_v56 = vadd.f32 %v2856_v20, %v2641_v34  ;;  %v2858_v15 = vpop.f32.mrb[23].mxu0  ;;  %v5141_v34 = vld [vmem:[#allocation16 + $0xa8] ss:$16 sps:$4 sm:$0xff]  }
 0xc26   : > { %v6847_v27 = vadd.f32 %v5385_v58, %v2855_v38  ;;  %v2859_v48 = vadd.f32 %v2858_v15, %v2645_v51  ;;  %v5146_v51 = vld [vmem:[#allocation16 + $0xc4] ss:$16 sps:$4 sm:$0xff]   ;;  %3447 = vmatpush1.bf16.msra.mxu0 %v5141_v34 }
 0xc27   : > { %v6850_v61 = vadd.f32 %v5386_v9, %v2857_v56  ;;  %3395 = vmatprep.subr.bf16.mxu1 %v5146_v51  ;;  %3448 = vmatprep.subr.bf16.mxu0 %v5149_v8  ;;  %v5182_v34 = vld [vmem:[#allocation16 + $0x184] ss:$16 sps:$4 sm:$0xff]   ;;  %v5185_v51 = vld [vmem:[#allocation16 + $0x18c] ss:$16 sps:$4 sm:$0xff]   ;;  %v5180_v8 = vld [vmem:[#allocation16 + $0x180] ss:$16 sps:$4 sm:$0xff]  }
 0xc28   : > { %v6853_v62 = vadd.f32 %v5387_v45, %v2859_v48  ;;  %v2877_v63 = vadd.f32 %v6847_v27, %v6844_v53  ;;  %3396 = vmatpush1.bf16.msra.mxu1 %v5144_v4  ;;  %v5183_v4 = vld [vmem:[#allocation16 + $0x188] ss:$16 sps:$4 sm:$0xff]  }
 0xc29   : > { %3397 = vmatprep.subr.bf16.mxu1 %v5152_v40  ;;  %v5191_v40 = vld [vmem:[#allocation16 + $0x1ac] ss:$16 sps:$4 sm:$0xff]  }
 0xc2a   : > { %2878 = vadd.xlane.f32.xlu0 %v2877_v63  ;;  %v2880_v55 = vadd.f32 %v6853_v62, %v6850_v61  ;;  %3449 = vmatpush1.bf16.msra.mxu0 %v5147_v39  ;;  %v5188_v39 = vld [vmem:[#allocation16 + $0x1a4] ss:$16 sps:$4 sm:$0xff]  }
 0xc2b   : > { %3450 = vmatprep.subr.bf16.mxu0 %v5155_v13  ;;  %v5186_v13 = vld [vmem:[#allocation16 + $0x1a0] ss:$16 sps:$4 sm:$0xff]  }
 0xc2c   : > { %2881 = vadd.xlane.f32.xlu1 %v2880_v55  ;;  %3398 = vmatpush1.bf16.msra.mxu1 %v5150_v43  ;;  %v5189_v43 = vld [vmem:[#allocation16 + $0x1a8] ss:$16 sps:$4 sm:$0xff]  }
 0xc2d   : > { %3399 = vmatprep.subr.bf16.mxu1 %v5158_v59  ;;  %v5197_v59 = vld [vmem:[#allocation16 + $0x1cc] ss:$16 sps:$4 sm:$0xff]  }
 0xc2e   : > { %3451 = vmatpush1.bf16.msra.mxu0 %v5153_v26  ;;  %v5194_v26 = vld [vmem:[#allocation16 + $0x1c4] ss:$16 sps:$4 sm:$0xff]  }
 0xc2f   : > { %3452 = vmatprep.subr.bf16.mxu0 %v5161_v22  ;;  %v5192_v22 = vld [vmem:[#allocation16 + $0x1c0] ss:$16 sps:$4 sm:$0xff]  }
 0xc30   : > { %3400 = vmatpush1.bf16.msra.mxu1 %v5156_v25  ;;  %v5195_v25 = vld [vmem:[#allocation16 + $0x1c8] ss:$16 sps:$4 sm:$0xff]  }
 0xc31   : > { %3401 = vmatprep.subr.bf16.mxu1 %v5164_v36  ;;  %v5203_v36 = vld [vmem:[#allocation16 + $0x1ec] ss:$16 sps:$4 sm:$0xff]  }
 0xc32   : > { %3453 = vmatpush1.bf16.msra.mxu0 %v5159_v19  ;;  %v5200_v19 = vld [vmem:[#allocation16 + $0x1e4] ss:$16 sps:$4 sm:$0xff]  }
 0xc33   : > { %3454 = vmatprep.subr.bf16.mxu0 %v5167_v42  ;;  %v5198_v42 = vld [vmem:[#allocation16 + $0x1e0] ss:$16 sps:$4 sm:$0xff]  }
 0xc34   : > { %3402 = vmatpush1.bf16.msra.mxu1 %v5162_v49  ;;  %v5201_v49 = vld [vmem:[#allocation16 + $0x1e8] ss:$16 sps:$4 sm:$0xff]  }
 0xc35   : > { %3403 = vmatprep.subr.bf16.mxu1 %v5170_v7 }
 0xc36   : > { %3455 = vmatpush1.bf16.msra.mxu0 %v5165_v50  ;;  %v5206_v50 = vld [vmem:[#allocation18 + $0x4] ss:$8 sps:$4 sm:$0xff]  }
 0xc37   : > { %3456 = vmatprep.subr.bf16.mxu0 %v5173_v3 }
 0xc38   : > { %3404 = vmatpush1.bf16.msra.mxu1 %v5168_v30 }
 0xc39   : > { %3405 = vmatprep.subr.bf16.mxu1 %v5176_v32 }
 0xc3a   : > { %3457 = vmatpush1.bf16.msra.mxu0 %v5171_v31 }
 0xc3b   : > { %3458 = vmatprep.subr.bf16.mxu0 %v5179_v33 }
 0xc3c   : > { %3406 = vmatpush1.bf16.msra.mxu1 %v5174_v5 }
 0xc3d   : > { %3407 = vmatprep.subr.bf16.mxu1 %v5182_v34 }
 0xc3e   : > { %3459 = vmatpush1.bf16.msra.mxu0 %v5177_v6 }
 0xc3f   : > { %3460 = vmatprep.subr.bf16.mxu0 %v5185_v51 }
 0xc40   : > { %3408 = vmatpush1.bf16.msra.mxu1 %v5180_v8 }
 0xc41   : > { %3409 = vmatprep.subr.bf16.mxu1 %v5188_v39 }
 0xc42   : > { %3461 = vmatpush1.bf16.msra.mxu0 %v5183_v4 }
 0xc43   : > { %3462 = vmatprep.subr.bf16.mxu0 %v5191_v40 }
 0xc44   : > { %3410 = vmatpush1.bf16.msra.mxu1 %v5186_v13 }
 0xc45   : > { %3411 = vmatprep.subr.bf16.mxu1 %v5194_v26 }
 0xc46   : > { %3463 = vmatpush1.bf16.msra.mxu0 %v5189_v43  ;;  %v5204_v43 = vld [vmem:[#allocation18] ss:$8 sps:$4 sm:$0xff]  }
 0xc47   : > { %3464 = vmatprep.subr.bf16.mxu0 %v5197_v59 }
 0xc48   : > { %3412 = vmatpush1.bf16.msra.mxu1 %v5192_v22 }
 0xc49   : > { %3413 = vmatprep.subr.bf16.mxu1 %v5200_v19 }
 0xc4a   : > { %3465 = vmatpush1.bf16.msra.mxu0 %v5195_v25 }
 0xc4b   : > { %3466 = vmatprep.subr.bf16.mxu0 %v5203_v36 }
 0xc4c   : > { %3414 = vmatpush1.bf16.msra.mxu1 %v5198_v42  ;;  %v5207_v42 = vld [vmem:[#allocation18 + $0x10] ss:$8 sps:$4 sm:$0xff]  }
 0xc4d   : > { %3973 = vmatprep.subr.bf16.mxu1 %v5206_v50 }
 0xc4e   : > { %3467 = vmatpush1.bf16.msra.mxu0 %v5201_v49 }
 0xcaf   : > { %v2873_v16 = vpop.xlane.xlu0 %2872 }
 0xcb0   : > { %v2883_v17 = vmul.f32 0.00390625, %v2873_v16 }
 0xcb1   : > { %v2876_v38 = vpop.xlane.xlu1 %2875 }
 0xcb2   : > { %v6860_v20 = vsub.f32 %v6828_v14, %v2883_v17  ;;  %v6863_v52 = vsub.f32 %v6831_v29, %v2883_v17  ;;  %v2884_v56 = vmul.f32 0.00390625, %v2876_v38 }
 0xcb4   : > { %v6866_v15 = vsub.f32 %v6834_v11, %v2884_v56  ;;  %v6869_v58 = vsub.f32 %v6837_v41, %v2884_v56  ;;  %v2895_v48 = vmul.f32 %v6860_v20, %v6860_v20  ;;  %v2896_v9 = vmul.f32 %v6863_v52, %v6863_v52 }
 0xcb6   : > { %v2903_v45 = vadd.f32 %v2896_v9, %v2895_v48  ;;  %v2897_v63 = vmul.f32 %v6866_v15, %v6866_v15  ;;  %v2898_v55 = vmul.f32 %v6869_v58, %v6869_v58 }
 0xcb7   : > { %v2879_v18 = vpop.xlane.xlu0 %2878 }
 0xcb8   : > { %v2885_v54 = vmul.f32 0.00390625, %v2879_v18  ;;  %2904 = vadd.xlane.f32.xlu0 %v2903_v45  ;;  %v2906_v35 = vadd.f32 %v2898_v55, %v2897_v63 }
 0xcb9   : > { %v2882_v21 = vpop.xlane.xlu1 %2881 }
 0xcba   : > { %v6880_v23 = vsub.f32 %v6844_v53, %v2885_v54  ;;  %v6883_v24 = vsub.f32 %v6847_v27, %v2885_v54  ;;  %v2886_v60 = vmul.f32 0.00390625, %v2882_v21  ;;  %2907 = vadd.xlane.f32.xlu1 %v2906_v35  ;;  %v2869_v35 = vld [vmem:[%s7223_s0] sm:$0x3] }
 0xcbc   : > { %v6886_v47 = vsub.f32 %v6850_v61, %v2886_v60  ;;  %v6889_v0 = vsub.f32 %v6853_v62, %v2886_v60  ;;  %v2899_v57 = vmul.f32 %v6880_v23, %v6880_v23  ;;  %v2900_v46 = vmul.f32 %v6883_v24, %v6883_v24  ;;  %v2870_v60 = vld [vmem:[%s7224_s23] sm:$0x3]  ;;  %s7008_s23 = scalar_lea.hbm %s7230_s21, %s4601_s2 }
 0xcbd   : > { %v2958_v7 = vrot.slane %v2870_v60, %v6717_v28  ;;  %v2962_v3 = vrot.slane %v2870_v60, %v6720_v10  ;;  %v5228_v60 = vld [vmem:[#allocation18 + $0x80] ss:$8 sps:$4 sm:$0xff]  }
 0xcbe   : > { %v2909_v37 = vadd.f32 %v2900_v46, %v2899_v57  ;;  %v2901_v2 = vmul.f32 %v6886_v47, %v6886_v47  ;;  %v2902_v44 = vmul.f32 %v6889_v0, %v6889_v0  ;;  %v2939_v57 = vrot.slane %v2869_v35, %v6717_v28 }
 0xcbf   : > { %v2943_v46 = vrot.slane %v2869_v35, %v6720_v10  ;;  %v5225_v35 = vld [vmem:[#allocation18 + $0x70] ss:$8 sps:$4 sm:$0xff]  }
 0xcc0   : > { %2910 = vadd.xlane.f32.xlu0 %v2909_v37  ;;  %v2912_v1 = vadd.f32 %v2902_v44, %v2901_v2 }
 0xcc2   : > { %2913 = vadd.xlane.f32.xlu1 %v2912_v1 }
 0xd45   : > { %v2905_v16 = vpop.xlane.xlu0 %2904 }
 0xd46   : > { %v2915_v17 = vmul.f32 0.00390625, %v2905_v16 }
 0xd47   : > { %v2908_v38 = vpop.xlane.xlu1 %2907 }
 0xd48   : > { %v2919_v56 = vadd.f32 1e-12, %v2915_v17  ;;  %v2916_v48 = vmul.f32 0.00390625, %v2908_v38 }
 0xd4a   : > { %5340 = vrsqrt.f32 %v2919_v56  ;;  %v2920_v9 = vadd.f32 1e-12, %v2916_v48  ;;  %v5215_v56 = vld [vmem:[#allocation18 + $0x34] ss:$8 sps:$4 sm:$0xff]   ;;  %v5218_v48 = vld [vmem:[#allocation18 + $0x44] ss:$8 sps:$4 sm:$0xff]  }
 0xd4c   : > { %5342 = vrsqrt.f32 %v2920_v9  ;;  %v5216_v9 = vld [vmem:[#allocation18 + $0x40] ss:$8 sps:$4 sm:$0xff]  }
 0xd4d   : > { %v2911_v45 = vpop.xlane.xlu0 %2910 }
 0xd4e   : > { %v2917_v63 = vmul.f32 0.00390625, %v2911_v45  ;;  %v5221_v45 = vld [vmem:[#allocation18 + $0x54] ss:$8 sps:$4 sm:$0xff]  }
 0xd4f   : > { %v2914_v55 = vpop.xlane.xlu1 %2913 }
 0xd50   : > { %v2921_v18 = vadd.f32 1e-12, %v2917_v63  ;;  %v2918_v54 = vmul.f32 0.00390625, %v2914_v55  ;;  %v5219_v63 = vld [vmem:[#allocation18 + $0x50] ss:$8 sps:$4 sm:$0xff]  }
 0xd51   : > { %v5224_v55 = vld [vmem:[#allocation18 + $0x64] ss:$8 sps:$4 sm:$0xff]  }
 0xd52   : > { %5344 = vrsqrt.f32 %v2921_v18  ;;  %v2922_v21 = vadd.f32 1e-12, %v2918_v54  ;;  %v5222_v18 = vld [vmem:[#allocation18 + $0x60] ss:$8 sps:$4 sm:$0xff]   ;;  %v5227_v54 = vld [vmem:[#allocation18 + $0x74] ss:$8 sps:$4 sm:$0xff]  }
 0xd54   : > { %v5341_v37 = vpop.eup %5340  ;;  %5346 = vrsqrt.f32 %v2922_v21  ;;  %v5230_v21 = vld [vmem:[#allocation18 + $0x84] ss:$8 sps:$4 sm:$0xff]  }
 0xd55   : > { %v2927_v2 = vmul.f32 %v5341_v37, %v6860_v20  ;;  %v2928_v44 = vmul.f32 %v5341_v37, %v6863_v52  ;;  %v5236_v37 = vld [vmem:[#allocation18 + $0xa4] ss:$8 sps:$4 sm:$0xff]  }
 0xd56   : > { %v5343_v1 = vpop.eup %5342 }
 0xd57   : > { %v2929_v30 = vmul.f32 %v5343_v1, %v6866_v15  ;;  %v2930_v31 = vmul.f32 %v5343_v1, %v6869_v58  ;;  %v2947_v32 = vmul.f32 %v2943_v46, %v2928_v44  ;;  %v2946_v33 = vmul.f32 %v2939_v57, %v2927_v2  ;;  %v5209_v15 = vld [vmem:[#allocation18 + $0x14] ss:$8 sps:$4 sm:$0xff]   ;;  %v5234_v2 = vld [vmem:[#allocation18 + $0xa0] ss:$8 sps:$4 sm:$0xff]   ;;  %v5237_v1 = vld [vmem:[#allocation18 + $0xb0] ss:$8 sps:$4 sm:$0xff]  }
 0xd58   : > { %v5239_v44 = vld [vmem:[#allocation18 + $0xb4] ss:$8 sps:$4 sm:$0xff]  }
 0xd59   : > { %v2949_v5 = vmul.f32 %v2943_v46, %v2930_v31  ;;  %v2948_v6 = vmul.f32 %v2939_v57, %v2929_v30  ;;  %v2966_v34 = vadd.f32 %v2962_v3, %v2947_v32  ;;  %v2965_v8 = vadd.f32 %v2958_v7, %v2946_v33  ;;  %v5245_v30 = vld [vmem:[#allocation18 + $0xd4] ss:$8 sps:$4 sm:$0xff]   ;;  %v5243_v31 = vld [vmem:[#allocation18 + $0xd0] ss:$8 sps:$4 sm:$0xff]   ;;  %v5248_v32 = vld [vmem:[#allocation18 + $0xe4] ss:$8 sps:$4 sm:$0xff]  }
 0xd5a   : > { %v5246_v33 = vld [vmem:[#allocation18 + $0xe0] ss:$8 sps:$4 sm:$0xff]  }
 0xd5b   : > { %v2968_v51 = vadd.f32 %v2962_v3, %v2949_v5  ;;  %v2967_v4 = vadd.f32 %v2958_v7, %v2948_v6  ;;  %v5251_v5 = vld [vmem:[#allocation18 + $0xf4] ss:$8 sps:$4 sm:$0xff]   ;;  %v5249_v6 = vld [vmem:[#allocation18 + $0xf0] ss:$8 sps:$4 sm:$0xff]  }
 0xd5c   : > { %v5345_v20 = vpop.eup %5344 }
 0xd5d   : > { %v2974_v39 = vpack.c.bf16 %v2968_v51, %v2966_v34  ;;  %v2973_v52 = vpack.c.bf16 %v2967_v4, %v2965_v8  ;;  %v2932_v40 = vmul.f32 %v5345_v20, %v6883_v24  ;;  %v2931_v13 = vmul.f32 %v5345_v20, %v6880_v23  ;;  %v5212_v24 = vld [vmem:[#allocation18 + $0x24] ss:$8 sps:$4 sm:$0xff]   ;;  %v3041_v8 = vld [vmem:[%s7225_s15] sm:$0xf]  ;;  %s5646_s15 = scalar_lea.vmem %s7010_s14, 1024 }
 0xd5e   : > { %v5347_v26 = vpop.eup %5346  ;;  %v5254_v34 = vld [vmem:[#allocation18 + $0x104] ss:$8 sps:$4 sm:$0xff]   ;;  %v3053_v51 = vsub.s32 2, %v6714_v12  ;;  %v3057_v4 = vsub.s32 3, %v6714_v12  ;;  %v3046_v20 = vrot.slane %v3041_v8, %v6717_v28  ;;  %p5647_p11 = scmp.ne.s32.totalorder %s7010_s14, %s5646_s15  ;;  %p5654_p9 = scmp.lt.s32.totalorder %s5652_s18, %s5646_s15 }
 0xd5f   : > { %3415 = vmatprep.mubr.bf16.mxu1 %v2974_v39  ;;  %3468 = vmatprep.mubr.bf16.mxu0 %v2974_v39  ;;  %v2934_v58 = vmul.f32 %v5347_v26, %v6889_v0  ;;  %v2951_v59 = vmul.f32 %v2943_v46, %v2932_v40  ;;  %v2933_v22 = vmul.f32 %v5347_v26, %v6886_v47  ;;  %v5210_v0 = vld [vmem:[#allocation18 + $0x20] ss:$8 sps:$4 sm:$0xff]   ;;  %v5213_v47 = vld [vmem:[#allocation18 + $0x30] ss:$8 sps:$4 sm:$0xff]  }
 0xd60   : > { %3416 = vmatmul.mubr.bf16.vlgmr.msra.gmra.mrb[8].mxu1 %v2973_v52  ;;  %3469 = vmatmul.mubr.bf16.vlgmr.msra.gmra.mrb[24].mxu0 %v2973_v52  ;;  %v2950_v25 = vmul.f32 %v2939_v57, %v2931_v13  ;;  %v3054_v39 = vrot.slane %v3041_v8, %v3053_v51  ;;  %v3050_v52 = vrot.slane %v3041_v8, %v6720_v10  ;;  %p5648_p4 = pnand %p5647_p11, %p7232_p8  ;;  %p5655_p13 = por %p5654_p9, %p5653_p5 }
 0xd61   : > { %v2953_v19 = vmul.f32 %v2943_v46, %v2934_v58  ;;  %v2952_v36 = vmul.f32 %v2939_v57, %v2933_v22  ;;  %3974 = vmatpush1.bf16.msra.mxu1 %v5204_v43  ;;  %v2970_v23 = vadd.f32 %v2962_v3, %v2951_v59  ;;  %v5233_v57 = vld [vmem:[#allocation18 + $0x94] ss:$8 sps:$4 sm:$0xff]   ;;  %v5231_v46 = vld [vmem:[#allocation18 + $0x90] ss:$8 sps:$4 sm:$0xff]   ;;  %v3058_v40 = vrot.slane %v3041_v8, %v3057_v4 }
 0xd62   : > { %3975 = vmatprep.subr.bf16.mxu1 %v5209_v15  ;;  %v2969_v50 = vadd.f32 %v2958_v7, %v2950_v25  ;;  %p5649_p10 = pneg %p5648_p4 }
 0xd63   : > { %v2972_v49 = vadd.f32 %v2962_v3, %v2953_v19  ;;  %v2971_v16 = vadd.f32 %v2958_v7, %v2952_v36  ;;  %v5242_v7 = vld [vmem:[#allocation18 + $0xc4] ss:$8 sps:$4 sm:$0xff]   ;;  %v5240_v3 = vld [vmem:[#allocation18 + $0xc0] ss:$8 sps:$4 sm:$0xff]  }
 0xd64   : > { %p5656_p1 = pnand %p5655_p13, %p5649_p10 }
 0xd65   : > { %v2976_v17 = vpack.c.bf16 %v2972_v49, %v2970_v23  ;;  %v2975_v38 = vpack.c.bf16 %v2971_v16, %v2969_v50  ;;  %3976 = vmatpush1.bf16.msra.mxu1 %v5207_v42 }
 0xd66   : > { %3977 = vmatprep.subr.bf16.mxu1 %v5212_v24 }
 0xd67   : > { %3425 = vmatprep.mubr.bf16.mxu1 %v2976_v17  ;;  %3478 = vmatprep.mubr.bf16.mxu0 %v2976_v17 }
 0xd68   : > { %3426 = vmatmul.mubr.bf16.gmra.mrb[12].mxu1 %v2975_v38  ;;  %3479 = vmatmul.mubr.bf16.gmra.mrb[28].mxu0 %v2975_v38 }
 0xd69   : > { %3978 = vmatpush1.bf16.msra.mxu1 %v5210_v0 }
 0xd6a   : > { %3979 = vmatprep.subr.bf16.mxu1 %v5215_v56 }
 0xd6d   : > { %3980 = vmatpush1.bf16.msra.mxu1 %v5213_v47 }
 0xd6e   : > { %3981 = vmatprep.subr.bf16.mxu1 %v5218_v48 }
 0xd71   : > { %3982 = vmatpush1.bf16.msra.mxu1 %v5216_v9 }
 0xd72   : > { %3983 = vmatprep.subr.bf16.mxu1 %v5221_v45 }
 0xd75   : > { %3984 = vmatpush1.bf16.msra.mxu1 %v5219_v63 }
 0xd76   : > { %3985 = vmatprep.subr.bf16.mxu1 %v5224_v55 }
 0xd79   : > { %3986 = vmatpush1.bf16.msra.mxu1 %v5222_v18 }
 0xd7a   : > { %3987 = vmatprep.subr.bf16.mxu1 %v5227_v54 }
 0xd7d   : > { %3988 = vmatpush1.bf16.msra.mxu1 %v5225_v35 }
 0xd7e   : > { %3989 = vmatprep.subr.bf16.mxu1 %v5230_v21 }
 0xd81   : > { %3990 = vmatpush1.bf16.msra.mxu1 %v5228_v60 }
 0xd82   : > { %3991 = vmatprep.subr.bf16.mxu1 %v5233_v57 }
 0xd85   : > { %3992 = vmatpush1.bf16.msra.mxu1 %v5231_v46 }
 0xd86   : > { %3993 = vmatprep.subr.bf16.mxu1 %v5236_v37 }
 0xd89   : > { %3994 = vmatpush1.bf16.msra.mxu1 %v5234_v2 }
 0xd8a   : > { %3995 = vmatprep.subr.bf16.mxu1 %v5239_v44 }
 0xd8d   : > { %3996 = vmatpush1.bf16.msra.mxu1 %v5237_v1 }
 0xd8e   : > { %3997 = vmatprep.subr.bf16.mxu1 %v5242_v7 }
 0xd91   : > { %3998 = vmatpush1.bf16.msra.mxu1 %v5240_v3 }
 0xd92   : > { %3999 = vmatprep.subr.bf16.mxu1 %v5245_v30 }
 0xd95   : > { %4000 = vmatpush1.bf16.msra.mxu1 %v5243_v31 }
 0xd96   : > { %4001 = vmatprep.subr.bf16.mxu1 %v5248_v32 }
 0xd99   : > { %4002 = vmatpush1.bf16.msra.mxu1 %v5246_v33 }
 0xd9a   : > { %4003 = vmatprep.subr.bf16.mxu1 %v5251_v5 }
 0xd9d   : > { %4004 = vmatpush1.bf16.msra.mxu1 %v5249_v6 }
 0xd9e   : > { %4026 = vmatprep.subr.bf16.mxu1 %v5254_v34 }
 0xe33   : > { %v3417_v13 = vpop.f32.mrb[8].mxu1  ;;  %v3470_v43 = vpop.f32.mrb[24].mxu0 }
 0xe34   : > { %v3418_v26 = vadd.f32 %v3417_v13, %v3046_v20  ;;  %v3471_v15 = vadd.f32 %v3470_v43, %v3054_v39  ;;  %v3419_v58 = vpop.f32.mrb[9].mxu1  ;;  %v3472_v59 = vpop.f32.mrb[25].mxu0 }
 0xe35   : > { %v3420_v22 = vadd.f32 %v3419_v58, %v3050_v52  ;;  %v3473_v25 = vadd.f32 %v3472_v59, %v3058_v40  ;;  %v3421_v19 = vpop.f32.mrb[10].mxu1  ;;  %v3474_v36 = vpop.f32.mrb[26].mxu0 }
 0xe36   : > { %v3505_v42 = vmul.f32 0.70710677, %v3418_v26  ;;  %v3507_v24 = vmul.f32 0.70710677, %v3471_v15  ;;  %v3422_v49 = vadd.f32 %v3421_v19, %v3046_v20  ;;  %v6924_v50 = vadd.f32 %v3474_v36, %v3054_v39  ;;  %v3423_v16 = vpop.f32.mrb[11].mxu1  ;;  %v3476_v17 = vpop.f32.mrb[27].mxu0 }
 0xe37   : > { %v3506_v23 = vmul.f32 0.70710677, %v3420_v22  ;;  %v3508_v12 = vmul.f32 0.70710677, %v3473_v25  ;;  %v3424_v38 = vadd.f32 %v3423_v16, %v3050_v52  ;;  %v6926_v0 = vadd.f32 %v3476_v17, %v3058_v40 }
 0xe38   : > { %5348 = verf.f32 %v3505_v42  ;;  %v3509_v56 = vmul.f32 0.70710677, %v3422_v49  ;;  %v3511_v47 = vmul.f32 0.70710677, %v6924_v50  ;;  %v3489_v8 = vmul.f32 0.5, %v3418_v26 }
 0xe39   : > { %5350 = verf.f32 %v3507_v24  ;;  %v3510_v48 = vmul.f32 0.70710677, %v3424_v38  ;;  %v3512_v45 = vmul.f32 0.70710677, %v6926_v0  ;;  %v3491_v4 = vmul.f32 0.5, %v3471_v15 }
 0xe3a   : > { %5352 = verf.f32 %v3506_v23  ;;  %v3492_v19 = vmul.f32 0.5, %v3473_v25  ;;  %v3493_v36 = vmul.f32 0.5, %v3422_v49 }
 0xe3b   : > { %5354 = verf.f32 %v3508_v12  ;;  %v3427_v9 = vpop.f32.mrb[12].mxu1  ;;  %v3480_v55 = vpop.f32.mrb[28].mxu0  ;;  %v3495_v12 = vmul.f32 0.5, %v6924_v50 }
 0xe3c   : > { %5356 = verf.f32 %v3509_v56  ;;  %v6930_v63 = vadd.f32 %v3427_v9, %v3046_v20  ;;  %v3429_v18 = vpop.f32.mrb[13].mxu1  ;;  %v6932_v54 = vadd.f32 %v3480_v55, %v3054_v39  ;;  %v3482_v21 = vpop.f32.mrb[29].mxu0  ;;  %v3496_v9 = vmul.f32 0.5, %v6926_v0 }
 0xe3d   : > { %5358 = verf.f32 %v3511_v47  ;;  %v6934_v35 = vadd.f32 %v3429_v18, %v3050_v52  ;;  %v3431_v60 = vpop.f32.mrb[14].mxu1  ;;  %v6937_v46 = vadd.f32 %v3482_v21, %v3058_v40  ;;  %v3484_v37 = vpop.f32.mrb[30].mxu0 }
 0xe3e   : > { %5360 = verf.f32 %v3510_v48  ;;  %v3513_v57 = vmul.f32 0.70710677, %v6930_v63  ;;  %v3433_v2 = vpop.f32.mrb[15].mxu1  ;;  %v3515_v44 = vmul.f32 0.70710677, %v6932_v54  ;;  %v3486_v1 = vpop.f32.mrb[31].mxu0  ;;  %v6942_v30 = vadd.f32 %v3431_v60, %v3046_v20 }
 0xe3f   : > { %5362 = verf.f32 %v3512_v45  ;;  %v3514_v7 = vmul.f32 0.70710677, %v6934_v35  ;;  %v3516_v3 = vmul.f32 0.70710677, %v6937_v46  ;;  %v6944_v31 = vadd.f32 %v3484_v37, %v3054_v39 }
 0xe40   : > { %5364 = verf.f32 %v3513_v57  ;;  %v6946_v32 = vadd.f32 %v3433_v2, %v3050_v52  ;;  %v3517_v6 = vmul.f32 0.70710677, %v6942_v30  ;;  %v6949_v34 = vadd.f32 %v3486_v1, %v3058_v40  ;;  %v5252_v1 = vld [vmem:[#allocation18 + $0x100] ss:$8 sps:$4 sm:$0xff]  }
 0xe41   : > { %5366 = verf.f32 %v3515_v44  ;;  %v3519_v13 = vmul.f32 0.70710677, %v6944_v31  ;;  %v3490_v39 = vmul.f32 0.5, %v3420_v22  ;;  %v3494_v22 = vmul.f32 0.5, %v3424_v38 }
 0xe42   : > { %v5349_v33 = vpop.eup %5348  ;;  %5368 = verf.f32 %v3514_v7  ;;  %v3518_v52 = vmul.f32 0.70710677, %v6946_v32  ;;  %v3520_v26 = vmul.f32 0.70710677, %v6949_v34  ;;  %v3497_v0 = vmul.f32 0.5, %v6930_v63 }
 0xe43   : > { %v5351_v5 = vpop.eup %5350  ;;  %5370 = verf.f32 %v3516_v3  ;;  %v3537_v43 = vadd.f32 1.0, %v5349_v33  ;;  %v5257_v33 = vld [vmem:[#allocation18 + $0x114] ss:$8 sps:$4 sm:$0xff]   ;;  %v5255_v63 = vld [vmem:[#allocation18 + $0x110] ss:$8 sps:$4 sm:$0xff]  }
 0xe44   : > { %v5353_v51 = vpop.eup %5352  ;;  %5372 = verf.f32 %v3517_v6  ;;  %v3539_v59 = vadd.f32 1.0, %v5351_v5 }
 0xe45   : > { %v5355_v20 = vpop.eup %5354  ;;  %5374 = verf.f32 %v3519_v13  ;;  %v3538_v40 = vadd.f32 1.0, %v5353_v51  ;;  %v3553_v56 = vmul.f32 %v3537_v43, %v3489_v8 }
 0xe46   : > { %v5357_v58 = vpop.eup %5356  ;;  %5376 = verf.f32 %v3518_v52  ;;  %v3540_v23 = vadd.f32 1.0, %v5355_v20  ;;  %v6955_v25 = vmul.f32 %v3539_v59, %v3491_v4  ;;  %v3499_v4 = vmul.f32 0.5, %v6932_v54  ;;  %v5260_v54 = vld [vmem:[#allocation18 + $0x124] ss:$8 sps:$4 sm:$0xff]  }
 0xe47   : > { %v5359_v42 = vpop.eup %5358  ;;  %v3541_v24 = vadd.f32 1.0, %v5357_v58  ;;  %5378 = verf.f32 %v3520_v26  ;;  %v3554_v18 = vmul.f32 %v3538_v40, %v3490_v39  ;;  %v3501_v20 = vmul.f32 0.5, %v6942_v30 }
 0xe48   : > { %v5361_v15 = vpop.eup %5360  ;;  %v3543_v16 = vadd.f32 1.0, %v5359_v42  ;;  %v3556_v50 = vmul.f32 %v3540_v23, %v3492_v19  ;;  %v3498_v52 = vmul.f32 0.5, %v6934_v35  ;;  %v3503_v58 = vmul.f32 0.5, %v6944_v31 }
 0xe49   : > { %v5363_v17 = vpop.eup %5362  ;;  %v3557_v47 = vmul.f32 %v3541_v24, %v3493_v36  ;;  %v3542_v48 = vadd.f32 1.0, %v5361_v15  ;;  %v3502_v19 = vmul.f32 0.5, %v6946_v32  ;;  %v3500_v15 = vmul.f32 0.5, %v6937_v46 }
 0xe4a   : > { %v6957_v49 = vmul.f32 %v3543_v16, %v3495_v12  ;;  %v3544_v45 = vadd.f32 1.0, %v5363_v17  ;;  %v5365_v55 = vpop.eup %5364  ;;  %v3504_v35 = vmul.f32 0.5, %v6949_v34  ;;  %v5261_v34 = vld [vmem:[#allocation18 + $0x130] ss:$8 sps:$4 sm:$0xff]  }
 0xe4b   : > { %v3569_v21 = vpack.c.bf16 %v3557_v47, %v3553_v56  ;;  %v3558_v60 = vmul.f32 %v3542_v48, %v3494_v22  ;;  %v5367_v57 = vpop.eup %5366  ;;  %v3545_v3 = vadd.f32 1.0, %v5365_v55  ;;  %v5258_v48 = vld [vmem:[#allocation18 + $0x120] ss:$8 sps:$4 sm:$0xff]  }
 0xe4c   : > { %v3571_v38 = vpack.c.bf16 %v6957_v49, %v6955_v25  ;;  %v3560_v37 = vmul.f32 %v3544_v45, %v3496_v9  ;;  %v5369_v2 = vpop.eup %5368  ;;  %v3547_v51 = vadd.f32 1.0, %v5367_v57  ;;  %v5263_v9 = vld [vmem:[#allocation18 + $0x134] ss:$8 sps:$4 sm:$0xff]   ;;  %v5266_v45 = vld [vmem:[#allocation18 + $0x144] ss:$8 sps:$4 sm:$0xff]  }
 0xe4d   : > { %v3570_v44 = vpack.c.bf16 %v3558_v60, %v3554_v18  ;;  %v5371_v7 = vpop.eup %5370  ;;  %v3546_v13 = vadd.f32 1.0, %v5369_v2  ;;  %v3561_v36 = vmul.f32 %v3545_v3, %v3497_v0  ;;  %v5264_v55 = vld [vmem:[#allocation18 + $0x140] ss:$8 sps:$4 sm:$0xff]   ;;  %v5269_v18 = vld [vmem:[#allocation18 + $0x154] ss:$8 sps:$4 sm:$0xff]  }
 0xe4e   : > { %v3572_v5 = vpack.c.bf16 %v3560_v37, %v3556_v50  ;;  %v5373_v6 = vpop.eup %5372  ;;  %v3548_v42 = vadd.f32 1.0, %v5371_v7  ;;  %v6968_v30 = vmul.f32 %v3547_v51, %v3499_v4  ;;  %v5272_v60 = vld [vmem:[#allocation18 + $0x164] ss:$8 sps:$4 sm:$0xff]   ;;  %v5270_v57 = vld [vmem:[#allocation18 + $0x160] ss:$8 sps:$4 sm:$0xff]  }
 0xe4f   : > { %4005 = vmatprep.mubr.bf16.mxu1 %v3570_v44  ;;  %v5375_v8 = vpop.eup %5374  ;;  %v3549_v43 = vadd.f32 1.0, %v5373_v6  ;;  %v3562_v31 = vmul.f32 %v3546_v13, %v3498_v52  ;;  %v5275_v50 = vld [vmem:[#allocation18 + $0x174] ss:$8 sps:$4 sm:$0xff]   ;;  %v5273_v37 = vld [vmem:[#allocation18 + $0x170] ss:$8 sps:$4 sm:$0xff]  }
 0xe50   : > { %4006 = vmatmul.mubr.bf16.vlgmr.msra.gmra.mrb[16].mxu1 %v3569_v21  ;;  %v5377_v39 = vpop.eup %5376  ;;  %v3551_v59 = vadd.f32 1.0, %v5375_v8  ;;  %v6976_v17 = vmul.f32 %v3548_v42, %v3500_v15  ;;  %v5267_v21 = vld [vmem:[#allocation18 + $0x150] ss:$8 sps:$4 sm:$0xff]   ;;  %v5278_v2 = vld [vmem:[#allocation18 + $0x184] ss:$8 sps:$4 sm:$0xff]  }
 0xe51   : > { %4027 = vmatpush1.bf16.msra.mxu1 %v5252_v1  ;;  %v3565_v40 = vmul.f32 %v3549_v43, %v3501_v20  ;;  %v3550_v24 = vadd.f32 1.0, %v5377_v39  ;;  %v5379_v26 = vpop.eup %5378  ;;  %v5276_v44 = vld [vmem:[#allocation18 + $0x180] ss:$8 sps:$4 sm:$0xff]   ;;  %v5281_v1 = vld [vmem:[#allocation18 + $0x194] ss:$8 sps:$4 sm:$0xff]  }
 0xe52   : > { %4028 = vmatprep.subr.bf16.mxu1 %v5257_v33  ;;  %v6971_v23 = vmul.f32 %v3551_v59, %v3503_v58  ;;  %v3552_v32 = vadd.f32 1.0, %v5379_v26  ;;  %v5279_v7 = vld [vmem:[#allocation18 + $0x190] ss:$8 sps:$4 sm:$0xff]   ;;  %v5284_v3 = vld [vmem:[#allocation18 + $0x1a4] ss:$8 sps:$4 sm:$0xff]  }
 0xe53   : > { %v3566_v12 = vmul.f32 %v3550_v24, %v3502_v19  ;;  %v3573_v16 = vpack.c.bf16 %v3565_v40, %v3561_v36  ;;  %v5282_v33 = vld [vmem:[#allocation18 + $0x1a0] ss:$8 sps:$4 sm:$0xff]   ;;  %v5285_v6 = vld [vmem:[#allocation18 + $0x1b0] ss:$8 sps:$4 sm:$0xff]   ;;  %v5290_v0 = vld [vmem:[#allocation18 + $0x1c4] ss:$8 sps:$4 sm:$0xff]  }
 0xe54   : > { %v3575_v22 = vpack.c.bf16 %v6971_v23, %v6968_v30  ;;  %v3568_v56 = vmul.f32 %v3552_v32, %v3504_v35  ;;  %v5288_v51 = vld [vmem:[#allocation18 + $0x1c0] ss:$8 sps:$4 sm:$0xff]   ;;  %v5293_v8 = vld [vmem:[#allocation18 + $0x1d4] ss:$8 sps:$4 sm:$0xff]   ;;  %v5291_v4 = vld [vmem:[#allocation18 + $0x1d0] ss:$8 sps:$4 sm:$0xff]  }
 0xe55   : > { %4029 = vmatpush1.bf16.msra.mxu1 %v5255_v63  ;;  %v3574_v47 = vpack.c.bf16 %v3566_v12, %v3562_v31  ;;  %v5296_v13 = vld [vmem:[#allocation18 + $0x1e4] ss:$8 sps:$4 sm:$0xff]   ;;  %v5294_v20 = vld [vmem:[#allocation18 + $0x1e0] ss:$8 sps:$4 sm:$0xff]   ;;  %v5299_v43 = vld [vmem:[#allocation18 + $0x1f4] ss:$8 sps:$4 sm:$0xff]  }
 0xe56   : > { %4030 = vmatprep.subr.bf16.mxu1 %v5260_v54  ;;  %v3576_v46 = vpack.c.bf16 %v3568_v56, %v6976_v17  ;;  %v5297_v39 = vld [vmem:[#allocation18 + $0x1f0] ss:$8 sps:$4 sm:$0xff]  }
 0xe57   : > { %4015 = vmatprep.mubr.bf16.mxu1 %v3574_v47  ;;  %v3641_v52 = vld [vmem:[%s7228_s9] sm:$0x3] }
 0xe58   : > { %4016 = vmatmul.mubr.bf16.gmra.mrb[20].mxu1 %v3573_v16  ;;  %v3646_v58 = vrot.slane %v3641_v52, %v6717_v28  ;;  %v3650_v59 = vrot.slane %v3641_v52, %v6720_v10 }
 0xe59   : > { %4031 = vmatpush1.bf16.msra.mxu1 %v5258_v48  ;;  %4058 = vmatprep.mubr.bf16.mxu1 %v3572_v5  ;;  %v5287_v5 = vld [vmem:[#allocation18 + $0x1b4] ss:$8 sps:$4 sm:$0xff]  }
 0xe5a   : > { %4032 = vmatprep.subr.bf16.mxu1 %v5263_v9 }
 0xe5d   : > { %4033 = vmatpush1.bf16.msra.mxu1 %v5261_v34 }
 0xe5e   : > { %4034 = vmatprep.subr.bf16.mxu1 %v5266_v45 }
 0xe61   : > { %4035 = vmatpush1.bf16.msra.mxu1 %v5264_v55 }
 0xe62   : > { %4036 = vmatprep.subr.bf16.mxu1 %v5269_v18 }
 0xe65   : > { %4037 = vmatpush1.bf16.msra.mxu1 %v5267_v21 }
 0xe66   : > { %4038 = vmatprep.subr.bf16.mxu1 %v5272_v60 }
 0xe69   : > { %4039 = vmatpush1.bf16.msra.mxu1 %v5270_v57 }
 0xe6a   : > { %4040 = vmatprep.subr.bf16.mxu1 %v5275_v50 }
 0xe6d   : > { %4041 = vmatpush1.bf16.msra.mxu1 %v5273_v37 }
 0xe6e   : > { %4042 = vmatprep.subr.bf16.mxu1 %v5278_v2 }
 0xe71   : > { %4043 = vmatpush1.bf16.msra.mxu1 %v5276_v44 }
 0xe72   : > { %4044 = vmatprep.subr.bf16.mxu1 %v5281_v1 }
 0xe75   : > { %4045 = vmatpush1.bf16.msra.mxu1 %v5279_v7 }
 0xe76   : > { %4046 = vmatprep.subr.bf16.mxu1 %v5284_v3 }
 0xe79   : > { %4047 = vmatpush1.bf16.msra.mxu1 %v5282_v33 }
 0xe7a   : > { %4048 = vmatprep.subr.bf16.mxu1 %v5287_v5 }
 0xe7d   : > { %4049 = vmatpush1.bf16.msra.mxu1 %v5285_v6 }
 0xe7e   : > { %4050 = vmatprep.subr.bf16.mxu1 %v5290_v0 }
 0xe81   : > { %4051 = vmatpush1.bf16.msra.mxu1 %v5288_v51 }
 0xe82   : > { %4052 = vmatprep.subr.bf16.mxu1 %v5293_v8 }
 0xe85   : > { %4053 = vmatpush1.bf16.msra.mxu1 %v5291_v4 }
 0xe86   : > { %4054 = vmatprep.subr.bf16.mxu1 %v5296_v13 }
 0xe89   : > { %4055 = vmatpush1.bf16.msra.mxu1 %v5294_v20 }
 0xe8a   : > { %4056 = vmatprep.subr.bf16.mxu1 %v5299_v43 }
 0xe8d   : > { %4057 = vmatpush1.bf16.msra.mxu1 %v5297_v39 }
 0xe90   : > { %4059 = vmatmul.mubr.bf16.vlgmr.msra.gmra.mrb[16].mxu1 %v3571_v38 }
 0xe91   : > { %4068 = vmatprep.mubr.bf16.mxu1 %v3576_v46 }
 0xe98   : > { %4069 = vmatmul.mubr.bf16.gmra.mrb[20].mxu1 %v3575_v22 }
 0xf63   : > { %v4060_v19 = vpop.f32.mrb[16].mxu1 }
 0xf64   : > { %v4703_v25 = vadd.f32 %v4060_v19, %v3646_v58  ;;  %v4062_v49 = vpop.f32.mrb[17].mxu1 }
 0xf65   : > { %v4704_v38 = vadd.f32 %v4062_v49, %v3650_v59  ;;  %v4064_v63 = vpop.f32.mrb[18].mxu1 }
 0xf66   : > { %v4079_v36 = vadd.f32 %v4703_v25, %v6828_v14  ;;  %v4705_v42 = vadd.f32 %v4064_v63, %v3646_v58  ;;  %v4066_v40 = vpop.f32.mrb[19].mxu1 }
 0xf67   : > { %v4080_v24 = vadd.f32 %v4704_v38, %v6831_v29  ;;  %v4706_v54 = vadd.f32 %v4066_v40, %v3650_v59 }
 0xf68   : > { %4087 = vst [vmem:[%s6357_s28] sm:$0xff] %v4079_v36  ;;  %v4081_v28 = vadd.f32 %v4705_v42, %v6834_v11 }
 0xf69   : > { %4088 = vst [vmem:[%s6357_s28 + $0x8] sm:$0xff] %v4080_v24  ;;  %v4082_v10 = vadd.f32 %v4706_v54, %v6837_v41 }
 0xf6a   : > { %4089 = vst [vmem:[%s6357_s28 + $0x10] sm:$0xff] %v4081_v28 }
 0xf6b   : > { %4090 = vst [vmem:[%s6357_s28 + $0x18] sm:$0xff] %v4082_v10  ;;  %v4070_v26 = vpop.f32.mrb[20].mxu1 }
 0xf6c   : > { %v4707_v14 = vadd.f32 %v4070_v26, %v3646_v58  ;;  %v4072_v30 = vpop.f32.mrb[21].mxu1 }
 0xf6d   : > { %v4708_v29 = vadd.f32 %v4072_v30, %v3650_v59  ;;  %v4074_v15 = vpop.f32.mrb[22].mxu1 }
 0xf6e   : > { %v4083_v11 = vadd.f32 %v4707_v14, %v6844_v53  ;;  %v4709_v23 = vadd.f32 %v4074_v15, %v3646_v58  ;;  %v4076_v41 = vpop.f32.mrb[23].mxu1 }
 0xf6f   : > { %v4084_v35 = vadd.f32 %v4708_v29, %v6847_v27  ;;  %v4710_v31 = vadd.f32 %v4076_v41, %v3650_v59 }
 0xf70   : > { %4091 = vst [vmem:[%s6357_s28 + $0x20] sm:$0xff] %v4083_v11  ;;  %v4085_v12 = vadd.f32 %v4709_v23, %v6850_v61 }
 0xf71   : > { %4092 = vst [vmem:[%s6357_s28 + $0x28] sm:$0xff] %v4084_v35  ;;  %v4086_v53 = vadd.f32 %v4710_v31, %v6853_v62 }
 0xf72   : > { %4093 = vst [vmem:[%s6357_s28 + $0x30] sm:$0xff] %v4085_v12 }
 0xf73   : > { %4094 = vst [vmem:[%s6357_s28 + $0x38] sm:$0xff] %v4086_v53 }
 0xf74   : > { %5659 = shalt.err (!%p5656_p1)
}
 0xf75   : > { %s5660_s28 = scalar_lea.hbm %s7008_s23, 1024  ;;  %s5664_s8 = scalar_lea.hbm %s7231_s10, 4096 }
 0xf76   : > { %p5661_p12 = scmp.ne.s32.totalorder %s7008_s23, %s5660_s28  ;;  %p5665_p7 = scmp.lt.u32.totalorder %s7008_s23, %s7231_s10 }
 0xf77   : > { %p5666_p0 = scmp.lt.u32.totalorder %s5664_s8, %s5660_s28  ;;  %p5668_p11 = scmp.lt.u32.totalorder %s5660_s28, %s7008_s23 }
 0xf78   : > { %p5662_p6 = pnand %p5661_p12, %p7232_p8 }
 0xf79   : > { %p5667_p2 = por %p5666_p0, %p5665_p7 }
 0xf7a   : > { %p5663_p3 = pneg %p5662_p6 }
 0xf7b   : > { %p5669_p4 = por %p5668_p11, %p5667_p2 }
 0xf7d   : > { %p5670_p10 = pnand %p5669_p4, %p5663_p3 }
 0xf7f   : > { %5673 = shalt.err (!%p5670_p10)
}
 0xf80   : > { %s5801_s2 = smov 256   ;;  %s5802_s0 = smov 16  }
 0xf81   : > { %4749 = dma.vmem_to_hbm [thread:$0]  (%p7232_p8), %s7010_s14, 1024, %s7008_s23, %s4096_s4, %s5801_s2, %s5801_s2, %s5802_s0  }
 0xf82 PF: > { %s7233_s16 = sld [smem:[#allocation26_spill]]  ;;  %s7234_s21 = sld [smem:[#allocation36_spill]] }
 0xf83   : > { %p4797_p5 = scmp.ge.s32.totalorder %s5784_s3, 2 }
 0xf88   : > { %s4127_s15 = sand.u32 1, %s7233_s16   ;;  %p7235_p9 = scmp.ne.s32.totalorder %s7234_s21, 0 }
 0xf89   : > { %s4128_s7 = scalar_lea.sflag [#allocation6], %s4127_s15 }
 0xf8a   : > { %p4781_p13 = pnand %p4797_p5, %p7235_p9 }
 0xf8c   : > { %5739 = dma.done.wait (!%p4781_p13), %s4128_s7, 1024  }
 0xf8d   : > { %5741 = vsyncadd (!%p4781_p13), %s4128_s7, 4294966272  ;;  %s41_s3 = sadd.s32 1, %s5784_s3   ;;  %s7236_s0 = sld [smem:[#allocation27_spill]] }
 0xf8e   : > { %p38_p1 = scmp.ge.s32.totalorder %s41_s3, 6   ;;  %s7237_s26 = sld [smem:[#allocation37_spill]] }
 0xf8f   : > { %s7238_s19 = smov %s6231_s30  ;;  %s7239_s14 = sld [smem:[#allocation32_spill]] }
 0xf90   : > { %s7240_s27 = sld [smem:[#allocation33_spill]]  ;;  %s7241_s30 = smov %s5752_s20 }
 0xf91   : > { %s7243_s21 = smov %s5760_s1  ;;  %s7244_s1 = smov %s5764_s22 }
 0xf92   : > { %s7245_s22 = smov %s7238_s19  ;;  %s7246_s2 = smov %s5776_s24 }
 0xf93   : > { %s7247_s23 = smov %s5780_s25  ;;  %40 = sbr.rel (!%p38_p1) target bundleno = 33 (0x21), region = 193 }
 0xf94   : > { %s7242_s20 = smov %s7237_s26 }
 0xf95   : > { %s7248_s24 = smov %s7239_s14 }
 0xf96   : > { %s7249_s25 = smov %s7240_s27 }
 0xf9a   :  { %4133 = vsyncpa [#allocation5], 1 }
 0xf9b   :  { %4135 = vsyncpa [#allocation5 + $0x1], 1 }
 0xf9c   :  { %4136 = vsyncpa [#allocation8], 1 }
 0xf9d   :  { %4138 = vsyncpa [#allocation8 + $0x1], 1 }
 0xf9e   :  { %4139 = vsyncpa [#allocation11], 1 }
 0xf9f   :  { %4140 = vsyncpa [#allocation14], 1 }
 0xfa0   :  { %4141 = vsyncpa [#allocation17], 1 }
 0xfa1   :  { %4142 = vsyncpa [#allocation6], 1 }
 0xfa2   :  { %4144 = vsyncpa [#allocation6 + $0x1], 1 }

</bundles_post_ra>
